<compile_context>
chip_gen: v5e
topology: v5e:2x2
jax: 0.10.0
libtpu: 0.0.40
codegen_flags: <defaults>
</compile_context>

<pallas_src>
import math

import jax
import jax.numpy as jnp
from jax.experimental import pallas as pl
from jax.experimental.pallas import tpu as pltpu

# ----------------------- synthetic configuration ---------------------------
N, C, H, W = 2, 3, 16, 16          # batch, channels, spatial
HW = H * W                          # 256 -> lane-dense (multiple of 128)
NUM_CLASSES = 10
CLS_CHANNELS = 8
TOTAL_SIGMA = 0.25                  # conf.arch.total_sigma
FIRST_QUERY_BUDGET_FRAC = 0.5       # conf.arch.first_query_budget_frac
IMAGE_DIMS = H * W * 3              # image_size * image_size * 3

SQRT_FIRST_FRAC = math.sqrt(FIRST_QUERY_BUDGET_FRAC)      # self.first_query_budget_frac
SIGMA1 = TOTAL_SIGMA / SQRT_FIRST_FRAC                    # sigma_1
SECOND_FRAC = math.sqrt(1.0 - SQRT_FIRST_FRAC ** 2)       # sqrt(1 - f^2)
SIGMA2_SCALE = TOTAL_SIGMA / SECOND_FRAC / math.sqrt(IMAGE_DIMS)

CIFAR_MEAN = jnp.array([0.4914, 0.4822, 0.4465], jnp.float32)
CIFAR_STD = jnp.array([0.2470, 0.2435, 0.2616], jnp.float32)

# tap order matches the (ky, kx) row-major order of a flattened (3, 3) kernel
TAPS = [(dy, dx) for dy in (-1, 0, 1) for dx in (-1, 0, 1)]


# ----------------------------- fused Pallas kernel --------------------------
def _fused_two_query_kernel(x_ref, e1_ref, e2_ref, mplus_ref, mminus_ref,
                            mw_ref, mb_ref, cw_ref, cb_ref, mean_ref, istd_ref,
                            lw_ref, lb_ref,
                            logits_ref, mask_ref):
    f32 = jnp.float32
    mplus = mplus_ref[...]     # (1, HW) valid-lane mask for dx=+1 taps
    mminus = mminus_ref[...]   # (1, HW) valid-lane mask for dx=-1 taps

    def shifted_taps(img):
        """9 shifted (N, HW) planes of a flattened image plane (SAME zero pad).

        out[tap][n, h*W+w] = img[n, (h+dy)*W + (w+dx)]  (0 when out of image).
        The flattened shift + zero fill handles the row (dy) boundary; the
        precomputed column masks handle the dx boundary.  All planes stay
        lane-dense (last dim 256)."""
        rows = img.shape[0]
        taps = []
        for dy, dx in TAPS:
            s = dy * W + dx
            if s == 0:
                t = img
            elif s > 0:
                t = jnp.concatenate(
                    [img[:, s:], jnp.zeros((rows, s), f32)], axis=1)
            else:
                t = jnp.concatenate(
                    [jnp.zeros((rows, -s), f32), img[:, :s]], axis=1)
            if dx == 1:
                t = t * mplus
            elif dx == -1:
                t = t * mminus
            taps.append(t)
        return taps

    # ---- first query: x += Normal(0, sigma_1) -------------------------------
    x_orig = [x_ref[ci] for ci in range(C)]                       # (N, HW) per channel
    x_q1 = [x_orig[ci] + f32(SIGMA1) * e1_ref[ci] for ci in range(C)]

    # ---- mask model: conv3x3(C->1, pad=1) + sigmoid (VPU broadcast FMAs) -----
    pre = jnp.zeros((N, HW), f32) + mb_ref[0]
    for ci in range(C):
        taps = shifted_taps(x_q1[ci])
        for ti in range(9):
            pre = pre + mw_ref[ci * 9 + ti] * taps[ti]
    mask = 1.0 / (1.0 + jnp.exp(-pre))                            # sigmoid, (N, HW)
    mask_ref[...] = mask                                          # lane-dense output

    # ---- per-sample sigma_2 from ||mask||_2 ----------------------------------
    ss = jnp.sum(mask * mask, axis=-1, keepdims=True)             # (N, 1)
    norm2 = f32(math.sqrt(3.0)) * jnp.sqrt(ss)
    sigma2 = jnp.maximum(f32(1e-6), f32(SIGMA2_SCALE) * norm2)    # (N, 1)
    s1sq = f32(SIGMA1 * SIGMA1)
    s2sq = sigma2 * sigma2                                        # (N, 1)

    # MMSE averaging weights (shared across channels)
    denom = mask * mask * s1sq + s2sq                             # (N, HW)
    inv = 1.0 / denom   # exact divide (approx EUP reciprocal is optional here)
    w1 = s2sq * inv
    w2 = s1sq * mask * inv

    # ---- combine queries, normalize, gather classifier conv taps ------------
    cls_taps = []
    for ci in range(C):
        x_t = x_orig[ci] * mask + sigma2 * e2_ref[ci]             # masked + 2nd-query noise
        x_fin = x_t * w2 + w1 * x_q1[ci]                          # MMSE averaging
        xn = (x_fin - mean_ref[ci]) * istd_ref[ci]                # normalize THEN zero-pad
        cls_taps.append(shifted_taps(xn))

    # ---- classifier: conv3x3(C->F)+ReLU with fused GAP + linear head --------
    lw = lw_ref[...]                                              # (F, NUM_CLASSES)
    acc_logits = jnp.zeros((N, NUM_CLASSES), f32) + lb_ref[...]
    inv_hw = f32(1.0 / HW)
    for oc in range(CLS_CHANNELS):
        acc = jnp.zeros((N, HW), f32) + cb_ref[oc]
        base = oc * C * 9
        for ci in range(C):
            taps = cls_taps[ci]
            for ti in range(9):
                acc = acc + cw_ref[base + ci * 9 + ti] * taps[ti]
        feat = jnp.maximum(acc, 0.0)                              # ReLU, (N, HW)
        pooled = jnp.sum(feat, axis=-1, keepdims=True) * inv_hw   # GAP, (N, 1)
        acc_logits = acc_logits + pooled * lw[oc:oc + 1, :]       # rank-1 head update
    logits_ref[...] = acc_logits


def _build_fused_call():
    smem = pl.BlockSpec(memory_space=pltpu.MemorySpace.SMEM)
    vmem = pl.BlockSpec(memory_space=pltpu.MemorySpace.VMEM)
    return pl.pallas_call(
        _fused_two_query_kernel,
        in_specs=[vmem, vmem, vmem, vmem, vmem,          # x, eps1, eps2, col masks
                  smem, smem, smem, smem, smem, smem,    # conv weights / biases / norm
                  vmem, vmem],                           # head weights / bias
        out_specs=(vmem, vmem),
        out_shape=(jax.ShapeDtypeStruct((N, NUM_CLASSES), jnp.float32),
                   jax.ShapeDtypeStruct((N, HW), jnp.float32)),
        # No grid: the whole (tiny) working set lives in VMEM for one invocation.
        # TODO(synk): for realistic batch sizes, grid over the batch with a
        # "parallel" axis and re-budget tiles for v7x's 64 MiB VMEM.
    )


# ------------------------------- JAX glue -----------------------------------
def two_query_forward(x, eps1, eps2, params):
    """Single fused Pallas kernel implementing TWO_QUERY_ARCH_DDP.forward
    (mask_recon == 0, mask_supervise > 0 branch). Returns (logits, masks)."""
    # channel-major (C, N, HW): each per-channel plane is a lane-dense (N, 256) tile
    def to_cmajor(a):
        return jnp.transpose(a, (1, 0, 2, 3)).reshape(C, N, HW)

    x_c, e1_c, e2_c = to_cmajor(x), to_cmajor(eps1), to_cmajor(eps2)

    # column-validity masks for dx = +1 / -1 taps of the 3x3 SAME conv
    w_idx = jnp.arange(HW, dtype=jnp.int32) % W
    mplus = (w_idx < (W - 1)).astype(jnp.float32).reshape(1, HW)
    mminus = (w_idx >= 1).astype(jnp.float32).reshape(1, HW)

    logits, mask = _build_fused_call()(
        x_c, e1_c, e2_c, mplus, mminus,
        params["mask_w"].reshape(-1),           # (27,)  SMEM scalars
        params["mask_b"].reshape(-1),           # (1,)
        params["cls_w"].reshape(-1),            # (216,)
        params["cls_b"].reshape(-1),            # (8,)
        CIFAR_MEAN,                             # (3,)
        1.0 / CIFAR_STD,                        # (3,)
        params["lin_w"],                        # (8, 10) VMEM
        params["lin_b"].reshape(1, NUM_CLASSES))
    return logits, mask.reshape(N, H, W)


def make_params():
    k = jax.random.PRNGKey(42)
    k1, k2, k3, k4 = jax.random.split(k, 4)
    mask_w = jax.random.normal(k1, (1, C, 3, 3), jnp.float32) / math.sqrt(C * 9)
    mask_b = jnp.zeros((1,), jnp.float32)
    cls_w = jax.random.normal(k2, (CLS_CHANNELS, C, 3, 3), jnp.float32) / math.sqrt(C * 9)
    cls_b = 0.01 * jax.random.normal(k3, (CLS_CHANNELS,), jnp.float32)
    lin_w = jax.random.normal(k4, (CLS_CHANNELS, NUM_CLASSES), jnp.float32) / math.sqrt(CLS_CHANNELS)
    lin_b = jnp.zeros((NUM_CLASSES,), jnp.float32)
    return dict(mask_w=mask_w, mask_b=mask_b, cls_w=cls_w, cls_b=cls_b,
                lin_w=lin_w, lin_b=lin_b)


# ------------------------- pure-JAX reference --------------------------------
def reference_forward(x, eps1, eps2, params):
    x_noisy = x + SIGMA1 * eps1
    dn = ("NCHW", "OIHW", "NCHW")
    hi = jax.lax.Precision.HIGHEST
    mask = jax.nn.sigmoid(
        jax.lax.conv_general_dilated(x_noisy, params["mask_w"], (1, 1), "SAME",
                                     dimension_numbers=dn, precision=hi)
        + params["mask_b"][None, :, None, None])
    norm2 = math.sqrt(3.0) * jnp.sqrt(jnp.sum(mask.reshape(N, -1) ** 2, axis=1))
    sigma2 = jnp.maximum(1e-6, SIGMA2_SCALE * norm2)
    x_t = x * mask + sigma2[:, None, None, None] * eps2
    s1sq = SIGMA1 ** 2
    s2sq = (sigma2 ** 2)[:, None, None, None]
    denom = mask ** 2 * s1sq + s2sq
    w1 = s2sq / denom
    w2 = s1sq * mask / denom
    x_final = x_t * w2 + w1 * x_noisy
    xn = (x_final - CIFAR_MEAN[None, :, None, None]) / CIFAR_STD[None, :, None, None]
    feat = jax.lax.conv_general_dilated(xn, params["cls_w"], (1, 1), "SAME",
                                        dimension_numbers=dn, precision=hi) \
        + params["cls_b"][None, :, None, None]
    feat = jnp.maximum(feat, 0.0)
    pooled = jnp.mean(feat, axis=(2, 3))
    logits = pooled @ params["lin_w"] + params["lin_b"]
    return logits, mask.reshape(N, H, W)


# --------------------------------- main --------------------------------------
if __name__ == "__main__":
    key = jax.random.PRNGKey(0)
    kx, ke1, ke2 = jax.random.split(key, 3)
    x = jax.random.uniform(kx, (N, C, H, W), jnp.float32)          # input image batch
    eps1 = jax.random.normal(ke1, (N, C, H, W), jnp.float32)       # first-query std-normal noise
    eps2 = jax.random.normal(ke2, (N, C, H, W), jnp.float32)       # second-query std-normal noise
    params = make_params()

    logits, masks = jax.jit(two_query_forward)(x, eps1, eps2, params)
    jax.block_until_ready((logits, masks))

    ref_logits, ref_masks = reference_forward(x, eps1, eps2, params)

    assert logits.shape == (N, NUM_CLASSES) and masks.shape == (N, H, W)
    assert bool(jnp.all(jnp.isfinite(logits))) and bool(jnp.all(jnp.isfinite(masks)))
    assert bool(jnp.allclose(masks, ref_masks, atol=5e-2, rtol=5e-2)), \
        float(jnp.max(jnp.abs(masks - ref_masks)))
    assert bool(jnp.allclose(logits, ref_logits, atol=5e-2, rtol=5e-2)), \
        float(jnp.max(jnp.abs(logits - ref_logits)))

    print("KERNEL_OK")
</pallas_src>

<mosaic_0001>
module attributes {stable_mosaic.version = 11 : i64} {
  func.func @_fused_two_query_kernel(%arg0: memref<3x2x256xf32, #tpu.memory_space<vmem>>, %arg1: memref<3x2x256xf32, #tpu.memory_space<vmem>>, %arg2: memref<3x2x256xf32, #tpu.memory_space<vmem>>, %arg3: memref<1x256xf32, #tpu.memory_space<vmem>>, %arg4: memref<1x256xf32, #tpu.memory_space<vmem>>, %arg5: memref<27xf32, #tpu.memory_space<smem>>, %arg6: memref<1xf32, #tpu.memory_space<smem>>, %arg7: memref<216xf32, #tpu.memory_space<smem>>, %arg8: memref<8xf32, #tpu.memory_space<smem>>, %arg9: memref<3xf32, #tpu.memory_space<smem>>, %arg10: memref<3xf32, #tpu.memory_space<smem>>, %arg11: memref<8x10xf32, #tpu.memory_space<vmem>>, %arg12: memref<1x10xf32, #tpu.memory_space<vmem>>, %arg13: memref<2x10xf32, #tpu.memory_space<vmem>>, %arg14: memref<2x256xf32, #tpu.memory_space<vmem>>) attributes {dimension_semantics = [], scalar_prefetch = 0 : i64, scratch_operands = 0 : i64, tpu.core_type = #tpu.core_type<tc>} {
    %c0 = arith.constant 0 : index
    %c0_0 = arith.constant 0 : index
    %0 = vector.load %arg3[%c0, %c0_0] : memref<1x256xf32, #tpu.memory_space<vmem>>, vector<1x256xf32>
    %c0_1 = arith.constant 0 : index
    %c0_2 = arith.constant 0 : index
    %1 = vector.load %arg4[%c0_1, %c0_2] : memref<1x256xf32, #tpu.memory_space<vmem>>, vector<1x256xf32>
    %c0_3 = arith.constant 0 : index
    %c0_4 = arith.constant 0 : index
    %c0_5 = arith.constant 0 : index
    %2 = vector.load %arg0[%c0_3, %c0_4, %c0_5] : memref<3x2x256xf32, #tpu.memory_space<vmem>>, vector<1x2x256xf32>
    %3 = vector.shape_cast %2 : vector<1x2x256xf32> to vector<2x256xf32>
    %c1 = arith.constant 1 : index
    %c0_6 = arith.constant 0 : index
    %c0_7 = arith.constant 0 : index
    %4 = vector.load %arg0[%c1, %c0_6, %c0_7] : memref<3x2x256xf32, #tpu.memory_space<vmem>>, vector<1x2x256xf32>
    %5 = vector.shape_cast %4 : vector<1x2x256xf32> to vector<2x256xf32>
    %c2 = arith.constant 2 : index
    %c0_8 = arith.constant 0 : index
    %c0_9 = arith.constant 0 : index
    %6 = vector.load %arg0[%c2, %c0_8, %c0_9] : memref<3x2x256xf32, #tpu.memory_space<vmem>>, vector<1x2x256xf32>
    %7 = vector.shape_cast %6 : vector<1x2x256xf32> to vector<2x256xf32>
    %c0_10 = arith.constant 0 : index
    %c0_11 = arith.constant 0 : index
    %c0_12 = arith.constant 0 : index
    %8 = vector.load %arg1[%c0_10, %c0_11, %c0_12] : memref<3x2x256xf32, #tpu.memory_space<vmem>>, vector<1x2x256xf32>
    %9 = vector.shape_cast %8 : vector<1x2x256xf32> to vector<2x256xf32>
    %cst = arith.constant 0.353553385 : f32
    %10 = vector.broadcast %cst : f32 to vector<2x256xf32>
    %11 = arith.mulf %10, %9 : vector<2x256xf32>
    %12 = arith.addf %3, %11 : vector<2x256xf32>
    %c1_13 = arith.constant 1 : index
    %c0_14 = arith.constant 0 : index
    %c0_15 = arith.constant 0 : index
    %13 = vector.load %arg1[%c1_13, %c0_14, %c0_15] : memref<3x2x256xf32, #tpu.memory_space<vmem>>, vector<1x2x256xf32>
    %14 = vector.shape_cast %13 : vector<1x2x256xf32> to vector<2x256xf32>
    %cst_16 = arith.constant 0.353553385 : f32
    %15 = vector.broadcast %cst_16 : f32 to vector<2x256xf32>
    %16 = arith.mulf %15, %14 : vector<2x256xf32>
    %17 = arith.addf %5, %16 : vector<2x256xf32>
    %c2_17 = arith.constant 2 : index
    %c0_18 = arith.constant 0 : index
    %c0_19 = arith.constant 0 : index
    %18 = vector.load %arg1[%c2_17, %c0_18, %c0_19] : memref<3x2x256xf32, #tpu.memory_space<vmem>>, vector<1x2x256xf32>
    %19 = vector.shape_cast %18 : vector<1x2x256xf32> to vector<2x256xf32>
    %cst_20 = arith.constant 0.353553385 : f32
    %20 = vector.broadcast %cst_20 : f32 to vector<2x256xf32>
    %21 = arith.mulf %20, %19 : vector<2x256xf32>
    %22 = arith.addf %7, %21 : vector<2x256xf32>
    %cst_21 = arith.constant 0.000000e+00 : f32
    %23 = vector.broadcast %cst_21 : f32 to vector<2x256xf32>
    %c0_22 = arith.constant 0 : index
    %24 = memref.load %arg6[%c0_22] : memref<1xf32, #tpu.memory_space<smem>>
    %25 = vector.broadcast %24 : f32 to vector<2x256xf32>
    %26 = arith.addf %23, %25 : vector<2x256xf32>
    %cst_23 = arith.constant 0.000000e+00 : f32
    %27 = vector.broadcast %cst_23 : f32 to vector<2x17xf32>
    %28 = vector.extract_strided_slice %12 {offsets = [0, 0], sizes = [2, 239], strides = [1, 1]} : vector<2x256xf32> to vector<2x239xf32>
    %29 = tpu.concatenate %27, %28 in 1 : vector<2x17xf32>, vector<2x239xf32> -> vector<2x256xf32>
    %30 = vector.broadcast %1 : vector<1x256xf32> to vector<2x256xf32>
    %31 = arith.mulf %29, %30 : vector<2x256xf32>
    %cst_24 = arith.constant 0.000000e+00 : f32
    %32 = vector.broadcast %cst_24 : f32 to vector<2x16xf32>
    %33 = vector.extract_strided_slice %12 {offsets = [0, 0], sizes = [2, 240], strides = [1, 1]} : vector<2x256xf32> to vector<2x240xf32>
    %34 = tpu.concatenate %32, %33 in 1 : vector<2x16xf32>, vector<2x240xf32> -> vector<2x256xf32>
    %cst_25 = arith.constant 0.000000e+00 : f32
    %35 = vector.broadcast %cst_25 : f32 to vector<2x15xf32>
    %36 = vector.extract_strided_slice %12 {offsets = [0, 0], sizes = [2, 241], strides = [1, 1]} : vector<2x256xf32> to vector<2x241xf32>
    %37 = tpu.concatenate %35, %36 in 1 : vector<2x15xf32>, vector<2x241xf32> -> vector<2x256xf32>
    %38 = vector.broadcast %0 : vector<1x256xf32> to vector<2x256xf32>
    %39 = arith.mulf %37, %38 : vector<2x256xf32>
    %cst_26 = arith.constant 0.000000e+00 : f32
    %40 = vector.broadcast %cst_26 : f32 to vector<2x1xf32>
    %41 = vector.extract_strided_slice %12 {offsets = [0, 0], sizes = [2, 255], strides = [1, 1]} : vector<2x256xf32> to vector<2x255xf32>
    %42 = tpu.concatenate %40, %41 in 1 : vector<2x1xf32>, vector<2x255xf32> -> vector<2x256xf32>
    %43 = vector.broadcast %1 : vector<1x256xf32> to vector<2x256xf32>
    %44 = arith.mulf %42, %43 : vector<2x256xf32>
    %45 = vector.extract_strided_slice %12 {offsets = [0, 1], sizes = [2, 255], strides = [1, 1]} : vector<2x256xf32> to vector<2x255xf32>
    %cst_27 = arith.constant 0.000000e+00 : f32
    %46 = vector.broadcast %cst_27 : f32 to vector<2x1xf32>
    %47 = tpu.concatenate %45, %46 in 1 : vector<2x255xf32>, vector<2x1xf32> -> vector<2x256xf32>
    %48 = vector.broadcast %0 : vector<1x256xf32> to vector<2x256xf32>
    %49 = arith.mulf %47, %48 : vector<2x256xf32>
    %50 = vector.extract_strided_slice %12 {offsets = [0, 15], sizes = [2, 241], strides = [1, 1]} : vector<2x256xf32> to vector<2x241xf32>
    %cst_28 = arith.constant 0.000000e+00 : f32
    %51 = vector.broadcast %cst_28 : f32 to vector<2x15xf32>
    %52 = tpu.concatenate %50, %51 in 1 : vector<2x241xf32>, vector<2x15xf32> -> vector<2x256xf32>
    %53 = vector.broadcast %1 : vector<1x256xf32> to vector<2x256xf32>
    %54 = arith.mulf %52, %53 : vector<2x256xf32>
    %55 = vector.extract_strided_slice %12 {offsets = [0, 16], sizes = [2, 240], strides = [1, 1]} : vector<2x256xf32> to vector<2x240xf32>
    %cst_29 = arith.constant 0.000000e+00 : f32
    %56 = vector.broadcast %cst_29 : f32 to vector<2x16xf32>
    %57 = tpu.concatenate %55, %56 in 1 : vector<2x240xf32>, vector<2x16xf32> -> vector<2x256xf32>
    %58 = vector.extract_strided_slice %12 {offsets = [0, 17], sizes = [2, 239], strides = [1, 1]} : vector<2x256xf32> to vector<2x239xf32>
    %cst_30 = arith.constant 0.000000e+00 : f32
    %59 = vector.broadcast %cst_30 : f32 to vector<2x17xf32>
    %60 = tpu.concatenate %58, %59 in 1 : vector<2x239xf32>, vector<2x17xf32> -> vector<2x256xf32>
    %61 = vector.broadcast %0 : vector<1x256xf32> to vector<2x256xf32>
    %62 = arith.mulf %60, %61 : vector<2x256xf32>
    %c0_31 = arith.constant 0 : index
    %63 = memref.load %arg5[%c0_31] : memref<27xf32, #tpu.memory_space<smem>>
    %64 = vector.broadcast %63 : f32 to vector<2x256xf32>
    %65 = arith.mulf %64, %31 : vector<2x256xf32>
    %66 = arith.addf %26, %65 : vector<2x256xf32>
    %c1_32 = arith.constant 1 : index
    %67 = memref.load %arg5[%c1_32] : memref<27xf32, #tpu.memory_space<smem>>
    %68 = vector.broadcast %67 : f32 to vector<2x256xf32>
    %69 = arith.mulf %68, %34 : vector<2x256xf32>
    %70 = arith.addf %66, %69 : vector<2x256xf32>
    %c2_33 = arith.constant 2 : index
    %71 = memref.load %arg5[%c2_33] : memref<27xf32, #tpu.memory_space<smem>>
    %72 = vector.broadcast %71 : f32 to vector<2x256xf32>
    %73 = arith.mulf %72, %39 : vector<2x256xf32>
    %74 = arith.addf %70, %73 : vector<2x256xf32>
    %c3 = arith.constant 3 : index
    %75 = memref.load %arg5[%c3] : memref<27xf32, #tpu.memory_space<smem>>
    %76 = vector.broadcast %75 : f32 to vector<2x256xf32>
    %77 = arith.mulf %76, %44 : vector<2x256xf32>
    %78 = arith.addf %74, %77 : vector<2x256xf32>
    %c4 = arith.constant 4 : index
    %79 = memref.load %arg5[%c4] : memref<27xf32, #tpu.memory_space<smem>>
    %80 = vector.broadcast %79 : f32 to vector<2x256xf32>
    %81 = arith.mulf %80, %12 : vector<2x256xf32>
    %82 = arith.addf %78, %81 : vector<2x256xf32>
    %c5 = arith.constant 5 : index
    %83 = memref.load %arg5[%c5] : memref<27xf32, #tpu.memory_space<smem>>
    %84 = vector.broadcast %83 : f32 to vector<2x256xf32>
    %85 = arith.mulf %84, %49 : vector<2x256xf32>
    %86 = arith.addf %82, %85 : vector<2x256xf32>
    %c6 = arith.constant 6 : index
    %87 = memref.load %arg5[%c6] : memref<27xf32, #tpu.memory_space<smem>>
    %88 = vector.broadcast %87 : f32 to vector<2x256xf32>
    %89 = arith.mulf %88, %54 : vector<2x256xf32>
    %90 = arith.addf %86, %89 : vector<2x256xf32>
    %c7 = arith.constant 7 : index
    %91 = memref.load %arg5[%c7] : memref<27xf32, #tpu.memory_space<smem>>
    %92 = vector.broadcast %91 : f32 to vector<2x256xf32>
    %93 = arith.mulf %92, %57 : vector<2x256xf32>
    %94 = arith.addf %90, %93 : vector<2x256xf32>
    %c8 = arith.constant 8 : index
    %95 = memref.load %arg5[%c8] : memref<27xf32, #tpu.memory_space<smem>>
    %96 = vector.broadcast %95 : f32 to vector<2x256xf32>
    %97 = arith.mulf %96, %62 : vector<2x256xf32>
    %98 = arith.addf %94, %97 : vector<2x256xf32>
    %cst_34 = arith.constant 0.000000e+00 : f32
    %99 = vector.broadcast %cst_34 : f32 to vector<2x17xf32>
    %100 = vector.extract_strided_slice %17 {offsets = [0, 0], sizes = [2, 239], strides = [1, 1]} : vector<2x256xf32> to vector<2x239xf32>
    %101 = tpu.concatenate %99, %100 in 1 : vector<2x17xf32>, vector<2x239xf32> -> vector<2x256xf32>
    %102 = vector.broadcast %1 : vector<1x256xf32> to vector<2x256xf32>
    %103 = arith.mulf %101, %102 : vector<2x256xf32>
    %cst_35 = arith.constant 0.000000e+00 : f32
    %104 = vector.broadcast %cst_35 : f32 to vector<2x16xf32>
    %105 = vector.extract_strided_slice %17 {offsets = [0, 0], sizes = [2, 240], strides = [1, 1]} : vector<2x256xf32> to vector<2x240xf32>
    %106 = tpu.concatenate %104, %105 in 1 : vector<2x16xf32>, vector<2x240xf32> -> vector<2x256xf32>
    %cst_36 = arith.constant 0.000000e+00 : f32
    %107 = vector.broadcast %cst_36 : f32 to vector<2x15xf32>
    %108 = vector.extract_strided_slice %17 {offsets = [0, 0], sizes = [2, 241], strides = [1, 1]} : vector<2x256xf32> to vector<2x241xf32>
    %109 = tpu.concatenate %107, %108 in 1 : vector<2x15xf32>, vector<2x241xf32> -> vector<2x256xf32>
    %110 = vector.broadcast %0 : vector<1x256xf32> to vector<2x256xf32>
    %111 = arith.mulf %109, %110 : vector<2x256xf32>
    %cst_37 = arith.constant 0.000000e+00 : f32
    %112 = vector.broadcast %cst_37 : f32 to vector<2x1xf32>
    %113 = vector.extract_strided_slice %17 {offsets = [0, 0], sizes = [2, 255], strides = [1, 1]} : vector<2x256xf32> to vector<2x255xf32>
    %114 = tpu.concatenate %112, %113 in 1 : vector<2x1xf32>, vector<2x255xf32> -> vector<2x256xf32>
    %115 = vector.broadcast %1 : vector<1x256xf32> to vector<2x256xf32>
    %116 = arith.mulf %114, %115 : vector<2x256xf32>
    %117 = vector.extract_strided_slice %17 {offsets = [0, 1], sizes = [2, 255], strides = [1, 1]} : vector<2x256xf32> to vector<2x255xf32>
    %cst_38 = arith.constant 0.000000e+00 : f32
    %118 = vector.broadcast %cst_38 : f32 to vector<2x1xf32>
    %119 = tpu.concatenate %117, %118 in 1 : vector<2x255xf32>, vector<2x1xf32> -> vector<2x256xf32>
    %120 = vector.broadcast %0 : vector<1x256xf32> to vector<2x256xf32>
    %121 = arith.mulf %119, %120 : vector<2x256xf32>
    %122 = vector.extract_strided_slice %17 {offsets = [0, 15], sizes = [2, 241], strides = [1, 1]} : vector<2x256xf32> to vector<2x241xf32>
    %cst_39 = arith.constant 0.000000e+00 : f32
    %123 = vector.broadcast %cst_39 : f32 to vector<2x15xf32>
    %124 = tpu.concatenate %122, %123 in 1 : vector<2x241xf32>, vector<2x15xf32> -> vector<2x256xf32>
    %125 = vector.broadcast %1 : vector<1x256xf32> to vector<2x256xf32>
    %126 = arith.mulf %124, %125 : vector<2x256xf32>
    %127 = vector.extract_strided_slice %17 {offsets = [0, 16], sizes = [2, 240], strides = [1, 1]} : vector<2x256xf32> to vector<2x240xf32>
    %cst_40 = arith.constant 0.000000e+00 : f32
    %128 = vector.broadcast %cst_40 : f32 to vector<2x16xf32>
    %129 = tpu.concatenate %127, %128 in 1 : vector<2x240xf32>, vector<2x16xf32> -> vector<2x256xf32>
    %130 = vector.extract_strided_slice %17 {offsets = [0, 17], sizes = [2, 239], strides = [1, 1]} : vector<2x256xf32> to vector<2x239xf32>
    %cst_41 = arith.constant 0.000000e+00 : f32
    %131 = vector.broadcast %cst_41 : f32 to vector<2x17xf32>
    %132 = tpu.concatenate %130, %131 in 1 : vector<2x239xf32>, vector<2x17xf32> -> vector<2x256xf32>
    %133 = vector.broadcast %0 : vector<1x256xf32> to vector<2x256xf32>
    %134 = arith.mulf %132, %133 : vector<2x256xf32>
    %c9 = arith.constant 9 : index
    %135 = memref.load %arg5[%c9] : memref<27xf32, #tpu.memory_space<smem>>
    %136 = vector.broadcast %135 : f32 to vector<2x256xf32>
    %137 = arith.mulf %136, %103 : vector<2x256xf32>
    %138 = arith.addf %98, %137 : vector<2x256xf32>
    %c10 = arith.constant 10 : index
    %139 = memref.load %arg5[%c10] : memref<27xf32, #tpu.memory_space<smem>>
    %140 = vector.broadcast %139 : f32 to vector<2x256xf32>
    %141 = arith.mulf %140, %106 : vector<2x256xf32>
    %142 = arith.addf %138, %141 : vector<2x256xf32>
    %c11 = arith.constant 11 : index
    %143 = memref.load %arg5[%c11] : memref<27xf32, #tpu.memory_space<smem>>
    %144 = vector.broadcast %143 : f32 to vector<2x256xf32>
    %145 = arith.mulf %144, %111 : vector<2x256xf32>
    %146 = arith.addf %142, %145 : vector<2x256xf32>
    %c12 = arith.constant 12 : index
    %147 = memref.load %arg5[%c12] : memref<27xf32, #tpu.memory_space<smem>>
    %148 = vector.broadcast %147 : f32 to vector<2x256xf32>
    %149 = arith.mulf %148, %116 : vector<2x256xf32>
    %150 = arith.addf %146, %149 : vector<2x256xf32>
    %c13 = arith.constant 13 : index
    %151 = memref.load %arg5[%c13] : memref<27xf32, #tpu.memory_space<smem>>
    %152 = vector.broadcast %151 : f32 to vector<2x256xf32>
    %153 = arith.mulf %152, %17 : vector<2x256xf32>
    %154 = arith.addf %150, %153 : vector<2x256xf32>
    %c14 = arith.constant 14 : index
    %155 = memref.load %arg5[%c14] : memref<27xf32, #tpu.memory_space<smem>>
    %156 = vector.broadcast %155 : f32 to vector<2x256xf32>
    %157 = arith.mulf %156, %121 : vector<2x256xf32>
    %158 = arith.addf %154, %157 : vector<2x256xf32>
    %c15 = arith.constant 15 : index
    %159 = memref.load %arg5[%c15] : memref<27xf32, #tpu.memory_space<smem>>
    %160 = vector.broadcast %159 : f32 to vector<2x256xf32>
    %161 = arith.mulf %160, %126 : vector<2x256xf32>
    %162 = arith.addf %158, %161 : vector<2x256xf32>
    %c16 = arith.constant 16 : index
    %163 = memref.load %arg5[%c16] : memref<27xf32, #tpu.memory_space<smem>>
    %164 = vector.broadcast %163 : f32 to vector<2x256xf32>
    %165 = arith.mulf %164, %129 : vector<2x256xf32>
    %166 = arith.addf %162, %165 : vector<2x256xf32>
    %c17 = arith.constant 17 : index
    %167 = memref.load %arg5[%c17] : memref<27xf32, #tpu.memory_space<smem>>
    %168 = vector.broadcast %167 : f32 to vector<2x256xf32>
    %169 = arith.mulf %168, %134 : vector<2x256xf32>
    %170 = arith.addf %166, %169 : vector<2x256xf32>
    %cst_42 = arith.constant 0.000000e+00 : f32
    %171 = vector.broadcast %cst_42 : f32 to vector<2x17xf32>
    %172 = vector.extract_strided_slice %22 {offsets = [0, 0], sizes = [2, 239], strides = [1, 1]} : vector<2x256xf32> to vector<2x239xf32>
    %173 = tpu.concatenate %171, %172 in 1 : vector<2x17xf32>, vector<2x239xf32> -> vector<2x256xf32>
    %174 = vector.broadcast %1 : vector<1x256xf32> to vector<2x256xf32>
    %175 = arith.mulf %173, %174 : vector<2x256xf32>
    %cst_43 = arith.constant 0.000000e+00 : f32
    %176 = vector.broadcast %cst_43 : f32 to vector<2x16xf32>
    %177 = vector.extract_strided_slice %22 {offsets = [0, 0], sizes = [2, 240], strides = [1, 1]} : vector<2x256xf32> to vector<2x240xf32>
    %178 = tpu.concatenate %176, %177 in 1 : vector<2x16xf32>, vector<2x240xf32> -> vector<2x256xf32>
    %cst_44 = arith.constant 0.000000e+00 : f32
    %179 = vector.broadcast %cst_44 : f32 to vector<2x15xf32>
    %180 = vector.extract_strided_slice %22 {offsets = [0, 0], sizes = [2, 241], strides = [1, 1]} : vector<2x256xf32> to vector<2x241xf32>
    %181 = tpu.concatenate %179, %180 in 1 : vector<2x15xf32>, vector<2x241xf32> -> vector<2x256xf32>
    %182 = vector.broadcast %0 : vector<1x256xf32> to vector<2x256xf32>
    %183 = arith.mulf %181, %182 : vector<2x256xf32>
    %cst_45 = arith.constant 0.000000e+00 : f32
    %184 = vector.broadcast %cst_45 : f32 to vector<2x1xf32>
    %185 = vector.extract_strided_slice %22 {offsets = [0, 0], sizes = [2, 255], strides = [1, 1]} : vector<2x256xf32> to vector<2x255xf32>
    %186 = tpu.concatenate %184, %185 in 1 : vector<2x1xf32>, vector<2x255xf32> -> vector<2x256xf32>
    %187 = vector.broadcast %1 : vector<1x256xf32> to vector<2x256xf32>
    %188 = arith.mulf %186, %187 : vector<2x256xf32>
    %189 = vector.extract_strided_slice %22 {offsets = [0, 1], sizes = [2, 255], strides = [1, 1]} : vector<2x256xf32> to vector<2x255xf32>
    %cst_46 = arith.constant 0.000000e+00 : f32
    %190 = vector.broadcast %cst_46 : f32 to vector<2x1xf32>
    %191 = tpu.concatenate %189, %190 in 1 : vector<2x255xf32>, vector<2x1xf32> -> vector<2x256xf32>
    %192 = vector.broadcast %0 : vector<1x256xf32> to vector<2x256xf32>
    %193 = arith.mulf %191, %192 : vector<2x256xf32>
    %194 = vector.extract_strided_slice %22 {offsets = [0, 15], sizes = [2, 241], strides = [1, 1]} : vector<2x256xf32> to vector<2x241xf32>
    %cst_47 = arith.constant 0.000000e+00 : f32
    %195 = vector.broadcast %cst_47 : f32 to vector<2x15xf32>
    %196 = tpu.concatenate %194, %195 in 1 : vector<2x241xf32>, vector<2x15xf32> -> vector<2x256xf32>
    %197 = vector.broadcast %1 : vector<1x256xf32> to vector<2x256xf32>
    %198 = arith.mulf %196, %197 : vector<2x256xf32>
    %199 = vector.extract_strided_slice %22 {offsets = [0, 16], sizes = [2, 240], strides = [1, 1]} : vector<2x256xf32> to vector<2x240xf32>
    %cst_48 = arith.constant 0.000000e+00 : f32
    %200 = vector.broadcast %cst_48 : f32 to vector<2x16xf32>
    %201 = tpu.concatenate %199, %200 in 1 : vector<2x240xf32>, vector<2x16xf32> -> vector<2x256xf32>
    %202 = vector.extract_strided_slice %22 {offsets = [0, 17], sizes = [2, 239], strides = [1, 1]} : vector<2x256xf32> to vector<2x239xf32>
    %cst_49 = arith.constant 0.000000e+00 : f32
    %203 = vector.broadcast %cst_49 : f32 to vector<2x17xf32>
    %204 = tpu.concatenate %202, %203 in 1 : vector<2x239xf32>, vector<2x17xf32> -> vector<2x256xf32>
    %205 = vector.broadcast %0 : vector<1x256xf32> to vector<2x256xf32>
    %206 = arith.mulf %204, %205 : vector<2x256xf32>
    %c18 = arith.constant 18 : index
    %207 = memref.load %arg5[%c18] : memref<27xf32, #tpu.memory_space<smem>>
    %208 = vector.broadcast %207 : f32 to vector<2x256xf32>
    %209 = arith.mulf %208, %175 : vector<2x256xf32>
    %210 = arith.addf %170, %209 : vector<2x256xf32>
    %c19 = arith.constant 19 : index
    %211 = memref.load %arg5[%c19] : memref<27xf32, #tpu.memory_space<smem>>
    %212 = vector.broadcast %211 : f32 to vector<2x256xf32>
    %213 = arith.mulf %212, %178 : vector<2x256xf32>
    %214 = arith.addf %210, %213 : vector<2x256xf32>
    %c20 = arith.constant 20 : index
    %215 = memref.load %arg5[%c20] : memref<27xf32, #tpu.memory_space<smem>>
    %216 = vector.broadcast %215 : f32 to vector<2x256xf32>
    %217 = arith.mulf %216, %183 : vector<2x256xf32>
    %218 = arith.addf %214, %217 : vector<2x256xf32>
    %c21 = arith.constant 21 : index
    %219 = memref.load %arg5[%c21] : memref<27xf32, #tpu.memory_space<smem>>
    %220 = vector.broadcast %219 : f32 to vector<2x256xf32>
    %221 = arith.mulf %220, %188 : vector<2x256xf32>
    %222 = arith.addf %218, %221 : vector<2x256xf32>
    %c22 = arith.constant 22 : index
    %223 = memref.load %arg5[%c22] : memref<27xf32, #tpu.memory_space<smem>>
    %224 = vector.broadcast %223 : f32 to vector<2x256xf32>
    %225 = arith.mulf %224, %22 : vector<2x256xf32>
    %226 = arith.addf %222, %225 : vector<2x256xf32>
    %c23 = arith.constant 23 : index
    %227 = memref.load %arg5[%c23] : memref<27xf32, #tpu.memory_space<smem>>
    %228 = vector.broadcast %227 : f32 to vector<2x256xf32>
    %229 = arith.mulf %228, %193 : vector<2x256xf32>
    %230 = arith.addf %226, %229 : vector<2x256xf32>
    %c24 = arith.constant 24 : index
    %231 = memref.load %arg5[%c24] : memref<27xf32, #tpu.memory_space<smem>>
    %232 = vector.broadcast %231 : f32 to vector<2x256xf32>
    %233 = arith.mulf %232, %198 : vector<2x256xf32>
    %234 = arith.addf %230, %233 : vector<2x256xf32>
    %c25 = arith.constant 25 : index
    %235 = memref.load %arg5[%c25] : memref<27xf32, #tpu.memory_space<smem>>
    %236 = vector.broadcast %235 : f32 to vector<2x256xf32>
    %237 = arith.mulf %236, %201 : vector<2x256xf32>
    %238 = arith.addf %234, %237 : vector<2x256xf32>
    %c26 = arith.constant 26 : index
    %239 = memref.load %arg5[%c26] : memref<27xf32, #tpu.memory_space<smem>>
    %240 = vector.broadcast %239 : f32 to vector<2x256xf32>
    %241 = arith.mulf %240, %206 : vector<2x256xf32>
    %242 = arith.addf %238, %241 : vector<2x256xf32>
    %cst_50 = arith.constant 0.000000e+00 : f32
    %243 = vector.broadcast %cst_50 : f32 to vector<2x256xf32>
    %244 = arith.subf %243, %242 : vector<2x256xf32>
    %245 = math.exp %244 : vector<2x256xf32>
    %cst_51 = arith.constant 1.000000e+00 : f32
    %246 = vector.broadcast %cst_51 : f32 to vector<2x256xf32>
    %247 = arith.addf %246, %245 : vector<2x256xf32>
    %cst_52 = arith.constant 1.000000e+00 : f32
    %248 = vector.broadcast %cst_52 : f32 to vector<2x256xf32>
    %249 = arith.divf %248, %247 : vector<2x256xf32>
    %c0_53 = arith.constant 0 : index
    %c0_54 = arith.constant 0 : index
    %250 = vector.load %arg14[%c0_53, %c0_54] : memref<2x256xf32, #tpu.memory_space<vmem>>, vector<2x256xf32>
    tpu.vector_store %arg14[%c0_53, %c0_54], %249 {strides = array<i32>} : memref<2x256xf32, #tpu.memory_space<vmem>>, vector<2x256xf32>,
    %251 = arith.mulf %249, %249 : vector<2x256xf32>
    %cst_55 = arith.constant dense<0.000000e+00> : vector<2xf32>
    %252 = vector.multi_reduction <add>, %251, %cst_55 [1] : vector<2x256xf32> to vector<2xf32>
    %253 = vector.shape_cast %252 : vector<2xf32> to vector<2x1xf32>
    %254 = math.sqrt %253 : vector<2x1xf32>
    %cst_56 = arith.constant 1.73205078 : f32
    %255 = vector.broadcast %cst_56 : f32 to vector<2x1xf32>
    %256 = arith.mulf %255, %254 : vector<2x1xf32>
    %cst_57 = arith.constant 0.0127577595 : f32
    %257 = vector.broadcast %cst_57 : f32 to vector<2x1xf32>
    %258 = arith.mulf %257, %256 : vector<2x1xf32>
    %cst_58 = arith.constant 9.99999997E-7 : f32
    %259 = vector.broadcast %cst_58 : f32 to vector<2x1xf32>
    %260 = arith.maximumf %259, %258 : vector<2x1xf32>
    %261 = arith.mulf %260, %260 : vector<2x1xf32>
    %262 = arith.mulf %249, %249 : vector<2x256xf32>
    %cst_59 = arith.constant 1.250000e-01 : f32
    %263 = vector.broadcast %cst_59 : f32 to vector<2x256xf32>
    %264 = arith.mulf %262, %263 : vector<2x256xf32>
    %265 = vector.broadcast %261 : vector<2x1xf32> to vector<2x256xf32>
    %266 = arith.addf %264, %265 : vector<2x256xf32>
    %cst_60 = arith.constant 1.000000e+00 : f32
    %267 = vector.broadcast %cst_60 : f32 to vector<2x256xf32>
    %268 = arith.divf %267, %266 : vector<2x256xf32>
    %269 = vector.broadcast %261 : vector<2x1xf32> to vector<2x256xf32>
    %270 = arith.mulf %269, %268 : vector<2x256xf32>
    %cst_61 = arith.constant 1.250000e-01 : f32
    %271 = vector.broadcast %cst_61 : f32 to vector<2x256xf32>
    %272 = arith.mulf %271, %249 : vector<2x256xf32>
    %273 = arith.mulf %272, %268 : vector<2x256xf32>
    %274 = arith.mulf %3, %249 : vector<2x256xf32>
    %c0_62 = arith.constant 0 : index
    %c0_63 = arith.constant 0 : index
    %c0_64 = arith.constant 0 : index
    %275 = vector.load %arg2[%c0_62, %c0_63, %c0_64] : memref<3x2x256xf32, #tpu.memory_space<vmem>>, vector<1x2x256xf32>
    %276 = vector.shape_cast %275 : vector<1x2x256xf32> to vector<2x256xf32>
    %277 = vector.broadcast %260 : vector<2x1xf32> to vector<2x256xf32>
    %278 = arith.mulf %277, %276 : vector<2x256xf32>
    %279 = arith.addf %274, %278 : vector<2x256xf32>
    %280 = arith.mulf %279, %273 : vector<2x256xf32>
    %281 = arith.mulf %270, %12 : vector<2x256xf32>
    %282 = arith.addf %280, %281 : vector<2x256xf32>
    %c0_65 = arith.constant 0 : index
    %283 = memref.load %arg9[%c0_65] : memref<3xf32, #tpu.memory_space<smem>>
    %284 = vector.broadcast %283 : f32 to vector<2x256xf32>
    %285 = arith.subf %282, %284 : vector<2x256xf32>
    %c0_66 = arith.constant 0 : index
    %286 = memref.load %arg10[%c0_66] : memref<3xf32, #tpu.memory_space<smem>>
    %287 = vector.broadcast %286 : f32 to vector<2x256xf32>
    %288 = arith.mulf %285, %287 : vector<2x256xf32>
    %cst_67 = arith.constant 0.000000e+00 : f32
    %289 = vector.broadcast %cst_67 : f32 to vector<2x17xf32>
    %290 = vector.extract_strided_slice %288 {offsets = [0, 0], sizes = [2, 239], strides = [1, 1]} : vector<2x256xf32> to vector<2x239xf32>
    %291 = tpu.concatenate %289, %290 in 1 : vector<2x17xf32>, vector<2x239xf32> -> vector<2x256xf32>
    %292 = vector.broadcast %1 : vector<1x256xf32> to vector<2x256xf32>
    %293 = arith.mulf %291, %292 : vector<2x256xf32>
    %cst_68 = arith.constant 0.000000e+00 : f32
    %294 = vector.broadcast %cst_68 : f32 to vector<2x16xf32>
    %295 = vector.extract_strided_slice %288 {offsets = [0, 0], sizes = [2, 240], strides = [1, 1]} : vector<2x256xf32> to vector<2x240xf32>
    %296 = tpu.concatenate %294, %295 in 1 : vector<2x16xf32>, vector<2x240xf32> -> vector<2x256xf32>
    %cst_69 = arith.constant 0.000000e+00 : f32
    %297 = vector.broadcast %cst_69 : f32 to vector<2x15xf32>
    %298 = vector.extract_strided_slice %288 {offsets = [0, 0], sizes = [2, 241], strides = [1, 1]} : vector<2x256xf32> to vector<2x241xf32>
    %299 = tpu.concatenate %297, %298 in 1 : vector<2x15xf32>, vector<2x241xf32> -> vector<2x256xf32>
    %300 = vector.broadcast %0 : vector<1x256xf32> to vector<2x256xf32>
    %301 = arith.mulf %299, %300 : vector<2x256xf32>
    %cst_70 = arith.constant 0.000000e+00 : f32
    %302 = vector.broadcast %cst_70 : f32 to vector<2x1xf32>
    %303 = vector.extract_strided_slice %288 {offsets = [0, 0], sizes = [2, 255], strides = [1, 1]} : vector<2x256xf32> to vector<2x255xf32>
    %304 = tpu.concatenate %302, %303 in 1 : vector<2x1xf32>, vector<2x255xf32> -> vector<2x256xf32>
    %305 = vector.broadcast %1 : vector<1x256xf32> to vector<2x256xf32>
    %306 = arith.mulf %304, %305 : vector<2x256xf32>
    %307 = vector.extract_strided_slice %288 {offsets = [0, 1], sizes = [2, 255], strides = [1, 1]} : vector<2x256xf32> to vector<2x255xf32>
    %cst_71 = arith.constant 0.000000e+00 : f32
    %308 = vector.broadcast %cst_71 : f32 to vector<2x1xf32>
    %309 = tpu.concatenate %307, %308 in 1 : vector<2x255xf32>, vector<2x1xf32> -> vector<2x256xf32>
    %310 = vector.broadcast %0 : vector<1x256xf32> to vector<2x256xf32>
    %311 = arith.mulf %309, %310 : vector<2x256xf32>
    %312 = vector.extract_strided_slice %288 {offsets = [0, 15], sizes = [2, 241], strides = [1, 1]} : vector<2x256xf32> to vector<2x241xf32>
    %cst_72 = arith.constant 0.000000e+00 : f32
    %313 = vector.broadcast %cst_72 : f32 to vector<2x15xf32>
    %314 = tpu.concatenate %312, %313 in 1 : vector<2x241xf32>, vector<2x15xf32> -> vector<2x256xf32>
    %315 = vector.broadcast %1 : vector<1x256xf32> to vector<2x256xf32>
    %316 = arith.mulf %314, %315 : vector<2x256xf32>
    %317 = vector.extract_strided_slice %288 {offsets = [0, 16], sizes = [2, 240], strides = [1, 1]} : vector<2x256xf32> to vector<2x240xf32>
    %cst_73 = arith.constant 0.000000e+00 : f32
    %318 = vector.broadcast %cst_73 : f32 to vector<2x16xf32>
    %319 = tpu.concatenate %317, %318 in 1 : vector<2x240xf32>, vector<2x16xf32> -> vector<2x256xf32>
    %320 = vector.extract_strided_slice %288 {offsets = [0, 17], sizes = [2, 239], strides = [1, 1]} : vector<2x256xf32> to vector<2x239xf32>
    %cst_74 = arith.constant 0.000000e+00 : f32
    %321 = vector.broadcast %cst_74 : f32 to vector<2x17xf32>
    %322 = tpu.concatenate %320, %321 in 1 : vector<2x239xf32>, vector<2x17xf32> -> vector<2x256xf32>
    %323 = vector.broadcast %0 : vector<1x256xf32> to vector<2x256xf32>
    %324 = arith.mulf %322, %323 : vector<2x256xf32>
    %325 = arith.mulf %5, %249 : vector<2x256xf32>
    %c1_75 = arith.constant 1 : index
    %c0_76 = arith.constant 0 : index
    %c0_77 = arith.constant 0 : index
    %326 = vector.load %arg2[%c1_75, %c0_76, %c0_77] : memref<3x2x256xf32, #tpu.memory_space<vmem>>, vector<1x2x256xf32>
    %327 = vector.shape_cast %326 : vector<1x2x256xf32> to vector<2x256xf32>
    %328 = vector.broadcast %260 : vector<2x1xf32> to vector<2x256xf32>
    %329 = arith.mulf %328, %327 : vector<2x256xf32>
    %330 = arith.addf %325, %329 : vector<2x256xf32>
    %331 = arith.mulf %330, %273 : vector<2x256xf32>
    %332 = arith.mulf %270, %17 : vector<2x256xf32>
    %333 = arith.addf %331, %332 : vector<2x256xf32>
    %c1_78 = arith.constant 1 : index
    %334 = memref.load %arg9[%c1_78] : memref<3xf32, #tpu.memory_space<smem>>
    %335 = vector.broadcast %334 : f32 to vector<2x256xf32>
    %336 = arith.subf %333, %335 : vector<2x256xf32>
    %c1_79 = arith.constant 1 : index
    %337 = memref.load %arg10[%c1_79] : memref<3xf32, #tpu.memory_space<smem>>
    %338 = vector.broadcast %337 : f32 to vector<2x256xf32>
    %339 = arith.mulf %336, %338 : vector<2x256xf32>
    %cst_80 = arith.constant 0.000000e+00 : f32
    %340 = vector.broadcast %cst_80 : f32 to vector<2x17xf32>
    %341 = vector.extract_strided_slice %339 {offsets = [0, 0], sizes = [2, 239], strides = [1, 1]} : vector<2x256xf32> to vector<2x239xf32>
    %342 = tpu.concatenate %340, %341 in 1 : vector<2x17xf32>, vector<2x239xf32> -> vector<2x256xf32>
    %343 = vector.broadcast %1 : vector<1x256xf32> to vector<2x256xf32>
    %344 = arith.mulf %342, %343 : vector<2x256xf32>
    %cst_81 = arith.constant 0.000000e+00 : f32
    %345 = vector.broadcast %cst_81 : f32 to vector<2x16xf32>
    %346 = vector.extract_strided_slice %339 {offsets = [0, 0], sizes = [2, 240], strides = [1, 1]} : vector<2x256xf32> to vector<2x240xf32>
    %347 = tpu.concatenate %345, %346 in 1 : vector<2x16xf32>, vector<2x240xf32> -> vector<2x256xf32>
    %cst_82 = arith.constant 0.000000e+00 : f32
    %348 = vector.broadcast %cst_82 : f32 to vector<2x15xf32>
    %349 = vector.extract_strided_slice %339 {offsets = [0, 0], sizes = [2, 241], strides = [1, 1]} : vector<2x256xf32> to vector<2x241xf32>
    %350 = tpu.concatenate %348, %349 in 1 : vector<2x15xf32>, vector<2x241xf32> -> vector<2x256xf32>
    %351 = vector.broadcast %0 : vector<1x256xf32> to vector<2x256xf32>
    %352 = arith.mulf %350, %351 : vector<2x256xf32>
    %cst_83 = arith.constant 0.000000e+00 : f32
    %353 = vector.broadcast %cst_83 : f32 to vector<2x1xf32>
    %354 = vector.extract_strided_slice %339 {offsets = [0, 0], sizes = [2, 255], strides = [1, 1]} : vector<2x256xf32> to vector<2x255xf32>
    %355 = tpu.concatenate %353, %354 in 1 : vector<2x1xf32>, vector<2x255xf32> -> vector<2x256xf32>
    %356 = vector.broadcast %1 : vector<1x256xf32> to vector<2x256xf32>
    %357 = arith.mulf %355, %356 : vector<2x256xf32>
    %358 = vector.extract_strided_slice %339 {offsets = [0, 1], sizes = [2, 255], strides = [1, 1]} : vector<2x256xf32> to vector<2x255xf32>
    %cst_84 = arith.constant 0.000000e+00 : f32
    %359 = vector.broadcast %cst_84 : f32 to vector<2x1xf32>
    %360 = tpu.concatenate %358, %359 in 1 : vector<2x255xf32>, vector<2x1xf32> -> vector<2x256xf32>
    %361 = vector.broadcast %0 : vector<1x256xf32> to vector<2x256xf32>
    %362 = arith.mulf %360, %361 : vector<2x256xf32>
    %363 = vector.extract_strided_slice %339 {offsets = [0, 15], sizes = [2, 241], strides = [1, 1]} : vector<2x256xf32> to vector<2x241xf32>
    %cst_85 = arith.constant 0.000000e+00 : f32
    %364 = vector.broadcast %cst_85 : f32 to vector<2x15xf32>
    %365 = tpu.concatenate %363, %364 in 1 : vector<2x241xf32>, vector<2x15xf32> -> vector<2x256xf32>
    %366 = vector.broadcast %1 : vector<1x256xf32> to vector<2x256xf32>
    %367 = arith.mulf %365, %366 : vector<2x256xf32>
    %368 = vector.extract_strided_slice %339 {offsets = [0, 16], sizes = [2, 240], strides = [1, 1]} : vector<2x256xf32> to vector<2x240xf32>
    %cst_86 = arith.constant 0.000000e+00 : f32
    %369 = vector.broadcast %cst_86 : f32 to vector<2x16xf32>
    %370 = tpu.concatenate %368, %369 in 1 : vector<2x240xf32>, vector<2x16xf32> -> vector<2x256xf32>
    %371 = vector.extract_strided_slice %339 {offsets = [0, 17], sizes = [2, 239], strides = [1, 1]} : vector<2x256xf32> to vector<2x239xf32>
    %cst_87 = arith.constant 0.000000e+00 : f32
    %372 = vector.broadcast %cst_87 : f32 to vector<2x17xf32>
    %373 = tpu.concatenate %371, %372 in 1 : vector<2x239xf32>, vector<2x17xf32> -> vector<2x256xf32>
    %374 = vector.broadcast %0 : vector<1x256xf32> to vector<2x256xf32>
    %375 = arith.mulf %373, %374 : vector<2x256xf32>
    %376 = arith.mulf %7, %249 : vector<2x256xf32>
    %c2_88 = arith.constant 2 : index
    %c0_89 = arith.constant 0 : index
    %c0_90 = arith.constant 0 : index
    %377 = vector.load %arg2[%c2_88, %c0_89, %c0_90] : memref<3x2x256xf32, #tpu.memory_space<vmem>>, vector<1x2x256xf32>
    %378 = vector.shape_cast %377 : vector<1x2x256xf32> to vector<2x256xf32>
    %379 = vector.broadcast %260 : vector<2x1xf32> to vector<2x256xf32>
    %380 = arith.mulf %379, %378 : vector<2x256xf32>
    %381 = arith.addf %376, %380 : vector<2x256xf32>
    %382 = arith.mulf %381, %273 : vector<2x256xf32>
    %383 = arith.mulf %270, %22 : vector<2x256xf32>
    %384 = arith.addf %382, %383 : vector<2x256xf32>
    %c2_91 = arith.constant 2 : index
    %385 = memref.load %arg9[%c2_91] : memref<3xf32, #tpu.memory_space<smem>>
    %386 = vector.broadcast %385 : f32 to vector<2x256xf32>
    %387 = arith.subf %384, %386 : vector<2x256xf32>
    %c2_92 = arith.constant 2 : index
    %388 = memref.load %arg10[%c2_92] : memref<3xf32, #tpu.memory_space<smem>>
    %389 = vector.broadcast %388 : f32 to vector<2x256xf32>
    %390 = arith.mulf %387, %389 : vector<2x256xf32>
    %cst_93 = arith.constant 0.000000e+00 : f32
    %391 = vector.broadcast %cst_93 : f32 to vector<2x17xf32>
    %392 = vector.extract_strided_slice %390 {offsets = [0, 0], sizes = [2, 239], strides = [1, 1]} : vector<2x256xf32> to vector<2x239xf32>
    %393 = tpu.concatenate %391, %392 in 1 : vector<2x17xf32>, vector<2x239xf32> -> vector<2x256xf32>
    %394 = vector.broadcast %1 : vector<1x256xf32> to vector<2x256xf32>
    %395 = arith.mulf %393, %394 : vector<2x256xf32>
    %cst_94 = arith.constant 0.000000e+00 : f32
    %396 = vector.broadcast %cst_94 : f32 to vector<2x16xf32>
    %397 = vector.extract_strided_slice %390 {offsets = [0, 0], sizes = [2, 240], strides = [1, 1]} : vector<2x256xf32> to vector<2x240xf32>
    %398 = tpu.concatenate %396, %397 in 1 : vector<2x16xf32>, vector<2x240xf32> -> vector<2x256xf32>
    %cst_95 = arith.constant 0.000000e+00 : f32
    %399 = vector.broadcast %cst_95 : f32 to vector<2x15xf32>
    %400 = vector.extract_strided_slice %390 {offsets = [0, 0], sizes = [2, 241], strides = [1, 1]} : vector<2x256xf32> to vector<2x241xf32>
    %401 = tpu.concatenate %399, %400 in 1 : vector<2x15xf32>, vector<2x241xf32> -> vector<2x256xf32>
    %402 = vector.broadcast %0 : vector<1x256xf32> to vector<2x256xf32>
    %403 = arith.mulf %401, %402 : vector<2x256xf32>
    %cst_96 = arith.constant 0.000000e+00 : f32
    %404 = vector.broadcast %cst_96 : f32 to vector<2x1xf32>
    %405 = vector.extract_strided_slice %390 {offsets = [0, 0], sizes = [2, 255], strides = [1, 1]} : vector<2x256xf32> to vector<2x255xf32>
    %406 = tpu.concatenate %404, %405 in 1 : vector<2x1xf32>, vector<2x255xf32> -> vector<2x256xf32>
    %407 = vector.broadcast %1 : vector<1x256xf32> to vector<2x256xf32>
    %408 = arith.mulf %406, %407 : vector<2x256xf32>
    %409 = vector.extract_strided_slice %390 {offsets = [0, 1], sizes = [2, 255], strides = [1, 1]} : vector<2x256xf32> to vector<2x255xf32>
    %cst_97 = arith.constant 0.000000e+00 : f32
    %410 = vector.broadcast %cst_97 : f32 to vector<2x1xf32>
    %411 = tpu.concatenate %409, %410 in 1 : vector<2x255xf32>, vector<2x1xf32> -> vector<2x256xf32>
    %412 = vector.broadcast %0 : vector<1x256xf32> to vector<2x256xf32>
    %413 = arith.mulf %411, %412 : vector<2x256xf32>
    %414 = vector.extract_strided_slice %390 {offsets = [0, 15], sizes = [2, 241], strides = [1, 1]} : vector<2x256xf32> to vector<2x241xf32>
    %cst_98 = arith.constant 0.000000e+00 : f32
    %415 = vector.broadcast %cst_98 : f32 to vector<2x15xf32>
    %416 = tpu.concatenate %414, %415 in 1 : vector<2x241xf32>, vector<2x15xf32> -> vector<2x256xf32>
    %417 = vector.broadcast %1 : vector<1x256xf32> to vector<2x256xf32>
    %418 = arith.mulf %416, %417 : vector<2x256xf32>
    %419 = vector.extract_strided_slice %390 {offsets = [0, 16], sizes = [2, 240], strides = [1, 1]} : vector<2x256xf32> to vector<2x240xf32>
    %cst_99 = arith.constant 0.000000e+00 : f32
    %420 = vector.broadcast %cst_99 : f32 to vector<2x16xf32>
    %421 = tpu.concatenate %419, %420 in 1 : vector<2x240xf32>, vector<2x16xf32> -> vector<2x256xf32>
    %422 = vector.extract_strided_slice %390 {offsets = [0, 17], sizes = [2, 239], strides = [1, 1]} : vector<2x256xf32> to vector<2x239xf32>
    %cst_100 = arith.constant 0.000000e+00 : f32
    %423 = vector.broadcast %cst_100 : f32 to vector<2x17xf32>
    %424 = tpu.concatenate %422, %423 in 1 : vector<2x239xf32>, vector<2x17xf32> -> vector<2x256xf32>
    %425 = vector.broadcast %0 : vector<1x256xf32> to vector<2x256xf32>
    %426 = arith.mulf %424, %425 : vector<2x256xf32>
    %c0_101 = arith.constant 0 : index
    %c0_102 = arith.constant 0 : index
    %427 = vector.load %arg11[%c0_101, %c0_102] : memref<8x10xf32, #tpu.memory_space<vmem>>, vector<8x10xf32>
    %cst_103 = arith.constant 0.000000e+00 : f32
    %428 = vector.broadcast %cst_103 : f32 to vector<2x10xf32>
    %c0_104 = arith.constant 0 : index
    %c0_105 = arith.constant 0 : index
    %429 = vector.load %arg12[%c0_104, %c0_105] : memref<1x10xf32, #tpu.memory_space<vmem>>, vector<1x10xf32>
    %430 = vector.broadcast %429 : vector<1x10xf32> to vector<2x10xf32>
    %431 = arith.addf %428, %430 : vector<2x10xf32>
    %cst_106 = arith.constant 0.000000e+00 : f32
    %432 = vector.broadcast %cst_106 : f32 to vector<2x256xf32>
    %c0_107 = arith.constant 0 : index
    %433 = memref.load %arg8[%c0_107] : memref<8xf32, #tpu.memory_space<smem>>
    %434 = vector.broadcast %433 : f32 to vector<2x256xf32>
    %435 = arith.addf %432, %434 : vector<2x256xf32>
    %c0_108 = arith.constant 0 : index
    %436 = memref.load %arg7[%c0_108] : memref<216xf32, #tpu.memory_space<smem>>
    %437 = vector.broadcast %436 : f32 to vector<2x256xf32>
    %438 = arith.mulf %437, %293 : vector<2x256xf32>
    %439 = arith.addf %435, %438 : vector<2x256xf32>
    %c1_109 = arith.constant 1 : index
    %440 = memref.load %arg7[%c1_109] : memref<216xf32, #tpu.memory_space<smem>>
    %441 = vector.broadcast %440 : f32 to vector<2x256xf32>
    %442 = arith.mulf %441, %296 : vector<2x256xf32>
    %443 = arith.addf %439, %442 : vector<2x256xf32>
    %c2_110 = arith.constant 2 : index
    %444 = memref.load %arg7[%c2_110] : memref<216xf32, #tpu.memory_space<smem>>
    %445 = vector.broadcast %444 : f32 to vector<2x256xf32>
    %446 = arith.mulf %445, %301 : vector<2x256xf32>
    %447 = arith.addf %443, %446 : vector<2x256xf32>
    %c3_111 = arith.constant 3 : index
    %448 = memref.load %arg7[%c3_111] : memref<216xf32, #tpu.memory_space<smem>>
    %449 = vector.broadcast %448 : f32 to vector<2x256xf32>
    %450 = arith.mulf %449, %306 : vector<2x256xf32>
    %451 = arith.addf %447, %450 : vector<2x256xf32>
    %c4_112 = arith.constant 4 : index
    %452 = memref.load %arg7[%c4_112] : memref<216xf32, #tpu.memory_space<smem>>
    %453 = vector.broadcast %452 : f32 to vector<2x256xf32>
    %454 = arith.mulf %453, %288 : vector<2x256xf32>
    %455 = arith.addf %451, %454 : vector<2x256xf32>
    %c5_113 = arith.constant 5 : index
    %456 = memref.load %arg7[%c5_113] : memref<216xf32, #tpu.memory_space<smem>>
    %457 = vector.broadcast %456 : f32 to vector<2x256xf32>
    %458 = arith.mulf %457, %311 : vector<2x256xf32>
    %459 = arith.addf %455, %458 : vector<2x256xf32>
    %c6_114 = arith.constant 6 : index
    %460 = memref.load %arg7[%c6_114] : memref<216xf32, #tpu.memory_space<smem>>
    %461 = vector.broadcast %460 : f32 to vector<2x256xf32>
    %462 = arith.mulf %461, %316 : vector<2x256xf32>
    %463 = arith.addf %459, %462 : vector<2x256xf32>
    %c7_115 = arith.constant 7 : index
    %464 = memref.load %arg7[%c7_115] : memref<216xf32, #tpu.memory_space<smem>>
    %465 = vector.broadcast %464 : f32 to vector<2x256xf32>
    %466 = arith.mulf %465, %319 : vector<2x256xf32>
    %467 = arith.addf %463, %466 : vector<2x256xf32>
    %c8_116 = arith.constant 8 : index
    %468 = memref.load %arg7[%c8_116] : memref<216xf32, #tpu.memory_space<smem>>
    %469 = vector.broadcast %468 : f32 to vector<2x256xf32>
    %470 = arith.mulf %469, %324 : vector<2x256xf32>
    %471 = arith.addf %467, %470 : vector<2x256xf32>
    %c9_117 = arith.constant 9 : index
    %472 = memref.load %arg7[%c9_117] : memref<216xf32, #tpu.memory_space<smem>>
    %473 = vector.broadcast %472 : f32 to vector<2x256xf32>
    %474 = arith.mulf %473, %344 : vector<2x256xf32>
    %475 = arith.addf %471, %474 : vector<2x256xf32>
    %c10_118 = arith.constant 10 : index
    %476 = memref.load %arg7[%c10_118] : memref<216xf32, #tpu.memory_space<smem>>
    %477 = vector.broadcast %476 : f32 to vector<2x256xf32>
    %478 = arith.mulf %477, %347 : vector<2x256xf32>
    %479 = arith.addf %475, %478 : vector<2x256xf32>
    %c11_119 = arith.constant 11 : index
    %480 = memref.load %arg7[%c11_119] : memref<216xf32, #tpu.memory_space<smem>>
    %481 = vector.broadcast %480 : f32 to vector<2x256xf32>
    %482 = arith.mulf %481, %352 : vector<2x256xf32>
    %483 = arith.addf %479, %482 : vector<2x256xf32>
    %c12_120 = arith.constant 12 : index
    %484 = memref.load %arg7[%c12_120] : memref<216xf32, #tpu.memory_space<smem>>
    %485 = vector.broadcast %484 : f32 to vector<2x256xf32>
    %486 = arith.mulf %485, %357 : vector<2x256xf32>
    %487 = arith.addf %483, %486 : vector<2x256xf32>
    %c13_121 = arith.constant 13 : index
    %488 = memref.load %arg7[%c13_121] : memref<216xf32, #tpu.memory_space<smem>>
    %489 = vector.broadcast %488 : f32 to vector<2x256xf32>
    %490 = arith.mulf %489, %339 : vector<2x256xf32>
    %491 = arith.addf %487, %490 : vector<2x256xf32>
    %c14_122 = arith.constant 14 : index
    %492 = memref.load %arg7[%c14_122] : memref<216xf32, #tpu.memory_space<smem>>
    %493 = vector.broadcast %492 : f32 to vector<2x256xf32>
    %494 = arith.mulf %493, %362 : vector<2x256xf32>
    %495 = arith.addf %491, %494 : vector<2x256xf32>
    %c15_123 = arith.constant 15 : index
    %496 = memref.load %arg7[%c15_123] : memref<216xf32, #tpu.memory_space<smem>>
    %497 = vector.broadcast %496 : f32 to vector<2x256xf32>
    %498 = arith.mulf %497, %367 : vector<2x256xf32>
    %499 = arith.addf %495, %498 : vector<2x256xf32>
    %c16_124 = arith.constant 16 : index
    %500 = memref.load %arg7[%c16_124] : memref<216xf32, #tpu.memory_space<smem>>
    %501 = vector.broadcast %500 : f32 to vector<2x256xf32>
    %502 = arith.mulf %501, %370 : vector<2x256xf32>
    %503 = arith.addf %499, %502 : vector<2x256xf32>
    %c17_125 = arith.constant 17 : index
    %504 = memref.load %arg7[%c17_125] : memref<216xf32, #tpu.memory_space<smem>>
    %505 = vector.broadcast %504 : f32 to vector<2x256xf32>
    %506 = arith.mulf %505, %375 : vector<2x256xf32>
    %507 = arith.addf %503, %506 : vector<2x256xf32>
    %c18_126 = arith.constant 18 : index
    %508 = memref.load %arg7[%c18_126] : memref<216xf32, #tpu.memory_space<smem>>
    %509 = vector.broadcast %508 : f32 to vector<2x256xf32>
    %510 = arith.mulf %509, %395 : vector<2x256xf32>
    %511 = arith.addf %507, %510 : vector<2x256xf32>
    %c19_127 = arith.constant 19 : index
    %512 = memref.load %arg7[%c19_127] : memref<216xf32, #tpu.memory_space<smem>>
    %513 = vector.broadcast %512 : f32 to vector<2x256xf32>
    %514 = arith.mulf %513, %398 : vector<2x256xf32>
    %515 = arith.addf %511, %514 : vector<2x256xf32>
    %c20_128 = arith.constant 20 : index
    %516 = memref.load %arg7[%c20_128] : memref<216xf32, #tpu.memory_space<smem>>
    %517 = vector.broadcast %516 : f32 to vector<2x256xf32>
    %518 = arith.mulf %517, %403 : vector<2x256xf32>
    %519 = arith.addf %515, %518 : vector<2x256xf32>
    %c21_129 = arith.constant 21 : index
    %520 = memref.load %arg7[%c21_129] : memref<216xf32, #tpu.memory_space<smem>>
    %521 = vector.broadcast %520 : f32 to vector<2x256xf32>
    %522 = arith.mulf %521, %408 : vector<2x256xf32>
    %523 = arith.addf %519, %522 : vector<2x256xf32>
    %c22_130 = arith.constant 22 : index
    %524 = memref.load %arg7[%c22_130] : memref<216xf32, #tpu.memory_space<smem>>
    %525 = vector.broadcast %524 : f32 to vector<2x256xf32>
    %526 = arith.mulf %525, %390 : vector<2x256xf32>
    %527 = arith.addf %523, %526 : vector<2x256xf32>
    %c23_131 = arith.constant 23 : index
    %528 = memref.load %arg7[%c23_131] : memref<216xf32, #tpu.memory_space<smem>>
    %529 = vector.broadcast %528 : f32 to vector<2x256xf32>
    %530 = arith.mulf %529, %413 : vector<2x256xf32>
    %531 = arith.addf %527, %530 : vector<2x256xf32>
    %c24_132 = arith.constant 24 : index
    %532 = memref.load %arg7[%c24_132] : memref<216xf32, #tpu.memory_space<smem>>
    %533 = vector.broadcast %532 : f32 to vector<2x256xf32>
    %534 = arith.mulf %533, %418 : vector<2x256xf32>
    %535 = arith.addf %531, %534 : vector<2x256xf32>
    %c25_133 = arith.constant 25 : index
    %536 = memref.load %arg7[%c25_133] : memref<216xf32, #tpu.memory_space<smem>>
    %537 = vector.broadcast %536 : f32 to vector<2x256xf32>
    %538 = arith.mulf %537, %421 : vector<2x256xf32>
    %539 = arith.addf %535, %538 : vector<2x256xf32>
    %c26_134 = arith.constant 26 : index
    %540 = memref.load %arg7[%c26_134] : memref<216xf32, #tpu.memory_space<smem>>
    %541 = vector.broadcast %540 : f32 to vector<2x256xf32>
    %542 = arith.mulf %541, %426 : vector<2x256xf32>
    %543 = arith.addf %539, %542 : vector<2x256xf32>
    %cst_135 = arith.constant 0.000000e+00 : f32
    %544 = vector.broadcast %cst_135 : f32 to vector<2x256xf32>
    %545 = arith.maximumf %543, %544 : vector<2x256xf32>
    %cst_136 = arith.constant dense<0.000000e+00> : vector<2xf32>
    %546 = vector.multi_reduction <add>, %545, %cst_136 [1] : vector<2x256xf32> to vector<2xf32>
    %547 = vector.shape_cast %546 : vector<2xf32> to vector<2x1xf32>
    %cst_137 = arith.constant 3.906250e-03 : f32
    %548 = vector.broadcast %cst_137 : f32 to vector<2x1xf32>
    %549 = arith.mulf %547, %548 : vector<2x1xf32>
    %550 = vector.extract_strided_slice %427 {offsets = [0, 0], sizes = [1, 10], strides = [1, 1]} : vector<8x10xf32> to vector<1x10xf32>
    %551 = vector.broadcast %549 : vector<2x1xf32> to vector<2x10xf32>
    %552 = vector.broadcast %550 : vector<1x10xf32> to vector<2x10xf32>
    %553 = arith.mulf %551, %552 : vector<2x10xf32>
    %554 = arith.addf %431, %553 : vector<2x10xf32>
    %cst_138 = arith.constant 0.000000e+00 : f32
    %555 = vector.broadcast %cst_138 : f32 to vector<2x256xf32>
    %c1_139 = arith.constant 1 : index
    %556 = memref.load %arg8[%c1_139] : memref<8xf32, #tpu.memory_space<smem>>
    %557 = vector.broadcast %556 : f32 to vector<2x256xf32>
    %558 = arith.addf %555, %557 : vector<2x256xf32>
    %c27 = arith.constant 27 : index
    %559 = memref.load %arg7[%c27] : memref<216xf32, #tpu.memory_space<smem>>
    %560 = vector.broadcast %559 : f32 to vector<2x256xf32>
    %561 = arith.mulf %560, %293 : vector<2x256xf32>
    %562 = arith.addf %558, %561 : vector<2x256xf32>
    %c28 = arith.constant 28 : index
    %563 = memref.load %arg7[%c28] : memref<216xf32, #tpu.memory_space<smem>>
    %564 = vector.broadcast %563 : f32 to vector<2x256xf32>
    %565 = arith.mulf %564, %296 : vector<2x256xf32>
    %566 = arith.addf %562, %565 : vector<2x256xf32>
    %c29 = arith.constant 29 : index
    %567 = memref.load %arg7[%c29] : memref<216xf32, #tpu.memory_space<smem>>
    %568 = vector.broadcast %567 : f32 to vector<2x256xf32>
    %569 = arith.mulf %568, %301 : vector<2x256xf32>
    %570 = arith.addf %566, %569 : vector<2x256xf32>
    %c30 = arith.constant 30 : index
    %571 = memref.load %arg7[%c30] : memref<216xf32, #tpu.memory_space<smem>>
    %572 = vector.broadcast %571 : f32 to vector<2x256xf32>
    %573 = arith.mulf %572, %306 : vector<2x256xf32>
    %574 = arith.addf %570, %573 : vector<2x256xf32>
    %c31 = arith.constant 31 : index
    %575 = memref.load %arg7[%c31] : memref<216xf32, #tpu.memory_space<smem>>
    %576 = vector.broadcast %575 : f32 to vector<2x256xf32>
    %577 = arith.mulf %576, %288 : vector<2x256xf32>
    %578 = arith.addf %574, %577 : vector<2x256xf32>
    %c32 = arith.constant 32 : index
    %579 = memref.load %arg7[%c32] : memref<216xf32, #tpu.memory_space<smem>>
    %580 = vector.broadcast %579 : f32 to vector<2x256xf32>
    %581 = arith.mulf %580, %311 : vector<2x256xf32>
    %582 = arith.addf %578, %581 : vector<2x256xf32>
    %c33 = arith.constant 33 : index
    %583 = memref.load %arg7[%c33] : memref<216xf32, #tpu.memory_space<smem>>
    %584 = vector.broadcast %583 : f32 to vector<2x256xf32>
    %585 = arith.mulf %584, %316 : vector<2x256xf32>
    %586 = arith.addf %582, %585 : vector<2x256xf32>
    %c34 = arith.constant 34 : index
    %587 = memref.load %arg7[%c34] : memref<216xf32, #tpu.memory_space<smem>>
    %588 = vector.broadcast %587 : f32 to vector<2x256xf32>
    %589 = arith.mulf %588, %319 : vector<2x256xf32>
    %590 = arith.addf %586, %589 : vector<2x256xf32>
    %c35 = arith.constant 35 : index
    %591 = memref.load %arg7[%c35] : memref<216xf32, #tpu.memory_space<smem>>
    %592 = vector.broadcast %591 : f32 to vector<2x256xf32>
    %593 = arith.mulf %592, %324 : vector<2x256xf32>
    %594 = arith.addf %590, %593 : vector<2x256xf32>
    %c36 = arith.constant 36 : index
    %595 = memref.load %arg7[%c36] : memref<216xf32, #tpu.memory_space<smem>>
    %596 = vector.broadcast %595 : f32 to vector<2x256xf32>
    %597 = arith.mulf %596, %344 : vector<2x256xf32>
    %598 = arith.addf %594, %597 : vector<2x256xf32>
    %c37 = arith.constant 37 : index
    %599 = memref.load %arg7[%c37] : memref<216xf32, #tpu.memory_space<smem>>
    %600 = vector.broadcast %599 : f32 to vector<2x256xf32>
    %601 = arith.mulf %600, %347 : vector<2x256xf32>
    %602 = arith.addf %598, %601 : vector<2x256xf32>
    %c38 = arith.constant 38 : index
    %603 = memref.load %arg7[%c38] : memref<216xf32, #tpu.memory_space<smem>>
    %604 = vector.broadcast %603 : f32 to vector<2x256xf32>
    %605 = arith.mulf %604, %352 : vector<2x256xf32>
    %606 = arith.addf %602, %605 : vector<2x256xf32>
    %c39 = arith.constant 39 : index
    %607 = memref.load %arg7[%c39] : memref<216xf32, #tpu.memory_space<smem>>
    %608 = vector.broadcast %607 : f32 to vector<2x256xf32>
    %609 = arith.mulf %608, %357 : vector<2x256xf32>
    %610 = arith.addf %606, %609 : vector<2x256xf32>
    %c40 = arith.constant 40 : index
    %611 = memref.load %arg7[%c40] : memref<216xf32, #tpu.memory_space<smem>>
    %612 = vector.broadcast %611 : f32 to vector<2x256xf32>
    %613 = arith.mulf %612, %339 : vector<2x256xf32>
    %614 = arith.addf %610, %613 : vector<2x256xf32>
    %c41 = arith.constant 41 : index
    %615 = memref.load %arg7[%c41] : memref<216xf32, #tpu.memory_space<smem>>
    %616 = vector.broadcast %615 : f32 to vector<2x256xf32>
    %617 = arith.mulf %616, %362 : vector<2x256xf32>
    %618 = arith.addf %614, %617 : vector<2x256xf32>
    %c42 = arith.constant 42 : index
    %619 = memref.load %arg7[%c42] : memref<216xf32, #tpu.memory_space<smem>>
    %620 = vector.broadcast %619 : f32 to vector<2x256xf32>
    %621 = arith.mulf %620, %367 : vector<2x256xf32>
    %622 = arith.addf %618, %621 : vector<2x256xf32>
    %c43 = arith.constant 43 : index
    %623 = memref.load %arg7[%c43] : memref<216xf32, #tpu.memory_space<smem>>
    %624 = vector.broadcast %623 : f32 to vector<2x256xf32>
    %625 = arith.mulf %624, %370 : vector<2x256xf32>
    %626 = arith.addf %622, %625 : vector<2x256xf32>
    %c44 = arith.constant 44 : index
    %627 = memref.load %arg7[%c44] : memref<216xf32, #tpu.memory_space<smem>>
    %628 = vector.broadcast %627 : f32 to vector<2x256xf32>
    %629 = arith.mulf %628, %375 : vector<2x256xf32>
    %630 = arith.addf %626, %629 : vector<2x256xf32>
    %c45 = arith.constant 45 : index
    %631 = memref.load %arg7[%c45] : memref<216xf32, #tpu.memory_space<smem>>
    %632 = vector.broadcast %631 : f32 to vector<2x256xf32>
    %633 = arith.mulf %632, %395 : vector<2x256xf32>
    %634 = arith.addf %630, %633 : vector<2x256xf32>
    %c46 = arith.constant 46 : index
    %635 = memref.load %arg7[%c46] : memref<216xf32, #tpu.memory_space<smem>>
    %636 = vector.broadcast %635 : f32 to vector<2x256xf32>
    %637 = arith.mulf %636, %398 : vector<2x256xf32>
    %638 = arith.addf %634, %637 : vector<2x256xf32>
    %c47 = arith.constant 47 : index
    %639 = memref.load %arg7[%c47] : memref<216xf32, #tpu.memory_space<smem>>
    %640 = vector.broadcast %639 : f32 to vector<2x256xf32>
    %641 = arith.mulf %640, %403 : vector<2x256xf32>
    %642 = arith.addf %638, %641 : vector<2x256xf32>
    %c48 = arith.constant 48 : index
    %643 = memref.load %arg7[%c48] : memref<216xf32, #tpu.memory_space<smem>>
    %644 = vector.broadcast %643 : f32 to vector<2x256xf32>
    %645 = arith.mulf %644, %408 : vector<2x256xf32>
    %646 = arith.addf %642, %645 : vector<2x256xf32>
    %c49 = arith.constant 49 : index
    %647 = memref.load %arg7[%c49] : memref<216xf32, #tpu.memory_space<smem>>
    %648 = vector.broadcast %647 : f32 to vector<2x256xf32>
    %649 = arith.mulf %648, %390 : vector<2x256xf32>
    %650 = arith.addf %646, %649 : vector<2x256xf32>
    %c50 = arith.constant 50 : index
    %651 = memref.load %arg7[%c50] : memref<216xf32, #tpu.memory_space<smem>>
    %652 = vector.broadcast %651 : f32 to vector<2x256xf32>
    %653 = arith.mulf %652, %413 : vector<2x256xf32>
    %654 = arith.addf %650, %653 : vector<2x256xf32>
    %c51 = arith.constant 51 : index
    %655 = memref.load %arg7[%c51] : memref<216xf32, #tpu.memory_space<smem>>
    %656 = vector.broadcast %655 : f32 to vector<2x256xf32>
    %657 = arith.mulf %656, %418 : vector<2x256xf32>
    %658 = arith.addf %654, %657 : vector<2x256xf32>
    %c52 = arith.constant 52 : index
    %659 = memref.load %arg7[%c52] : memref<216xf32, #tpu.memory_space<smem>>
    %660 = vector.broadcast %659 : f32 to vector<2x256xf32>
    %661 = arith.mulf %660, %421 : vector<2x256xf32>
    %662 = arith.addf %658, %661 : vector<2x256xf32>
    %c53 = arith.constant 53 : index
    %663 = memref.load %arg7[%c53] : memref<216xf32, #tpu.memory_space<smem>>
    %664 = vector.broadcast %663 : f32 to vector<2x256xf32>
    %665 = arith.mulf %664, %426 : vector<2x256xf32>
    %666 = arith.addf %662, %665 : vector<2x256xf32>
    %cst_140 = arith.constant 0.000000e+00 : f32
    %667 = vector.broadcast %cst_140 : f32 to vector<2x256xf32>
    %668 = arith.maximumf %666, %667 : vector<2x256xf32>
    %cst_141 = arith.constant dense<0.000000e+00> : vector<2xf32>
    %669 = vector.multi_reduction <add>, %668, %cst_141 [1] : vector<2x256xf32> to vector<2xf32>
    %670 = vector.shape_cast %669 : vector<2xf32> to vector<2x1xf32>
    %cst_142 = arith.constant 3.906250e-03 : f32
    %671 = vector.broadcast %cst_142 : f32 to vector<2x1xf32>
    %672 = arith.mulf %670, %671 : vector<2x1xf32>
    %673 = vector.extract_strided_slice %427 {offsets = [1, 0], sizes = [1, 10], strides = [1, 1]} : vector<8x10xf32> to vector<1x10xf32>
    %674 = vector.broadcast %672 : vector<2x1xf32> to vector<2x10xf32>
    %675 = vector.broadcast %673 : vector<1x10xf32> to vector<2x10xf32>
    %676 = arith.mulf %674, %675 : vector<2x10xf32>
    %677 = arith.addf %554, %676 : vector<2x10xf32>
    %cst_143 = arith.constant 0.000000e+00 : f32
    %678 = vector.broadcast %cst_143 : f32 to vector<2x256xf32>
    %c2_144 = arith.constant 2 : index
    %679 = memref.load %arg8[%c2_144] : memref<8xf32, #tpu.memory_space<smem>>
    %680 = vector.broadcast %679 : f32 to vector<2x256xf32>
    %681 = arith.addf %678, %680 : vector<2x256xf32>
    %c54 = arith.constant 54 : index
    %682 = memref.load %arg7[%c54] : memref<216xf32, #tpu.memory_space<smem>>
    %683 = vector.broadcast %682 : f32 to vector<2x256xf32>
    %684 = arith.mulf %683, %293 : vector<2x256xf32>
    %685 = arith.addf %681, %684 : vector<2x256xf32>
    %c55 = arith.constant 55 : index
    %686 = memref.load %arg7[%c55] : memref<216xf32, #tpu.memory_space<smem>>
    %687 = vector.broadcast %686 : f32 to vector<2x256xf32>
    %688 = arith.mulf %687, %296 : vector<2x256xf32>
    %689 = arith.addf %685, %688 : vector<2x256xf32>
    %c56 = arith.constant 56 : index
    %690 = memref.load %arg7[%c56] : memref<216xf32, #tpu.memory_space<smem>>
    %691 = vector.broadcast %690 : f32 to vector<2x256xf32>
    %692 = arith.mulf %691, %301 : vector<2x256xf32>
    %693 = arith.addf %689, %692 : vector<2x256xf32>
    %c57 = arith.constant 57 : index
    %694 = memref.load %arg7[%c57] : memref<216xf32, #tpu.memory_space<smem>>
    %695 = vector.broadcast %694 : f32 to vector<2x256xf32>
    %696 = arith.mulf %695, %306 : vector<2x256xf32>
    %697 = arith.addf %693, %696 : vector<2x256xf32>
    %c58 = arith.constant 58 : index
    %698 = memref.load %arg7[%c58] : memref<216xf32, #tpu.memory_space<smem>>
    %699 = vector.broadcast %698 : f32 to vector<2x256xf32>
    %700 = arith.mulf %699, %288 : vector<2x256xf32>
    %701 = arith.addf %697, %700 : vector<2x256xf32>
    %c59 = arith.constant 59 : index
    %702 = memref.load %arg7[%c59] : memref<216xf32, #tpu.memory_space<smem>>
    %703 = vector.broadcast %702 : f32 to vector<2x256xf32>
    %704 = arith.mulf %703, %311 : vector<2x256xf32>
    %705 = arith.addf %701, %704 : vector<2x256xf32>
    %c60 = arith.constant 60 : index
    %706 = memref.load %arg7[%c60] : memref<216xf32, #tpu.memory_space<smem>>
    %707 = vector.broadcast %706 : f32 to vector<2x256xf32>
    %708 = arith.mulf %707, %316 : vector<2x256xf32>
    %709 = arith.addf %705, %708 : vector<2x256xf32>
    %c61 = arith.constant 61 : index
    %710 = memref.load %arg7[%c61] : memref<216xf32, #tpu.memory_space<smem>>
    %711 = vector.broadcast %710 : f32 to vector<2x256xf32>
    %712 = arith.mulf %711, %319 : vector<2x256xf32>
    %713 = arith.addf %709, %712 : vector<2x256xf32>
    %c62 = arith.constant 62 : index
    %714 = memref.load %arg7[%c62] : memref<216xf32, #tpu.memory_space<smem>>
    %715 = vector.broadcast %714 : f32 to vector<2x256xf32>
    %716 = arith.mulf %715, %324 : vector<2x256xf32>
    %717 = arith.addf %713, %716 : vector<2x256xf32>
    %c63 = arith.constant 63 : index
    %718 = memref.load %arg7[%c63] : memref<216xf32, #tpu.memory_space<smem>>
    %719 = vector.broadcast %718 : f32 to vector<2x256xf32>
    %720 = arith.mulf %719, %344 : vector<2x256xf32>
    %721 = arith.addf %717, %720 : vector<2x256xf32>
    %c64 = arith.constant 64 : index
    %722 = memref.load %arg7[%c64] : memref<216xf32, #tpu.memory_space<smem>>
    %723 = vector.broadcast %722 : f32 to vector<2x256xf32>
    %724 = arith.mulf %723, %347 : vector<2x256xf32>
    %725 = arith.addf %721, %724 : vector<2x256xf32>
    %c65 = arith.constant 65 : index
    %726 = memref.load %arg7[%c65] : memref<216xf32, #tpu.memory_space<smem>>
    %727 = vector.broadcast %726 : f32 to vector<2x256xf32>
    %728 = arith.mulf %727, %352 : vector<2x256xf32>
    %729 = arith.addf %725, %728 : vector<2x256xf32>
    %c66 = arith.constant 66 : index
    %730 = memref.load %arg7[%c66] : memref<216xf32, #tpu.memory_space<smem>>
    %731 = vector.broadcast %730 : f32 to vector<2x256xf32>
    %732 = arith.mulf %731, %357 : vector<2x256xf32>
    %733 = arith.addf %729, %732 : vector<2x256xf32>
    %c67 = arith.constant 67 : index
    %734 = memref.load %arg7[%c67] : memref<216xf32, #tpu.memory_space<smem>>
    %735 = vector.broadcast %734 : f32 to vector<2x256xf32>
    %736 = arith.mulf %735, %339 : vector<2x256xf32>
    %737 = arith.addf %733, %736 : vector<2x256xf32>
    %c68 = arith.constant 68 : index
    %738 = memref.load %arg7[%c68] : memref<216xf32, #tpu.memory_space<smem>>
    %739 = vector.broadcast %738 : f32 to vector<2x256xf32>
    %740 = arith.mulf %739, %362 : vector<2x256xf32>
    %741 = arith.addf %737, %740 : vector<2x256xf32>
    %c69 = arith.constant 69 : index
    %742 = memref.load %arg7[%c69] : memref<216xf32, #tpu.memory_space<smem>>
    %743 = vector.broadcast %742 : f32 to vector<2x256xf32>
    %744 = arith.mulf %743, %367 : vector<2x256xf32>
    %745 = arith.addf %741, %744 : vector<2x256xf32>
    %c70 = arith.constant 70 : index
    %746 = memref.load %arg7[%c70] : memref<216xf32, #tpu.memory_space<smem>>
    %747 = vector.broadcast %746 : f32 to vector<2x256xf32>
    %748 = arith.mulf %747, %370 : vector<2x256xf32>
    %749 = arith.addf %745, %748 : vector<2x256xf32>
    %c71 = arith.constant 71 : index
    %750 = memref.load %arg7[%c71] : memref<216xf32, #tpu.memory_space<smem>>
    %751 = vector.broadcast %750 : f32 to vector<2x256xf32>
    %752 = arith.mulf %751, %375 : vector<2x256xf32>
    %753 = arith.addf %749, %752 : vector<2x256xf32>
    %c72 = arith.constant 72 : index
    %754 = memref.load %arg7[%c72] : memref<216xf32, #tpu.memory_space<smem>>
    %755 = vector.broadcast %754 : f32 to vector<2x256xf32>
    %756 = arith.mulf %755, %395 : vector<2x256xf32>
    %757 = arith.addf %753, %756 : vector<2x256xf32>
    %c73 = arith.constant 73 : index
    %758 = memref.load %arg7[%c73] : memref<216xf32, #tpu.memory_space<smem>>
    %759 = vector.broadcast %758 : f32 to vector<2x256xf32>
    %760 = arith.mulf %759, %398 : vector<2x256xf32>
    %761 = arith.addf %757, %760 : vector<2x256xf32>
    %c74 = arith.constant 74 : index
    %762 = memref.load %arg7[%c74] : memref<216xf32, #tpu.memory_space<smem>>
    %763 = vector.broadcast %762 : f32 to vector<2x256xf32>
    %764 = arith.mulf %763, %403 : vector<2x256xf32>
    %765 = arith.addf %761, %764 : vector<2x256xf32>
    %c75 = arith.constant 75 : index
    %766 = memref.load %arg7[%c75] : memref<216xf32, #tpu.memory_space<smem>>
    %767 = vector.broadcast %766 : f32 to vector<2x256xf32>
    %768 = arith.mulf %767, %408 : vector<2x256xf32>
    %769 = arith.addf %765, %768 : vector<2x256xf32>
    %c76 = arith.constant 76 : index
    %770 = memref.load %arg7[%c76] : memref<216xf32, #tpu.memory_space<smem>>
    %771 = vector.broadcast %770 : f32 to vector<2x256xf32>
    %772 = arith.mulf %771, %390 : vector<2x256xf32>
    %773 = arith.addf %769, %772 : vector<2x256xf32>
    %c77 = arith.constant 77 : index
    %774 = memref.load %arg7[%c77] : memref<216xf32, #tpu.memory_space<smem>>
    %775 = vector.broadcast %774 : f32 to vector<2x256xf32>
    %776 = arith.mulf %775, %413 : vector<2x256xf32>
    %777 = arith.addf %773, %776 : vector<2x256xf32>
    %c78 = arith.constant 78 : index
    %778 = memref.load %arg7[%c78] : memref<216xf32, #tpu.memory_space<smem>>
    %779 = vector.broadcast %778 : f32 to vector<2x256xf32>
    %780 = arith.mulf %779, %418 : vector<2x256xf32>
    %781 = arith.addf %777, %780 : vector<2x256xf32>
    %c79 = arith.constant 79 : index
    %782 = memref.load %arg7[%c79] : memref<216xf32, #tpu.memory_space<smem>>
    %783 = vector.broadcast %782 : f32 to vector<2x256xf32>
    %784 = arith.mulf %783, %421 : vector<2x256xf32>
    %785 = arith.addf %781, %784 : vector<2x256xf32>
    %c80 = arith.constant 80 : index
    %786 = memref.load %arg7[%c80] : memref<216xf32, #tpu.memory_space<smem>>
    %787 = vector.broadcast %786 : f32 to vector<2x256xf32>
    %788 = arith.mulf %787, %426 : vector<2x256xf32>
    %789 = arith.addf %785, %788 : vector<2x256xf32>
    %cst_145 = arith.constant 0.000000e+00 : f32
    %790 = vector.broadcast %cst_145 : f32 to vector<2x256xf32>
    %791 = arith.maximumf %789, %790 : vector<2x256xf32>
    %cst_146 = arith.constant dense<0.000000e+00> : vector<2xf32>
    %792 = vector.multi_reduction <add>, %791, %cst_146 [1] : vector<2x256xf32> to vector<2xf32>
    %793 = vector.shape_cast %792 : vector<2xf32> to vector<2x1xf32>
    %cst_147 = arith.constant 3.906250e-03 : f32
    %794 = vector.broadcast %cst_147 : f32 to vector<2x1xf32>
    %795 = arith.mulf %793, %794 : vector<2x1xf32>
    %796 = vector.extract_strided_slice %427 {offsets = [2, 0], sizes = [1, 10], strides = [1, 1]} : vector<8x10xf32> to vector<1x10xf32>
    %797 = vector.broadcast %795 : vector<2x1xf32> to vector<2x10xf32>
    %798 = vector.broadcast %796 : vector<1x10xf32> to vector<2x10xf32>
    %799 = arith.mulf %797, %798 : vector<2x10xf32>
    %800 = arith.addf %677, %799 : vector<2x10xf32>
    %cst_148 = arith.constant 0.000000e+00 : f32
    %801 = vector.broadcast %cst_148 : f32 to vector<2x256xf32>
    %c3_149 = arith.constant 3 : index
    %802 = memref.load %arg8[%c3_149] : memref<8xf32, #tpu.memory_space<smem>>
    %803 = vector.broadcast %802 : f32 to vector<2x256xf32>
    %804 = arith.addf %801, %803 : vector<2x256xf32>
    %c81 = arith.constant 81 : index
    %805 = memref.load %arg7[%c81] : memref<216xf32, #tpu.memory_space<smem>>
    %806 = vector.broadcast %805 : f32 to vector<2x256xf32>
    %807 = arith.mulf %806, %293 : vector<2x256xf32>
    %808 = arith.addf %804, %807 : vector<2x256xf32>
    %c82 = arith.constant 82 : index
    %809 = memref.load %arg7[%c82] : memref<216xf32, #tpu.memory_space<smem>>
    %810 = vector.broadcast %809 : f32 to vector<2x256xf32>
    %811 = arith.mulf %810, %296 : vector<2x256xf32>
    %812 = arith.addf %808, %811 : vector<2x256xf32>
    %c83 = arith.constant 83 : index
    %813 = memref.load %arg7[%c83] : memref<216xf32, #tpu.memory_space<smem>>
    %814 = vector.broadcast %813 : f32 to vector<2x256xf32>
    %815 = arith.mulf %814, %301 : vector<2x256xf32>
    %816 = arith.addf %812, %815 : vector<2x256xf32>
    %c84 = arith.constant 84 : index
    %817 = memref.load %arg7[%c84] : memref<216xf32, #tpu.memory_space<smem>>
    %818 = vector.broadcast %817 : f32 to vector<2x256xf32>
    %819 = arith.mulf %818, %306 : vector<2x256xf32>
    %820 = arith.addf %816, %819 : vector<2x256xf32>
    %c85 = arith.constant 85 : index
    %821 = memref.load %arg7[%c85] : memref<216xf32, #tpu.memory_space<smem>>
    %822 = vector.broadcast %821 : f32 to vector<2x256xf32>
    %823 = arith.mulf %822, %288 : vector<2x256xf32>
    %824 = arith.addf %820, %823 : vector<2x256xf32>
    %c86 = arith.constant 86 : index
    %825 = memref.load %arg7[%c86] : memref<216xf32, #tpu.memory_space<smem>>
    %826 = vector.broadcast %825 : f32 to vector<2x256xf32>
    %827 = arith.mulf %826, %311 : vector<2x256xf32>
    %828 = arith.addf %824, %827 : vector<2x256xf32>
    %c87 = arith.constant 87 : index
    %829 = memref.load %arg7[%c87] : memref<216xf32, #tpu.memory_space<smem>>
    %830 = vector.broadcast %829 : f32 to vector<2x256xf32>
    %831 = arith.mulf %830, %316 : vector<2x256xf32>
    %832 = arith.addf %828, %831 : vector<2x256xf32>
    %c88 = arith.constant 88 : index
    %833 = memref.load %arg7[%c88] : memref<216xf32, #tpu.memory_space<smem>>
    %834 = vector.broadcast %833 : f32 to vector<2x256xf32>
    %835 = arith.mulf %834, %319 : vector<2x256xf32>
    %836 = arith.addf %832, %835 : vector<2x256xf32>
    %c89 = arith.constant 89 : index
    %837 = memref.load %arg7[%c89] : memref<216xf32, #tpu.memory_space<smem>>
    %838 = vector.broadcast %837 : f32 to vector<2x256xf32>
    %839 = arith.mulf %838, %324 : vector<2x256xf32>
    %840 = arith.addf %836, %839 : vector<2x256xf32>
    %c90 = arith.constant 90 : index
    %841 = memref.load %arg7[%c90] : memref<216xf32, #tpu.memory_space<smem>>
    %842 = vector.broadcast %841 : f32 to vector<2x256xf32>
    %843 = arith.mulf %842, %344 : vector<2x256xf32>
    %844 = arith.addf %840, %843 : vector<2x256xf32>
    %c91 = arith.constant 91 : index
    %845 = memref.load %arg7[%c91] : memref<216xf32, #tpu.memory_space<smem>>
    %846 = vector.broadcast %845 : f32 to vector<2x256xf32>
    %847 = arith.mulf %846, %347 : vector<2x256xf32>
    %848 = arith.addf %844, %847 : vector<2x256xf32>
    %c92 = arith.constant 92 : index
    %849 = memref.load %arg7[%c92] : memref<216xf32, #tpu.memory_space<smem>>
    %850 = vector.broadcast %849 : f32 to vector<2x256xf32>
    %851 = arith.mulf %850, %352 : vector<2x256xf32>
    %852 = arith.addf %848, %851 : vector<2x256xf32>
    %c93 = arith.constant 93 : index
    %853 = memref.load %arg7[%c93] : memref<216xf32, #tpu.memory_space<smem>>
    %854 = vector.broadcast %853 : f32 to vector<2x256xf32>
    %855 = arith.mulf %854, %357 : vector<2x256xf32>
    %856 = arith.addf %852, %855 : vector<2x256xf32>
    %c94 = arith.constant 94 : index
    %857 = memref.load %arg7[%c94] : memref<216xf32, #tpu.memory_space<smem>>
    %858 = vector.broadcast %857 : f32 to vector<2x256xf32>
    %859 = arith.mulf %858, %339 : vector<2x256xf32>
    %860 = arith.addf %856, %859 : vector<2x256xf32>
    %c95 = arith.constant 95 : index
    %861 = memref.load %arg7[%c95] : memref<216xf32, #tpu.memory_space<smem>>
    %862 = vector.broadcast %861 : f32 to vector<2x256xf32>
    %863 = arith.mulf %862, %362 : vector<2x256xf32>
    %864 = arith.addf %860, %863 : vector<2x256xf32>
    %c96 = arith.constant 96 : index
    %865 = memref.load %arg7[%c96] : memref<216xf32, #tpu.memory_space<smem>>
    %866 = vector.broadcast %865 : f32 to vector<2x256xf32>
    %867 = arith.mulf %866, %367 : vector<2x256xf32>
    %868 = arith.addf %864, %867 : vector<2x256xf32>
    %c97 = arith.constant 97 : index
    %869 = memref.load %arg7[%c97] : memref<216xf32, #tpu.memory_space<smem>>
    %870 = vector.broadcast %869 : f32 to vector<2x256xf32>
    %871 = arith.mulf %870, %370 : vector<2x256xf32>
    %872 = arith.addf %868, %871 : vector<2x256xf32>
    %c98 = arith.constant 98 : index
    %873 = memref.load %arg7[%c98] : memref<216xf32, #tpu.memory_space<smem>>
    %874 = vector.broadcast %873 : f32 to vector<2x256xf32>
    %875 = arith.mulf %874, %375 : vector<2x256xf32>
    %876 = arith.addf %872, %875 : vector<2x256xf32>
    %c99 = arith.constant 99 : index
    %877 = memref.load %arg7[%c99] : memref<216xf32, #tpu.memory_space<smem>>
    %878 = vector.broadcast %877 : f32 to vector<2x256xf32>
    %879 = arith.mulf %878, %395 : vector<2x256xf32>
    %880 = arith.addf %876, %879 : vector<2x256xf32>
    %c100 = arith.constant 100 : index
    %881 = memref.load %arg7[%c100] : memref<216xf32, #tpu.memory_space<smem>>
    %882 = vector.broadcast %881 : f32 to vector<2x256xf32>
    %883 = arith.mulf %882, %398 : vector<2x256xf32>
    %884 = arith.addf %880, %883 : vector<2x256xf32>
    %c101 = arith.constant 101 : index
    %885 = memref.load %arg7[%c101] : memref<216xf32, #tpu.memory_space<smem>>
    %886 = vector.broadcast %885 : f32 to vector<2x256xf32>
    %887 = arith.mulf %886, %403 : vector<2x256xf32>
    %888 = arith.addf %884, %887 : vector<2x256xf32>
    %c102 = arith.constant 102 : index
    %889 = memref.load %arg7[%c102] : memref<216xf32, #tpu.memory_space<smem>>
    %890 = vector.broadcast %889 : f32 to vector<2x256xf32>
    %891 = arith.mulf %890, %408 : vector<2x256xf32>
    %892 = arith.addf %888, %891 : vector<2x256xf32>
    %c103 = arith.constant 103 : index
    %893 = memref.load %arg7[%c103] : memref<216xf32, #tpu.memory_space<smem>>
    %894 = vector.broadcast %893 : f32 to vector<2x256xf32>
    %895 = arith.mulf %894, %390 : vector<2x256xf32>
    %896 = arith.addf %892, %895 : vector<2x256xf32>
    %c104 = arith.constant 104 : index
    %897 = memref.load %arg7[%c104] : memref<216xf32, #tpu.memory_space<smem>>
    %898 = vector.broadcast %897 : f32 to vector<2x256xf32>
    %899 = arith.mulf %898, %413 : vector<2x256xf32>
    %900 = arith.addf %896, %899 : vector<2x256xf32>
    %c105 = arith.constant 105 : index
    %901 = memref.load %arg7[%c105] : memref<216xf32, #tpu.memory_space<smem>>
    %902 = vector.broadcast %901 : f32 to vector<2x256xf32>
    %903 = arith.mulf %902, %418 : vector<2x256xf32>
    %904 = arith.addf %900, %903 : vector<2x256xf32>
    %c106 = arith.constant 106 : index
    %905 = memref.load %arg7[%c106] : memref<216xf32, #tpu.memory_space<smem>>
    %906 = vector.broadcast %905 : f32 to vector<2x256xf32>
    %907 = arith.mulf %906, %421 : vector<2x256xf32>
    %908 = arith.addf %904, %907 : vector<2x256xf32>
    %c107 = arith.constant 107 : index
    %909 = memref.load %arg7[%c107] : memref<216xf32, #tpu.memory_space<smem>>
    %910 = vector.broadcast %909 : f32 to vector<2x256xf32>
    %911 = arith.mulf %910, %426 : vector<2x256xf32>
    %912 = arith.addf %908, %911 : vector<2x256xf32>
    %cst_150 = arith.constant 0.000000e+00 : f32
    %913 = vector.broadcast %cst_150 : f32 to vector<2x256xf32>
    %914 = arith.maximumf %912, %913 : vector<2x256xf32>
    %cst_151 = arith.constant dense<0.000000e+00> : vector<2xf32>
    %915 = vector.multi_reduction <add>, %914, %cst_151 [1] : vector<2x256xf32> to vector<2xf32>
    %916 = vector.shape_cast %915 : vector<2xf32> to vector<2x1xf32>
    %cst_152 = arith.constant 3.906250e-03 : f32
    %917 = vector.broadcast %cst_152 : f32 to vector<2x1xf32>
    %918 = arith.mulf %916, %917 : vector<2x1xf32>
    %919 = vector.extract_strided_slice %427 {offsets = [3, 0], sizes = [1, 10], strides = [1, 1]} : vector<8x10xf32> to vector<1x10xf32>
    %920 = vector.broadcast %918 : vector<2x1xf32> to vector<2x10xf32>
    %921 = vector.broadcast %919 : vector<1x10xf32> to vector<2x10xf32>
    %922 = arith.mulf %920, %921 : vector<2x10xf32>
    %923 = arith.addf %800, %922 : vector<2x10xf32>
    %cst_153 = arith.constant 0.000000e+00 : f32
    %924 = vector.broadcast %cst_153 : f32 to vector<2x256xf32>
    %c4_154 = arith.constant 4 : index
    %925 = memref.load %arg8[%c4_154] : memref<8xf32, #tpu.memory_space<smem>>
    %926 = vector.broadcast %925 : f32 to vector<2x256xf32>
    %927 = arith.addf %924, %926 : vector<2x256xf32>
    %c108 = arith.constant 108 : index
    %928 = memref.load %arg7[%c108] : memref<216xf32, #tpu.memory_space<smem>>
    %929 = vector.broadcast %928 : f32 to vector<2x256xf32>
    %930 = arith.mulf %929, %293 : vector<2x256xf32>
    %931 = arith.addf %927, %930 : vector<2x256xf32>
    %c109 = arith.constant 109 : index
    %932 = memref.load %arg7[%c109] : memref<216xf32, #tpu.memory_space<smem>>
    %933 = vector.broadcast %932 : f32 to vector<2x256xf32>
    %934 = arith.mulf %933, %296 : vector<2x256xf32>
    %935 = arith.addf %931, %934 : vector<2x256xf32>
    %c110 = arith.constant 110 : index
    %936 = memref.load %arg7[%c110] : memref<216xf32, #tpu.memory_space<smem>>
    %937 = vector.broadcast %936 : f32 to vector<2x256xf32>
    %938 = arith.mulf %937, %301 : vector<2x256xf32>
    %939 = arith.addf %935, %938 : vector<2x256xf32>
    %c111 = arith.constant 111 : index
    %940 = memref.load %arg7[%c111] : memref<216xf32, #tpu.memory_space<smem>>
    %941 = vector.broadcast %940 : f32 to vector<2x256xf32>
    %942 = arith.mulf %941, %306 : vector<2x256xf32>
    %943 = arith.addf %939, %942 : vector<2x256xf32>
    %c112 = arith.constant 112 : index
    %944 = memref.load %arg7[%c112] : memref<216xf32, #tpu.memory_space<smem>>
    %945 = vector.broadcast %944 : f32 to vector<2x256xf32>
    %946 = arith.mulf %945, %288 : vector<2x256xf32>
    %947 = arith.addf %943, %946 : vector<2x256xf32>
    %c113 = arith.constant 113 : index
    %948 = memref.load %arg7[%c113] : memref<216xf32, #tpu.memory_space<smem>>
    %949 = vector.broadcast %948 : f32 to vector<2x256xf32>
    %950 = arith.mulf %949, %311 : vector<2x256xf32>
    %951 = arith.addf %947, %950 : vector<2x256xf32>
    %c114 = arith.constant 114 : index
    %952 = memref.load %arg7[%c114] : memref<216xf32, #tpu.memory_space<smem>>
    %953 = vector.broadcast %952 : f32 to vector<2x256xf32>
    %954 = arith.mulf %953, %316 : vector<2x256xf32>
    %955 = arith.addf %951, %954 : vector<2x256xf32>
    %c115 = arith.constant 115 : index
    %956 = memref.load %arg7[%c115] : memref<216xf32, #tpu.memory_space<smem>>
    %957 = vector.broadcast %956 : f32 to vector<2x256xf32>
    %958 = arith.mulf %957, %319 : vector<2x256xf32>
    %959 = arith.addf %955, %958 : vector<2x256xf32>
    %c116 = arith.constant 116 : index
    %960 = memref.load %arg7[%c116] : memref<216xf32, #tpu.memory_space<smem>>
    %961 = vector.broadcast %960 : f32 to vector<2x256xf32>
    %962 = arith.mulf %961, %324 : vector<2x256xf32>
    %963 = arith.addf %959, %962 : vector<2x256xf32>
    %c117 = arith.constant 117 : index
    %964 = memref.load %arg7[%c117] : memref<216xf32, #tpu.memory_space<smem>>
    %965 = vector.broadcast %964 : f32 to vector<2x256xf32>
    %966 = arith.mulf %965, %344 : vector<2x256xf32>
    %967 = arith.addf %963, %966 : vector<2x256xf32>
    %c118 = arith.constant 118 : index
    %968 = memref.load %arg7[%c118] : memref<216xf32, #tpu.memory_space<smem>>
    %969 = vector.broadcast %968 : f32 to vector<2x256xf32>
    %970 = arith.mulf %969, %347 : vector<2x256xf32>
    %971 = arith.addf %967, %970 : vector<2x256xf32>
    %c119 = arith.constant 119 : index
    %972 = memref.load %arg7[%c119] : memref<216xf32, #tpu.memory_space<smem>>
    %973 = vector.broadcast %972 : f32 to vector<2x256xf32>
    %974 = arith.mulf %973, %352 : vector<2x256xf32>
    %975 = arith.addf %971, %974 : vector<2x256xf32>
    %c120 = arith.constant 120 : index
    %976 = memref.load %arg7[%c120] : memref<216xf32, #tpu.memory_space<smem>>
    %977 = vector.broadcast %976 : f32 to vector<2x256xf32>
    %978 = arith.mulf %977, %357 : vector<2x256xf32>
    %979 = arith.addf %975, %978 : vector<2x256xf32>
    %c121 = arith.constant 121 : index
    %980 = memref.load %arg7[%c121] : memref<216xf32, #tpu.memory_space<smem>>
    %981 = vector.broadcast %980 : f32 to vector<2x256xf32>
    %982 = arith.mulf %981, %339 : vector<2x256xf32>
    %983 = arith.addf %979, %982 : vector<2x256xf32>
    %c122 = arith.constant 122 : index
    %984 = memref.load %arg7[%c122] : memref<216xf32, #tpu.memory_space<smem>>
    %985 = vector.broadcast %984 : f32 to vector<2x256xf32>
    %986 = arith.mulf %985, %362 : vector<2x256xf32>
    %987 = arith.addf %983, %986 : vector<2x256xf32>
    %c123 = arith.constant 123 : index
    %988 = memref.load %arg7[%c123] : memref<216xf32, #tpu.memory_space<smem>>
    %989 = vector.broadcast %988 : f32 to vector<2x256xf32>
    %990 = arith.mulf %989, %367 : vector<2x256xf32>
    %991 = arith.addf %987, %990 : vector<2x256xf32>
    %c124 = arith.constant 124 : index
    %992 = memref.load %arg7[%c124] : memref<216xf32, #tpu.memory_space<smem>>
    %993 = vector.broadcast %992 : f32 to vector<2x256xf32>
    %994 = arith.mulf %993, %370 : vector<2x256xf32>
    %995 = arith.addf %991, %994 : vector<2x256xf32>
    %c125 = arith.constant 125 : index
    %996 = memref.load %arg7[%c125] : memref<216xf32, #tpu.memory_space<smem>>
    %997 = vector.broadcast %996 : f32 to vector<2x256xf32>
    %998 = arith.mulf %997, %375 : vector<2x256xf32>
    %999 = arith.addf %995, %998 : vector<2x256xf32>
    %c126 = arith.constant 126 : index
    %1000 = memref.load %arg7[%c126] : memref<216xf32, #tpu.memory_space<smem>>
    %1001 = vector.broadcast %1000 : f32 to vector<2x256xf32>
    %1002 = arith.mulf %1001, %395 : vector<2x256xf32>
    %1003 = arith.addf %999, %1002 : vector<2x256xf32>
    %c127 = arith.constant 127 : index
    %1004 = memref.load %arg7[%c127] : memref<216xf32, #tpu.memory_space<smem>>
    %1005 = vector.broadcast %1004 : f32 to vector<2x256xf32>
    %1006 = arith.mulf %1005, %398 : vector<2x256xf32>
    %1007 = arith.addf %1003, %1006 : vector<2x256xf32>
    %c128 = arith.constant 128 : index
    %1008 = memref.load %arg7[%c128] : memref<216xf32, #tpu.memory_space<smem>>
    %1009 = vector.broadcast %1008 : f32 to vector<2x256xf32>
    %1010 = arith.mulf %1009, %403 : vector<2x256xf32>
    %1011 = arith.addf %1007, %1010 : vector<2x256xf32>
    %c129 = arith.constant 129 : index
    %1012 = memref.load %arg7[%c129] : memref<216xf32, #tpu.memory_space<smem>>
    %1013 = vector.broadcast %1012 : f32 to vector<2x256xf32>
    %1014 = arith.mulf %1013, %408 : vector<2x256xf32>
    %1015 = arith.addf %1011, %1014 : vector<2x256xf32>
    %c130 = arith.constant 130 : index
    %1016 = memref.load %arg7[%c130] : memref<216xf32, #tpu.memory_space<smem>>
    %1017 = vector.broadcast %1016 : f32 to vector<2x256xf32>
    %1018 = arith.mulf %1017, %390 : vector<2x256xf32>
    %1019 = arith.addf %1015, %1018 : vector<2x256xf32>
    %c131 = arith.constant 131 : index
    %1020 = memref.load %arg7[%c131] : memref<216xf32, #tpu.memory_space<smem>>
    %1021 = vector.broadcast %1020 : f32 to vector<2x256xf32>
    %1022 = arith.mulf %1021, %413 : vector<2x256xf32>
    %1023 = arith.addf %1019, %1022 : vector<2x256xf32>
    %c132 = arith.constant 132 : index
    %1024 = memref.load %arg7[%c132] : memref<216xf32, #tpu.memory_space<smem>>
    %1025 = vector.broadcast %1024 : f32 to vector<2x256xf32>
    %1026 = arith.mulf %1025, %418 : vector<2x256xf32>
    %1027 = arith.addf %1023, %1026 : vector<2x256xf32>
    %c133 = arith.constant 133 : index
    %1028 = memref.load %arg7[%c133] : memref<216xf32, #tpu.memory_space<smem>>
    %1029 = vector.broadcast %1028 : f32 to vector<2x256xf32>
    %1030 = arith.mulf %1029, %421 : vector<2x256xf32>
    %1031 = arith.addf %1027, %1030 : vector<2x256xf32>
    %c134 = arith.constant 134 : index
    %1032 = memref.load %arg7[%c134] : memref<216xf32, #tpu.memory_space<smem>>
    %1033 = vector.broadcast %1032 : f32 to vector<2x256xf32>
    %1034 = arith.mulf %1033, %426 : vector<2x256xf32>
    %1035 = arith.addf %1031, %1034 : vector<2x256xf32>
    %cst_155 = arith.constant 0.000000e+00 : f32
    %1036 = vector.broadcast %cst_155 : f32 to vector<2x256xf32>
    %1037 = arith.maximumf %1035, %1036 : vector<2x256xf32>
    %cst_156 = arith.constant dense<0.000000e+00> : vector<2xf32>
    %1038 = vector.multi_reduction <add>, %1037, %cst_156 [1] : vector<2x256xf32> to vector<2xf32>
    %1039 = vector.shape_cast %1038 : vector<2xf32> to vector<2x1xf32>
    %cst_157 = arith.constant 3.906250e-03 : f32
    %1040 = vector.broadcast %cst_157 : f32 to vector<2x1xf32>
    %1041 = arith.mulf %1039, %1040 : vector<2x1xf32>
    %1042 = vector.extract_strided_slice %427 {offsets = [4, 0], sizes = [1, 10], strides = [1, 1]} : vector<8x10xf32> to vector<1x10xf32>
    %1043 = vector.broadcast %1041 : vector<2x1xf32> to vector<2x10xf32>
    %1044 = vector.broadcast %1042 : vector<1x10xf32> to vector<2x10xf32>
    %1045 = arith.mulf %1043, %1044 : vector<2x10xf32>
    %1046 = arith.addf %923, %1045 : vector<2x10xf32>
    %cst_158 = arith.constant 0.000000e+00 : f32
    %1047 = vector.broadcast %cst_158 : f32 to vector<2x256xf32>
    %c5_159 = arith.constant 5 : index
    %1048 = memref.load %arg8[%c5_159] : memref<8xf32, #tpu.memory_space<smem>>
    %1049 = vector.broadcast %1048 : f32 to vector<2x256xf32>
    %1050 = arith.addf %1047, %1049 : vector<2x256xf32>
    %c135 = arith.constant 135 : index
    %1051 = memref.load %arg7[%c135] : memref<216xf32, #tpu.memory_space<smem>>
    %1052 = vector.broadcast %1051 : f32 to vector<2x256xf32>
    %1053 = arith.mulf %1052, %293 : vector<2x256xf32>
    %1054 = arith.addf %1050, %1053 : vector<2x256xf32>
    %c136 = arith.constant 136 : index
    %1055 = memref.load %arg7[%c136] : memref<216xf32, #tpu.memory_space<smem>>
    %1056 = vector.broadcast %1055 : f32 to vector<2x256xf32>
    %1057 = arith.mulf %1056, %296 : vector<2x256xf32>
    %1058 = arith.addf %1054, %1057 : vector<2x256xf32>
    %c137 = arith.constant 137 : index
    %1059 = memref.load %arg7[%c137] : memref<216xf32, #tpu.memory_space<smem>>
    %1060 = vector.broadcast %1059 : f32 to vector<2x256xf32>
    %1061 = arith.mulf %1060, %301 : vector<2x256xf32>
    %1062 = arith.addf %1058, %1061 : vector<2x256xf32>
    %c138 = arith.constant 138 : index
    %1063 = memref.load %arg7[%c138] : memref<216xf32, #tpu.memory_space<smem>>
    %1064 = vector.broadcast %1063 : f32 to vector<2x256xf32>
    %1065 = arith.mulf %1064, %306 : vector<2x256xf32>
    %1066 = arith.addf %1062, %1065 : vector<2x256xf32>
    %c139 = arith.constant 139 : index
    %1067 = memref.load %arg7[%c139] : memref<216xf32, #tpu.memory_space<smem>>
    %1068 = vector.broadcast %1067 : f32 to vector<2x256xf32>
    %1069 = arith.mulf %1068, %288 : vector<2x256xf32>
    %1070 = arith.addf %1066, %1069 : vector<2x256xf32>
    %c140 = arith.constant 140 : index
    %1071 = memref.load %arg7[%c140] : memref<216xf32, #tpu.memory_space<smem>>
    %1072 = vector.broadcast %1071 : f32 to vector<2x256xf32>
    %1073 = arith.mulf %1072, %311 : vector<2x256xf32>
    %1074 = arith.addf %1070, %1073 : vector<2x256xf32>
    %c141 = arith.constant 141 : index
    %1075 = memref.load %arg7[%c141] : memref<216xf32, #tpu.memory_space<smem>>
    %1076 = vector.broadcast %1075 : f32 to vector<2x256xf32>
    %1077 = arith.mulf %1076, %316 : vector<2x256xf32>
    %1078 = arith.addf %1074, %1077 : vector<2x256xf32>
    %c142 = arith.constant 142 : index
    %1079 = memref.load %arg7[%c142] : memref<216xf32, #tpu.memory_space<smem>>
    %1080 = vector.broadcast %1079 : f32 to vector<2x256xf32>
    %1081 = arith.mulf %1080, %319 : vector<2x256xf32>
    %1082 = arith.addf %1078, %1081 : vector<2x256xf32>
    %c143 = arith.constant 143 : index
    %1083 = memref.load %arg7[%c143] : memref<216xf32, #tpu.memory_space<smem>>
    %1084 = vector.broadcast %1083 : f32 to vector<2x256xf32>
    %1085 = arith.mulf %1084, %324 : vector<2x256xf32>
    %1086 = arith.addf %1082, %1085 : vector<2x256xf32>
    %c144 = arith.constant 144 : index
    %1087 = memref.load %arg7[%c144] : memref<216xf32, #tpu.memory_space<smem>>
    %1088 = vector.broadcast %1087 : f32 to vector<2x256xf32>
    %1089 = arith.mulf %1088, %344 : vector<2x256xf32>
    %1090 = arith.addf %1086, %1089 : vector<2x256xf32>
    %c145 = arith.constant 145 : index
    %1091 = memref.load %arg7[%c145] : memref<216xf32, #tpu.memory_space<smem>>
    %1092 = vector.broadcast %1091 : f32 to vector<2x256xf32>
    %1093 = arith.mulf %1092, %347 : vector<2x256xf32>
    %1094 = arith.addf %1090, %1093 : vector<2x256xf32>
    %c146 = arith.constant 146 : index
    %1095 = memref.load %arg7[%c146] : memref<216xf32, #tpu.memory_space<smem>>
    %1096 = vector.broadcast %1095 : f32 to vector<2x256xf32>
    %1097 = arith.mulf %1096, %352 : vector<2x256xf32>
    %1098 = arith.addf %1094, %1097 : vector<2x256xf32>
    %c147 = arith.constant 147 : index
    %1099 = memref.load %arg7[%c147] : memref<216xf32, #tpu.memory_space<smem>>
    %1100 = vector.broadcast %1099 : f32 to vector<2x256xf32>
    %1101 = arith.mulf %1100, %357 : vector<2x256xf32>
    %1102 = arith.addf %1098, %1101 : vector<2x256xf32>
    %c148 = arith.constant 148 : index
    %1103 = memref.load %arg7[%c148] : memref<216xf32, #tpu.memory_space<smem>>
    %1104 = vector.broadcast %1103 : f32 to vector<2x256xf32>
    %1105 = arith.mulf %1104, %339 : vector<2x256xf32>
    %1106 = arith.addf %1102, %1105 : vector<2x256xf32>
    %c149 = arith.constant 149 : index
    %1107 = memref.load %arg7[%c149] : memref<216xf32, #tpu.memory_space<smem>>
    %1108 = vector.broadcast %1107 : f32 to vector<2x256xf32>
    %1109 = arith.mulf %1108, %362 : vector<2x256xf32>
    %1110 = arith.addf %1106, %1109 : vector<2x256xf32>
    %c150 = arith.constant 150 : index
    %1111 = memref.load %arg7[%c150] : memref<216xf32, #tpu.memory_space<smem>>
    %1112 = vector.broadcast %1111 : f32 to vector<2x256xf32>
    %1113 = arith.mulf %1112, %367 : vector<2x256xf32>
    %1114 = arith.addf %1110, %1113 : vector<2x256xf32>
    %c151 = arith.constant 151 : index
    %1115 = memref.load %arg7[%c151] : memref<216xf32, #tpu.memory_space<smem>>
    %1116 = vector.broadcast %1115 : f32 to vector<2x256xf32>
    %1117 = arith.mulf %1116, %370 : vector<2x256xf32>
    %1118 = arith.addf %1114, %1117 : vector<2x256xf32>
    %c152 = arith.constant 152 : index
    %1119 = memref.load %arg7[%c152] : memref<216xf32, #tpu.memory_space<smem>>
    %1120 = vector.broadcast %1119 : f32 to vector<2x256xf32>
    %1121 = arith.mulf %1120, %375 : vector<2x256xf32>
    %1122 = arith.addf %1118, %1121 : vector<2x256xf32>
    %c153 = arith.constant 153 : index
    %1123 = memref.load %arg7[%c153] : memref<216xf32, #tpu.memory_space<smem>>
    %1124 = vector.broadcast %1123 : f32 to vector<2x256xf32>
    %1125 = arith.mulf %1124, %395 : vector<2x256xf32>
    %1126 = arith.addf %1122, %1125 : vector<2x256xf32>
    %c154 = arith.constant 154 : index
    %1127 = memref.load %arg7[%c154] : memref<216xf32, #tpu.memory_space<smem>>
    %1128 = vector.broadcast %1127 : f32 to vector<2x256xf32>
    %1129 = arith.mulf %1128, %398 : vector<2x256xf32>
    %1130 = arith.addf %1126, %1129 : vector<2x256xf32>
    %c155 = arith.constant 155 : index
    %1131 = memref.load %arg7[%c155] : memref<216xf32, #tpu.memory_space<smem>>
    %1132 = vector.broadcast %1131 : f32 to vector<2x256xf32>
    %1133 = arith.mulf %1132, %403 : vector<2x256xf32>
    %1134 = arith.addf %1130, %1133 : vector<2x256xf32>
    %c156 = arith.constant 156 : index
    %1135 = memref.load %arg7[%c156] : memref<216xf32, #tpu.memory_space<smem>>
    %1136 = vector.broadcast %1135 : f32 to vector<2x256xf32>
    %1137 = arith.mulf %1136, %408 : vector<2x256xf32>
    %1138 = arith.addf %1134, %1137 : vector<2x256xf32>
    %c157 = arith.constant 157 : index
    %1139 = memref.load %arg7[%c157] : memref<216xf32, #tpu.memory_space<smem>>
    %1140 = vector.broadcast %1139 : f32 to vector<2x256xf32>
    %1141 = arith.mulf %1140, %390 : vector<2x256xf32>
    %1142 = arith.addf %1138, %1141 : vector<2x256xf32>
    %c158 = arith.constant 158 : index
    %1143 = memref.load %arg7[%c158] : memref<216xf32, #tpu.memory_space<smem>>
    %1144 = vector.broadcast %1143 : f32 to vector<2x256xf32>
    %1145 = arith.mulf %1144, %413 : vector<2x256xf32>
    %1146 = arith.addf %1142, %1145 : vector<2x256xf32>
    %c159 = arith.constant 159 : index
    %1147 = memref.load %arg7[%c159] : memref<216xf32, #tpu.memory_space<smem>>
    %1148 = vector.broadcast %1147 : f32 to vector<2x256xf32>
    %1149 = arith.mulf %1148, %418 : vector<2x256xf32>
    %1150 = arith.addf %1146, %1149 : vector<2x256xf32>
    %c160 = arith.constant 160 : index
    %1151 = memref.load %arg7[%c160] : memref<216xf32, #tpu.memory_space<smem>>
    %1152 = vector.broadcast %1151 : f32 to vector<2x256xf32>
    %1153 = arith.mulf %1152, %421 : vector<2x256xf32>
    %1154 = arith.addf %1150, %1153 : vector<2x256xf32>
    %c161 = arith.constant 161 : index
    %1155 = memref.load %arg7[%c161] : memref<216xf32, #tpu.memory_space<smem>>
    %1156 = vector.broadcast %1155 : f32 to vector<2x256xf32>
    %1157 = arith.mulf %1156, %426 : vector<2x256xf32>
    %1158 = arith.addf %1154, %1157 : vector<2x256xf32>
    %cst_160 = arith.constant 0.000000e+00 : f32
    %1159 = vector.broadcast %cst_160 : f32 to vector<2x256xf32>
    %1160 = arith.maximumf %1158, %1159 : vector<2x256xf32>
    %cst_161 = arith.constant dense<0.000000e+00> : vector<2xf32>
    %1161 = vector.multi_reduction <add>, %1160, %cst_161 [1] : vector<2x256xf32> to vector<2xf32>
    %1162 = vector.shape_cast %1161 : vector<2xf32> to vector<2x1xf32>
    %cst_162 = arith.constant 3.906250e-03 : f32
    %1163 = vector.broadcast %cst_162 : f32 to vector<2x1xf32>
    %1164 = arith.mulf %1162, %1163 : vector<2x1xf32>
    %1165 = vector.extract_strided_slice %427 {offsets = [5, 0], sizes = [1, 10], strides = [1, 1]} : vector<8x10xf32> to vector<1x10xf32>
    %1166 = vector.broadcast %1164 : vector<2x1xf32> to vector<2x10xf32>
    %1167 = vector.broadcast %1165 : vector<1x10xf32> to vector<2x10xf32>
    %1168 = arith.mulf %1166, %1167 : vector<2x10xf32>
    %1169 = arith.addf %1046, %1168 : vector<2x10xf32>
    %cst_163 = arith.constant 0.000000e+00 : f32
    %1170 = vector.broadcast %cst_163 : f32 to vector<2x256xf32>
    %c6_164 = arith.constant 6 : index
    %1171 = memref.load %arg8[%c6_164] : memref<8xf32, #tpu.memory_space<smem>>
    %1172 = vector.broadcast %1171 : f32 to vector<2x256xf32>
    %1173 = arith.addf %1170, %1172 : vector<2x256xf32>
    %c162 = arith.constant 162 : index
    %1174 = memref.load %arg7[%c162] : memref<216xf32, #tpu.memory_space<smem>>
    %1175 = vector.broadcast %1174 : f32 to vector<2x256xf32>
    %1176 = arith.mulf %1175, %293 : vector<2x256xf32>
    %1177 = arith.addf %1173, %1176 : vector<2x256xf32>
    %c163 = arith.constant 163 : index
    %1178 = memref.load %arg7[%c163] : memref<216xf32, #tpu.memory_space<smem>>
    %1179 = vector.broadcast %1178 : f32 to vector<2x256xf32>
    %1180 = arith.mulf %1179, %296 : vector<2x256xf32>
    %1181 = arith.addf %1177, %1180 : vector<2x256xf32>
    %c164 = arith.constant 164 : index
    %1182 = memref.load %arg7[%c164] : memref<216xf32, #tpu.memory_space<smem>>
    %1183 = vector.broadcast %1182 : f32 to vector<2x256xf32>
    %1184 = arith.mulf %1183, %301 : vector<2x256xf32>
    %1185 = arith.addf %1181, %1184 : vector<2x256xf32>
    %c165 = arith.constant 165 : index
    %1186 = memref.load %arg7[%c165] : memref<216xf32, #tpu.memory_space<smem>>
    %1187 = vector.broadcast %1186 : f32 to vector<2x256xf32>
    %1188 = arith.mulf %1187, %306 : vector<2x256xf32>
    %1189 = arith.addf %1185, %1188 : vector<2x256xf32>
    %c166 = arith.constant 166 : index
    %1190 = memref.load %arg7[%c166] : memref<216xf32, #tpu.memory_space<smem>>
    %1191 = vector.broadcast %1190 : f32 to vector<2x256xf32>
    %1192 = arith.mulf %1191, %288 : vector<2x256xf32>
    %1193 = arith.addf %1189, %1192 : vector<2x256xf32>
    %c167 = arith.constant 167 : index
    %1194 = memref.load %arg7[%c167] : memref<216xf32, #tpu.memory_space<smem>>
    %1195 = vector.broadcast %1194 : f32 to vector<2x256xf32>
    %1196 = arith.mulf %1195, %311 : vector<2x256xf32>
    %1197 = arith.addf %1193, %1196 : vector<2x256xf32>
    %c168 = arith.constant 168 : index
    %1198 = memref.load %arg7[%c168] : memref<216xf32, #tpu.memory_space<smem>>
    %1199 = vector.broadcast %1198 : f32 to vector<2x256xf32>
    %1200 = arith.mulf %1199, %316 : vector<2x256xf32>
    %1201 = arith.addf %1197, %1200 : vector<2x256xf32>
    %c169 = arith.constant 169 : index
    %1202 = memref.load %arg7[%c169] : memref<216xf32, #tpu.memory_space<smem>>
    %1203 = vector.broadcast %1202 : f32 to vector<2x256xf32>
    %1204 = arith.mulf %1203, %319 : vector<2x256xf32>
    %1205 = arith.addf %1201, %1204 : vector<2x256xf32>
    %c170 = arith.constant 170 : index
    %1206 = memref.load %arg7[%c170] : memref<216xf32, #tpu.memory_space<smem>>
    %1207 = vector.broadcast %1206 : f32 to vector<2x256xf32>
    %1208 = arith.mulf %1207, %324 : vector<2x256xf32>
    %1209 = arith.addf %1205, %1208 : vector<2x256xf32>
    %c171 = arith.constant 171 : index
    %1210 = memref.load %arg7[%c171] : memref<216xf32, #tpu.memory_space<smem>>
    %1211 = vector.broadcast %1210 : f32 to vector<2x256xf32>
    %1212 = arith.mulf %1211, %344 : vector<2x256xf32>
    %1213 = arith.addf %1209, %1212 : vector<2x256xf32>
    %c172 = arith.constant 172 : index
    %1214 = memref.load %arg7[%c172] : memref<216xf32, #tpu.memory_space<smem>>
    %1215 = vector.broadcast %1214 : f32 to vector<2x256xf32>
    %1216 = arith.mulf %1215, %347 : vector<2x256xf32>
    %1217 = arith.addf %1213, %1216 : vector<2x256xf32>
    %c173 = arith.constant 173 : index
    %1218 = memref.load %arg7[%c173] : memref<216xf32, #tpu.memory_space<smem>>
    %1219 = vector.broadcast %1218 : f32 to vector<2x256xf32>
    %1220 = arith.mulf %1219, %352 : vector<2x256xf32>
    %1221 = arith.addf %1217, %1220 : vector<2x256xf32>
    %c174 = arith.constant 174 : index
    %1222 = memref.load %arg7[%c174] : memref<216xf32, #tpu.memory_space<smem>>
    %1223 = vector.broadcast %1222 : f32 to vector<2x256xf32>
    %1224 = arith.mulf %1223, %357 : vector<2x256xf32>
    %1225 = arith.addf %1221, %1224 : vector<2x256xf32>
    %c175 = arith.constant 175 : index
    %1226 = memref.load %arg7[%c175] : memref<216xf32, #tpu.memory_space<smem>>
    %1227 = vector.broadcast %1226 : f32 to vector<2x256xf32>
    %1228 = arith.mulf %1227, %339 : vector<2x256xf32>
    %1229 = arith.addf %1225, %1228 : vector<2x256xf32>
    %c176 = arith.constant 176 : index
    %1230 = memref.load %arg7[%c176] : memref<216xf32, #tpu.memory_space<smem>>
    %1231 = vector.broadcast %1230 : f32 to vector<2x256xf32>
    %1232 = arith.mulf %1231, %362 : vector<2x256xf32>
    %1233 = arith.addf %1229, %1232 : vector<2x256xf32>
    %c177 = arith.constant 177 : index
    %1234 = memref.load %arg7[%c177] : memref<216xf32, #tpu.memory_space<smem>>
    %1235 = vector.broadcast %1234 : f32 to vector<2x256xf32>
    %1236 = arith.mulf %1235, %367 : vector<2x256xf32>
    %1237 = arith.addf %1233, %1236 : vector<2x256xf32>
    %c178 = arith.constant 178 : index
    %1238 = memref.load %arg7[%c178] : memref<216xf32, #tpu.memory_space<smem>>
    %1239 = vector.broadcast %1238 : f32 to vector<2x256xf32>
    %1240 = arith.mulf %1239, %370 : vector<2x256xf32>
    %1241 = arith.addf %1237, %1240 : vector<2x256xf32>
    %c179 = arith.constant 179 : index
    %1242 = memref.load %arg7[%c179] : memref<216xf32, #tpu.memory_space<smem>>
    %1243 = vector.broadcast %1242 : f32 to vector<2x256xf32>
    %1244 = arith.mulf %1243, %375 : vector<2x256xf32>
    %1245 = arith.addf %1241, %1244 : vector<2x256xf32>
    %c180 = arith.constant 180 : index
    %1246 = memref.load %arg7[%c180] : memref<216xf32, #tpu.memory_space<smem>>
    %1247 = vector.broadcast %1246 : f32 to vector<2x256xf32>
    %1248 = arith.mulf %1247, %395 : vector<2x256xf32>
    %1249 = arith.addf %1245, %1248 : vector<2x256xf32>
    %c181 = arith.constant 181 : index
    %1250 = memref.load %arg7[%c181] : memref<216xf32, #tpu.memory_space<smem>>
    %1251 = vector.broadcast %1250 : f32 to vector<2x256xf32>
    %1252 = arith.mulf %1251, %398 : vector<2x256xf32>
    %1253 = arith.addf %1249, %1252 : vector<2x256xf32>
    %c182 = arith.constant 182 : index
    %1254 = memref.load %arg7[%c182] : memref<216xf32, #tpu.memory_space<smem>>
    %1255 = vector.broadcast %1254 : f32 to vector<2x256xf32>
    %1256 = arith.mulf %1255, %403 : vector<2x256xf32>
    %1257 = arith.addf %1253, %1256 : vector<2x256xf32>
    %c183 = arith.constant 183 : index
    %1258 = memref.load %arg7[%c183] : memref<216xf32, #tpu.memory_space<smem>>
    %1259 = vector.broadcast %1258 : f32 to vector<2x256xf32>
    %1260 = arith.mulf %1259, %408 : vector<2x256xf32>
    %1261 = arith.addf %1257, %1260 : vector<2x256xf32>
    %c184 = arith.constant 184 : index
    %1262 = memref.load %arg7[%c184] : memref<216xf32, #tpu.memory_space<smem>>
    %1263 = vector.broadcast %1262 : f32 to vector<2x256xf32>
    %1264 = arith.mulf %1263, %390 : vector<2x256xf32>
    %1265 = arith.addf %1261, %1264 : vector<2x256xf32>
    %c185 = arith.constant 185 : index
    %1266 = memref.load %arg7[%c185] : memref<216xf32, #tpu.memory_space<smem>>
    %1267 = vector.broadcast %1266 : f32 to vector<2x256xf32>
    %1268 = arith.mulf %1267, %413 : vector<2x256xf32>
    %1269 = arith.addf %1265, %1268 : vector<2x256xf32>
    %c186 = arith.constant 186 : index
    %1270 = memref.load %arg7[%c186] : memref<216xf32, #tpu.memory_space<smem>>
    %1271 = vector.broadcast %1270 : f32 to vector<2x256xf32>
    %1272 = arith.mulf %1271, %418 : vector<2x256xf32>
    %1273 = arith.addf %1269, %1272 : vector<2x256xf32>
    %c187 = arith.constant 187 : index
    %1274 = memref.load %arg7[%c187] : memref<216xf32, #tpu.memory_space<smem>>
    %1275 = vector.broadcast %1274 : f32 to vector<2x256xf32>
    %1276 = arith.mulf %1275, %421 : vector<2x256xf32>
    %1277 = arith.addf %1273, %1276 : vector<2x256xf32>
    %c188 = arith.constant 188 : index
    %1278 = memref.load %arg7[%c188] : memref<216xf32, #tpu.memory_space<smem>>
    %1279 = vector.broadcast %1278 : f32 to vector<2x256xf32>
    %1280 = arith.mulf %1279, %426 : vector<2x256xf32>
    %1281 = arith.addf %1277, %1280 : vector<2x256xf32>
    %cst_165 = arith.constant 0.000000e+00 : f32
    %1282 = vector.broadcast %cst_165 : f32 to vector<2x256xf32>
    %1283 = arith.maximumf %1281, %1282 : vector<2x256xf32>
    %cst_166 = arith.constant dense<0.000000e+00> : vector<2xf32>
    %1284 = vector.multi_reduction <add>, %1283, %cst_166 [1] : vector<2x256xf32> to vector<2xf32>
    %1285 = vector.shape_cast %1284 : vector<2xf32> to vector<2x1xf32>
    %cst_167 = arith.constant 3.906250e-03 : f32
    %1286 = vector.broadcast %cst_167 : f32 to vector<2x1xf32>
    %1287 = arith.mulf %1285, %1286 : vector<2x1xf32>
    %1288 = vector.extract_strided_slice %427 {offsets = [6, 0], sizes = [1, 10], strides = [1, 1]} : vector<8x10xf32> to vector<1x10xf32>
    %1289 = vector.broadcast %1287 : vector<2x1xf32> to vector<2x10xf32>
    %1290 = vector.broadcast %1288 : vector<1x10xf32> to vector<2x10xf32>
    %1291 = arith.mulf %1289, %1290 : vector<2x10xf32>
    %1292 = arith.addf %1169, %1291 : vector<2x10xf32>
    %cst_168 = arith.constant 0.000000e+00 : f32
    %1293 = vector.broadcast %cst_168 : f32 to vector<2x256xf32>
    %c7_169 = arith.constant 7 : index
    %1294 = memref.load %arg8[%c7_169] : memref<8xf32, #tpu.memory_space<smem>>
    %1295 = vector.broadcast %1294 : f32 to vector<2x256xf32>
    %1296 = arith.addf %1293, %1295 : vector<2x256xf32>
    %c189 = arith.constant 189 : index
    %1297 = memref.load %arg7[%c189] : memref<216xf32, #tpu.memory_space<smem>>
    %1298 = vector.broadcast %1297 : f32 to vector<2x256xf32>
    %1299 = arith.mulf %1298, %293 : vector<2x256xf32>
    %1300 = arith.addf %1296, %1299 : vector<2x256xf32>
    %c190 = arith.constant 190 : index
    %1301 = memref.load %arg7[%c190] : memref<216xf32, #tpu.memory_space<smem>>
    %1302 = vector.broadcast %1301 : f32 to vector<2x256xf32>
    %1303 = arith.mulf %1302, %296 : vector<2x256xf32>
    %1304 = arith.addf %1300, %1303 : vector<2x256xf32>
    %c191 = arith.constant 191 : index
    %1305 = memref.load %arg7[%c191] : memref<216xf32, #tpu.memory_space<smem>>
    %1306 = vector.broadcast %1305 : f32 to vector<2x256xf32>
    %1307 = arith.mulf %1306, %301 : vector<2x256xf32>
    %1308 = arith.addf %1304, %1307 : vector<2x256xf32>
    %c192 = arith.constant 192 : index
    %1309 = memref.load %arg7[%c192] : memref<216xf32, #tpu.memory_space<smem>>
    %1310 = vector.broadcast %1309 : f32 to vector<2x256xf32>
    %1311 = arith.mulf %1310, %306 : vector<2x256xf32>
    %1312 = arith.addf %1308, %1311 : vector<2x256xf32>
    %c193 = arith.constant 193 : index
    %1313 = memref.load %arg7[%c193] : memref<216xf32, #tpu.memory_space<smem>>
    %1314 = vector.broadcast %1313 : f32 to vector<2x256xf32>
    %1315 = arith.mulf %1314, %288 : vector<2x256xf32>
    %1316 = arith.addf %1312, %1315 : vector<2x256xf32>
    %c194 = arith.constant 194 : index
    %1317 = memref.load %arg7[%c194] : memref<216xf32, #tpu.memory_space<smem>>
    %1318 = vector.broadcast %1317 : f32 to vector<2x256xf32>
    %1319 = arith.mulf %1318, %311 : vector<2x256xf32>
    %1320 = arith.addf %1316, %1319 : vector<2x256xf32>
    %c195 = arith.constant 195 : index
    %1321 = memref.load %arg7[%c195] : memref<216xf32, #tpu.memory_space<smem>>
    %1322 = vector.broadcast %1321 : f32 to vector<2x256xf32>
    %1323 = arith.mulf %1322, %316 : vector<2x256xf32>
    %1324 = arith.addf %1320, %1323 : vector<2x256xf32>
    %c196 = arith.constant 196 : index
    %1325 = memref.load %arg7[%c196] : memref<216xf32, #tpu.memory_space<smem>>
    %1326 = vector.broadcast %1325 : f32 to vector<2x256xf32>
    %1327 = arith.mulf %1326, %319 : vector<2x256xf32>
    %1328 = arith.addf %1324, %1327 : vector<2x256xf32>
    %c197 = arith.constant 197 : index
    %1329 = memref.load %arg7[%c197] : memref<216xf32, #tpu.memory_space<smem>>
    %1330 = vector.broadcast %1329 : f32 to vector<2x256xf32>
    %1331 = arith.mulf %1330, %324 : vector<2x256xf32>
    %1332 = arith.addf %1328, %1331 : vector<2x256xf32>
    %c198 = arith.constant 198 : index
    %1333 = memref.load %arg7[%c198] : memref<216xf32, #tpu.memory_space<smem>>
    %1334 = vector.broadcast %1333 : f32 to vector<2x256xf32>
    %1335 = arith.mulf %1334, %344 : vector<2x256xf32>
    %1336 = arith.addf %1332, %1335 : vector<2x256xf32>
    %c199 = arith.constant 199 : index
    %1337 = memref.load %arg7[%c199] : memref<216xf32, #tpu.memory_space<smem>>
    %1338 = vector.broadcast %1337 : f32 to vector<2x256xf32>
    %1339 = arith.mulf %1338, %347 : vector<2x256xf32>
    %1340 = arith.addf %1336, %1339 : vector<2x256xf32>
    %c200 = arith.constant 200 : index
    %1341 = memref.load %arg7[%c200] : memref<216xf32, #tpu.memory_space<smem>>
    %1342 = vector.broadcast %1341 : f32 to vector<2x256xf32>
    %1343 = arith.mulf %1342, %352 : vector<2x256xf32>
    %1344 = arith.addf %1340, %1343 : vector<2x256xf32>
    %c201 = arith.constant 201 : index
    %1345 = memref.load %arg7[%c201] : memref<216xf32, #tpu.memory_space<smem>>
    %1346 = vector.broadcast %1345 : f32 to vector<2x256xf32>
    %1347 = arith.mulf %1346, %357 : vector<2x256xf32>
    %1348 = arith.addf %1344, %1347 : vector<2x256xf32>
    %c202 = arith.constant 202 : index
    %1349 = memref.load %arg7[%c202] : memref<216xf32, #tpu.memory_space<smem>>
    %1350 = vector.broadcast %1349 : f32 to vector<2x256xf32>
    %1351 = arith.mulf %1350, %339 : vector<2x256xf32>
    %1352 = arith.addf %1348, %1351 : vector<2x256xf32>
    %c203 = arith.constant 203 : index
    %1353 = memref.load %arg7[%c203] : memref<216xf32, #tpu.memory_space<smem>>
    %1354 = vector.broadcast %1353 : f32 to vector<2x256xf32>
    %1355 = arith.mulf %1354, %362 : vector<2x256xf32>
    %1356 = arith.addf %1352, %1355 : vector<2x256xf32>
    %c204 = arith.constant 204 : index
    %1357 = memref.load %arg7[%c204] : memref<216xf32, #tpu.memory_space<smem>>
    %1358 = vector.broadcast %1357 : f32 to vector<2x256xf32>
    %1359 = arith.mulf %1358, %367 : vector<2x256xf32>
    %1360 = arith.addf %1356, %1359 : vector<2x256xf32>
    %c205 = arith.constant 205 : index
    %1361 = memref.load %arg7[%c205] : memref<216xf32, #tpu.memory_space<smem>>
    %1362 = vector.broadcast %1361 : f32 to vector<2x256xf32>
    %1363 = arith.mulf %1362, %370 : vector<2x256xf32>
    %1364 = arith.addf %1360, %1363 : vector<2x256xf32>
    %c206 = arith.constant 206 : index
    %1365 = memref.load %arg7[%c206] : memref<216xf32, #tpu.memory_space<smem>>
    %1366 = vector.broadcast %1365 : f32 to vector<2x256xf32>
    %1367 = arith.mulf %1366, %375 : vector<2x256xf32>
    %1368 = arith.addf %1364, %1367 : vector<2x256xf32>
    %c207 = arith.constant 207 : index
    %1369 = memref.load %arg7[%c207] : memref<216xf32, #tpu.memory_space<smem>>
    %1370 = vector.broadcast %1369 : f32 to vector<2x256xf32>
    %1371 = arith.mulf %1370, %395 : vector<2x256xf32>
    %1372 = arith.addf %1368, %1371 : vector<2x256xf32>
    %c208 = arith.constant 208 : index
    %1373 = memref.load %arg7[%c208] : memref<216xf32, #tpu.memory_space<smem>>
    %1374 = vector.broadcast %1373 : f32 to vector<2x256xf32>
    %1375 = arith.mulf %1374, %398 : vector<2x256xf32>
    %1376 = arith.addf %1372, %1375 : vector<2x256xf32>
    %c209 = arith.constant 209 : index
    %1377 = memref.load %arg7[%c209] : memref<216xf32, #tpu.memory_space<smem>>
    %1378 = vector.broadcast %1377 : f32 to vector<2x256xf32>
    %1379 = arith.mulf %1378, %403 : vector<2x256xf32>
    %1380 = arith.addf %1376, %1379 : vector<2x256xf32>
    %c210 = arith.constant 210 : index
    %1381 = memref.load %arg7[%c210] : memref<216xf32, #tpu.memory_space<smem>>
    %1382 = vector.broadcast %1381 : f32 to vector<2x256xf32>
    %1383 = arith.mulf %1382, %408 : vector<2x256xf32>
    %1384 = arith.addf %1380, %1383 : vector<2x256xf32>
    %c211 = arith.constant 211 : index
    %1385 = memref.load %arg7[%c211] : memref<216xf32, #tpu.memory_space<smem>>
    %1386 = vector.broadcast %1385 : f32 to vector<2x256xf32>
    %1387 = arith.mulf %1386, %390 : vector<2x256xf32>
    %1388 = arith.addf %1384, %1387 : vector<2x256xf32>
    %c212 = arith.constant 212 : index
    %1389 = memref.load %arg7[%c212] : memref<216xf32, #tpu.memory_space<smem>>
    %1390 = vector.broadcast %1389 : f32 to vector<2x256xf32>
    %1391 = arith.mulf %1390, %413 : vector<2x256xf32>
    %1392 = arith.addf %1388, %1391 : vector<2x256xf32>
    %c213 = arith.constant 213 : index
    %1393 = memref.load %arg7[%c213] : memref<216xf32, #tpu.memory_space<smem>>
    %1394 = vector.broadcast %1393 : f32 to vector<2x256xf32>
    %1395 = arith.mulf %1394, %418 : vector<2x256xf32>
    %1396 = arith.addf %1392, %1395 : vector<2x256xf32>
    %c214 = arith.constant 214 : index
    %1397 = memref.load %arg7[%c214] : memref<216xf32, #tpu.memory_space<smem>>
    %1398 = vector.broadcast %1397 : f32 to vector<2x256xf32>
    %1399 = arith.mulf %1398, %421 : vector<2x256xf32>
    %1400 = arith.addf %1396, %1399 : vector<2x256xf32>
    %c215 = arith.constant 215 : index
    %1401 = memref.load %arg7[%c215] : memref<216xf32, #tpu.memory_space<smem>>
    %1402 = vector.broadcast %1401 : f32 to vector<2x256xf32>
    %1403 = arith.mulf %1402, %426 : vector<2x256xf32>
    %1404 = arith.addf %1400, %1403 : vector<2x256xf32>
    %cst_170 = arith.constant 0.000000e+00 : f32
    %1405 = vector.broadcast %cst_170 : f32 to vector<2x256xf32>
    %1406 = arith.maximumf %1404, %1405 : vector<2x256xf32>
    %cst_171 = arith.constant dense<0.000000e+00> : vector<2xf32>
    %1407 = vector.multi_reduction <add>, %1406, %cst_171 [1] : vector<2x256xf32> to vector<2xf32>
    %1408 = vector.shape_cast %1407 : vector<2xf32> to vector<2x1xf32>
    %cst_172 = arith.constant 3.906250e-03 : f32
    %1409 = vector.broadcast %cst_172 : f32 to vector<2x1xf32>
    %1410 = arith.mulf %1408, %1409 : vector<2x1xf32>
    %1411 = vector.extract_strided_slice %427 {offsets = [7, 0], sizes = [1, 10], strides = [1, 1]} : vector<8x10xf32> to vector<1x10xf32>
    %1412 = vector.broadcast %1410 : vector<2x1xf32> to vector<2x10xf32>
    %1413 = vector.broadcast %1411 : vector<1x10xf32> to vector<2x10xf32>
    %1414 = arith.mulf %1412, %1413 : vector<2x10xf32>
    %1415 = arith.addf %1292, %1414 : vector<2x10xf32>
    %c0_173 = arith.constant 0 : index
    %c0_174 = arith.constant 0 : index
    %1416 = vector.load %arg13[%c0_173, %c0_174] : memref<2x10xf32, #tpu.memory_space<vmem>>, vector<2x10xf32>
    tpu.vector_store %arg13[%c0_173, %c0_174], %1415 {strides = array<i32>} : memref<2x10xf32, #tpu.memory_space<vmem>>, vector<2x10xf32>,
    return
  }
}

</mosaic_0001>

<bundles_post_ra>
// kernel: two_query_forward.1
= control target key start
LH: loop header
LB: loop body
LE: loop exit
PB: predicated region body
PF: predicated region fallthrough
CT: control target
= control target key end

     0   :  { %s6116_s0 = inlined_call_operand.vmem [shape: f32[3,2,256], index: 0, kind: input, shape index: {}]   ;;  %s6117_s1 = inlined_call_operand.vmem [shape: f32[3,2,256], index: 1, kind: input, shape index: {}]   ;;  %s6118_s2 = inlined_call_operand.vmem [shape: f32[3,2,256], index: 2, kind: input, shape index: {}]   ;;  %s6119_s3 = inlined_call_operand.vmem [shape: f32[1,256], index: 3, kind: input, shape index: {}]   ;;  %s6120_s4 = inlined_call_operand.vmem [shape: f32[1,256], index: 4, kind: input, shape index: {}]   ;;  %s6121_s5 = inlined_call_operand.vmem [shape: f32[27], index: 5, kind: input, shape index: {}]   ;;  %s6122_s6 = inlined_call_operand.<no memory space> [shape: f32[1], index: 6, kind: input, shape index: {}]   ;;  %s6123_s7 = inlined_call_operand.vmem [shape: f32[216], index: 7, kind: input, shape index: {}]   ;;  %s6124_s8 = inlined_call_operand.vmem [shape: f32[8], index: 8, kind: input, shape index: {}]   ;;  %s6125_s9 = inlined_call_operand.vmem [shape: f32[3], index: 9, kind: input, shape index: {}]   ;;  %s6126_s10 = inlined_call_operand.vmem [shape: f32[3], index: 10, kind: input, shape index: {}]   ;;  %s6127_s11 = inlined_call_operand.vmem [shape: f32[8,10], index: 11, kind: input, shape index: {}]   ;;  %s6128_s12 = inlined_call_operand.vmem [shape: f32[1,10], index: 12, kind: input, shape index: {}]   ;;  %s6129_s13 = inlined_call_operand.hbm [shape: f32[2,10], index: 13, kind: output, shape index: {0}]   ;;  %s6130_s14 = inlined_call_operand.vmem [shape: f32[2,256], index: 14, kind: output, shape index: {1}]  }
   0x1   :  { %6204 = sst [smem:[#allocation173_spill]] %s6127_s11 }
   0x2   :  { %6205 = sst [smem:[#allocation174_spill]] %s6128_s12 }
   0x3   :  { %6206 = sst [smem:[#allocation175_spill]] %s6129_s13 }
   0x4   :  { %21 = vsyncpa [#allocation5], 0 }
   0x5   :  { %22 = vsyncpa [#allocation7], 0 }
   0x6   :  { %23 = vsyncpa [#allocation10], 0  ;;  %s51_s15 = sshll.u32 %s6123_s7, 4  ;;  %s52_s15 = int_to_ptr.vmem [resolvable:$true] %s51_s15 }
   0x7   :  { %24 = vsyncpa [#allocation4], 0  ;;  %s69_s18 = sshll.u32 %s6125_s9, 4  ;;  %s3093_s19 = smov [#allocation6]   ;;  %s70_s18 = int_to_ptr.vmem [resolvable:$true] %s69_s18 }
   0x8   :  { %54 = dma.vmem_to_smem %s52_s15, 32, %s3093_s19, [#allocation7]  }
   0x9   :  { %s3094_s20 = smov [#allocation9]   ;;  %s40_s23 = sshll.u32 %s6121_s5, 4  ;;  %s41_s23 = int_to_ptr.vmem [resolvable:$true] %s40_s23 }
   0xa   :  { %72 = dma.vmem_to_smem %s70_s18, 16, %s3094_s20, [#allocation10]  }
   0xb   :  { %s60_s7 = sshll.u32 %s6124_s8, 4  ;;  %s3095_s26 = smov [#allocation3]   ;;  %s61_s7 = int_to_ptr.vmem [resolvable:$true] %s60_s7 }
   0xc   :  { %43 = dma.vmem_to_smem %s41_s23, 16, %s3095_s26, [#allocation5]  }
   0xd   :  { %s3096_s27 = smov [#allocation8]   ;;  %s78_s29 = sshll.u32 %s6126_s10, 4  ;;  %s79_s29 = int_to_ptr.vmem [resolvable:$true] %s78_s29 }
   0xe   :  { %63 = dma.vmem_to_smem %s61_s7, 16, %s3096_s27, [#allocation7]  }
   0xf   :  { %s3097_s30 = smov [#allocation11]  }
  0x10   :  { %81 = dma.vmem_to_smem %s79_s29, 16, %s3097_s30, [#allocation10]  }
  0x11   :  { %3085 = dma.done.wait [#allocation5], 16  }
  0x12   :  { %3086 = vsyncadd [#allocation5], 4294967280 }
  0x13   :  { %3087 = dma.done.wait [#allocation7], 48  }
  0x14   :  { %3088 = vsyncadd [#allocation7], 4294967248 }
  0x15   :  { %3089 = dma.done.wait [#allocation10], 32  }
  0x16   :  { %3090 = vsyncadd [#allocation10], 4294967264 }
  0x17   :  { %106 = sfence }
  0x18   :  { %v109_v0 = vld [vmem:[%s6116_s0] sm:$0xf]  ;;  %s6132_s10 = smov 17   ;;  %s6134_s17 = smov 16   ;;  %v2713_v20 = vld [vmem:[%s6117_s1 + $0x4] sm:$0xf]  ;;  %v126_v57 = vstv %s6122_s6 }
  0x19   :  { %v114_v1 = vld [vmem:[%s6117_s1] sm:$0xf]  ;;  %s6146_s18 = smov 15   ;;  %s6144_s19 = smov 1   ;;  %v119_v23 = vmul.f32 0.35355338, %v2713_v20 }
  0x1a   :  { %v115_v2 = vmul.f32 0.35355338, %v114_v1  ;;  %s6142_s20 = smov 127   ;;  %s6140_s21 = smov 113   ;;  %v2711_v24 = vld [vmem:[%s6116_s0 + $0x4] sm:$0xf] }
  0x1b   :  { %s2718_s22 = sld [smem:[#allocation3 + $0x4]]  ;;  %s6138_s23 = smov 112   ;;  %v3236_v25 = vadd.f32 %v2711_v24, %v119_v23  ;;  %vm136_vm0 = vcmask 138240   ;;  %v108_v43 = vld [vmem:[%s6120_s4] sm:$0x3]  ;;  %vm155_vm1 = vcmask 130048  }
  0x1c   :  { %v3203_v3 = vadd.f32 %v115_v2, %v109_v0  ;;  %s6136_s7 = smov 111   ;;  %s2727_s9 = sld [smem:[#allocation3 + $0xd]]  ;;  %v3274_v47 = vperm.slane %v108_v43, 0  ;;  %v107_v48 = vld [vmem:[%s6119_s3] sm:$0x3]  ;;  %vm167_vm2 = vcmask 121856  }
  0x1d   :  { %s3261_s28 = sld [smem:[#allocation3]]  ;;  %v3281_v52 = vperm.slane %v107_v48, 0  ;;  %v2714_v60 = vld [vmem:[%s6117_s1 + $0x8] sm:$0xf]  ;;  %vm186_vm3 = vcmask 7168   ;;  %vm200_vm4 = vcmask 1039360  }
  0x1e   :  { %129 = vst [vmem:[#allocation1] ss:$4 sm:$0xff] %v3203_v3  ;;  %s3263_s29 = sld [smem:[#allocation3 + $0x1]]  ;;  %vm214_vm5 = vcmask 924672   ;;  %vm228_vm6 = vcmask 916480   ;;  %vm6131_vm7 = vcmask 908288  }
  0x1f   :  { %s3265_s30 = sld [smem:[#allocation3 + $0x2]] }
  0x20   :  { %s3309_s25 = sld [smem:[#allocation3 + $0x3]] }
  0x21   :  { %v272_v18 = vstv %s2718_s22  ;;  %s3325_s26 = sld [smem:[#allocation3 + $0x5]] }
  0x22   :  { %v273_v19 = vmul.f32 %v272_v18, %v3203_v3  ;;  %v432_v45 = vstv %s2727_s9  ;;  %s2736_s27 = sld [smem:[#allocation3 + $0x16]] }
  0x23   :  { %v248_v49 = vstv %s3261_s28  ;;  %v433_v56 = vmul.f32 %v432_v45, %v3236_v25  ;;  %s2720_s9 = sld [smem:[#allocation3 + $0x6]] }
  0x24   :  { %v254_v50 = vstv %s3263_s29  ;;  %s3381_s28 = sld [smem:[#allocation3 + $0x7]] }
  0x25   :  { %v130_v4 = vld.sshfl [vmem:[#allocation1] sm:$0xff pattern:$0x73625140]  ;;  %v131_v5 = vld.sshfl [vmem:[#allocation1 + $0x8] sm:$0xff pattern:$0x73625140]  ;;  %v260_v58 = vstv %s3265_s30 }
  0x26   :  { %132 = vrot.lane.b32.xlu0 %v130_v4, %s6132_s10  ;;  %148 = vst [vmem:[#allocation1] ss:$4 sm:$0xff] %v3203_v3  ;;  %v123_v4 = vmul.f32 0.35355338, %v2714_v60  ;;  %s3390_s29 = sld [smem:[#allocation3 + $0x8]] }
  0x27   :  { %s3398_s30 = sld [smem:[#allocation3 + $0x9]] }
  0x28   :  { %s3403_s5 = sld [smem:[#allocation3 + $0xa]] }
  0x29   :  { %s3417_s8 = sld [smem:[#allocation3 + $0xb]] }
  0x2a   :  { %s3430_s15 = sld [smem:[#allocation3 + $0xc]] }
  0x2b   :  { %s3446_s16 = sld [smem:[#allocation3 + $0xe]] }
  0x2c   :  { %s3450_s4 = sld [smem:[#allocation3 + $0xf]] }
  0x2d   :  { %v149_v6 = vld.sshfl [vmem:[#allocation1] sm:$0xff pattern:$0x73625140]  ;;  %v150_v7 = vld.sshfl [vmem:[#allocation1 + $0x8] sm:$0xff pattern:$0x73625140] }
  0x2e   :  { %151 = vrot.lane.b32.xlu1 %v149_v6, %s6134_s17  ;;  %134 = vrot.lane.b32.xlu0 %v131_v5, %s6132_s10  ;;  %160 = vst [vmem:[#allocation1] ss:$4 sm:$0xff] %v3203_v3  ;;  %v3297_v6 = vperm.slane %v108_v43, 1  ;;  %s3461_s22 = sld [smem:[#allocation3 + $0x10]] }
  0x2f   :  { %s3465_s3 = sld [smem:[#allocation3 + $0x11]] }
  0x30   :  { %s3476_s24 = sld [smem:[#allocation3 + $0x12]] }
  0x31   :  { %s3480_s6 = sld [smem:[#allocation3 + $0x13]] }
  0x32   :  { %s3490_s1 = sld [smem:[#allocation3 + $0x14]] }
  0x33   :  { %s3930_s13 = sld [smem:[#allocation6 + $0x31]] }
  0x34   :  { %s3974_s11 = sld [smem:[#allocation6 + $0x5e]] }
  0x35   :  { %v161_v8 = vld.sshfl [vmem:[#allocation1] sm:$0xff pattern:$0x73625140]  ;;  %v162_v9 = vld.sshfl [vmem:[#allocation1 + $0x8] sm:$0xff pattern:$0x73625140] }
  0x36   :  { %153 = vrot.lane.b32.xlu1 %v150_v7, %s6134_s17  ;;  %179 = vst [vmem:[#allocation1] ss:$4 sm:$0xff] %v3203_v3  ;;  %163 = vrot.lane.b32.xlu2 %v161_v8, %s6146_s18  ;;  %v3299_v8 = vperm.slane %v107_v48, 1  ;;  %s3976_s12 = sld [smem:[#allocation6 + $0x67]] }
  0x3d   :  { %v181_v10 = vld.sshfl [vmem:[#allocation1 + $0x8] sm:$0xff pattern:$0x73625140]  ;;  %v180_v11 = vld.sshfl [vmem:[#allocation1] sm:$0xff pattern:$0x73625140] }
  0x3e   :  { %184 = vrot.lane.b32.xlu1 %v181_v10, %s6144_s19  ;;  %182 = vrot.lane.b32.xlu0 %v180_v11, %s6144_s19  ;;  %193 = vst [vmem:[#allocation1] ss:$4 sm:$0xff] %v3203_v3 }
  0x3f   :  { %165 = vrot.lane.b32.xlu2 %v162_v9, %s6146_s18  ;;  %v2712_v9 = vld [vmem:[%s6116_s0 + $0x8] sm:$0xf] }
  0x40   :  { %v3311_v18 = vadd.f32 %v2712_v9, %v123_v4 }
  0x45   :  { %v195_v12 = vld.sshfl [vmem:[#allocation1 + $0x8] sm:$0xff pattern:$0x73625140]  ;;  %v194_v13 = vld.sshfl [vmem:[#allocation1] sm:$0xff pattern:$0x73625140] }
  0x46   :  { %198 = vrot.lane.b32.xlu0 %v195_v12, %s6142_s20  ;;  %207 = vst [vmem:[#allocation1] ss:$4 sm:$0xff] %v3203_v3 }
  0x47   :  { %196 = vrot.lane.b32.xlu2 %v194_v13, %s6142_s20 }
  0x4d   :  { %v208_v14 = vld.sshfl [vmem:[#allocation1] sm:$0xff pattern:$0x73625140]  ;;  %v209_v15 = vld.sshfl [vmem:[#allocation1 + $0x8] sm:$0xff pattern:$0x73625140] }
  0x4e   :  { %210 = vrot.lane.b32.xlu1 %v208_v14, %s6140_s21  ;;  %221 = vst [vmem:[#allocation1] ss:$4 sm:$0xff] %v3203_v3 }
  0x4f   :  { %212 = vrot.lane.b32.xlu2 %v209_v15, %s6140_s21 }
  0x55   :  { %v223_v16 = vld.sshfl [vmem:[#allocation1 + $0x8] sm:$0xff pattern:$0x73625140]  ;;  %v222_v17 = vld.sshfl [vmem:[#allocation1] sm:$0xff pattern:$0x73625140] }
  0x56   :  { %226 = vrot.lane.b32.xlu1 %v223_v16, %s6138_s23  ;;  %224 = vrot.lane.b32.xlu0 %v222_v17, %s6138_s23  ;;  %233 = vst [vmem:[#allocation1] ss:$4 sm:$0xff] %v3203_v3 }
  0x5d   :  { %v235_v21 = vld.sshfl [vmem:[#allocation1 + $0x8] sm:$0xff pattern:$0x73625140]  ;;  %v234_v22 = vld.sshfl [vmem:[#allocation1] sm:$0xff pattern:$0x73625140] }
  0x5e   :  { %238 = vrot.lane.b32.xlu0 %v235_v21, %s6136_s7  ;;  %275 = vst [vmem:[#allocation1] ss:$4 sm:$0xff] %v273_v19  ;;  %236 = vrot.lane.b32.xlu2 %v234_v22, %s6136_s7 }
  0x65   :  { %v3238_v26 = vld.sshfl [vmem:[#allocation1] sm:$0xff pattern:$0x73625140]  ;;  %v3240_v27 = vld.sshfl [vmem:[#allocation1 + $0x8] sm:$0xff pattern:$0x73625140] }
  0x66   :  { %307 = vst [vmem:[#allocation1] ss:$4 sm:$0xff] %v3236_v25 }
  0x6d   :  { %v308_v28 = vld.sshfl [vmem:[#allocation1] sm:$0xff pattern:$0x73625140]  ;;  %v309_v29 = vld.sshfl [vmem:[#allocation1 + $0x8] sm:$0xff pattern:$0x73625140] }
  0x6e   :  { %310 = vrot.lane.b32.xlu1 %v308_v28, %s6132_s10  ;;  %320 = vst [vmem:[#allocation1] ss:$4 sm:$0xff] %v3236_v25  ;;  %312 = vrot.lane.b32.xlu2 %v309_v29, %s6132_s10 }
  0x75   :  { %v322_v30 = vld.sshfl [vmem:[#allocation1 + $0x8] sm:$0xff pattern:$0x73625140]  ;;  %v321_v31 = vld.sshfl [vmem:[#allocation1] sm:$0xff pattern:$0x73625140] }
  0x76   :  { %325 = vrot.lane.b32.xlu1 %v322_v30, %s6134_s17  ;;  %323 = vrot.lane.b32.xlu0 %v321_v31, %s6134_s17  ;;  %331 = vst [vmem:[#allocation1] ss:$4 sm:$0xff] %v3236_v25  ;;  %v266_v31 = vstv %s3309_s25  ;;  %s3502_s25 = sld [smem:[#allocation3 + $0x15]] }
  0x7d   :  { %v333_v32 = vld.sshfl [vmem:[#allocation1 + $0x8] sm:$0xff pattern:$0x73625140]  ;;  %v332_v33 = vld.sshfl [vmem:[#allocation1] sm:$0xff pattern:$0x73625140] }
  0x7e   :  { %336 = vrot.lane.b32.xlu0 %v333_v32, %s6146_s18  ;;  %344 = vst [vmem:[#allocation1] ss:$4 sm:$0xff] %v3236_v25  ;;  %334 = vrot.lane.b32.xlu2 %v332_v33, %s6146_s18 }
  0x85   :  { %v345_v34 = vld.sshfl [vmem:[#allocation1] sm:$0xff pattern:$0x73625140]  ;;  %v346_v35 = vld.sshfl [vmem:[#allocation1 + $0x8] sm:$0xff pattern:$0x73625140] }
  0x86   :  { %347 = vrot.lane.b32.xlu1 %v345_v34, %s6144_s19  ;;  %357 = vst [vmem:[#allocation1] ss:$4 sm:$0xff] %v3236_v25  ;;  %349 = vrot.lane.b32.xlu2 %v346_v35, %s6144_s19 }
  0x8d   :  { %v359_v36 = vld.sshfl [vmem:[#allocation1 + $0x8] sm:$0xff pattern:$0x73625140]  ;;  %v358_v37 = vld.sshfl [vmem:[#allocation1] sm:$0xff pattern:$0x73625140] }
  0x8e   :  { %362 = vrot.lane.b32.xlu1 %v359_v36, %s6142_s20  ;;  %360 = vrot.lane.b32.xlu0 %v358_v37, %s6142_s20  ;;  %370 = vst [vmem:[#allocation1] ss:$4 sm:$0xff] %v3236_v25 }
  0x90   :  { %v164_v44 = vpop.permute.xlu2 %163 }
  0x91   :  { %v171_v55 = vsel %vm167_vm2, 0.0, %v164_v44 }
  0x92   :  { %v177_v59 = vmul.f32 %v3281_v52, %v171_v55 }
  0x94   :  { %v261_v2 = vmul.f32 %v260_v58, %v177_v59 }
  0x95   :  { %v372_v38 = vld.sshfl [vmem:[#allocation1 + $0x8] sm:$0xff pattern:$0x73625140]  ;;  %v371_v39 = vld.sshfl [vmem:[#allocation1] sm:$0xff pattern:$0x73625140] }
  0x96   :  { %375 = vrot.lane.b32.xlu0 %v372_v38, %s6140_s21  ;;  %383 = vst [vmem:[#allocation1] ss:$4 sm:$0xff] %v3236_v25  ;;  %373 = vrot.lane.b32.xlu2 %v371_v39, %s6140_s21 }
  0x98   :  { %v133_v42 = vpop.permute.xlu0 %132 }
  0x99   :  { %v140_v46 = vsel %vm136_vm0, 0.0, %v133_v42  ;;  %v166_v7 = vpop.permute.xlu2 %165 }
  0x9a   :  { %v146_v53 = vmul.f32 %v3274_v47, %v140_v46  ;;  %v168_v12 = vsel %vm167_vm2, %v164_v44, %v166_v7 }
  0x9b   :  { %v178_v15 = vmul.f32 %v3299_v8, %v168_v12 }
  0x9c   :  { %v249_v61 = vmul.f32 %v248_v49, %v146_v53 }
  0x9d   :  { %v384_v40 = vld.sshfl [vmem:[#allocation1] sm:$0xff pattern:$0x73625140]  ;;  %v385_v41 = vld.sshfl [vmem:[#allocation1 + $0x8] sm:$0xff pattern:$0x73625140]  ;;  %v262_v22 = vmul.f32 %v260_v58, %v178_v15 }
  0x9e   :  { %386 = vrot.lane.b32.xlu1 %v384_v40, %s6138_s23  ;;  %394 = vst [vmem:[#allocation1] ss:$4 sm:$0xff] %v3236_v25  ;;  %388 = vrot.lane.b32.xlu2 %v385_v41, %s6138_s23  ;;  %v251_v1 = vadd.f32 %v249_v61, %v126_v57  ;;  %v283_v40 = vstv %s3325_s26  ;;  %v592_v61 = vstv %s2736_s27  ;;  %s3520_s26 = sld [smem:[#allocation3 + $0x17]] }
  0x9f   :  { %s3524_s27 = sld [smem:[#allocation3 + $0x18]] }
  0xa0   :  { %v152_v51 = vpop.permute.xlu1 %151  ;;  %v135_v5 = vpop.permute.xlu0 %134 }
  0xa1   :  { %v159_v54 = vsel %vm155_vm1, 0.0, %v152_v51  ;;  %v137_v11 = vsel %vm136_vm0, %v133_v42, %v135_v5  ;;  %v197_v38 = vpop.permute.xlu2 %196 }
  0xa2   :  { %v255_v62 = vmul.f32 %v254_v50, %v159_v54  ;;  %v147_v13 = vmul.f32 %v3297_v6, %v137_v11 }
  0xa4   :  { %v257_v10 = vadd.f32 %v255_v62, %v251_v1  ;;  %v250_v19 = vmul.f32 %v248_v49, %v147_v13  ;;  %v593_v62 = vmul.f32 %v592_v61, %v3311_v18 }
  0xa5   :  { %v396_v63 = vld.sshfl [vmem:[#allocation1 + $0x8] sm:$0xff pattern:$0x73625140]  ;;  %v395_v0 = vld.sshfl [vmem:[#allocation1] sm:$0xff pattern:$0x73625140] }
  0xa6   :  { %399 = vrot.lane.b32.xlu1 %v396_v63, %s6136_s7  ;;  %397 = vrot.lane.b32.xlu0 %v395_v0, %s6136_s7  ;;  %435 = vst [vmem:[#allocation1] ss:$4 sm:$0xff] %v433_v56  ;;  %v263_v16 = vadd.f32 %v261_v2, %v257_v10  ;;  %v252_v21 = vadd.f32 %v250_v19, %v126_v57 }
  0xa8   :  { %v154_v14 = vpop.permute.xlu1 %153 }
  0xa9   :  { %v156_v17 = vsel %vm155_vm1, %v152_v51, %v154_v14  ;;  %v213_v58 = vpop.permute.xlu2 %212 }
  0xaa   :  { %v256_v20 = vmul.f32 %v254_v50, %v156_v17 }
  0xac   :  { %v258_v28 = vadd.f32 %v256_v20, %v252_v21 }
  0xad   :  { %v3313_v23 = vld.sshfl [vmem:[#allocation1] sm:$0xff pattern:$0x73625140]  ;;  %v3315_v24 = vld.sshfl [vmem:[#allocation1 + $0x8] sm:$0xff pattern:$0x73625140] }
  0xae   :  { %467 = vst [vmem:[#allocation1] ss:$4 sm:$0xff] %v3311_v18  ;;  %v3318_v29 = vadd.f32 %v262_v22, %v258_v28 }
  0xb0   :  { %v3320_v30 = vpop.permute.xlu0 %182  ;;  %v185_v57 = vpop.permute.xlu1 %184 }
  0xb1   :  { %v190_v32 = vsel %vm186_vm3, 0.0, %v3320_v30  ;;  %v187_v14 = vsel %vm186_vm3, %v3320_v30, %v185_v57 }
  0xb2   :  { %v191_v33 = vmul.f32 %v190_v32, %v3274_v47  ;;  %v218_v32 = vsel %vm214_vm5, %v213_v58, 0.0 }
  0xb4   :  { %v267_v34 = vmul.f32 %v266_v31, %v191_v33 }
  0xb5   :  { %v469_v35 = vld.sshfl [vmem:[#allocation1 + $0x8] sm:$0xff pattern:$0x73625140]  ;;  %v468_v36 = vld.sshfl [vmem:[#allocation1] sm:$0xff pattern:$0x73625140] }
  0xb6   :  { %472 = vrot.lane.b32.xlu0 %v469_v35, %s6132_s10  ;;  %480 = vst [vmem:[#allocation1] ss:$4 sm:$0xff] %v3311_v18  ;;  %470 = vrot.lane.b32.xlu2 %v468_v36, %s6132_s10  ;;  %v269_v37 = vadd.f32 %v267_v34, %v263_v16  ;;  %v192_v16 = vmul.f32 %v187_v14, %v3297_v6 }
  0xb7   :  { %v220_v36 = vmul.f32 %v218_v32, %v3297_v6  ;;  %v420_v32 = vstv %s3417_s8  ;;  %s3659_s8 = sld [smem:[#allocation6 + $0x1c]] }
  0xb8   :  { %v199_v39 = vpop.permute.xlu0 %198  ;;  %v280_v43 = vadd.f32 %v3238_v26, %v269_v37  ;;  %v237_v0 = vpop.permute.xlu2 %236  ;;  %v268_v19 = vmul.f32 %v266_v31, %v192_v16  ;;  %v289_v37 = vstv %s2720_s9  ;;  %s3533_s9 = sld [smem:[#allocation3 + $0x19]] }
  0xb9   :  { %v201_v41 = vsel %vm200_vm4, %v197_v38, %v199_v39  ;;  %v204_v20 = vsel %vm200_vm4, %v199_v39, 0.0  ;;  %v291_v39 = vmul.f32 %v289_v37, %v220_v36 }
  0xba   :  { %v205_v42 = vmul.f32 %v201_v41, %v3281_v52  ;;  %v270_v28 = vadd.f32 %v268_v19, %v3318_v29  ;;  %v206_v30 = vmul.f32 %v204_v20, %v3299_v8 }
  0xbc   :  { %v284_v44 = vmul.f32 %v283_v40, %v205_v42  ;;  %v281_v31 = vadd.f32 %v3240_v27, %v270_v28  ;;  %v285_v34 = vmul.f32 %v283_v40, %v206_v30  ;;  %v295_v42 = vstv %s3381_s28  ;;  %s3535_s28 = sld [smem:[#allocation3 + $0x1a]] }
  0xbd   :  { %v481_v45 = vld.sshfl [vmem:[#allocation1] sm:$0xff pattern:$0x73625140]  ;;  %v482_v46 = vld.sshfl [vmem:[#allocation1 + $0x8] sm:$0xff pattern:$0x73625140] }
  0xbe   :  { %483 = vrot.lane.b32.xlu1 %v481_v45, %s6134_s17  ;;  %491 = vst [vmem:[#allocation1] ss:$4 sm:$0xff] %v3311_v18  ;;  %485 = vrot.lane.b32.xlu2 %v482_v46, %s6134_s17  ;;  %v3342_v48 = vadd.f32 %v284_v44, %v280_v43  ;;  %v287_v38 = vadd.f32 %v285_v34, %v281_v31 }
  0xc0   :  { %v211_v63 = vpop.permute.xlu1 %210  ;;  %v293_v45 = vadd.f32 %v291_v39, %v287_v38 }
  0xc1   :  { %v215_v35 = vsel %vm214_vm5, %v211_v63, %v213_v58 }
  0xc2   :  { %v219_v29 = vmul.f32 %v215_v35, %v3274_v47 }
  0xc4   :  { %v290_v44 = vmul.f32 %v289_v37, %v219_v29 }
  0xc5   :  { %v493_v49 = vld.sshfl [vmem:[#allocation1 + $0x8] sm:$0xff pattern:$0x73625140]  ;;  %v492_v50 = vld.sshfl [vmem:[#allocation1] sm:$0xff pattern:$0x73625140] }
  0xc6   :  { %496 = vrot.lane.b32.xlu1 %v493_v49, %s6146_s18  ;;  %494 = vrot.lane.b32.xlu0 %v492_v50, %s6146_s18  ;;  %504 = vst [vmem:[#allocation1] ss:$4 sm:$0xff] %v3311_v18 }
  0xc8   :  { %v225_v4 = vpop.permute.xlu0 %224  ;;  %v227_v5 = vpop.permute.xlu1 %226 }
  0xc9   :  { %v313_v7 = vpop.permute.xlu2 %312  ;;  %v232_v27 = vsel %vm228_vm6, %v227_v5, 0.0 }
  0xca   :  { %v297_v46 = vmul.f32 %v295_v42, %v232_v27 }
  0xcd   :  { %v506_v26 = vld.sshfl [vmem:[#allocation1 + $0x8] sm:$0xff pattern:$0x73625140]  ;;  %v505_v51 = vld.sshfl [vmem:[#allocation1] sm:$0xff pattern:$0x73625140] }
  0xce   :  { %509 = vrot.lane.b32.xlu0 %v506_v26, %s6144_s19  ;;  %517 = vst [vmem:[#allocation1] ss:$4 sm:$0xff] %v3311_v18  ;;  %507 = vrot.lane.b32.xlu2 %v505_v51, %s6144_s19  ;;  %v229_v26 = vsel %vm228_vm6, %v225_v4, %v227_v5  ;;  %v301_v51 = vstv %s3390_s29  ;;  %v414_v4 = vstv %s3403_s5  ;;  %s3650_s29 = sld [smem:[#allocation8 + $0x2]] }
  0xcf   :  { %v296_v57 = vmul.f32 %v295_v42, %v229_v26  ;;  %s3657_s5 = sld [smem:[#allocation6 + $0x1]] }
  0xd0   :  { %v239_v9 = vpop.permute.xlu0 %238 }
  0xd1   :  { %v244_v40 = vsel %vm6131_vm7, %v239_v9, 0.0 }
  0xd2   :  { %v246_v49 = vmul.f32 %v244_v40, %v3299_v8  ;;  %v426_v40 = vstv %s3430_s15  ;;  %s772_s15 = sld [smem:[#allocation11]] }
  0xd4   :  { %v303_v58 = vmul.f32 %v301_v51, %v246_v49 }
  0xd5   :  { %v518_v53 = vld.sshfl [vmem:[#allocation1] sm:$0xff pattern:$0x73625140]  ;;  %v519_v54 = vld.sshfl [vmem:[#allocation1 + $0x8] sm:$0xff pattern:$0x73625140] }
  0xd6   :  { %520 = vrot.lane.b32.xlu1 %v518_v53, %s6142_s20  ;;  %530 = vst [vmem:[#allocation1] ss:$4 sm:$0xff] %v3311_v18  ;;  %522 = vrot.lane.b32.xlu2 %v519_v54, %s6142_s20  ;;  %v241_v54 = vsel %vm6131_vm7, %v237_v0, %v239_v9 }
  0xd7   :  { %v245_v61 = vmul.f32 %v241_v54, %v3281_v52 }
  0xd8   :  { %v3362_v11 = vpop.permute.xlu2 %334 }
  0xdd   :  { %v532_v55 = vld.sshfl [vmem:[#allocation1 + $0x8] sm:$0xff pattern:$0x73625140]  ;;  %v531_v56 = vld.sshfl [vmem:[#allocation1] sm:$0xff pattern:$0x73625140] }
  0xde   :  { %535 = vrot.lane.b32.xlu1 %v532_v55, %s6140_s21  ;;  %533 = vrot.lane.b32.xlu0 %v531_v56, %s6140_s21  ;;  %543 = vst [vmem:[#allocation1] ss:$4 sm:$0xff] %v3311_v18  ;;  %v292_v55 = vadd.f32 %v290_v44, %v3342_v48  ;;  %v299_v56 = vadd.f32 %v297_v46, %v293_v45 }
  0xe0   :  { %v311_v10 = vpop.permute.xlu1 %310  ;;  %v3368_v15 = vpop.permute.xlu2 %349  ;;  %v298_v0 = vadd.f32 %v296_v57, %v292_v55 }
  0xe1   :  { %v314_v53 = vsel %vm136_vm0, %v311_v10, %v313_v7  ;;  %v302_v7 = vmul.f32 %v301_v51, %v245_v61 }
  0xe3   :  { %v304_v28 = vadd.f32 %v302_v7, %v298_v0 }
  0xe5   :  { %v545_v59 = vld.sshfl [vmem:[#allocation1 + $0x8] sm:$0xff pattern:$0x73625140]  ;;  %v544_v60 = vld.sshfl [vmem:[#allocation1] sm:$0xff pattern:$0x73625140] }
  0xe6   :  { %548 = vrot.lane.b32.xlu0 %v545_v59, %s6138_s23  ;;  %554 = vst [vmem:[#allocation1] ss:$4 sm:$0xff] %v3311_v18  ;;  %546 = vrot.lane.b32.xlu2 %v544_v60, %s6138_s23  ;;  %v319_v59 = vmul.f32 %v314_v53, %v3297_v6 }
  0xe8   :  { %v3364_v12 = vpop.permute.xlu0 %323  ;;  %v326_v13 = vpop.permute.xlu1 %325 }
  0xe9   :  { %v327_v14 = vsel %vm155_vm1, %v3364_v12, %v326_v13  ;;  %v330_v13 = vsel %vm155_vm1, 0.0, %v3364_v12 }
  0xea   :  { %v415_v42 = vmul.f32 %v414_v4, %v330_v13 }
  0xed   :  { %v555_v1 = vld.sshfl [vmem:[#allocation1] sm:$0xff pattern:$0x73625140]  ;;  %v556_v2 = vld.sshfl [vmem:[#allocation1 + $0x8] sm:$0xff pattern:$0x73625140] }
  0xee   :  { %557 = vrot.lane.b32.xlu1 %v555_v1, %s6136_s7  ;;  %559 = vrot.lane.b32.xlu2 %v556_v2, %s6136_s7  ;;  %595 = vst [vmem:[#allocation1] ss:$4 sm:$0xff] %v593_v62  ;;  %v408_v62 = vstv %s3398_s30  ;;  %v317_v1 = vsel %vm136_vm0, 0.0, %v311_v10  ;;  %v305_v2 = vadd.f32 %v303_v58, %v299_v56  ;;  %v416_v10 = vmul.f32 %v414_v4, %v327_v14  ;;  %s3655_s30 = sld [smem:[#allocation6 + $0x36]] }
  0xef   :  { %v410_v48 = vmul.f32 %v408_v62, %v319_v59  ;;  %v318_v9 = vmul.f32 %v317_v1, %v3274_v47  ;;  %v443_v58 = vstv %s3446_s16  ;;  %s3665_s16 = sld [smem:[#allocation6 + $0x51]] }
  0xf0   :  { %v337_v17 = vpop.permute.xlu0 %336  ;;  %v3376_v22 = vpop.permute.xlu2 %373 }
  0xf1   :  { %v338_v16 = vsel %vm167_vm2, %v3362_v11, %v337_v17  ;;  %v412_v19 = vadd.f32 %v410_v48, %v305_v2  ;;  %v409_v30 = vmul.f32 %v408_v62, %v318_v9  ;;  %v341_v17 = vsel %vm167_vm2, 0.0, %v3362_v11 }
  0xf2   :  { %v343_v20 = vmul.f32 %v338_v16, %v3299_v8  ;;  %v342_v27 = vmul.f32 %v341_v17, %v3281_v52  ;;  %v449_v62 = vstv %s3450_s4  ;;  %v455_v9 = vstv %s3461_s22  ;;  %s3667_s4 = sld [smem:[#allocation6 + $0x52]] }
  0xf3   :  { %v418_v36 = vadd.f32 %v416_v10, %v412_v19  ;;  %v411_v39 = vadd.f32 %v409_v30, %v304_v28  ;;  %v461_v28 = vstv %s3465_s3  ;;  %s3672_s22 = sld [smem:[#allocation8 + $0x4]] }
  0xf4   :  { %v422_v37 = vmul.f32 %v420_v32, %v343_v20  ;;  %v421_v45 = vmul.f32 %v420_v32, %v342_v27  ;;  %s3674_s3 = sld [smem:[#allocation6 + $0x6c]] }
  0xf5   :  { %v417_v44 = vadd.f32 %v415_v42, %v411_v39  ;;  %v568_v39 = vstv %s3476_s24  ;;  %v574_v42 = vstv %s3480_s6  ;;  %s2742_s24 = sld [smem:[#allocation9 + $0x1]] }
  0xf6   :  { %v424_v11 = vadd.f32 %v422_v37, %v418_v36  ;;  %s3678_s6 = sld [smem:[#allocation8 + $0x5]] }
  0xf7   :  { %v423_v56 = vadd.f32 %v421_v45, %v417_v44  ;;  %v580_v45 = vstv %s3490_s1  ;;  %s3680_s1 = sld [smem:[#allocation6 + $0x87]] }
  0xf8   :  { %v3374_v21 = vpop.permute.xlu1 %347  ;;  %v3400_v43 = vpop.permute.xlu2 %388 }
  0xf9   :  { %v351_v31 = vsel %vm186_vm3, %v3374_v21, %v3368_v15  ;;  %v354_v15 = vsel %vm186_vm3, 0.0, %v3374_v21  ;;  %v393_v14 = vsel %vm228_vm6, %v3400_v43, 0.0 }
  0xfa   :  { %v356_v29 = vmul.f32 %v351_v31, %v3297_v6  ;;  %v355_v46 = vmul.f32 %v354_v15, %v3274_v47  ;;  %v457_v31 = vmul.f32 %v455_v9, %v393_v14 }
  0xfc   :  { %v428_v12 = vmul.f32 %v426_v40, %v356_v29  ;;  %v427_v57 = vmul.f32 %v426_v40, %v355_v46 }
  0xfe   :  { %v430_v53 = vadd.f32 %v428_v12, %v424_v11  ;;  %v429_v48 = vadd.f32 %v427_v57, %v423_v56 }
 0x100   :  { %v3383_v33 = vpop.permute.xlu0 %360  ;;  %v3393_v41 = vpop.permute.xlu1 %362  ;;  %v441_v1 = vadd.f32 %v3315_v24, %v430_v53  ;;  %v440_v10 = vadd.f32 %v3313_v23, %v429_v48 }
 0x101   :  { %v367_v49 = vsel %vm200_vm4, %v3393_v41, 0.0  ;;  %v364_v59 = vsel %vm200_vm4, %v3383_v33, %v3393_v41 }
 0x102   :  { %v369_v54 = vmul.f32 %v367_v49, %v3299_v8  ;;  %v368_v4 = vmul.f32 %v364_v59, %v3281_v52 }
 0x104   :  { %v445_v0 = vmul.f32 %v443_v58, %v369_v54  ;;  %v444_v20 = vmul.f32 %v443_v58, %v368_v4 }
 0x108   :  { %v3405_v50 = vpop.permute.xlu0 %375 }
 0x109   :  { %v380_v21 = vsel %vm214_vm5, %v3405_v50, 0.0  ;;  %v377_v2 = vsel %vm214_vm5, %v3376_v22, %v3405_v50  ;;  %v447_v50 = vadd.f32 %v445_v0, %v441_v1 }
 0x10a   :  { %v382_v61 = vmul.f32 %v380_v21, %v3297_v6  ;;  %v381_v24 = vmul.f32 %v377_v2, %v3274_v47 }
 0x10c   :  { %v451_v41 = vmul.f32 %v449_v62, %v382_v61  ;;  %v450_v36 = vmul.f32 %v449_v62, %v381_v24  ;;  %v586_v61 = vstv %s3502_s25  ;;  %s2743_s25 = sld [smem:[#allocation11 + $0x1]] }
 0x10e   :  { %v453_v32 = vadd.f32 %v451_v41, %v447_v50 }
 0x110   :  { %v3413_v60 = vpop.permute.xlu1 %386  ;;  %v3419_v63 = vpop.permute.xlu2 %470  ;;  %v459_v40 = vadd.f32 %v457_v31, %v453_v32  ;;  %v609_v32 = vstv %s3524_s27  ;;  %s3644_s27 = sld [smem:[#allocation6 + $0x1b]] }
 0x111   :  { %v390_v37 = vsel %vm228_vm6, %v3413_v60, %v3400_v43 }
 0x112   :  { %v456_v15 = vmul.f32 %v455_v9, %v390_v37 }
 0x118   :  { %v3423_v5 = vpop.permute.xlu0 %397  ;;  %v3437_v34 = vpop.permute.xlu2 %485 }
 0x119   :  { %v400_v35 = vpop.permute.xlu1 %399 }
 0x11a   :  { %v404_v7 = vsel %vm6131_vm7, %v400_v35, 0.0  ;;  %v401_v30 = vsel %vm6131_vm7, %v3423_v5, %v400_v35  ;;  %v477_v5 = vsel %vm136_vm0, 0.0, %v3419_v63  ;;  %v446_v35 = vadd.f32 %v444_v20, %v440_v10 }
 0x11b   :  { %v406_v16 = vmul.f32 %v404_v7, %v3299_v8  ;;  %v603_v10 = vstv %s3520_s26  ;;  %s3642_s26 = sld [smem:[#allocation6]] }
 0x11c   :  { %v452_v44 = vadd.f32 %v450_v36, %v446_v35  ;;  %v621_v35 = vstv %s3535_s28  ;;  %s3648_s28 = sld [smem:[#allocation8 + $0x1]] }
 0x11d   :  { %v463_v23 = vmul.f32 %v461_v28, %v406_v16 }
 0x11e   :  { %v458_v54 = vadd.f32 %v456_v15, %v452_v44 }
 0x11f   :  { %v465_v46 = vadd.f32 %v463_v23, %v459_v40 }
 0x128   :  { %v473_v38 = vpop.permute.xlu0 %472  ;;  %v3455_v26 = vpop.permute.xlu2 %507 }
 0x129   :  { %v474_v22 = vsel %vm136_vm0, %v3419_v63, %v473_v38  ;;  %v405_v38 = vmul.f32 %v401_v30, %v3281_v52  ;;  %v478_v63 = vmul.f32 %v477_v5, %v3274_v47  ;;  %v615_v5 = vstv %s3533_s9  ;;  %s3646_s9 = sld [smem:[#allocation8]] }
 0x12a   :  { %v479_v13 = vmul.f32 %v474_v22, %v3297_v6 }
 0x12b   :  { %v462_v49 = vmul.f32 %v461_v28, %v405_v38  ;;  %v569_v59 = vmul.f32 %v568_v39, %v478_v63 }
 0x12c   :  { %v570_v11 = vmul.f32 %v568_v39, %v479_v13 }
 0x12d   :  { %v464_v62 = vadd.f32 %v462_v49, %v458_v54 }
 0x12e   :  { %v572_v56 = vadd.f32 %v570_v11, %v465_v46 }
 0x130   :  { %v3457_v51 = vpop.permute.xlu1 %483  ;;  %v3482_v33 = vpop.permute.xlu2 %522 }
 0x131   :  { %v487_v27 = vsel %vm155_vm1, %v3457_v51, %v3437_v34  ;;  %v490_v1 = vsel %vm155_vm1, 0.0, %v3457_v51  ;;  %v527_v4 = vsel %vm200_vm4, %v3482_v33, 0.0  ;;  %v571_v51 = vadd.f32 %v569_v59, %v464_v62 }
 0x132   :  { %v576_v21 = vmul.f32 %v574_v42, %v487_v27  ;;  %v575_v41 = vmul.f32 %v574_v42, %v490_v1  ;;  %v529_v14 = vmul.f32 %v527_v4, %v3299_v8 }
 0x134   :  { %v578_v0 = vadd.f32 %v576_v21, %v572_v56  ;;  %v577_v30 = vadd.f32 %v575_v41, %v571_v51 }
 0x138   :  { %v495_v55 = vpop.permute.xlu0 %494  ;;  %v497_v19 = vpop.permute.xlu1 %496 }
 0x139   :  { %v498_v29 = vsel %vm167_vm2, %v495_v55, %v497_v19  ;;  %v501_v57 = vsel %vm167_vm2, 0.0, %v495_v55  ;;  %v514_v55 = vsel %vm186_vm3, 0.0, %v3455_v26 }
 0x13a   :  { %v503_v12 = vmul.f32 %v498_v29, %v3299_v8  ;;  %v502_v48 = vmul.f32 %v501_v57, %v3281_v52  ;;  %v515_v19 = vmul.f32 %v514_v55, %v3274_v47 }
 0x13c   :  { %v582_v58 = vmul.f32 %v580_v45, %v503_v12  ;;  %v581_v16 = vmul.f32 %v580_v45, %v502_v48  ;;  %v587_v37 = vmul.f32 %v586_v61, %v515_v19 }
 0x13e   :  { %v584_v7 = vadd.f32 %v582_v58, %v578_v0  ;;  %v583_v36 = vadd.f32 %v581_v16, %v577_v30 }
 0x140   :  { %v510_v17 = vpop.permute.xlu0 %509  ;;  %v3514_v60 = vpop.permute.xlu2 %546  ;;  %v589_v40 = vadd.f32 %v587_v37, %v583_v36 }
 0x141   :  { %v511_v43 = vsel %vm186_vm3, %v3455_v26, %v510_v17  ;;  %v597_v26 = vld.sshfl [vmem:[#allocation1 + $0x8] sm:$0xff pattern:$0x73625140]  ;;  %v605_v17 = vmul.f32 %v603_v10, %v529_v14 }
 0x142   :  { %v516_v34 = vmul.f32 %v511_v43, %v3297_v6 }
 0x144   :  { %v588_v2 = vmul.f32 %v586_v61, %v516_v34 }
 0x146   :  { %v590_v9 = vadd.f32 %v588_v2, %v584_v7 }
 0x148   :  { %v521_v53 = vpop.permute.xlu1 %520  ;;  %v560_v24 = vpop.permute.xlu2 %559  ;;  %v601_v13 = vadd.f32 %v597_v26, %v590_v9 }
 0x149   :  { %v564_v31 = vsel %vm6131_vm7, %v560_v24, 0.0  ;;  %v524_v29 = vsel %vm200_vm4, %v521_v53, %v3482_v33  ;;  %v596_v33 = vld.sshfl [vmem:[#allocation1] sm:$0xff pattern:$0x73625140] }
 0x14a   :  { %v566_v38 = vmul.f32 %v564_v31, %v3299_v8  ;;  %v607_v42 = vadd.f32 %v605_v17, %v601_v13  ;;  %v528_v27 = vmul.f32 %v524_v29, %v3281_v52  ;;  %v600_v21 = vadd.f32 %v596_v33, %v589_v40 }
 0x14c   :  { %v623_v63 = vmul.f32 %v621_v35, %v566_v38  ;;  %v604_v45 = vmul.f32 %v603_v10, %v528_v27 }
 0x14e   :  { %v606_v54 = vadd.f32 %v604_v45, %v600_v21 }
 0x150   :  { %v536_v22 = vpop.permute.xlu1 %535  ;;  %v534_v50 = vpop.permute.xlu0 %533 }
 0x151   :  { %v540_v20 = vsel %vm214_vm5, %v536_v22, 0.0  ;;  %v537_v39 = vsel %vm214_vm5, %v534_v50, %v536_v22 }
 0x152   :  { %v542_v28 = vmul.f32 %v540_v20, %v3297_v6  ;;  %v541_v11 = vmul.f32 %v537_v39, %v3274_v47 }
 0x154   :  { %v611_v23 = vmul.f32 %v609_v32, %v542_v28  ;;  %v610_v34 = vmul.f32 %v609_v32, %v541_v11 }
 0x156   :  { %v613_v12 = vadd.f32 %v611_v23, %v607_v42  ;;  %v612_v61 = vadd.f32 %v610_v34, %v606_v54 }
 0x158   :  { %v549_v43 = vpop.permute.xlu0 %548 }
 0x159   :  { %v553_v15 = vsel %vm228_vm6, %v549_v43, 0.0  ;;  %v550_v49 = vsel %vm228_vm6, %v3514_v60, %v549_v43  ;;  %v735_v60 = vld [vmem:[%s6118_s2] sm:$0xf] }
 0x15a   :  { %v617_v44 = vmul.f32 %v615_v5, %v553_v15  ;;  %v616_v56 = vmul.f32 %v615_v5, %v550_v49  ;;  %737 = vst [vmem:[#allocation1] ss:$4 sm:$0xff] %v735_v60 }
 0x15c   :  { %v619_v46 = vadd.f32 %v617_v44, %v613_v12  ;;  %v618_v0 = vadd.f32 %v616_v56, %v612_v61 }
 0x15e   :  { %v625_v53 = vadd.f32 %v623_v63, %v619_v46 }
 0x160   :  { %v627_v57 = vsub.f32 0.0, %v625_v53  ;;  %v558_v58 = vpop.permute.xlu1 %557 }
 0x161   :  { %v561_v59 = vsel %vm6131_vm7, %v558_v58, %v560_v24  ;;  %v3560_v24 = vld.sshfl [vmem:[#allocation1] sm:$0xff pattern:$0x73625140]  ;;  %v3562_v51 = vld.sshfl [vmem:[#allocation1 + $0x8] sm:$0xff pattern:$0x73625140] }
 0x162   :  { %v630_v62 = vmul.f32 1.442695, %v627_v57  ;;  %v565_v1 = vmul.f32 %v561_v59, %v3281_v52  ;;  %756 = vst [vmem:[#allocation1] ss:$4 sm:$0xff] %v3203_v3  ;;  %vm667_vm7 = vcmask 1041408  }
 0x164   :  { %2984 = vpow2.f32 %v630_v62  ;;  %v622_v2 = vmul.f32 %v621_v35, %v565_v1 }
 0x166   :  { %v624_v48 = vadd.f32 %v622_v2, %v618_v0 }
 0x168   :  { %v626_v4 = vsub.f32 0.0, %v624_v48 }
 0x16a   :  { %v2985_v7 = vpop.eup %2984  ;;  %v628_v55 = vmul.f32 1.442695, %v626_v4 }
 0x16b   :  { %v633_v41 = vadd.f32 1.0, %v2985_v7 }
 0x16c   :  { %2986 = vpow2.f32 %v628_v55 }
 0x16d   :  { %2988 = vrcp.f32 %v633_v41  ;;  %v660_v20 = vand.u32 2147483648, %v633_v41  ;;  %vm654_vm9 = vweird.f32 %v633_v41  ;;  %v658_v30 = vand.u32 2147483647, %v633_v41 }
 0x16f   :  { %v661_v17 = vor.u32 1.1754944e-38, %v660_v20  ;;  %vm659_vm12 = vcmp.eq.f32.partialorder %v658_v30, 8.507059e+37 }
 0x172   :  { %v2987_v9 = vpop.eup %2986 }
 0x173   :  { %v2989_v14 = vpop.eup %2988  ;;  %v632_v22 = vadd.f32 1.0, %v2987_v9 }
 0x174   :  { %v650_v50 = vmul.f32 %v2989_v14, %v633_v41  ;;  %vm655_vm8 = vweird.f32 %v2989_v14 }
 0x175   :  { %2990 = vrcp.f32 %v632_v22  ;;  %vm656_vm10 = vmor %vm654_vm9, %vm655_vm8  ;;  %v645_v13 = vand.u32 2147483648, %v632_v22  ;;  %v643_v3 = vand.u32 2147483647, %v632_v22  ;;  %vm639_vm13 = vweird.f32 %v632_v22 }
 0x176   :  { %v651_v16 = vsub.f32 1.0, %v650_v50 }
 0x177   :  { %v646_v23 = vor.u32 1.1754944e-38, %v645_v13  ;;  %vm644_vm15 = vcmp.eq.f32.partialorder %v643_v3, 8.507059e+37 }
 0x178   :  { %v652_v19 = vmul.f32 %v2989_v14, %v651_v16 }
 0x17a   :  { %v653_v10 = vadd.f32 %v2989_v14, %v652_v19 }
 0x17b   :  { %v2991_v26 = vpop.eup %2990 }
 0x17c   :  { %v635_v28 = vmul.f32 %v2991_v26, %v632_v22  ;;  %v657_v31 = vsel %vm656_vm10, %v2989_v14, %v653_v10  ;;  %vm640_vm11 = vweird.f32 %v2991_v26 }
 0x17d   :  { %v662_v37 = vsel %vm659_vm12, %v661_v17, %v657_v31  ;;  %vm641_vm14 = vmor %vm639_vm13, %vm640_vm11 }
 0x17e   :  { %v636_v32 = vsub.f32 1.0, %v635_v28  ;;  %v666_v39 = vrot.slane %v662_v37, 6  ;;  %v672_v5 = vmul.f32 %v662_v37, %v662_v37  ;;  %v731_v19 = vmul.f32 0.125, %v662_v37 }
 0x180   :  { %v637_v36 = vmul.f32 %v2991_v26, %v636_v32  ;;  %v674_v40 = vsel %vm667_vm7, %v672_v5, 0.0  ;;  %v695_v59 = vmul.f32 0.125, %v672_v5  ;;  %v2998_v5 = vld [vmem:[%s6116_s0] sm:$0xf] }
 0x182   :  { %v638_v29 = vadd.f32 %v2991_v26, %v637_v36  ;;  %v758_v36 = vld.sshfl [vmem:[#allocation1 + $0x8] sm:$0xff pattern:$0x73625140] }
 0x184   :  { %v642_v38 = vsel %vm641_vm14, %v2991_v26, %v638_v29 }
 0x185   :  { %v647_v35 = vsel %vm644_vm15, %v646_v23, %v642_v38 }
 0x186   :  { %v671_v42 = vmul.f32 %v647_v35, %v647_v35  ;;  %v3566_v27 = vsel %vm667_vm7, %v647_v35, %v666_v39  ;;  %v730_v30 = vmul.f32 0.125, %v647_v35 }
 0x187   :  { %670 = vst [vmem:[%s6130_s14] sm:$0xf] %v3566_v27  ;;  %s769_s14 = sld [smem:[#allocation9]]  ;;  %v734_v35 = vmul.f32 %v2998_v5, %v3566_v27 }
 0x188   :  { %v673_v43 = vsel %vm667_vm7, %v671_v42, 0.0  ;;  %v694_v58 = vmul.f32 0.125, %v671_v42  ;;  %v757_v42 = vld.sshfl [vmem:[#allocation1] sm:$0xff pattern:$0x73625140] }
 0x189   :  { %v675_v15 = vadd.f32 %v674_v40, %v673_v43 }
 0x18b   :  { %676 = vadd.xlane.f32.xlu0 %v675_v15 }
 0x1fe   :  { %v677_v11 = vpop.xlane.xlu0 %676 }
 0x1ff   :  { %2992 = vrsqrt.f32 %v677_v11  ;;  %vm685_vm8 = vcmp.eq.f32.partialorder %v677_v11, inf  ;;  %v688_v21 = vand.u32 2147483648, %v677_v11  ;;  %vm687_vm9 = vcmp.eq.f32.partialorder %v677_v11, 0.0 }
 0x205   :  { %v2993_v12 = vpop.eup %2992 }
 0x206   :  { %v679_v44 = vmul.f32 %v2993_v12, %v677_v11 }
 0x208   :  { %v680_v63 = vmul.f32 %v2993_v12, %v679_v44 }
 0x20a   :  { %v681_v33 = vmul.f32 0.5, %v680_v63  ;;  %v770_v63 = vstv %s769_s14  ;;  %s3661_s14 = sld [smem:[#allocation6 + $0x37]] }
 0x20c   :  { %v682_v45 = vsub.f32 1.5, %v681_v33 }
 0x20e   :  { %v683_v46 = vmul.f32 %v2993_v12, %v682_v45 }
 0x210   :  { %v684_v49 = vmul.f32 %v683_v46, %v677_v11  ;;  %v773_v46 = vstv %s772_s15  ;;  %s3663_s15 = sld [smem:[#allocation8 + $0x3]] }
 0x212   :  { %v686_v34 = vsel %vm685_vm8, %v677_v11, %v684_v49 }
 0x213   :  { %v689_v53 = vsel %vm687_vm9, %v688_v21, %v686_v34 }
 0x214   :  { %v690_v54 = vmul.f32 1.7320508, %v689_v53 }
 0x216   :  { %v691_v56 = vmul.f32 0.01275776, %v690_v54 }
 0x218   :  { %v3574_v57 = vmax.f32 %v691_v56, 1e-06 }
 0x21a   :  { %v693_v61 = vmul.f32 %v3574_v57, %v3574_v57  ;;  %v743_v41 = vmul.f32 %v3562_v51, %v3574_v57  ;;  %v742_v17 = vmul.f32 %v3560_v24, %v3574_v57 }
 0x21c   :  { %v696_v62 = vadd.f32 %v694_v58, %v693_v61  ;;  %v697_v1 = vadd.f32 %v695_v59, %v693_v61  ;;  %v746_v28 = vrot.slane %v743_v41, 6 }
 0x21e   :  { %2994 = vrcp.f32 %v696_v62  ;;  %v709_v7 = vand.u32 2147483648, %v696_v62  ;;  %v707_v14 = vand.u32 2147483647, %v696_v62  ;;  %v724_v22 = vand.u32 2147483648, %v697_v1 }
 0x21f   :  { %2996 = vrcp.f32 %v697_v1  ;;  %v722_v16 = vand.u32 2147483647, %v697_v1  ;;  %vm703_vm12 = vweird.f32 %v696_v62  ;;  %vm718_vm14 = vweird.f32 %v697_v1 }
 0x220   :  { %v710_v26 = vor.u32 1.1754944e-38, %v709_v7  ;;  %vm708_vm15 = vcmp.eq.f32.partialorder %v707_v14, 8.507059e+37  ;;  %v725_v51 = vor.u32 1.1754944e-38, %v724_v22  ;;  %v747_v39 = vsel %vm667_vm7, %v742_v17, %v746_v28  ;;  %v2741_v7 = vld [vmem:[%s6118_s2 + $0x4] sm:$0xf] }
 0x221   :  { %vm723_vm9 = vcmp.eq.f32.partialorder %v722_v16, 8.507059e+37  ;;  %v749_v40 = vadd.f32 %v747_v39, %v734_v35 }
 0x224   :  { %v2995_v0 = vpop.eup %2994 }
 0x225   :  { %v2997_v2 = vpop.eup %2996  ;;  %v699_v48 = vmul.f32 %v2995_v0, %v696_v62  ;;  %vm704_vm10 = vweird.f32 %v2995_v0 }
 0x226   :  { %v714_v4 = vmul.f32 %v2997_v2, %v697_v1  ;;  %vm719_vm11 = vweird.f32 %v2997_v2  ;;  %vm705_vm13 = vmor %vm703_vm12, %vm704_vm10  ;;  %vm6329_vm10 = vcmask 908288  }
 0x227   :  { %v700_v60 = vsub.f32 1.0, %v699_v48  ;;  %vm720_vm8 = vmor %vm718_vm14, %vm719_vm11 }
 0x228   :  { %v715_v55 = vsub.f32 1.0, %v714_v4  ;;  %vm6330_vm11 = vmmov %vm6329_vm10 }
 0x229   :  { %v701_v9 = vmul.f32 %v2995_v0, %v700_v60  ;;  %vm6441_vm12 = vmmov %vm6329_vm10 }
 0x22a   :  { %v716_v50 = vmul.f32 %v2997_v2, %v715_v55 }
 0x22b   :  { %v702_v10 = vadd.f32 %v2995_v0, %v701_v9 }
 0x22c   :  { %v717_v20 = vadd.f32 %v2997_v2, %v716_v50 }
 0x22d   :  { %v706_v32 = vsel %vm705_vm13, %v2995_v0, %v702_v10  ;;  %v2999_v10 = vld [vmem:[%s6116_s0 + $0x4] sm:$0xf]  ;;  %vm6484_vm13 = vmmov %vm6329_vm10 }
 0x22e   :  { %v711_v31 = vsel %vm708_vm15, %v710_v26, %v706_v32  ;;  %v721_v13 = vsel %vm720_vm8, %v2997_v2, %v717_v20  ;;  %v876_v26 = vmul.f32 %v2999_v10, %v3566_v27 }
 0x22f   :  { %v726_v3 = vsel %vm723_vm9, %v725_v51, %v721_v13  ;;  %v732_v37 = vmul.f32 %v730_v30, %v711_v31  ;;  %v3582_v29 = vmul.f32 %v711_v31, %v693_v61  ;;  %v908_v13 = vstv %s2742_s24  ;;  %s3676_s24 = sld [smem:[#allocation6 + $0x6d]] }
 0x230   :  { %v3584_v23 = vmul.f32 %v726_v3, %v693_v61  ;;  %v733_v38 = vmul.f32 %v731_v19, %v726_v3  ;;  %v911_v3 = vstv %s2743_s25  ;;  %s3682_s25 = sld [smem:[#allocation6 + $0xa2]] }
 0x231   :  { %v761_v11 = vmul.f32 %v757_v42, %v3582_v29 }
 0x232   :  { %v752_v43 = vrot.slane %v733_v38, 6  ;;  %v762_v24 = vmul.f32 %v758_v36, %v3584_v23 }
 0x234   :  { %v3593_v15 = vsel %vm667_vm7, %v732_v37, %v752_v43  ;;  %v765_v12 = vrot.slane %v762_v24, 6 }
 0x235   :  { %v755_v44 = vmul.f32 %v3593_v15, %v749_v40 }
 0x236   :  { %v766_v33 = vsel %vm667_vm7, %v761_v11, %v765_v12  ;;  %v1162_v11 = vstv %s3642_s26  ;;  %v1353_v12 = vstv %s3644_s27  ;;  %s3739_s26 = sld [smem:[#allocation6 + $0x38]] }
 0x237   :  { %v768_v45 = vadd.f32 %v766_v33, %v755_v44  ;;  %v1159_v44 = vstv %s3646_s9  ;;  %v1735_v33 = vstv %s3665_s16  ;;  %s3741_s27 = sld [smem:[#allocation6 + $0x3]] }
 0x238   :  { %s3747_s9 = sld [smem:[#allocation6 + $0x53]] }
 0x239   :  { %v771_v49 = vsub.f32 %v768_v45, %v770_v63  ;;  %v1544_v63 = vstv %s3655_s30  ;;  %v1926_v45 = vstv %s3674_s3  ;;  %s3775_s30 = sld [smem:[#allocation6 + $0x39]] }
 0x23a   :  { %s3839_s16 = sld [smem:[#allocation6 + $0xa5]] }
 0x23b   :  { %v3598_v21 = vmul.f32 %v773_v46, %v771_v49  ;;  %v1350_v46 = vstv %s3648_s28  ;;  %v1541_v49 = vstv %s3650_s29  ;;  %s3764_s28 = sld [smem:[#allocation6 + $0x1e]]  ;;  %s6208_s29 = smov 113  }
 0x23c   :  { %s3912_s3 = sld [smem:[#allocation6 + $0x16]] }
 0x23d   :  { %776 = vst [vmem:[#allocation1] ss:$4 sm:$0xff] %v3598_v21 }
 0x244   :  { %v777_v34 = vld.sshfl [vmem:[#allocation1] sm:$0xff pattern:$0x73625140]  ;;  %v778_v53 = vld.sshfl [vmem:[#allocation1 + $0x8] sm:$0xff pattern:$0x73625140] }
 0x245   :  { %789 = vst [vmem:[#allocation1] ss:$4 sm:$0xff] %v3598_v21  ;;  %781 = vrot.lane.b32.xlu2 %v778_v53, %s6132_s10  ;;  %779 = vrot.lane.b32.xlu1 %v777_v34, %s6132_s10  ;;  %v1732_v34 = vstv %s3663_s15  ;;  %v1923_v53 = vstv %s3672_s22  ;;  %s3832_s15 = sld [smem:[#allocation6 + $0xa4]] }
 0x246   :  { %s3899_s22 = sld [smem:[#allocation6 + $0xd]] }
 0x24c   :  { %v790_v54 = vld.sshfl [vmem:[#allocation1] sm:$0xff pattern:$0x73625140]  ;;  %v791_v56 = vld.sshfl [vmem:[#allocation1 + $0x8] sm:$0xff pattern:$0x73625140] }
 0x24d   :  { %800 = vst [vmem:[#allocation1] ss:$4 sm:$0xff] %v3598_v21  ;;  %794 = vrot.lane.b32.xlu2 %v791_v56, %s6134_s17  ;;  %792 = vrot.lane.b32.xlu1 %v790_v54, %s6134_s17 }
 0x254   :  { %v801_v58 = vld.sshfl [vmem:[#allocation1] sm:$0xff pattern:$0x73625140]  ;;  %v802_v59 = vld.sshfl [vmem:[#allocation1 + $0x8] sm:$0xff pattern:$0x73625140] }
 0x255   :  { %813 = vst [vmem:[#allocation1] ss:$4 sm:$0xff] %v3598_v21  ;;  %805 = vrot.lane.b32.xlu2 %v802_v59, %s6146_s18  ;;  %803 = vrot.lane.b32.xlu1 %v801_v58, %s6146_s18  ;;  %v2114_v59 = vstv %s3678_s6  ;;  %s3879_s6 = sld [smem:[#allocation9 + $0x2]] }
 0x25c   :  { %v814_v61 = vld.sshfl [vmem:[#allocation1] sm:$0xff pattern:$0x73625140]  ;;  %v815_v62 = vld.sshfl [vmem:[#allocation1 + $0x8] sm:$0xff pattern:$0x73625140] }
 0x25d   :  { %826 = vst [vmem:[#allocation1] ss:$4 sm:$0xff] %v3598_v21  ;;  %818 = vrot.lane.b32.xlu2 %v815_v62, %s6144_s19  ;;  %816 = vrot.lane.b32.xlu1 %v814_v61, %s6144_s19  ;;  %v2117_v61 = vstv %s3680_s1  ;;  %v2308_v62 = vstv %s3682_s25  ;;  %s3884_s1 = sld [smem:[#allocation11 + $0x2]] }
 0x25e   :  { %s3892_s25 = sld [smem:[#allocation6 + $0x4]] }
 0x264   :  { %v827_v1 = vld.sshfl [vmem:[#allocation1] sm:$0xff pattern:$0x73625140]  ;;  %v828_v0 = vld.sshfl [vmem:[#allocation1 + $0x8] sm:$0xff pattern:$0x73625140] }
 0x265   :  { %839 = vst [vmem:[#allocation1] ss:$4 sm:$0xff] %v3598_v21  ;;  %831 = vrot.lane.b32.xlu2 %v828_v0, %s6142_s20  ;;  %829 = vrot.lane.b32.xlu1 %v827_v1, %s6142_s20  ;;  %s3699_s20 = sld [smem:[#allocation6 + $0xbe]] }
 0x26c   :  { %v840_v2 = vld.sshfl [vmem:[#allocation1] sm:$0xff pattern:$0x73625140]  ;;  %v841_v48 = vld.sshfl [vmem:[#allocation1 + $0x8] sm:$0xff pattern:$0x73625140] }
 0x26d   :  { %852 = vst [vmem:[#allocation1] ss:$4 sm:$0xff] %v3598_v21  ;;  %844 = vrot.lane.b32.xlu2 %v841_v48, %s6140_s21  ;;  %842 = vrot.lane.b32.xlu1 %v840_v2, %s6140_s21  ;;  %s3695_s21 = sld [smem:[#allocation6 + $0xa3]]  ;;  %v1168_v48 = vstv %s3657_s5  ;;  %s6209_s5 = smov 112  }
 0x274   :  { %v853_v4 = vld.sshfl [vmem:[#allocation1] sm:$0xff pattern:$0x73625140]  ;;  %v854_v60 = vld.sshfl [vmem:[#allocation1 + $0x8] sm:$0xff pattern:$0x73625140] }
 0x275   :  { %863 = vst [vmem:[#allocation1] ss:$4 sm:$0xff] %v3598_v21  ;;  %857 = vrot.lane.b32.xlu1 %v854_v60, %s6138_s23  ;;  %855 = vrot.lane.b32.xlu0 %v853_v4, %s6138_s23  ;;  %s3693_s23 = sld [smem:[#allocation8 + $0x7]] }
 0x27c   :  { %v864_v55 = vld.sshfl [vmem:[#allocation1] sm:$0xff pattern:$0x73625140]  ;;  %v865_v41 = vld.sshfl [vmem:[#allocation1 + $0x8] sm:$0xff pattern:$0x73625140] }
 0x27d   :  { %880 = vst [vmem:[#allocation1] ss:$4 sm:$0xff] %v2741_v7  ;;  %868 = vrot.lane.b32.xlu1 %v865_v41, %s6136_s7  ;;  %866 = vrot.lane.b32.xlu2 %v864_v55, %s6136_s7  ;;  %s3691_s7 = sld [smem:[#allocation6 + $0x88]]  ;;  %v1359_v55 = vstv %s3659_s8  ;;  %v1550_v41 = vstv %s3661_s14 }
 0x27e   :  { %s3821_s8 = sld [smem:[#allocation6 + $0x89]] }
 0x27f   :  { %s3826_s14 = sld [smem:[#allocation6 + $0x8a]] }
 0x284   :  { %v881_v9 = vld.sshfl [vmem:[#allocation1] sm:$0xff pattern:$0x73625140]  ;;  %v882_v14 = vld.sshfl [vmem:[#allocation1 + $0x8] sm:$0xff pattern:$0x73625140] }
 0x285   :  { %v886_v22 = vmul.f32 %v882_v14, %v3574_v57  ;;  %894 = vst [vmem:[#allocation1] ss:$4 sm:$0xff] %v3236_v25  ;;  %v885_v50 = vmul.f32 %v881_v9, %v3574_v57  ;;  %v1741_v9 = vstv %s3667_s4  ;;  %v1932_v14 = vstv %s3676_s24  ;;  %s3845_s4 = sld [smem:[#allocation6 + $0xbf]] }
 0x286   :  { %s3854_s24 = sld [smem:[#allocation6 + $0xc0]] }
 0x287   :  { %v889_v16 = vrot.slane %v886_v22, 6  ;;  %v2123_v22 = vstv %s3691_s7  ;;  %s3804_s7 = sld [smem:[#allocation6 + $0x6f]] }
 0x289   :  { %v890_v19 = vsel %vm667_vm7, %v885_v50, %v889_v16  ;;  %v2496_v50 = vstv %s3693_s23  ;;  %s3737_s23 = sld [smem:[#allocation6 + $0x1d]] }
 0x28a   :  { %v892_v20 = vadd.f32 %v890_v19, %v876_v26 }
 0x28c   :  { %v895_v28 = vld.sshfl [vmem:[#allocation1] sm:$0xff pattern:$0x73625140]  ;;  %v896_v30 = vld.sshfl [vmem:[#allocation1 + $0x8] sm:$0xff pattern:$0x73625140]  ;;  %v893_v31 = vmul.f32 %v892_v20, %v3593_v15 }
 0x28d   :  { %v900_v32 = vmul.f32 %v896_v30, %v3584_v23  ;;  %v899_v25 = vmul.f32 %v895_v28, %v3582_v29 }
 0x28f   :  { %v903_v51 = vrot.slane %v900_v32, 6  ;;  %v2314_v32 = vstv %s3695_s21  ;;  %s3784_s21 = sld [smem:[#allocation6 + $0x54]] }
 0x291   :  { %v904_v17 = vsel %vm667_vm7, %v899_v25, %v903_v51  ;;  %v2505_v25 = vstv %s3699_s20  ;;  %s3794_s20 = sld [smem:[#allocation6 + $0x6e]] }
 0x292   :  { %v906_v36 = vadd.f32 %v904_v17, %v893_v31 }
 0x294   :  { %v909_v37 = vsub.f32 %v906_v36, %v908_v13 }
 0x296   :  { %v3639_v38 = vmul.f32 %v911_v3, %v909_v37 }
 0x298   :  { %914 = vst [vmem:[#allocation1] ss:$4 sm:$0xff] %v3639_v38 }
 0x29f   :  { %v915_v39 = vld.sshfl [vmem:[#allocation1] sm:$0xff pattern:$0x73625140]  ;;  %v916_v5 = vld.sshfl [vmem:[#allocation1 + $0x8] sm:$0xff pattern:$0x73625140]  ;;  %v782_v40 = vpop.permute.xlu2 %781 }
 0x2a0   :  { %927 = vst [vmem:[#allocation1] ss:$4 sm:$0xff] %v3639_v38  ;;  %919 = vrot.lane.b32.xlu0 %v916_v5, %s6132_s10  ;;  %917 = vrot.lane.b32.xlu2 %v915_v39, %s6132_s10  ;;  %s3684_s10 = sld [smem:[#allocation6 + $0xbd]] }
 0x2a6   :  { %v2499_v1 = vstv %s3684_s10  ;;  %s6207_s10 = smov 127  }
 0x2a7   :  { %v928_v35 = vld.sshfl [vmem:[#allocation1] sm:$0xff pattern:$0x73625140]  ;;  %v929_v42 = vld.sshfl [vmem:[#allocation1 + $0x8] sm:$0xff pattern:$0x73625140]  ;;  %v795_v16 = vpop.permute.xlu2 %794 }
 0x2a8   :  { %938 = vst [vmem:[#allocation1] ss:$4 sm:$0xff] %v3639_v38  ;;  %932 = vrot.lane.b32.xlu2 %v929_v42, %s6134_s17  ;;  %930 = vrot.lane.b32.xlu1 %v928_v35, %s6134_s17  ;;  %s3689_s17 = sld [smem:[#allocation8 + $0x6]] }
 0x2ae   :  { %v2305_v4 = vstv %s3689_s17  ;;  %s3733_s17 = sld [smem:[#allocation6 + $0x2]] }
 0x2af   :  { %v939_v43 = vld.sshfl [vmem:[#allocation1] sm:$0xff pattern:$0x73625140]  ;;  %v940_v24 = vld.sshfl [vmem:[#allocation1 + $0x8] sm:$0xff pattern:$0x73625140] }
 0x2b0   :  { %951 = vst [vmem:[#allocation1] ss:$4 sm:$0xff] %v3639_v38  ;;  %943 = vrot.lane.b32.xlu1 %v940_v24, %s6146_s18  ;;  %941 = vrot.lane.b32.xlu0 %v939_v43, %s6146_s18  ;;  %s3921_s18 = sld [smem:[#allocation6 + $0x28]] }
 0x2b7   :  { %v952_v54 = vld.sshfl [vmem:[#allocation1] sm:$0xff pattern:$0x73625140]  ;;  %v953_v56 = vld.sshfl [vmem:[#allocation1 + $0x8] sm:$0xff pattern:$0x73625140]  ;;  %v780_v58 = vpop.permute.xlu1 %779 }
 0x2b8   :  { %964 = vst [vmem:[#allocation1] ss:$4 sm:$0xff] %v3639_v38  ;;  %v783_v0 = vsel %vm136_vm0, %v780_v58, %v782_v40  ;;  %v786_v2 = vsel %vm136_vm0, 0.0, %v780_v58  ;;  %956 = vrot.lane.b32.xlu0 %v953_v56, %s6144_s19  ;;  %954 = vrot.lane.b32.xlu2 %v952_v54, %s6144_s19  ;;  %s3918_s19 = sld [smem:[#allocation6 + $0x1f]] }
 0x2b9   :  { %v787_v60 = vmul.f32 %v786_v2, %v3274_v47  ;;  %v788_v7 = vmul.f32 %v783_v0, %v3297_v6 }
 0x2bb   :  { %v1163_v19 = vmul.f32 %v1162_v11, %v787_v60  ;;  %v1164_v10 = vmul.f32 %v1162_v11, %v788_v7  ;;  %v1354_v26 = vmul.f32 %v1353_v12, %v787_v60  ;;  %v1355_v20 = vmul.f32 %v1353_v12, %v788_v7 }
 0x2bc   :  { %v1545_v28 = vmul.f32 %v1544_v63, %v787_v60  ;;  %v1546_v30 = vmul.f32 %v1544_v63, %v788_v7  ;;  %v1736_v13 = vmul.f32 %v1735_v33, %v787_v60  ;;  %v1737_v17 = vmul.f32 %v1735_v33, %v788_v7 }
 0x2bd   :  { %v1165_v51 = vadd.f32 %v1163_v19, %v1159_v44  ;;  %v1166_v31 = vadd.f32 %v1164_v10, %v1159_v44  ;;  %v1356_v36 = vadd.f32 %v1354_v26, %v1350_v46  ;;  %v1357_v3 = vadd.f32 %v1355_v20, %v1350_v46 }
 0x2be   :  { %v1547_v37 = vadd.f32 %v1545_v28, %v1541_v49  ;;  %v1548_v39 = vadd.f32 %v1546_v30, %v1541_v49  ;;  %v1927_v42 = vmul.f32 %v1926_v45, %v787_v60  ;;  %v1928_v43 = vmul.f32 %v1926_v45, %v788_v7 }
 0x2bf   :  { %v965_v5 = vld.sshfl [vmem:[#allocation1] sm:$0xff pattern:$0x73625140]  ;;  %v966_v35 = vld.sshfl [vmem:[#allocation1 + $0x8] sm:$0xff pattern:$0x73625140]  ;;  %v2118_v24 = vmul.f32 %v2117_v61, %v787_v60  ;;  %v2119_v40 = vmul.f32 %v2117_v61, %v788_v7  ;;  %v793_v11 = vpop.permute.xlu1 %792  ;;  %v2309_v12 = vmul.f32 %v2308_v62, %v787_v60  ;;  %v2310_v63 = vmul.f32 %v2308_v62, %v788_v7 }
 0x2c0   :  { %977 = vst [vmem:[#allocation1] ss:$4 sm:$0xff] %v3639_v38  ;;  %v2500_v54 = vmul.f32 %v2499_v1, %v787_v60  ;;  %v2501_v56 = vmul.f32 %v2499_v1, %v788_v7  ;;  %v1738_v44 = vadd.f32 %v1736_v13, %v1732_v34  ;;  %v1739_v58 = vadd.f32 %v1737_v17, %v1732_v34 }
 0x2c1   :  { %v1929_v33 = vadd.f32 %v1927_v42, %v1923_v53  ;;  %v1930_v0 = vadd.f32 %v1928_v43, %v1923_v53  ;;  %969 = vrot.lane.b32.xlu2 %v966_v35, %s6207_s10  ;;  %v2120_v46 = vadd.f32 %v2118_v24, %v2114_v59  ;;  %v2121_v49 = vadd.f32 %v2119_v40, %v2114_v59  ;;  %v806_v59 = vpop.permute.xlu2 %805 }
 0x2c2   :  { %v2311_v2 = vadd.f32 %v2309_v12, %v2305_v4  ;;  %v2312_v19 = vadd.f32 %v2310_v63, %v2305_v4  ;;  %967 = vrot.lane.b32.xlu1 %v965_v5, %s6207_s10  ;;  %v2502_v45 = vadd.f32 %v2500_v54, %v2496_v50  ;;  %v2503_v61 = vadd.f32 %v2501_v56, %v2496_v50  ;;  %s4063_s10 = sld [smem:[#allocation6 + $0x3c]] }
 0x2c3   :  { %v796_v62 = vsel %vm155_vm1, %v793_v11, %v795_v16  ;;  %v799_v1 = vsel %vm155_vm1, 0.0, %v793_v11  ;;  %v1174_v63 = vstv %s3733_s17  ;;  %v1365_v54 = vstv %s3737_s23  ;;  %s3944_s17 = sld [smem:[#allocation6 + $0x3a]] }
 0x2c4   :  { %v1169_v34 = vmul.f32 %v1168_v48, %v799_v1  ;;  %v1170_v53 = vmul.f32 %v1168_v48, %v796_v62  ;;  %v1360_v60 = vmul.f32 %v1359_v55, %v799_v1  ;;  %v1361_v7 = vmul.f32 %v1359_v55, %v796_v62  ;;  %s3954_s23 = sld [smem:[#allocation6 + $0x4c]] }
 0x2c5   :  { %v1551_v4 = vmul.f32 %v1550_v41, %v799_v1  ;;  %v1552_v10 = vmul.f32 %v1550_v41, %v796_v62  ;;  %v1742_v26 = vmul.f32 %v1741_v9, %v799_v1  ;;  %v1743_v20 = vmul.f32 %v1741_v9, %v796_v62 }
 0x2c6   :  { %v3743_v50 = vadd.f32 %v1169_v34, %v1165_v51  ;;  %v1172_v16 = vadd.f32 %v1170_v53, %v1166_v31  ;;  %v3745_v28 = vadd.f32 %v1360_v60, %v1356_v36  ;;  %v1363_v48 = vadd.f32 %v1361_v7, %v1357_v3 }
 0x2c7   :  { %v978_v55 = vld.sshfl [vmem:[#allocation1] sm:$0xff pattern:$0x73625140]  ;;  %v979_v41 = vld.sshfl [vmem:[#allocation1 + $0x8] sm:$0xff pattern:$0x73625140]  ;;  %v3749_v9 = vadd.f32 %v1551_v4, %v1547_v37  ;;  %v1554_v30 = vadd.f32 %v1552_v10, %v1548_v39  ;;  %v3751_v13 = vadd.f32 %v1742_v26, %v1738_v44  ;;  %v1745_v51 = vadd.f32 %v1743_v20, %v1739_v58  ;;  %v3753_v17 = vpop.permute.xlu1 %803 }
 0x2c8   :  { %990 = vst [vmem:[#allocation1] ss:$4 sm:$0xff] %v3639_v38  ;;  %v1933_v31 = vmul.f32 %v1932_v14, %v799_v1  ;;  %v1934_v36 = vmul.f32 %v1932_v14, %v796_v62  ;;  %v2124_v3 = vmul.f32 %v2123_v22, %v799_v1  ;;  %v2125_v5 = vmul.f32 %v2123_v22, %v796_v62  ;;  %6231 = sst [smem:[#allocation36_spill]] %s4063_s10 }
 0x2c9   :  { %v2315_v37 = vmul.f32 %v2314_v32, %v799_v1  ;;  %v2316_v39 = vmul.f32 %v2314_v32, %v796_v62  ;;  %v2506_v35 = vmul.f32 %v2505_v25, %v799_v1  ;;  %v2507_v42 = vmul.f32 %v2505_v25, %v796_v62  ;;  %980 = vrot.lane.b32.xlu0 %v978_v55, %s6208_s29  ;;  %s4078_s10 = sld [smem:[#allocation6 + $0x8d]] }
 0x2ca   :  { %v3777_v14 = vadd.f32 %v1933_v31, %v1929_v33  ;;  %v1936_v22 = vadd.f32 %v1934_v36, %v1930_v0  ;;  %v3779_v43 = vadd.f32 %v2124_v3, %v2120_v46  ;;  %v3781_v24 = vadd.f32 %v2125_v5, %v2121_v49  ;;  %982 = vrot.lane.b32.xlu1 %v979_v41, %s6208_s29  ;;  %v819_v0 = vpop.permute.xlu2 %818  ;;  %s4061_s29 = sld [smem:[#allocation6 + $0x3b]] }
 0x2cb   :  { %v3786_v32 = vadd.f32 %v2315_v37, %v2311_v2  ;;  %v3788_v25 = vadd.f32 %v2316_v39, %v2312_v19  ;;  %v3790_v40 = vadd.f32 %v2506_v35, %v2502_v45  ;;  %v3792_v11 = vadd.f32 %v2507_v42, %v2503_v61 }
 0x2cc   :  { %v807_v12 = vsel %vm167_vm2, %v3753_v17, %v806_v59  ;;  %v1556_v44 = vstv %s3739_s26  ;;  %v1747_v19 = vstv %s3747_s9  ;;  %v1180_v61 = vstv %s3741_s27  ;;  %s3948_s27 = sld [smem:[#allocation6 + $0x43]] }
 0x2cd   :  { %v3801_v56 = vmul.f32 %v807_v12, %v3299_v8  ;;  %v1371_v62 = vstv %s3764_s28  ;;  %v1562_v7 = vstv %s3775_s30  ;;  %v1753_v10 = vstv %s3784_s21  ;;  %s3979_s26 = sld [smem:[#allocation6 + $0x70]] }
 0x2ce   :  { %v1938_v55 = vstv %s3794_s20  ;;  %v1944_v37 = vstv %s3804_s7  ;;  %s3987_s9 = sld [smem:[#allocation6 + $0x79]] }
 0x2cf   :  { %v991_v58 = vld.sshfl [vmem:[#allocation1] sm:$0xff pattern:$0x73625140]  ;;  %v992_v33 = vld.sshfl [vmem:[#allocation1 + $0x8] sm:$0xff pattern:$0x73625140]  ;;  %v817_v46 = vpop.permute.xlu1 %816  ;;  %v1176_v49 = vmul.f32 %v1174_v63, %v3801_v56  ;;  %v1367_v2 = vmul.f32 %v1365_v54, %v3801_v56  ;;  %v1558_v1 = vmul.f32 %v1556_v44, %v3801_v56  ;;  %v1749_v4 = vmul.f32 %v1747_v19, %v3801_v56 }
 0x2d0   :  { %1001 = vst [vmem:[#allocation1] ss:$4 sm:$0xff] %v3639_v38  ;;  %v820_v45 = vsel %vm186_vm3, %v817_v46, %v819_v0  ;;  %993 = vrot.lane.b32.xlu2 %v991_v58, %s6209_s5  ;;  %v1940_v5 = vmul.f32 %v1938_v55, %v3801_v56  ;;  %v2129_v58 = vstv %s3821_s8  ;;  %v810_v0 = vsel %vm167_vm2, 0.0, %v3753_v17  ;;  %s3996_s28 = sld [smem:[#allocation6 + $0x82]] }
 0x2d1   :  { %v825_v34 = vmul.f32 %v820_v45, %v3297_v6  ;;  %995 = vrot.lane.b32.xlu0 %v992_v33, %s6209_s5  ;;  %v1178_v53 = vadd.f32 %v1176_v49, %v1172_v16  ;;  %v1369_v60 = vadd.f32 %v1367_v2, %v1363_v48  ;;  %v1560_v59 = vadd.f32 %v1558_v1, %v1554_v30  ;;  %v2744_v30 = vld [vmem:[%s6118_s2 + $0x8] sm:$0xf]  ;;  %s6211_s2 = smov 111   ;;  %s4002_s30 = sld [smem:[#allocation6 + $0x8b]] }
 0x2d2   :  { %v1751_v48 = vadd.f32 %v1749_v4, %v1745_v51  ;;  %v1942_v12 = vadd.f32 %v1940_v5, %v1936_v22  ;;  %v2135_v33 = vstv %s3826_s14  ;;  %v2131_v2 = vmul.f32 %v2129_v58, %v3801_v56  ;;  %s4008_s21 = sld [smem:[#allocation6 + $0x94]]  ;;  %s6230_s5 = smov 17  }
 0x2d3   :  { %v1182_v26 = vmul.f32 %v1180_v61, %v825_v34  ;;  %v1373_v20 = vmul.f32 %v1371_v62, %v825_v34  ;;  %v1564_v16 = vmul.f32 %v1562_v7, %v825_v34  ;;  %v1755_v41 = vmul.f32 %v1753_v10, %v825_v34  ;;  %s4014_s20 = sld [smem:[#allocation6 + $0x9d]] }
 0x2d4   :  { %v1946_v42 = vmul.f32 %v1944_v37, %v825_v34  ;;  %v2137_v45 = vmul.f32 %v2135_v33, %v825_v34  ;;  %v823_v1 = vsel %vm186_vm3, 0.0, %v817_v46  ;;  %v2320_v22 = vstv %s3832_s15  ;;  %s4024_s7 = sld [smem:[#allocation6 + $0xa6]] }
 0x2d5   :  { %v3850_v31 = vadd.f32 %v1182_v26, %v1178_v53  ;;  %v3852_v36 = vadd.f32 %v1373_v20, %v1369_v60  ;;  %v3856_v3 = vadd.f32 %v1564_v16, %v1560_v59  ;;  %v3858_v51 = vadd.f32 %v1755_v41, %v1751_v48  ;;  %s4034_s8 = sld [smem:[#allocation6 + $0xaf]] }
 0x2d6   :  { %v3872_v49 = vadd.f32 %v1946_v42, %v1942_v12  ;;  %v2326_v53 = vstv %s3839_s16  ;;  %v2133_v60 = vadd.f32 %v2131_v2, %v3781_v24  ;;  %v2322_v17 = vmul.f32 %v2320_v22, %v3801_v56  ;;  %6218 = sst [smem:[#allocation24_spill]] %s3996_s28  ;;  %s6276_s28 = smov 127  }
 0x2d7   :  { %6210 = vst [vmem:[#allocation17_spill] sm:$0xff] %v3858_v51  ;;  %v1002_v39 = vld.sshfl [vmem:[#allocation1] sm:$0xff pattern:$0x73625140]  ;;  %v2328_v59 = vmul.f32 %v2326_v53, %v825_v34  ;;  %v3895_v4 = vmul.f32 %v810_v0, %v3281_v52  ;;  %v2511_v26 = vstv %s3845_s4  ;;  %v2517_v20 = vstv %s3854_s24  ;;  %s4037_s14 = sld [smem:[#allocation6 + $0xb8]] }
 0x2d8   :  { %v1003_v35 = vld.sshfl [vmem:[#allocation1 + $0x8] sm:$0xff pattern:$0x73625140]  ;;  %1004 = vrot.lane.b32.xlu1 %v1002_v39, %s6211_s2  ;;  %6212 = vst [vmem:[#allocation18_spill] sm:$0xff] %v3872_v49  ;;  %v3902_v46 = vmul.f32 %v823_v1, %v3274_v47  ;;  %v3904_v16 = vadd.f32 %v2137_v45, %v2133_v60  ;;  %v2324_v24 = vadd.f32 %v2322_v17, %v3788_v25  ;;  %s4040_s15 = sld [smem:[#allocation6 + $0xc1]] }
 0x2d9   :  { %1018 = vst [vmem:[#allocation1] ss:$4 sm:$0xff] %v2744_v30  ;;  %1006 = vrot.lane.b32.xlu2 %v1003_v35, %s6211_s2  ;;  %v2513_v48 = vmul.f32 %v2511_v26, %v3801_v56  ;;  %v2519_v5 = vmul.f32 %v2517_v20, %v825_v34  ;;  %v1175_v34 = vmul.f32 %v1174_v63, %v3895_v4  ;;  %6219 = sst [smem:[#allocation25_spill]] %s4014_s20 }
 0x2da   :  { %6213 = vst [vmem:[#allocation19_spill] sm:$0xff] %v3904_v16  ;;  %v3916_v35 = vadd.f32 %v2328_v59, %v2324_v24  ;;  %v1181_v12 = vmul.f32 %v1180_v61, %v3902_v46  ;;  %v1372_v0 = vmul.f32 %v1371_v62, %v3902_v46  ;;  %v1557_v62 = vmul.f32 %v1556_v44, %v3895_v4  ;;  %s4042_s16 = sld [smem:[#allocation6 + $0xca]] }
 0x2db   :  { %v2515_v25 = vadd.f32 %v2513_v48, %v3792_v11  ;;  %v1366_v11 = vmul.f32 %v1365_v54, %v3895_v4  ;;  %v1177_v2 = vadd.f32 %v1175_v34, %v3743_v50  ;;  %v1754_v44 = vmul.f32 %v1753_v10, %v3902_v46  ;;  %s4048_s4 = sld [smem:[#allocation6 + $0xd3]] }
 0x2dc   :  { %6214 = vst [vmem:[#allocation20_spill] sm:$0xff] %v3916_v35  ;;  %v1559_v50 = vadd.f32 %v1557_v62, %v3749_v9  ;;  %v2327_v34 = vmul.f32 %v2326_v53, %v3902_v46  ;;  %s4050_s24 = sld [smem:[#allocation6 + $0x5]]  ;;  %v1377_v62 = vstv %s3918_s19 }
 0x2dd   :  { %v1368_v54 = vadd.f32 %v1366_v11, %v3745_v28  ;;  %v3956_v1 = vadd.f32 %v1181_v12, %v1177_v2  ;;  %v1563_v28 = vmul.f32 %v1562_v7, %v3902_v46  ;;  %6222 = sst [smem:[#allocation28_spill]] %s4037_s14  ;;  %v1245_v2 = vstv %s3899_s22 }
 0x2de   :  { %s4056_s2 = sld [smem:[#allocation6 + $0x21]] }
 0x2df   :  { %v3961_v59 = vadd.f32 %v1372_v0, %v1368_v54  ;;  %v3982_v48 = vadd.f32 %v1563_v28, %v1559_v50  ;;  %6237 = sst [smem:[#allocation41_spill]] %s4078_s10  ;;  %v4086_v0 = vpop.permute.xlu1 %829 }
 0x2e0   :  { %v1019_v41 = vld.sshfl [vmem:[#allocation1] sm:$0xff pattern:$0x73625140]  ;;  %v1020_v30 = vld.sshfl [vmem:[#allocation1 + $0x8] sm:$0xff pattern:$0x73625140] }
 0x2e1   :  { %v1024_v39 = vmul.f32 %v1020_v30, %v3574_v57  ;;  %1032 = vst [vmem:[#allocation1] ss:$4 sm:$0xff] %v3311_v18  ;;  %v1023_v56 = vmul.f32 %v1019_v41, %v3574_v57  ;;  %v3932_v18 = vadd.f32 %v2519_v5, %v2515_v25  ;;  %v3000_v57 = vld [vmem:[%s6116_s0 + $0x8] sm:$0xf]  ;;  %s3970_s0 = sld [smem:[#allocation6 + $0x55]]  ;;  %v1945_v30 = vmul.f32 %v1944_v37, %v3902_v46 }
 0x2e2   :  { %v1014_v63 = vmul.f32 %v3000_v57, %v3566_v27  ;;  %v1748_v27 = vmul.f32 %v1747_v19, %v3895_v4  ;;  %6216 = vst [vmem:[#allocation22_spill] sm:$0xff] %v3982_v48  ;;  %v2130_v5 = vmul.f32 %v2129_v58, %v3895_v4  ;;  %6225 = sst [smem:[#allocation31_spill]] %s4048_s4 }
 0x2e3   :  { %v1027_v42 = vrot.slane %v1024_v39, 6  ;;  %6215 = vst [vmem:[#allocation21_spill] sm:$0xff] %v3932_v18  ;;  %v1049_v39 = vstv %s3884_s1  ;;  %6226 = sst [smem:[#allocation32_spill]] %s4050_s24 }
 0x2e4   :  { %v1750_v19 = vadd.f32 %v1748_v27, %v3751_v13  ;;  %v2132_v37 = vadd.f32 %v2130_v5, %v3779_v43  ;;  %s4054_s1 = sld [smem:[#allocation6 + $0x20]] }
 0x2e5   :  { %v1028_v61 = vsel %vm667_vm7, %v1023_v56, %v1027_v42  ;;  %v2136_v56 = vmul.f32 %v2135_v33, %v3902_v46  ;;  %v2321_v42 = vmul.f32 %v2320_v22, %v3895_v4  ;;  %v2518_v22 = vmul.f32 %v2517_v20, %v3902_v46  ;;  %6229 = sst [smem:[#allocation35_spill]] %s4056_s2  ;;  %v4082_v46 = vpop.permute.xlu2 %831 }
 0x2e6   :  { %v1030_v45 = vadd.f32 %v1028_v61, %v1014_v63  ;;  %v3984_v41 = vadd.f32 %v1754_v44, %v1750_v19  ;;  %s4065_s4 = sld [smem:[#allocation6 + $0x56]]  ;;  %v1186_v61 = vstv %s3892_s25  ;;  %v1818_v44 = vstv %s3974_s11 }
 0x2e7   :  { %v4028_v12 = vadd.f32 %v2136_v56, %v2132_v37  ;;  %v2323_v43 = vadd.f32 %v2321_v42, %v3786_v32  ;;  %s4067_s24 = sld [smem:[#allocation6 + $0x57]]  ;;  %v1759_v28 = vstv %s3970_s0  ;;  %v1950_v19 = vstv %s3979_s26  ;;  %v843_v37 = vpop.permute.xlu1 %842  ;;  %s6247_s0 = smov 1  }
 0x2e8   :  { %v1033_v60 = vld.sshfl [vmem:[#allocation1] sm:$0xff pattern:$0x73625140]  ;;  %v1034_v17 = vld.sshfl [vmem:[#allocation1 + $0x8] sm:$0xff pattern:$0x73625140]  ;;  %v1031_v10 = vmul.f32 %v1030_v45, %v3593_v15  ;;  %v1436_v45 = vstv %s3921_s18  ;;  %v4135_v56 = vmul.f32 %v1377_v62, %v3598_v21 }
 0x2e9   :  { %v1038_v24 = vmul.f32 %v1034_v17, %v3584_v23  ;;  %v1037_v9 = vmul.f32 %v1033_v60, %v3582_v29  ;;  %6217 = vst [vmem:[#allocation23_spill] sm:$0xff] %v3984_v41  ;;  %v1046_v23 = vstv %s3879_s6  ;;  %v1939_v29 = vmul.f32 %v1938_v55, %v3895_v4  ;;  %s4052_s6 = sld [smem:[#allocation6 + $0x6]] }
 0x2ea   :  { %6221 = vst [vmem:[#allocation27_spill] sm:$0xff] %v4028_v12  ;;  %v4044_v53 = vadd.f32 %v2327_v34, %v2323_v43  ;;  %6228 = sst [smem:[#allocation34_spill]] %s4054_s1  ;;  %v1568_v60 = vstv %s3944_s17  ;;  %v1627_v17 = vstv %s3948_s27  ;;  %v4145_v34 = vmul.f32 %v1759_v28, %v3598_v21 }
 0x2eb   :  { %v1041_v7 = vrot.slane %v1038_v24, 6  ;;  %v1941_v25 = vadd.f32 %v1939_v29, %v3777_v14  ;;  %v2512_v14 = vmul.f32 %v2511_v26, %v3895_v4  ;;  %s4071_s1 = sld [smem:[#allocation6 + $0x72]]  ;;  %v2332_v29 = vstv %s4024_s7 }
 0x2ec   :  { %6223 = vst [vmem:[#allocation29_spill] sm:$0xff] %v4044_v53  ;;  %s4073_s2 = sld [smem:[#allocation6 + $0x8c]]  ;;  %v4142_v42 = vmul.f32 %v1568_v60, %v3598_v21 }
 0x2ed   :  { %v1042_v13 = vsel %vm667_vm7, %v1037_v9, %v1041_v7  ;;  %v4016_v58 = vadd.f32 %v1945_v30, %v1941_v25  ;;  %v2514_v11 = vadd.f32 %v2512_v14, %v3790_v40  ;;  %6232 = sst [smem:[#allocation37_spill]] %s4067_s24  ;;  %v2009_v9 = vstv %s3987_s9  ;;  %v845_v5 = vpop.permute.xlu2 %844  ;;  %6241 = vst [vmem:[#allocation44_spill] sm:$0xff] %v4145_v34 }
 0x2ee   :  { %v1044_v15 = vadd.f32 %v1042_v13, %v1031_v10  ;;  %s4080_s24 = sld [smem:[#allocation6 + $0x7]]  ;;  %v2141_v10 = vstv %s4002_s30  ;;  %v2391_v30 = vstv %s4034_s8  ;;  %v4132_v25 = vmul.f32 %v1186_v61, %v3598_v21 }
 0x2ef   :  { %6220 = vst [vmem:[#allocation26_spill] sm:$0xff] %v4016_v58  ;;  %v4046_v4 = vadd.f32 %v2518_v22, %v2514_v11  ;;  %6227 = sst [smem:[#allocation33_spill]] %s4052_s6  ;;  %v4148_v14 = vmul.f32 %v1950_v19, %v3598_v21  ;;  %v4151_v43 = vmul.f32 %v2141_v10, %v3598_v21  ;;  %v4176_v61 = vmul.f32 %v1818_v44, %v3639_v38 }
 0x2f0   :  { %v1047_v55 = vsub.f32 %v1044_v15, %v1046_v23  ;;  %s4069_s6 = sld [smem:[#allocation6 + $0x71]]  ;;  %v2200_v23 = vstv %s4008_s21  ;;  %v2523_v15 = vstv %s4040_s15  ;;  %v4181_v62 = vmul.f32 %v2009_v9, %v3639_v38 }
 0x2f1   :  { %6224 = vst [vmem:[#allocation30_spill] sm:$0xff] %v4046_v4  ;;  %6234 = sst [smem:[#allocation39_spill]] %s4071_s1  ;;  %v6161_v19 = vstv %s4061_s29  ;;  %v833_v13 = vsel %vm200_vm4, %v4086_v0, %v4082_v46  ;;  %v4257_v0 = vpop.permute.xlu1 %857 }
 0x2f2   :  { %v4026_v33 = vmul.f32 %v1049_v39, %v1047_v55  ;;  %6235 = sst [smem:[#allocation40_spill]] %s4073_s2  ;;  %v836_v55 = vsel %vm200_vm4, %v4082_v46, 0.0  ;;  %6242 = vst [vmem:[#allocation45_spill] sm:$0xff] %v4148_v14 }
 0x2f3   :  { %s4084_s1 = sld [smem:[#allocation6 + $0x22]]  ;;  %6243 = vst [vmem:[#allocation46_spill] sm:$0xff] %v4151_v43  ;;  %v4190_v60 = vmul.f32 %v836_v55, %v3299_v8 }
 0x2f4   :  { %1052 = vst [vmem:[#allocation1] ss:$4 sm:$0xff] %v4026_v33  ;;  %s4088_s2 = sld [smem:[#allocation6 + $0x3d]]  ;;  %v6293_v12 = vstv %s4080_s24 }
 0x2f5   :  { %s4095_s10 = sld [smem:[#allocation6 + $0xa8]]  ;;  %6253 = vst [vmem:[#allocation49_spill] sm:$0xff] %v4176_v61 }
 0x2f6   :  { %6233 = sst [smem:[#allocation38_spill]] %s4069_s6  ;;  %6255 = vst [vmem:[#allocation50_spill] sm:$0xff] %v4181_v62 }
 0x2f7   :  { %s4090_s6 = sld [smem:[#allocation6 + $0xa7]] }
 0x2f8   :  { %s4104_s25 = sld [smem:[#allocation6 + $0x73]] }
 0x2f9   :  { %6238 = sst [smem:[#allocation42_spill]] %s4084_s1  ;;  %s6240_s1 = smov 15  }
 0x2fa   :  { %s4116_s19 = sld [smem:[#allocation6 + $0xa9]] }
 0x2fb   :  { %v1053_v32 = vld.sshfl [vmem:[#allocation1] sm:$0xff pattern:$0x73625140]  ;;  %v1054_v40 = vld.sshfl [vmem:[#allocation1 + $0x8] sm:$0xff pattern:$0x73625140] }
 0x2fc   :  { %1065 = vst [vmem:[#allocation1] ss:$4 sm:$0xff] %v4026_v33  ;;  %1057 = vrot.lane.b32.xlu1 %v1054_v40, %s6230_s5  ;;  %1055 = vrot.lane.b32.xlu0 %v1053_v32, %s6230_s5  ;;  %s6236_s5 = smov 16   ;;  %6239 = sst [smem:[#allocation43_spill]] %s4095_s10  ;;  %v2582_v32 = vstv %s4042_s16  ;;  %v4155_v40 = vmul.f32 %v2332_v29, %v3598_v21 }
 0x2fd   :  { %s4110_s10 = sld [smem:[#allocation6 + $0x8e]]  ;;  %v4201_v9 = vmul.f32 %v2582_v32, %v3639_v38 }
 0x2fe   :  { %s4122_s18 = sld [smem:[#allocation6 + $0xc2]]  ;;  %6244 = vst [vmem:[#allocation47_spill] sm:$0xff] %v4155_v40 }
 0x2ff   :  { %s4128_s22 = sld [smem:[#allocation6 + $0xc3]]  ;;  %6263 = vst [vmem:[#allocation53_spill] sm:$0xff] %v4201_v9 }
 0x300   :  { %s4139_s17 = sld [smem:[#allocation6 + $0xc4]] }
 0x301   :  { %s6246_s27 = sld [smem:[#allocation32_spill]] }
 0x302   :  { %s6248_s11 = sld [smem:[#allocation34_spill]] }
 0x303   :  { %v1066_v26 = vld.sshfl [vmem:[#allocation1] sm:$0xff pattern:$0x73625140]  ;;  %v1067_v20 = vld.sshfl [vmem:[#allocation1 + $0x8] sm:$0xff pattern:$0x73625140] }
 0x304   :  { %1076 = vst [vmem:[#allocation1] ss:$4 sm:$0xff] %v4026_v33  ;;  %1070 = vrot.lane.b32.xlu0 %v1067_v20, %s6236_s5  ;;  %1068 = vrot.lane.b32.xlu2 %v1066_v26, %s6236_s5  ;;  %s4092_s5 = sld [smem:[#allocation6 + $0x58]]  ;;  %v4158_v26 = vmul.f32 %v2523_v15, %v3598_v21  ;;  %v849_v20 = vsel %vm214_vm5, %v845_v5, 0.0  ;;  %v4170_v21 = vmul.f32 %v1436_v45, %v3639_v38 }
 0x305   :  { %s4164_s26 = sld [smem:[#allocation6 + $0x8]]  ;;  %v4187_v45 = vmul.f32 %v2391_v30, %v3639_v38  ;;  %v6169_v30 = vstv %s4065_s4 }
 0x306   :  { %6245 = vst [vmem:[#allocation48_spill] sm:$0xff] %v4158_v26  ;;  %s6250_s9 = sld [smem:[#allocation33_spill]]  ;;  %v4255_v46 = vmul.f32 %v6169_v30, %v4190_v60  ;;  %v837_v30 = vmul.f32 %v833_v13, %v3281_v52 }
 0x307   :  { %s6251_s30 = sld [smem:[#allocation35_spill]]  ;;  %6259 = vst [vmem:[#allocation52_spill] sm:$0xff] %v4187_v45  ;;  %v6163_v28 = vstv %s6246_s27  ;;  %v6287_v26 = vstv %s6246_s27 }
 0x308   :  { %s6252_s21 = sld [smem:[#allocation36_spill]]  ;;  %v6162_v44 = vstv %s6248_s11  ;;  %6273 = vst [vmem:[#allocation56_spill] sm:$0xff] %v4255_v46 }
 0x309   :  { %s4178_s7 = sld [smem:[#allocation6 + $0x23]]  ;;  %v4224_v32 = vmul.f32 %v6162_v44, %v4190_v60 }
 0x30a   :  { %s6256_s8 = sld [smem:[#allocation38_spill]]  ;;  %v6300_v16 = vstv %s4092_s5 }
 0x30b   :  { %v1077_v57 = vld.sshfl [vmem:[#allocation1] sm:$0xff pattern:$0x73625140]  ;;  %v1078_v63 = vld.sshfl [vmem:[#allocation1 + $0x8] sm:$0xff pattern:$0x73625140] }
 0x30c   :  { %1089 = vst [vmem:[#allocation1] ss:$4 sm:$0xff] %v4026_v33  ;;  %1081 = vrot.lane.b32.xlu2 %v1078_v63, %s6240_s1  ;;  %1079 = vrot.lane.b32.xlu1 %v1077_v57, %s6240_s1  ;;  %6249 = sst [smem:[#allocation32_spill]] %s4164_s26  ;;  %v4167_v57 = vmul.f32 %v1245_v2, %v3639_v38  ;;  %v4173_v63 = vmul.f32 %v1627_v17, %v3639_v38  ;;  %v6171_v10 = vstv %s6250_s9  ;;  %v6288_v45 = vstv %s6250_s9 }
 0x30d   :  { %v4184_v2 = vmul.f32 %v2200_v23, %v3639_v38  ;;  %s6258_s15 = sld [smem:[#allocation40_spill]]  ;;  %v851_v17 = vmul.f32 %v849_v20, %v3297_v6  ;;  %v6166_v23 = vstv %s6251_s30  ;;  %v4219_v38 = vmul.f32 %v6163_v28, %v4190_v60 }
 0x30e   :  { %s4192_s16 = sld [smem:[#allocation6 + $0x3e]]  ;;  %v6165_v29 = vstv %s6252_s21  ;;  %v4229_v20 = vmul.f32 %v6161_v19, %v4190_v60  ;;  %v846_v19 = vsel %vm214_vm5, %v843_v37, %v845_v5 }
 0x30f   :  { %6254 = sst [smem:[#allocation34_spill]] %s4178_s7  ;;  %6257 = vst [vmem:[#allocation51_spill] sm:$0xff] %v4184_v2  ;;  %v4239_v7 = vmul.f32 %v6171_v10, %v851_v17  ;;  %v4243_v24 = vmul.f32 %v6166_v23, %v851_v17  ;;  %v4247_v50 = vmul.f32 %v6165_v29, %v851_v17 }
 0x310   :  { %s6261_s1 = sld [smem:[#allocation37_spill]]  ;;  %v6172_v15 = vstv %s6256_s8  ;;  %6267 = vst [vmem:[#allocation54_spill] sm:$0xff] %v4229_v20 }
 0x311   :  { %s6265_s7 = sld [smem:[#allocation42_spill]]  ;;  %6271 = vst [vmem:[#allocation55_spill] sm:$0xff] %v4247_v50  ;;  %v4277_v44 = vmul.f32 %v6172_v15, %v4190_v60 }
 0x312   :  { %s4212_s26 = sld [smem:[#allocation6 + $0x8f]] }
 0x313   :  { %v1090_v22 = vld.sshfl [vmem:[#allocation1] sm:$0xff pattern:$0x73625140]  ;;  %v1091_v11 = vld.sshfl [vmem:[#allocation1 + $0x8] sm:$0xff pattern:$0x73625140]  ;;  %v6173_v55 = vstv %s6258_s15 }
 0x314   :  { %1102 = vst [vmem:[#allocation1] ss:$4 sm:$0xff] %v4026_v33  ;;  %1094 = vrot.lane.b32.xlu1 %v1091_v11, %s6247_s0  ;;  %1092 = vrot.lane.b32.xlu0 %v1090_v22, %s6247_s0  ;;  %6260 = sst [smem:[#allocation33_spill]] %s4192_s16  ;;  %v4214_v11 = vpop.permute.xlu2 %866  ;;  %v2534_v22 = vstv %s4122_s18  ;;  %v4294_v15 = vmul.f32 %v6173_v55, %v4190_v60  ;;  %v862_v55 = vsel %vm228_vm6, %v4257_v0, 0.0 }
 0x315   :  { %s4198_s0 = sld [smem:[#allocation6 + $0x59]]  ;;  %6277 = vst [vmem:[#allocation58_spill] sm:$0xff] %v4277_v44  ;;  %v4314_v9 = vmul.f32 %v2534_v22, %v4190_v60  ;;  %v4366_v43 = vmul.f32 %v6300_v16, %v862_v55  ;;  %v6306_v44 = vstv %s4116_s19 }
 0x316   :  { %s4206_s16 = sld [smem:[#allocation6 + $0x74]]  ;;  %v6170_v39 = vstv %s6261_s1  ;;  %6279 = vst [vmem:[#allocation60_spill] sm:$0xff] %v4294_v15  ;;  %v4380_v62 = vmul.f32 %v6306_v44, %v862_v55  ;;  %v6312_v14 = vstv %s6261_s1 }
 0x317   :  { %s4260_s14 = sld [smem:[#allocation6 + $0xc5]]  ;;  %v4265_v23 = vmul.f32 %v6170_v39, %v851_v17  ;;  %v850_v39 = vmul.f32 %v846_v19, %v3274_v47  ;;  %6285 = vst [vmem:[#allocation64_spill] sm:$0xff] %v4314_v9  ;;  %v6289_v9 = vstv %s6248_s11 }
 0x318   :  { %6266 = sst [smem:[#allocation38_spill]] %s4212_s26  ;;  %6301 = vst [vmem:[#allocation69_spill] sm:$0xff] %v4366_v43 }
 0x319   :  { %s6269_s26 = sld [smem:[#allocation39_spill]]  ;;  %6275 = vst [vmem:[#allocation57_spill] sm:$0xff] %v4265_v23 }
 0x31a   :  { %s4269_s20 = sld [smem:[#allocation6 + $0x9]]  ;;  %6307 = vst [vmem:[#allocation72_spill] sm:$0xff] %v4380_v62 }
 0x31b   :  { %6262 = sst [smem:[#allocation35_spill]] %s4198_s0  ;;  %v1103_v27 = vld.sshfl [vmem:[#allocation1] sm:$0xff pattern:$0x73625140] }
 0x31c   :  { %6264 = sst [smem:[#allocation36_spill]] %s4206_s16  ;;  %v1104_v54 = vld.sshfl [vmem:[#allocation1 + $0x8] sm:$0xff pattern:$0x73625140]  ;;  %1105 = vrot.lane.b32.xlu2 %v1103_v27, %s6276_s28  ;;  %v6281_v27 = vstv %s4090_s6 }
 0x31d   :  { %s4232_s16 = sld [smem:[#allocation6 + $0xaa]]  ;;  %1115 = vst [vmem:[#allocation1] ss:$4 sm:$0xff] %v4026_v33  ;;  %1107 = vrot.lane.b32.xlu0 %v1104_v54, %s6276_s28  ;;  %v2540_v54 = vstv %s4128_s22  ;;  %v4304_v19 = vmul.f32 %v6281_v27, %v4190_v60  ;;  %v4329_v60 = vmul.f32 %v6288_v45, %v850_v39  ;;  %v6290_v27 = vstv %s6251_s30 }
 0x31e   :  { %s6270_s0 = sld [smem:[#allocation41_spill]]  ;;  %v4316_v18 = vmul.f32 %v2540_v54, %v851_v17  ;;  %v6294_v45 = vstv %s6265_s7  ;;  %v4428_v62 = vmul.f32 %v2540_v54, %v850_v39 }
 0x31f   :  { %6274 = sst [smem:[#allocation37_spill]] %s4260_s14  ;;  %v1967_v5 = vstv %s6269_s26  ;;  %6282 = vst [vmem:[#allocation62_spill] sm:$0xff] %v4304_v19  ;;  %v4321_v19 = vmul.f32 %v6287_v26, %v837_v30  ;;  %v4337_v26 = vmul.f32 %v6290_v27, %v850_v39  ;;  %v4351_v15 = vmul.f32 %v6294_v45, %v862_v55 }
 0x320   :  { %s4280_s14 = sld [smem:[#allocation6 + $0x24]]  ;;  %v4289_v13 = vmul.f32 %v1967_v5, %v851_v17  ;;  %6286 = vst [vmem:[#allocation65_spill] sm:$0xff] %v4316_v18  ;;  %v6291_v18 = vstv %s4061_s29  ;;  %s6297_s29 = smov 113   ;;  %v6304_v45 = vstv %s4110_s10  ;;  %v4401_v44 = vmul.f32 %v1967_v5, %v850_v39 }
 0x321   :  { %s4287_s26 = sld [smem:[#allocation6 + $0x3f]]  ;;  %v4341_v35 = vmul.f32 %v6291_v18, %v837_v30  ;;  %v6298_v18 = vstv %s4088_s2  ;;  %6328 = vst [vmem:[#allocation83_spill] sm:$0xff] %v4428_v62 }
 0x322   :  { %6278 = vst [vmem:[#allocation59_spill] sm:$0xff] %v4289_v13  ;;  %s4299_s28 = sld [smem:[#allocation6 + $0x5a]]  ;;  %v4362_v27 = vmul.f32 %v6298_v18, %v862_v55  ;;  %v4374_v13 = vmul.f32 %v6304_v45, %v862_v55  ;;  %v6310_v18 = vstv %s4065_s4  ;;  %v6314_v45 = vstv %s6256_s8 }
 0x323   :  { %6268 = sst [smem:[#allocation40_spill]] %s4232_s16  ;;  %6292 = vst [vmem:[#allocation66_spill] sm:$0xff] %v4341_v35  ;;  %v4388_v16 = vmul.f32 %v6310_v18, %v837_v30 }
 0x324   :  { %s6272_s16 = sld [smem:[#allocation43_spill]]  ;;  %v2158_v37 = vstv %s6270_s0  ;;  %v1116_v4 = vld.sshfl [vmem:[#allocation1] sm:$0xff pattern:$0x73625140]  ;;  %6299 = vst [vmem:[#allocation68_spill] sm:$0xff] %v4362_v27  ;;  %s6349_s0 = smov 112  }
 0x325   :  { %v4296_v28 = vmul.f32 %v2158_v37, %v851_v17  ;;  %s6284_s18 = sld [smem:[#allocation31_spill]]  ;;  %v1117_v53 = vld.sshfl [vmem:[#allocation1 + $0x8] sm:$0xff pattern:$0x73625140]  ;;  %1118 = vrot.lane.b32.xlu1 %v1116_v4, %s6297_s29  ;;  %6305 = vst [vmem:[#allocation71_spill] sm:$0xff] %v4374_v13  ;;  %v6308_v4 = vstv %s4139_s17  ;;  %v4399_v13 = vmul.f32 %v6314_v45, %v837_v30  ;;  %v4407_v18 = vmul.f32 %v2158_v37, %v850_v39 }
 0x326   :  { %s4311_s22 = sld [smem:[#allocation6 + $0x75]]  ;;  %1128 = vst [vmem:[#allocation1] ss:$4 sm:$0xff] %v4026_v33  ;;  %v4384_v49 = vmul.f32 %v6308_v4, %v862_v55  ;;  %1120 = vrot.lane.b32.xlu2 %v1117_v53, %s6297_s29  ;;  %v4417_v45 = vmul.f32 %v2534_v22, %v837_v30 }
 0x327   :  { %6280 = vst [vmem:[#allocation61_spill] sm:$0xff] %v4296_v28  ;;  %v4347_v28 = vmul.f32 %v6293_v12, %v862_v55  ;;  %s4357_s27 = sld [smem:[#allocation6 + $0xab]]  ;;  %v6302_v12 = vstv %s4104_s25 }
 0x328   :  { %v4370_v58 = vmul.f32 %v6302_v12, %v862_v55  ;;  %s4376_s11 = sld [smem:[#allocation6 + $0xc6]]  ;;  %6309 = vst [vmem:[#allocation73_spill] sm:$0xff] %v4384_v49  ;;  %v4392_v12 = vmul.f32 %v6312_v14, %v850_v39  ;;  %v6317_v55 = vstv %s6258_s15  ;;  %v6321_v14 = vstv %s4090_s6 }
 0x329   :  { %6311 = vst [vmem:[#allocation74_spill] sm:$0xff] %v4388_v16  ;;  %s4395_s9 = sld [smem:[#allocation6 + $0xc]]  ;;  %v4405_v4 = vmul.f32 %v6317_v55, %v837_v30  ;;  %v4413_v53 = vmul.f32 %v6321_v14, %v837_v30  ;;  %v6327_v55 = vstv %s3912_s3 }
 0x32a   :  { %v2349_v29 = vstv %s6272_s16  ;;  %s4325_s16 = sld [smem:[#allocation6 + $0x90]]  ;;  %6303 = vst [vmem:[#allocation70_spill] sm:$0xff] %v4370_v58  ;;  %v869_v58 = vpop.permute.xlu1 %868  ;;  %v4426_v37 = vmul.f32 %v6327_v55, %v4026_v33  ;;  %v6334_v55 = vstv %s3976_s12 }
 0x32b   :  { %v4306_v10 = vmul.f32 %v2349_v29, %v851_v17  ;;  %v4333_v17 = vmul.f32 %v6289_v9, %v837_v30  ;;  %v2641_v40 = vstv %s6284_s18  ;;  %v6295_v9 = vstv %s6252_s21  ;;  %6313 = vst [vmem:[#allocation75_spill] sm:$0xff] %v4392_v12  ;;  %s6319_s4 = sld [smem:[#allocation24_spill]] }
 0x32c   :  { %v4355_v2 = vmul.f32 %v6295_v9, %v850_v39  ;;  %v856_v9 = vpop.permute.xlu0 %855  ;;  %6315 = vst [vmem:[#allocation76_spill] sm:$0xff] %v4399_v13  ;;  %s4409_s30 = sld [smem:[#allocation6 + $0x27]]  ;;  %v4415_v49 = vmul.f32 %v2349_v29, %v850_v39  ;;  %v870_v14 = vsel %vm6329_vm10, %v4214_v11, %v869_v58  ;;  %v873_v29 = vsel %vm6330_vm11, %v869_v58, 0.0 }
 0x32d   :  { %6283 = vst [vmem:[#allocation63_spill] sm:$0xff] %v4306_v10  ;;  %v4323_v10 = vpop.permute.xlu2 %917  ;;  %s6322_s21 = sld [smem:[#allocation25_spill]]  ;;  %v859_v5 = vsel %vm228_vm6, %v856_v9, %v4257_v0  ;;  %v6331_v30 = vstv %s3930_s13  ;;  %v6332_v0 = vstv %s3954_s23  ;;  %v4448_v39 = vmul.f32 %v6334_v55, %v4026_v33 }
 0x32e   :  { %6296 = vst [vmem:[#allocation67_spill] sm:$0xff] %v4355_v2  ;;  %s6324_s8 = sld [smem:[#allocation28_spill]]  ;;  %v4438_v22 = vmul.f32 %v6331_v30, %v4026_v33  ;;  %v4443_v9 = vmul.f32 %v6332_v0, %v4026_v33  ;;  %v4468_v55 = vmul.f32 %v2641_v40, %v4026_v33  ;;  %v4483_v40 = vmul.f32 %v873_v29, %v3299_v8 }
 0x32f   :  { %6316 = vst [vmem:[#allocation77_spill] sm:$0xff] %v4401_v44  ;;  %s4421_s15 = sld [smem:[#allocation6 + $0x42]]  ;;  %v6359_v44 = vstv %s4110_s10 }
 0x330   :  { %6318 = vst [vmem:[#allocation78_spill] sm:$0xff] %v4405_v4  ;;  %s4433_s6 = sld [smem:[#allocation6 + $0x5d]]  ;;  %v2176_v46 = vstv %s4325_s16 }
 0x331   :  { %6320 = vst [vmem:[#allocation79_spill] sm:$0xff] %v4407_v18  ;;  %v6336_v54 = vstv %s6319_s4  ;;  %s4455_s3 = sld [smem:[#allocation6 + $0x78]] }
 0x332   :  { %6323 = vst [vmem:[#allocation80_spill] sm:$0xff] %v4413_v53  ;;  %v4453_v62 = vmul.f32 %v6336_v54, %v4026_v33  ;;  %s6341_s13 = sld [smem:[#allocation32_spill]]  ;;  %v1130_v54 = vld.sshfl [vmem:[#allocation1 + $0x8] sm:$0xff pattern:$0x73625140] }
 0x333   :  { %6325 = vst [vmem:[#allocation81_spill] sm:$0xff] %v4415_v49  ;;  %v6338_v58 = vstv %s6322_s21  ;;  %s6343_s23 = sld [smem:[#allocation34_spill]]  ;;  %v6345_v49 = vstv %s4080_s24  ;;  %1133 = vrot.lane.b32.xlu1 %v1130_v54, %s6349_s0  ;;  %v6361_v54 = vstv %s4116_s19  ;;  %s6376_s21 = smov 111  }
 0x334   :  { %6326 = vst [vmem:[#allocation82_spill] sm:$0xff] %v4417_v45  ;;  %v4460_v11 = vmul.f32 %v6338_v58, %v4026_v33  ;;  %v6340_v30 = vstv %s6324_s8  ;;  %v1129_v45 = vld.sshfl [vmem:[#allocation1] sm:$0xff pattern:$0x73625140]  ;;  %v4472_v53 = vmul.f32 %v6345_v49, %v859_v5  ;;  %v6346_v58 = vstv %s6265_s7  ;;  %s6347_s12 = sld [smem:[#allocation33_spill]] }
 0x335   :  { %6333 = vst [vmem:[#allocation84_spill] sm:$0xff] %v4443_v9  ;;  %v4465_v0 = vmul.f32 %v6340_v30, %v4026_v33  ;;  %v4477_v18 = vmul.f32 %v6346_v58, %v859_v5  ;;  %v4480_v30 = vmul.f32 %v870_v14, %v3281_v52  ;;  %s6348_s1 = sld [smem:[#allocation35_spill]]  ;;  %1131 = vrot.lane.b32.xlu0 %v1129_v45, %s6349_s0  ;;  %v6352_v49 = vstv %s4088_s2 }
 0x336   :  { %6335 = vst [vmem:[#allocation85_spill] sm:$0xff] %v4448_v39  ;;  %s4487_s24 = sld [smem:[#allocation6 + $0xa]]  ;;  %v6354_v14 = vstv %s4092_s5  ;;  %v4513_v13 = vmul.f32 %v6361_v54, %v859_v5 }
 0x337   :  { %6337 = vst [vmem:[#allocation86_spill] sm:$0xff] %v4453_v62  ;;  %s6350_s18 = sld [smem:[#allocation36_spill]]  ;;  %v4497_v58 = vmul.f32 %v6354_v14, %v859_v5  ;;  %v4509_v62 = vmul.f32 %v6359_v44, %v859_v5 }
 0x338   :  { %6339 = vst [vmem:[#allocation87_spill] sm:$0xff] %v4460_v11  ;;  %s6351_s7 = sld [smem:[#allocation38_spill]]  ;;  %v6357_v11 = vstv %s4104_s25 }
 0x339   :  { %6342 = vst [vmem:[#allocation88_spill] sm:$0xff] %v4465_v0  ;;  %v1215_v0 = vstv %s6341_s13  ;;  %v1406_v29 = vstv %s6343_s23  ;;  %s6356_s29 = sld [smem:[#allocation40_spill]]  ;;  %v4505_v4 = vmul.f32 %v6357_v11, %v859_v5 }
 0x33a   :  { %6344 = vst [vmem:[#allocation89_spill] sm:$0xff] %v4468_v55  ;;  %v4485_v55 = vpop.permute.xlu2 %932  ;;  %s4501_s4 = sld [smem:[#allocation6 + $0x25]]  ;;  %v1597_v45 = vstv %s6347_s12  ;;  %v4528_v11 = vmul.f32 %v1215_v0, %v4480_v30  ;;  %v4531_v44 = vmul.f32 %v1215_v0, %v4483_v40  ;;  %v4534_v54 = vmul.f32 %v1406_v29, %v4480_v30 }
 0x33b   :  { %1139 = vst [vmem:[#allocation1] ss:$4 sm:$0xff] %v4026_v33  ;;  %v4493_v33 = vmul.f32 %v6352_v49, %v859_v5  ;;  %s4516_s2 = sld [smem:[#allocation6 + $0x40]]  ;;  %v6363_v49 = vstv %s4139_s17  ;;  %v4548_v0 = vmul.f32 %v1597_v45, %v4483_v40 }
 0x33c   :  { %6355 = vst [vmem:[#allocation91_spill] sm:$0xff] %v4497_v58  ;;  %v4520_v14 = vmul.f32 %v6363_v49, %v859_v5  ;;  %v1788_v58 = vstv %s6348_s1  ;;  %s4523_s5 = sld [smem:[#allocation6 + $0x5b]]  ;;  %v924_v5 = vsel %vm136_vm0, 0.0, %v4323_v10  ;;  %v920_v49 = vpop.permute.xlu0 %919 }
 0x33d   :  { %6353 = vst [vmem:[#allocation90_spill] sm:$0xff] %v4493_v33  ;;  %v1979_v12 = vstv %s6350_s18  ;;  %s4536_s10 = sld [smem:[#allocation6 + $0x76]]  ;;  %v4556_v39 = vmul.f32 %v1788_v58, %v4483_v40 }
 0x33e   :  { %6358 = vst [vmem:[#allocation92_spill] sm:$0xff] %v4505_v4  ;;  %v2170_v43 = vstv %s6351_s7  ;;  %s6365_s25 = sld [smem:[#allocation37_spill]]  ;;  %v4553_v4 = vmul.f32 %v1788_v58, %v4480_v30  ;;  %v4559_v16 = vmul.f32 %v1979_v12, %v4480_v30 }
 0x33f   :  { %6360 = vst [vmem:[#allocation93_spill] sm:$0xff] %v4509_v62  ;;  %v4545_v62 = vmul.f32 %v1597_v45, %v4480_v30  ;;  %s4550_s19 = sld [smem:[#allocation6 + $0x91]]  ;;  %v4567_v23 = vmul.f32 %v2170_v43, %v4480_v30  ;;  %v4570_v58 = vmul.f32 %v2170_v43, %v4483_v40 }
 0x340   :  { %6362 = vst [vmem:[#allocation94_spill] sm:$0xff] %v4513_v13  ;;  %v2361_v13 = vstv %s6356_s29  ;;  %s4564_s17 = sld [smem:[#allocation6 + $0x93]] }
 0x341   :  { %6364 = vst [vmem:[#allocation95_spill] sm:$0xff] %v4520_v14  ;;  %v4542_v14 = vmul.f32 %v1406_v29, %v4483_v40  ;;  %v4562_v29 = vmul.f32 %v1979_v12, %v4483_v40  ;;  %v4583_v43 = vmul.f32 %v2361_v13, %v4483_v40  ;;  %s4587_s8 = sld [smem:[#allocation6 + $0xae]] }
 0x342   :  { %6366 = vst [vmem:[#allocation96_spill] sm:$0xff] %v4545_v62  ;;  %v1140_v45 = vld.sshfl [vmem:[#allocation1] sm:$0xff pattern:$0x73625140]  ;;  %s4593_s13 = sld [smem:[#allocation6 + $0xc9]]  ;;  %v6392_v62 = vstv %s4421_s15 }
 0x343   :  { %6367 = vst [vmem:[#allocation97_spill] sm:$0xff] %v4548_v0  ;;  %v1141_v41 = vld.sshfl [vmem:[#allocation1 + $0x8] sm:$0xff pattern:$0x73625140]  ;;  %1142 = vrot.lane.b32.xlu2 %v1140_v45, %s6376_s21  ;;  %s4598_s23 = sld [smem:[#allocation6 + $0xac]] }
 0x344   :  { %6368 = vst [vmem:[#allocation98_spill] sm:$0xff] %v4553_v4  ;;  %v2552_v12 = vstv %s6365_s25  ;;  %v4580_v4 = vpop.permute.xlu2 %954  ;;  %1144 = vrot.lane.b32.xlu0 %v1141_v41, %s6376_s21  ;;  %s4659_s16 = sld [smem:[#allocation6 + $0x26]] }
 0x345   :  { %6369 = vst [vmem:[#allocation99_spill] sm:$0xff] %v4556_v39  ;;  %v921_v39 = vsel %vm136_vm0, %v4323_v10, %v920_v49  ;;  %v2367_v10 = vstv %s4357_s27  ;;  %v2558_v49 = vstv %s4376_s11  ;;  %v961_v41 = vsel %vm186_vm3, 0.0, %v4580_v4  ;;  %s4676_s27 = sld [smem:[#allocation6 + $0x5f]] }
 0x346   :  { %6370 = vst [vmem:[#allocation100_spill] sm:$0xff] %v4559_v16  ;;  %v4573_v16 = vmul.f32 %v2361_v13, %v4480_v30  ;;  %v926_v13 = vmul.f32 %v921_v39, %v3297_v6  ;;  %v4605_v45 = vmul.f32 %v2552_v12, %v4480_v30  ;;  %s4686_s11 = sld [smem:[#allocation6 + $0x7a]] }
 0x347   :  { %6371 = vst [vmem:[#allocation101_spill] sm:$0xff] %v4562_v29  ;;  %v925_v29 = vmul.f32 %v924_v5, %v3274_v47  ;;  %v1985_v5 = vstv %s4311_s22  ;;  %s4648_s22 = sld [smem:[#allocation6 + $0xb]] }
 0x348   :  { %6372 = vst [vmem:[#allocation102_spill] sm:$0xff] %v4567_v23  ;;  %v1794_v23 = vstv %s4299_s28  ;;  %s4636_s28 = sld [smem:[#allocation6 + $0x44]] }
 0x349   :  { %6373 = vst [vmem:[#allocation103_spill] sm:$0xff] %v4570_v58  ;;  %v1412_v58 = vstv %s4280_s14  ;;  %v4618_v39 = vmul.f32 %v1794_v23, %v925_v29  ;;  %s4620_s14 = sld [smem:[#allocation6 + $0xe]]  ;;  %v4622_v0 = vmul.f32 %v1985_v5, %v925_v29  ;;  %v4624_v30 = vmul.f32 %v2176_v46, %v925_v29 }
 0x34a   :  { %6374 = vst [vmem:[#allocation104_spill] sm:$0xff] %v4573_v16  ;;  %v1221_v16 = vstv %s4269_s20  ;;  %s4610_s20 = sld [smem:[#allocation6 + $0xc7]]  ;;  %v4614_v51 = vmul.f32 %v1412_v58, %v925_v29 }
 0x34b   :  { %1189 = vst [vmem:[#allocation1] ss:$4 sm:$0xff] %v4132_v25  ;;  %v1603_v25 = vstv %s4287_s26  ;;  %v4612_v61 = vmul.f32 %v1221_v16, %v925_v29  ;;  %s4630_s26 = sld [smem:[#allocation6 + $0x29]]  ;;  %v4638_v33 = vmul.f32 %v1221_v16, %v926_v13 }
 0x34c   :  { %6375 = vst [vmem:[#allocation105_spill] sm:$0xff] %v4583_v43  ;;  %v4608_v43 = vmul.f32 %v2552_v12, %v4483_v40  ;;  %v4616_v34 = vmul.f32 %v1603_v25, %v925_v29  ;;  %v4626_v40 = vmul.f32 %v2367_v10, %v925_v29  ;;  %v4628_v12 = vmul.f32 %v2558_v49, %v925_v29  ;;  %s4700_s12 = sld [smem:[#allocation6 + $0x95]] }
 0x34d   :  { %6377 = vst [vmem:[#allocation106_spill] sm:$0xff] %v4605_v45  ;;  %v962_v45 = vmul.f32 %v961_v41, %v3274_v47  ;;  %v4640_v29 = vmul.f32 %v1412_v58, %v926_v13  ;;  %v4646_v41 = vmul.f32 %v1794_v23, %v926_v13  ;;  %v4653_v58 = vmul.f32 %v1985_v5, %v926_v13  ;;  %s4712_s1 = sld [smem:[#allocation6 + $0xb0]] }
 0x34e   :  { %6378 = vst [vmem:[#allocation107_spill] sm:$0xff] %v4608_v43  ;;  %v931_v43 = vpop.permute.xlu1 %930  ;;  %v4662_v23 = vmul.f32 %v2558_v49, %v926_v13  ;;  %v6398_v49 = vstv %s4564_s17  ;;  %s4737_s0 = sld [smem:[#allocation6 + $0x41]] }
 0x34f   :  { %6379 = vst [vmem:[#allocation108_spill] sm:$0xff] %v4616_v34  ;;  %v6391_v34 = vstv %s4409_s30  ;;  %s4747_s18 = sld [smem:[#allocation6 + $0x5c]] }
 0x350   :  { %6380 = vst [vmem:[#allocation109_spill] sm:$0xff] %v4618_v39  ;;  %v6174_v39 = vstv %s4395_s9  ;;  %v4670_v5 = vmul.f32 %v6391_v34, %v962_v45  ;;  %v6400_v34 = vstv %s4587_s8  ;;  %s4755_s7 = sld [smem:[#allocation6 + $0x77]] }
 0x351   :  { %6381 = vst [vmem:[#allocation110_spill] sm:$0xff] %v4622_v0  ;;  %v4666_v16 = vmul.f32 %v6174_v39, %v962_v45  ;;  %v4694_v39 = vmul.f32 %v6400_v34, %v962_v45  ;;  %v4710_v34 = vpop.permute.xlu2 %969  ;;  %s4764_s29 = sld [smem:[#allocation6 + $0x92]] }
 0x352   :  { %6382 = vst [vmem:[#allocation111_spill] sm:$0xff] %v4624_v30  ;;  %v1190_v0 = vld.sshfl [vmem:[#allocation1] sm:$0xff pattern:$0x73625140]  ;;  %v974_v9 = vsel %vm200_vm4, %v4710_v34, 0.0  ;;  %s4847_s25 = sld [smem:[#allocation6 + $0x47]] }
 0x353   :  { %6383 = vst [vmem:[#allocation112_spill] sm:$0xff] %v4626_v40  ;;  %v1191_v30 = vld.sshfl [vmem:[#allocation1 + $0x8] sm:$0xff pattern:$0x73625140]  ;;  %v4657_v40 = vmul.f32 %v2367_v10, %v926_v13  ;;  %v6394_v10 = vstv %s4433_s6  ;;  %v1194_v35 = vadd.f32 %v1190_v0, %v3956_v1  ;;  %s4873_s21 = sld [smem:[#allocation6 + $0x7d]] }
 0x354   :  { %6384 = vst [vmem:[#allocation113_spill] sm:$0xff] %v4628_v12  ;;  %v4642_v12 = vmul.f32 %v1603_v25, %v926_v13  ;;  %v4655_v25 = vmul.f32 %v2176_v46, %v926_v13  ;;  %v4674_v46 = vmul.f32 %v6392_v62, %v962_v45  ;;  %v4690_v13 = vmul.f32 %v6398_v49, %v962_v45 }
 0x355   :  { %1248 = vst [vmem:[#allocation1] ss:$4 sm:$0xff] %v4167_v57  ;;  %v6396_v57 = vstv %s4455_s3  ;;  %v1227_v62 = vstv %s4487_s24  ;;  %v1991_v49 = vstv %s4536_s10  ;;  %s4718_s24 = sld [smem:[#allocation6 + $0xcb]] }
 0x356   :  { %6385 = vst [vmem:[#allocation114_spill] sm:$0xff] %v4642_v12  ;;  %s4832_s10 = sld [smem:[#allocation6 + $0x2c]] }
 0x357   :  { %6386 = vst [vmem:[#allocation115_spill] sm:$0xff] %v4646_v41  ;;  %v2182_v41 = vstv %s4550_s19  ;;  %s4862_s19 = sld [smem:[#allocation6 + $0x62]] }
 0x358   :  { %6387 = vst [vmem:[#allocation116_spill] sm:$0xff] %v4653_v58  ;;  %v1609_v58 = vstv %s4516_s2  ;;  %s4792_s2 = sld [smem:[#allocation6 + $0xc8]] }
 0x359   :  { %6388 = vst [vmem:[#allocation117_spill] sm:$0xff] %v4655_v25  ;;  %v4684_v25 = vmul.f32 %v6396_v57, %v962_v45  ;;  %v6402_v57 = vstv %s4593_s13 }
 0x35a   :  { %6389 = vst [vmem:[#allocation118_spill] sm:$0xff] %v4657_v40  ;;  %v4680_v40 = vmul.f32 %v6394_v10, %v962_v45  ;;  %v934_v10 = vsel %vm155_vm1, %v931_v43, %v4485_v55  ;;  %v2564_v55 = vstv %s4610_s20  ;;  %s4906_s20 = sld [smem:[#allocation6 + $0xf]] }
 0x35b   :  { %6390 = vst [vmem:[#allocation119_spill] sm:$0xff] %v4662_v23  ;;  %v1418_v23 = vstv %s4501_s4  ;;  %v4725_v2 = vmul.f32 %v1227_v62, %v934_v10  ;;  %v4735_v50 = vmul.f32 %v1609_v58, %v934_v10  ;;  %s4786_s4 = sld [smem:[#allocation6 + $0xad]] }
 0x35c   :  { %6393 = vst [vmem:[#allocation120_spill] sm:$0xff] %v4674_v46  ;;  %v2373_v46 = vstv %s4598_s23  ;;  %v4733_v12 = vmul.f32 %v1418_v23, %v934_v10  ;;  %s4885_s23 = sld [smem:[#allocation6 + $0x98]] }
 0x35d   :  { %6395 = vst [vmem:[#allocation121_spill] sm:$0xff] %v4680_v40  ;;  %v1800_v40 = vstv %s4523_s5  ;;  %s4821_s5 = sld [smem:[#allocation6 + $0x11]] }
 0x35e   :  { %6397 = vst [vmem:[#allocation122_spill] sm:$0xff] %v4684_v25  ;;  %v4704_v25 = vmul.f32 %v6402_v57, %v962_v45  ;;  %v1195_v45 = vadd.f32 %v1191_v30, %v3850_v31  ;;  %v4721_v57 = vld.sshfl [vmem:[#allocation1] sm:$0xff pattern:$0x73625140]  ;;  %v4749_v1 = vmul.f32 %v1800_v40, %v934_v10 }
 0x35f   :  { %6399 = vst [vmem:[#allocation123_spill] sm:$0xff] %v4690_v13  ;;  %v937_v13 = vsel %vm155_vm1, 0.0, %v931_v43  ;;  %v944_v43 = vpop.permute.xlu1 %943 }
 0x360   :  { %6401 = vst [vmem:[#allocation124_spill] sm:$0xff] %v4694_v39  ;;  %v942_v39 = vpop.permute.xlu0 %941  ;;  %v4731_v48 = vmul.f32 %v1227_v62, %v937_v13  ;;  %v4739_v31 = vmul.f32 %v1418_v23, %v937_v13  ;;  %v4741_v30 = vmul.f32 %v1609_v58, %v937_v13  ;;  %v4743_v20 = vmul.f32 %v1800_v40, %v937_v13 }
 0x361   :  { %6403 = vst [vmem:[#allocation125_spill] sm:$0xff] %v4704_v25  ;;  %v4723_v25 = vld.sshfl [vmem:[#allocation1 + $0x8] sm:$0xff pattern:$0x73625140]  ;;  %v945_v0 = vsel %vm167_vm2, %v942_v39, %v944_v43  ;;  %v948_v62 = vsel %vm167_vm2, 0.0, %v942_v39  ;;  %v1201_v58 = vadd.f32 %v4219_v38, %v1195_v45  ;;  %v4758_v23 = vmul.f32 %v1991_v49, %v934_v10 }
 0x362   :  { %1307 = vst [vmem:[#allocation1] ss:$4 sm:$0xff] %v4426_v37  ;;  %v4751_v37 = vmul.f32 %v1991_v49, %v937_v13  ;;  %v4760_v27 = vmul.f32 %v2182_v41, %v937_v13  ;;  %v4762_v40 = vmul.f32 %v2182_v41, %v934_v10  ;;  %v1200_v43 = vadd.f32 %v4321_v19, %v1194_v35  ;;  %v4784_v35 = vpop.permute.xlu2 %993 }
 0x363   :  { %6404 = vst [vmem:[#allocation126_spill] sm:$0xff] %v4743_v20  ;;  %v4769_v39 = vmul.f32 %v2373_v46, %v934_v10  ;;  %v4774_v38 = vmul.f32 %v2564_v55, %v937_v13  ;;  %v4776_v49 = vmul.f32 %v2564_v55, %v934_v10  ;;  %v4779_v41 = vmul.f32 %v948_v62, %v3281_v52 }
 0x364   :  { %6405 = vst [vmem:[#allocation127_spill] sm:$0xff] %v4749_v1  ;;  %v4772_v1 = vmul.f32 %v974_v9, %v3299_v8  ;;  %v4782_v45 = vmul.f32 %v945_v0, %v3299_v8  ;;  %v1233_v19 = vstv %s4648_s22  ;;  %v1424_v9 = vstv %s4659_s16  ;;  %s4918_s22 = sld [smem:[#allocation6 + $0x2a]] }
 0x365   :  { %6406 = vst [vmem:[#allocation128_spill] sm:$0xff] %v4751_v37  ;;  %v4767_v37 = vmul.f32 %v2373_v46, %v937_v13  ;;  %v1207_v10 = vadd.f32 %v4239_v7, %v1201_v58  ;;  %v1206_v46 = vadd.f32 %v4329_v60, %v1200_v43  ;;  %v6416_v13 = vstv %s4620_s14  ;;  %s4946_s16 = sld [smem:[#allocation6 + $0x45]] }
 0x366   :  { %6407 = vst [vmem:[#allocation129_spill] sm:$0xff] %v4758_v23  ;;  %v6417_v7 = vstv %s4630_s26  ;;  %v1806_v60 = vstv %s4747_s18  ;;  %s5196_s18 = sld [smem:[#allocation6 + $0x2d]] }
 0x367   :  { %6408 = vst [vmem:[#allocation130_spill] sm:$0xff] %v4760_v27  ;;  %v4812_v58 = vmul.f32 %v6417_v7, %v4772_v1  ;;  %v6418_v7 = vstv %s4636_s28  ;;  %v1213_v27 = vadd.f32 %v4347_v28, %v1207_v10  ;;  %v6422_v28 = vstv %s4676_s27 }
 0x368   :  { %6409 = vst [vmem:[#allocation131_spill] sm:$0xff] %v4762_v40  ;;  %v957_v62 = vpop.permute.xlu0 %956  ;;  %v1615_v40 = vstv %s4737_s0  ;;  %v4860_v10 = vmul.f32 %v6422_v28, %v4772_v1  ;;  %s5191_s0 = sld [smem:[#allocation6 + $0x49]] }
 0x369   :  { %6410 = vst [vmem:[#allocation132_spill] sm:$0xff] %v4767_v37  ;;  %v4795_v55 = vld.sshfl [vmem:[#allocation1] sm:$0xff pattern:$0x73625140]  ;;  %v4807_v37 = vmul.f32 %v6416_v13, %v4772_v1  ;;  %v958_v43 = vsel %vm186_vm3, %v4580_v4, %v957_v62  ;;  %v4830_v13 = vmul.f32 %v1424_v9, %v4782_v45  ;;  %v4842_v23 = vmul.f32 %v1615_v40, %v4779_v41  ;;  %v968_v62 = vpop.permute.xlu1 %967 }
 0x36a   :  { %6411 = vst [vmem:[#allocation133_spill] sm:$0xff] %v4769_v39  ;;  %v4797_v0 = vld.sshfl [vmem:[#allocation1 + $0x8] sm:$0xff pattern:$0x73625140]  ;;  %v1997_v39 = vstv %s4755_s7  ;;  %v2188_v4 = vstv %s4764_s29  ;;  %s5204_s7 = sld [smem:[#allocation6 + $0x64]] }
 0x36b   :  { %6412 = vst [vmem:[#allocation134_spill] sm:$0xff] %v4774_v38  ;;  %v4819_v38 = vmul.f32 %v1233_v19, %v4782_v45  ;;  %v4866_v20 = vmul.f32 %v1997_v39, %v4779_v41  ;;  %v4880_v28 = vmul.f32 %v2188_v4, %v4779_v41  ;;  %s5218_s29 = sld [smem:[#allocation6 + $0x12]] }
 0x36c   :  { %6413 = vst [vmem:[#allocation135_spill] sm:$0xff] %v4776_v49  ;;  %v4816_v49 = vmul.f32 %v1233_v19, %v4779_v41  ;;  %v4837_v19 = vmul.f32 %v6418_v7, %v4772_v1  ;;  %v4852_v7 = vmul.f32 %v1806_v60, %v4779_v41 }
 0x36d   :  { %6414 = vst [vmem:[#allocation136_spill] sm:$0xff] %v4795_v55  ;;  %v4855_v55 = vmul.f32 %v1806_v60, %v4782_v45  ;;  %v2379_v60 = vstv %s4786_s4  ;;  %s5236_s4 = sld [smem:[#allocation6 + $0x7f]] }
 0x36e   :  { %6415 = vst [vmem:[#allocation137_spill] sm:$0xff] %v4797_v0  ;;  %v4845_v0 = vmul.f32 %v1615_v40, %v4782_v45  ;;  %v963_v40 = vmul.f32 %v958_v43, %v3297_v6  ;;  %v2570_v43 = vstv %s4792_s2  ;;  %s5247_s2 = sld [smem:[#allocation6 + $0x48]] }
 0x36f   :  { %1380 = vst [vmem:[#allocation1] ss:$4 sm:$0xff] %v4135_v56  ;;  %v4824_v56 = vmul.f32 %v1424_v9, %v4779_v41  ;;  %v1212_v9 = vadd.f32 %v4472_v53, %v1206_v46  ;;  %v6425_v53 = vstv %s4686_s11 }
 0x370   :  { %6419 = vst [vmem:[#allocation138_spill] sm:$0xff] %v4837_v19  ;;  %v4871_v46 = vmul.f32 %v6425_v53, %v4772_v1  ;;  %v1219_v53 = vadd.f32 %v4531_v44, %v1213_v27  ;;  %v4909_v44 = vmul.f32 %v2379_v60, %v4779_v41 }
 0x371   :  { %6420 = vst [vmem:[#allocation139_spill] sm:$0xff] %v4852_v7  ;;  %v1218_v27 = vadd.f32 %v4528_v11, %v1212_v9  ;;  %v6439_v11 = vstv %s4718_s24 }
 0x372   :  { %6421 = vst [vmem:[#allocation140_spill] sm:$0xff] %v4855_v55  ;;  %v4877_v55 = vmul.f32 %v1997_v39, %v4782_v45  ;;  %v4891_v39 = vpop.permute.xlu2 %1006  ;;  %v4929_v9 = vmul.f32 %v6439_v11, %v4772_v1 }
 0x373   :  { %6423 = vst [vmem:[#allocation141_spill] sm:$0xff] %v4860_v10  ;;  %v4883_v10 = vmul.f32 %v2188_v4, %v4782_v45  ;;  %v6432_v4 = vstv %s4712_s1  ;;  %v1224_v11 = vadd.f32 %v4612_v61, %v1218_v27  ;;  %v6454_v27 = vstv %s4630_s26  ;;  %s5068_s26 = sld [smem:[#allocation6 + $0xb1]] }
 0x374   :  { %6424 = vst [vmem:[#allocation142_spill] sm:$0xff] %v4866_v20 }
 0x375   :  { %6426 = vst [vmem:[#allocation143_spill] sm:$0xff] %v4871_v46  ;;  %v971_v46 = vsel %vm200_vm4, %v968_v62, %v4710_v34  ;;  %v4912_v34 = vmul.f32 %v2379_v60, %v4782_v45 }
 0x376   :  { %6427 = vst [vmem:[#allocation144_spill] sm:$0xff] %v4877_v55  ;;  %v1381_v20 = vld.sshfl [vmem:[#allocation1] sm:$0xff pattern:$0x73625140]  ;;  %v6430_v55 = vstv %s4700_s12  ;;  %v975_v60 = vmul.f32 %v971_v46, %v3281_v52 }
 0x377   :  { %6428 = vst [vmem:[#allocation145_spill] sm:$0xff] %v4880_v28  ;;  %v1382_v7 = vld.sshfl [vmem:[#allocation1 + $0x8] sm:$0xff pattern:$0x73625140]  ;;  %v4896_v28 = vmul.f32 %v6430_v55, %v4772_v1  ;;  %v6436_v55 = vstv %s4395_s9  ;;  %s4939_s9 = sld [smem:[#allocation6 + $0xb3]] }
 0x378   :  { %6429 = vst [vmem:[#allocation146_spill] sm:$0xff] %v4883_v10  ;;  %v4901_v10 = vmul.f32 %v6432_v4, %v4772_v1  ;;  %v1386_v19 = vadd.f32 %v1382_v7, %v3852_v36  ;;  %v4916_v62 = vmul.f32 %v6436_v55, %v963_v40  ;;  %v4921_v36 = vmul.f32 %v2570_v43, %v4779_v41 }
 0x379   :  { %6431 = vst [vmem:[#allocation147_spill] sm:$0xff] %v4896_v28  ;;  %v1011_v4 = vsel %vm6441_vm12, %v4891_v39, 0.0  ;;  %v6442_v55 = vstv %s4409_s30  ;;  %s4957_s30 = sld [smem:[#allocation6 + $0x60]] }
 0x37a   :  { %6433 = vst [vmem:[#allocation148_spill] sm:$0xff] %v4901_v10  ;;  %v1392_v7 = vadd.f32 %v4224_v32, %v1386_v19  ;;  %v4937_v41 = vmul.f32 %v6442_v55, %v963_v40  ;;  %v6444_v32 = vstv %s4433_s6  ;;  %v6445_v19 = vstv %s4455_s3  ;;  %v981_v10 = vpop.permute.xlu0 %980  ;;  %s4983_s6 = sld [smem:[#allocation6 + $0x10]] }
 0x37b   :  { %1439 = vst [vmem:[#allocation1] ss:$4 sm:$0xff] %v4170_v21  ;;  %v4924_v21 = vmul.f32 %v2570_v43, %v4782_v45  ;;  %v1225_v45 = vadd.f32 %v4638_v33, %v1219_v53  ;;  %v6443_v43 = vstv %s4421_s15  ;;  %v4950_v1 = vmul.f32 %v6444_v32, %v963_v40  ;;  %s4977_s15 = sld [smem:[#allocation6 + $0x7b]] }
 0x37c   :  { %6434 = vst [vmem:[#allocation149_spill] sm:$0xff] %v4909_v44  ;;  %v4954_v46 = vmul.f32 %v6445_v19, %v963_v40  ;;  %v6446_v33 = vstv %s4564_s17  ;;  %v6448_v55 = vstv %s4587_s8  ;;  %v1398_v32 = vadd.f32 %v4243_v24, %v1392_v7  ;;  %s5004_s3 = sld [smem:[#allocation6 + $0x2b]] }
 0x37d   :  { %6435 = vst [vmem:[#allocation150_spill] sm:$0xff] %v4912_v34  ;;  %v4961_v53 = vmul.f32 %v6446_v33, %v963_v40  ;;  %v1385_v19 = vadd.f32 %v1381_v20, %v3961_v59  ;;  %v4974_v61 = vmul.f32 %v1011_v4, %v3299_v8  ;;  %v983_v33 = vpop.permute.xlu1 %982  ;;  %v1231_v4 = vadd.f32 %v4725_v2, %v1225_v45  ;;  %s5018_s17 = sld [smem:[#allocation6 + $0x46]] }
 0x37e   :  { %6437 = vst [vmem:[#allocation151_spill] sm:$0xff] %v4921_v36  ;;  %v1230_v59 = vadd.f32 %v4731_v48, %v1224_v11  ;;  %v6457_v2 = vstv %s4686_s11  ;;  %v984_v24 = vsel %vm214_vm5, %v981_v10, %v983_v33  ;;  %v6458_v48 = vstv %s4700_s12  ;;  %s5025_s8 = sld [smem:[#allocation6 + $0x96]] }
 0x37f   :  { %6438 = vst [vmem:[#allocation152_spill] sm:$0xff] %v4924_v21  ;;  %v4944_v21 = vmul.f32 %v6443_v43, %v963_v40  ;;  %v4965_v43 = vmul.f32 %v6448_v55, %v963_v40  ;;  %v6453_v55 = vstv %s4620_s14  ;;  %v1391_v7 = vadd.f32 %v4333_v17, %v1385_v19  ;;  %s5049_s14 = sld [smem:[#allocation6 + $0x7c]] }
 0x380   :  { %6440 = vst [vmem:[#allocation153_spill] sm:$0xff] %v4929_v9  ;;  %v6450_v9 = vstv %s4593_s13  ;;  %v5012_v45 = vmul.f32 %v6457_v2, %v975_v60  ;;  %v987_v11 = vsel %vm214_vm5, %v983_v33, 0.0  ;;  %v6460_v2 = vstv %s4712_s1  ;;  %s5034_s13 = sld [smem:[#allocation6 + $0x61]] }
 0x381   :  { %6447 = vst [vmem:[#allocation154_spill] sm:$0xff] %v4961_v53  ;;  %v4969_v36 = vmul.f32 %v6450_v9, %v963_v40  ;;  %v6456_v40 = vstv %s4676_s27  ;;  %v5030_v19 = vmul.f32 %v6460_v2, %v975_v60  ;;  %v6462_v10 = vstv %s4718_s24  ;;  %s5099_s27 = sld [smem:[#allocation6 + $0x97]] }
 0x382   :  { %6449 = vst [vmem:[#allocation155_spill] sm:$0xff] %v4965_v43  ;;  %v4981_v43 = vmul.f32 %v6453_v55, %v975_v60  ;;  %v4988_v20 = vld.sshfl [vmem:[#allocation1] sm:$0xff pattern:$0x73625140]  ;;  %v6455_v55 = vstv %s4636_s28  ;;  %v5008_v17 = vmul.f32 %v6456_v40, %v975_v60  ;;  %v6175_v40 = vstv %s4885_s23  ;;  %s5071_s28 = sld [smem:[#allocation6 + $0xcc]] }
 0x383   :  { %6451 = vst [vmem:[#allocation156_spill] sm:$0xff] %v4969_v36  ;;  %v4990_v9 = vld.sshfl [vmem:[#allocation1 + $0x8] sm:$0xff pattern:$0x73625140]  ;;  %v4996_v36 = vmul.f32 %v6454_v27, %v975_v60  ;;  %v5000_v34 = vmul.f32 %v6455_v55, %v975_v60  ;;  %v1404_v27 = vadd.f32 %v4351_v15, %v1398_v32  ;;  %v1397_v55 = vadd.f32 %v4337_v26, %v1391_v7  ;;  %s5111_s11 = sld [smem:[#allocation6 + $0xb2]] }
 0x384   :  { %6452 = vst [vmem:[#allocation157_spill] sm:$0xff] %v4974_v61  ;;  %v5038_v32 = vmul.f32 %v6462_v10, %v975_v60  ;;  %v1237_v33 = vadd.f32 %v4819_v38, %v1231_v4  ;;  %v6464_v7 = vstv %s4821_s5  ;;  %v5047_v2 = vmul.f32 %v984_v24, %v3274_v47  ;;  %s5123_s12 = sld [smem:[#allocation6 + $0xcd]] }
 0x385   :  { %1498 = vst [vmem:[#allocation1] ss:$4 sm:$0xff] %v4438_v22  ;;  %v5022_v22 = vmul.f32 %v6458_v48, %v975_v60  ;;  %v1403_v26 = vadd.f32 %v4477_v18, %v1397_v55  ;;  %v5044_v48 = vmul.f32 %v6464_v7, %v4974_v61  ;;  %v1236_v18 = vadd.f32 %v4816_v49, %v1230_v59  ;;  %v1005_v53 = vpop.permute.xlu1 %1004  ;;  %s5177_s1 = sld [smem:[#allocation6 + $0x13]] }
 0x386   :  { %6461 = vst [vmem:[#allocation159_spill] sm:$0xff] %v5030_v19  ;;  %v6466_v55 = vstv %s4832_s10  ;;  %v6467_v60 = vstv %s4847_s25  ;;  %v1410_v10 = vadd.f32 %v4542_v14, %v1404_v27  ;;  %v5065_v24 = vmul.f32 %v987_v11, %v3297_v6  ;;  %s5185_s24 = sld [smem:[#allocation6 + $0x2e]] }
 0x387   :  { %6459 = vst [vmem:[#allocation158_spill] sm:$0xff] %v5022_v22  ;;  %v5055_v15 = vmul.f32 %v6466_v55, %v4974_v61  ;;  %v5060_v38 = vmul.f32 %v6467_v60, %v4974_v61  ;;  %v1409_v4 = vadd.f32 %v4534_v54, %v1403_v26  ;;  %v1262_v7 = vstv %s4906_s20  ;;  %s5340_s20 = sld [smem:[#allocation6 + $0x33]] }
 0x388   :  { %6463 = vst [vmem:[#allocation160_spill] sm:$0xff] %v5038_v32  ;;  %v1453_v49 = vstv %s4918_s22  ;;  %v6469_v59 = vstv %s4862_s19  ;;  %v6470_v60 = vstv %s4873_s21  ;;  %v5086_v14 = vmul.f32 %v6175_v40, %v4974_v61  ;;  %s5365_s22 = sld [smem:[#allocation6 + $0x14]] }
 0x389   :  { %6465 = vst [vmem:[#allocation161_spill] sm:$0xff] %v5047_v2  ;;  %v5076_v55 = vmul.f32 %v6469_v59, %v4974_v61  ;;  %v5081_v54 = vmul.f32 %v6470_v60, %v4974_v61  ;;  %v1415_v26 = vadd.f32 %v4614_v51, %v1409_v4  ;;  %v1416_v32 = vadd.f32 %v4640_v29, %v1410_v10 }
 0x38a   :  { %6468 = vst [vmem:[#allocation162_spill] sm:$0xff] %v5065_v24  ;;  %v1644_v19 = vstv %s4946_s16  ;;  %v1243_v59 = vadd.f32 %v4916_v62, %v1237_v33  ;;  %v1263_v60 = vmul.f32 %v1262_v7, %v5047_v2  ;;  %v1835_v44 = vstv %s4957_s30  ;;  %s5377_s16 = sld [smem:[#allocation6 + $0x30]] }
 0x38b   :  { %6471 = vst [vmem:[#allocation163_spill] sm:$0xff] %v5081_v54  ;;  %v1242_v40 = vadd.f32 %v4666_v16, %v1236_v18  ;;  %v1421_v51 = vadd.f32 %v4739_v31, %v1415_v26  ;;  %v1422_v29 = vadd.f32 %v4733_v12, %v1416_v32  ;;  %v1264_v4 = vmul.f32 %v1262_v7, %v5065_v24  ;;  %v996_v32 = vpop.permute.xlu0 %995  ;;  %s5382_s30 = sld [smem:[#allocation6 + $0x4b]] }
 0x38c   :  { %6472 = vst [vmem:[#allocation164_spill] sm:$0xff] %v5086_v14  ;;  %v5088_v27 = vld.sshfl [vmem:[#allocation1] sm:$0xff pattern:$0x73625140]  ;;  %v6473_v14 = vstv %s4939_s9  ;;  %v2026_v62 = vstv %s4977_s15  ;;  %v5117_v33 = vmul.f32 %v1453_v49, %v5065_v24  ;;  %v5120_v16 = vmul.f32 %v1644_v19, %v5047_v2  ;;  %s5407_s15 = sld [smem:[#allocation6 + $0x15]] }
 0x38d   :  { %v5090_v11 = vld.sshfl [vmem:[#allocation1 + $0x8] sm:$0xff pattern:$0x73625140]  ;;  %v5105_v28 = vmul.f32 %v6473_v14, %v4974_v61  ;;  %v2217_v18 = vstv %s5025_s8  ;;  %v5126_v12 = vmul.f32 %v1644_v19, %v5065_v24  ;;  %v5129_v31 = vmul.f32 %v1835_v44, %v5047_v2  ;;  %s5485_s8 = sld [smem:[#allocation6 + $0x18]] }
 0x38e   :  { %1571 = vst [vmem:[#allocation1] ss:$4 sm:$0xff] %v4142_v42  ;;  %v5114_v42 = vmul.f32 %v1453_v49, %v5047_v2  ;;  %v1254_v10 = vadd.f32 %v4723_v25, %v1243_v59  ;;  %v1427_v7 = vadd.f32 %v4824_v56, %v1421_v51  ;;  %v5134_v49 = vmul.f32 %v1835_v44, %v5065_v24  ;;  %v5151_v44 = vpop.permute.xlu2 %1068 }
 0x38f   :  { %6474 = vst [vmem:[#allocation165_spill] sm:$0xff] %v5105_v28  ;;  %v5137_v14 = vmul.f32 %v2026_v62, %v5047_v2  ;;  %v1253_v19 = vadd.f32 %v4721_v57, %v1242_v40  ;;  %v1428_v26 = vadd.f32 %v4830_v13, %v1422_v29  ;;  %v5142_v61 = vmul.f32 %v2026_v62, %v5065_v24 }
 0x390   :  { %v5145_v28 = vmul.f32 %v2217_v18, %v5047_v2  ;;  %v5148_v25 = vmul.f32 %v2217_v18, %v5065_v24  ;;  %v1433_v56 = vadd.f32 %v4670_v5, %v1427_v7  ;;  %v1268_v59 = vstv %s4983_s6  ;;  %s5432_s6 = sld [smem:[#allocation6 + $0x4d]] }
 0x391   :  { %6475 = vst [vmem:[#allocation166_spill] sm:$0xff] %v5137_v14  ;;  %v2408_v51 = vstv %s5068_s26  ;;  %v5157_v13 = vsel %vm228_vm6, %v996_v32, 0.0  ;;  %v1459_v62 = vstv %s5004_s3  ;;  %v5163_v18 = vsel %vm228_vm6, %v4784_v35, %v996_v32  ;;  %s5445_s3 = sld [smem:[#allocation6 + $0x32]] }
 0x392   :  { %6476 = vst [vmem:[#allocation167_spill] sm:$0xff] %v5142_v61  ;;  %v1260_v5 = vadd.f32 %v4807_v37, %v1254_v10  ;;  %v1259_v57 = vadd.f32 %v4981_v43, %v1253_v19  ;;  %v1444_v22 = vadd.f32 %v4988_v20, %v1433_v56  ;;  %v1841_v54 = vstv %s5034_s13  ;;  %v6482_v37 = vld [vmem:[#allocation54_spill] sm:$0xff]  ;;  %s5491_s13 = sld [smem:[#allocation6 + $0x65]] }
 0x393   :  { %6477 = vst [vmem:[#allocation168_spill] sm:$0xff] %v5145_v28  ;;  %v1650_v28 = vstv %s5018_s17  ;;  %v2032_v14 = vstv %s5049_s14  ;;  %v2223_v61 = vstv %s5099_s27  ;;  %v5175_v35 = vmul.f32 %v2408_v51, %v5047_v2  ;;  %s5453_s17 = sld [smem:[#allocation6 + $0x17]] }
 0x394   :  { %6478 = vst [vmem:[#allocation169_spill] sm:$0xff] %v5148_v25  ;;  %v1434_v25 = vadd.f32 %v4937_v41, %v1428_v26  ;;  %v1266_v41 = vadd.f32 %v1264_v4, %v1260_v5  ;;  %v1269_v20 = vmul.f32 %v1268_v59, %v5163_v18  ;;  %v1270_v10 = vmul.f32 %v1268_v59, %v5157_v13  ;;  %v6486_v5 = vld [vmem:[#allocation22_spill] sm:$0xff]  ;;  %s5494_s14 = sld [smem:[#allocation6 + $0x4f]] }
 0x395   :  { %6479 = vst [vmem:[#allocation170_spill] sm:$0xff] %v5157_v13  ;;  %v1572_v40 = vld.sshfl [vmem:[#allocation1] sm:$0xff pattern:$0x73625140]  ;;  %v1008_v19 = vsel %vm6484_vm13, %v1005_v53, %v4891_v39  ;;  %v1265_v26 = vadd.f32 %v1263_v60, %v1259_v57  ;;  %v1461_v59 = vmul.f32 %v1459_v62, %v5157_v13  ;;  %v5202_v43 = vmul.f32 %v1650_v28, %v5163_v18  ;;  %s5505_s26 = sld [smem:[#allocation6 + $0x34]] }
 0x396   :  { %v1573_v29 = vld.sshfl [vmem:[#allocation1 + $0x8] sm:$0xff pattern:$0x73625140]  ;;  %6480 = vst [vmem:[#allocation171_spill] sm:$0xff] %v5163_v18  ;;  %v1445_v56 = vadd.f32 %v4990_v9, %v1434_v25  ;;  %v5207_v39 = vmul.f32 %v1650_v28, %v5157_v13  ;;  %v5213_v53 = vmul.f32 %v1841_v54, %v5157_v13  ;;  %v5216_v9 = vmul.f32 %v1008_v19, %v3281_v52  ;;  %v6488_v25 = vld [vmem:[#allocation66_spill] sm:$0xff]  ;;  %s5516_s27 = sld [smem:[#allocation6 + $0x19]] }
 0x397   :  { %v1577_v7 = vadd.f32 %v1573_v29, %v3856_v3  ;;  %1630 = vst [vmem:[#allocation1] ss:$4 sm:$0xff] %v4173_v63  ;;  %v5181_v3 = vmul.f32 %v2408_v51, %v5065_v24  ;;  %v1450_v51 = vadd.f32 %v4996_v36, %v1444_v22  ;;  %v1460_v29 = vmul.f32 %v1459_v62, %v5163_v18  ;;  %v6491_v19 = vld [vmem:[#allocation84_spill] sm:$0xff]  ;;  %v6493_v63 = vld [vmem:[#allocation67_spill] sm:$0xff] }
 0x398   :  { %6481 = vst [vmem:[#allocation172_spill] sm:$0xff] %v5175_v35  ;;  %v5210_v36 = vmul.f32 %v1841_v54, %v5163_v18  ;;  %v5226_v28 = vmul.f32 %v2032_v14, %v5163_v18  ;;  %v5229_v62 = vmul.f32 %v2032_v14, %v5157_v13  ;;  %v5231_v54 = vpop.permute.xlu2 %1081  ;;  %v6492_v14 = vld [vmem:[#allocation68_spill] sm:$0xff]  ;;  %v5242_v2 = vmul.f32 %v2223_v61, %v5163_v18 }
 0x399   :  { %v1583_v32 = vadd.f32 %v6482_v37, %v1577_v7  ;;  %6483 = vst [vmem:[#allocation54_spill] sm:$0xff] %v5181_v3  ;;  %v6485_v7 = vld [vmem:[#allocation55_spill] sm:$0xff]  ;;  %v1576_v37 = vadd.f32 %v1572_v40, %v6486_v5  ;;  %v1272_v40 = vadd.f32 %v1270_v10, %v1266_v41  ;;  %v1451_v5 = vadd.f32 %v4812_v58, %v1445_v56  ;;  %v1058_v10 = vpop.permute.xlu1 %1057 }
 0x39a   :  { %6487 = vst [vmem:[#allocation55_spill] sm:$0xff] %v5216_v9  ;;  %v1456_v41 = vadd.f32 %v5114_v42, %v1450_v51  ;;  %v6496_v58 = vstv %s4847_s25  ;;  %v6498_v56 = vstv %s4821_s5  ;;  %v6499_v51 = vstv %s4862_s19  ;;  %s5311_s5 = sld [smem:[#allocation6 + $0x4a]] }
 0x39b   :  { %v1589_v4 = vadd.f32 %v6485_v7, %v1583_v32  ;;  %v1582_v57 = vadd.f32 %v6488_v25, %v1576_v37  ;;  %6489 = vst [vmem:[#allocation22_spill] sm:$0xff] %v5226_v28  ;;  %v1056_v32 = vpop.permute.xlu0 %1055  ;;  %v1271_v7 = vadd.f32 %v1269_v20, %v1265_v26  ;;  %v5252_v42 = vmul.f32 %v6496_v58, %v5216_v9  ;;  %v6503_v28 = vld [vmem:[#allocation97_spill] sm:$0xff]  ;;  %s5317_s25 = sld [smem:[#allocation6 + $0x4e]] }
 0x39c   :  { %6490 = vst [vmem:[#allocation66_spill] sm:$0xff] %v5229_v62  ;;  %v1062_v37 = vsel %vm136_vm0, 0.0, %v1056_v32  ;;  %v6497_v20 = vstv %s4832_s10  ;;  %v1059_v58 = vsel %vm136_vm0, %v1056_v32, %v1058_v10  ;;  %s5271_s10 = sld [smem:[#allocation6 + $0x63]]  ;;  %v1471_v35 = vstv %s5196_s18  ;;  %vm6566_vm0 = vmmov %vm6329_vm10 }
 0x39d   :  { %v1595_v25 = vadd.f32 %v6492_v14, %v1589_v4  ;;  %v1588_v24 = vadd.f32 %v6493_v63, %v1582_v57  ;;  %6494 = vst [vmem:[#allocation84_spill] sm:$0xff] %v5242_v2  ;;  %v1466_v26 = vmul.f32 %v6497_v20, %v5216_v9  ;;  %v1275_v63 = vmul.f32 %v6498_v56, %v5216_v9  ;;  %s5338_s19 = sld [smem:[#allocation6 + $0x2f]] }
 0x39e   :  { %v5220_v22 = vld.sshfl [vmem:[#allocation1] sm:$0xff pattern:$0x73625140]  ;;  %v5222_v60 = vld.sshfl [vmem:[#allocation1 + $0x8] sm:$0xff pattern:$0x73625140]  ;;  %v5263_v4 = vmul.f32 %v6499_v51, %v5216_v9  ;;  %v1278_v14 = vadd.f32 %v5044_v48, %v1272_v40  ;;  %v5269_v3 = vmul.f32 %v1062_v37, %v3274_v47  ;;  %v1457_v20 = vadd.f32 %v5117_v33, %v1451_v5 }
 0x39f   :  { %1689 = vst [vmem:[#allocation1] ss:$4 sm:$0xff] %v6491_v19  ;;  %v5245_v19 = vmul.f32 %v2223_v61, %v5157_v13  ;;  %v6500_v61 = vld [vmem:[#allocation90_spill] sm:$0xff]  ;;  %v1462_v56 = vadd.f32 %v1460_v29, %v1456_v41  ;;  %v1277_v2 = vadd.f32 %v1275_v63, %v1271_v7  ;;  %v6502_v51 = vld [vmem:[#allocation96_spill] sm:$0xff]  ;;  %v5280_v48 = vsel %vm155_vm1, 0.0, %v5151_v44  ;;  %s5574_s18 = sld [smem:[#allocation6 + $0x66]] }
 0x3a0   :  { %v1594_v57 = vadd.f32 %v6500_v61, %v1588_v24  ;;  %6501 = vst [vmem:[#allocation67_spill] sm:$0xff] %v5269_v3  ;;  %v1601_v24 = vadd.f32 %v6503_v28, %v1595_v25  ;;  %v1286_v61 = vstv %s5177_s1  ;;  %v1477_v40 = vstv %s5185_s24  ;;  %v6506_v5 = vld [vmem:[#allocation108_spill] sm:$0xff]  ;;  %v6507_v28 = vld [vmem:[#allocation114_spill] sm:$0xff]  ;;  %v5295_v63 = vpop.permute.xlu2 %1105  ;;  %s5550_s1 = sld [smem:[#allocation6 + $0x50]] }
 0x3a1   :  { %6495 = vst [vmem:[#allocation68_spill] sm:$0xff] %v5245_v19  ;;  %v5285_v10 = vmul.f32 %v1059_v58, %v3297_v6  ;;  %v1280_v33 = vstv %s5218_s29  ;;  %v1463_v58 = vadd.f32 %v1461_v59, %v1457_v20  ;;  %v1287_v62 = vmul.f32 %v1286_v61, %v5280_v48  ;;  %s5556_s24 = sld [smem:[#allocation6 + $0x35]] }
 0x3a2   :  { %v1600_v19 = vadd.f32 %v6502_v51, %v1594_v57  ;;  %6504 = vst [vmem:[#allocation90_spill] sm:$0xff] %v5280_v48  ;;  %v1607_v37 = vadd.f32 %v6507_v28, %v1601_v24  ;;  %v1472_v57 = vmul.f32 %v1471_v35, %v5269_v3  ;;  %v6508_v51 = vld [vmem:[#allocation44_spill] sm:$0xff]  ;;  %v1468_v9 = vadd.f32 %v1466_v26, %v1462_v56  ;;  %s5611_s29 = sld [smem:[#allocation6 + $0xb5]] }
 0x3a3   :  { %6505 = vst [vmem:[#allocation96_spill] sm:$0xff] %v5285_v10  ;;  %v1662_v24 = vstv %s5247_s2  ;;  %v1281_v28 = vmul.f32 %v1280_v33, %v5269_v3  ;;  %v1478_v25 = vmul.f32 %v1477_v40, %v5280_v48  ;;  %v6509_v18 = vstv %s5191_s0  ;;  %s5620_s2 = sld [smem:[#allocation6 + $0x68]] }
 0x3a4   :  { %v1606_v41 = vadd.f32 %v6506_v5, %v1600_v19  ;;  %v1613_v19 = vadd.f32 %v4735_v50, %v1607_v37  ;;  %v1071_v5 = vpop.permute.xlu0 %1070  ;;  %v1473_v59 = vmul.f32 %v1471_v35, %v5285_v10  ;;  %v1282_v26 = vmul.f32 %v1280_v33, %v5285_v10 }
 0x3a5   :  { %v1474_v20 = vadd.f32 %v1472_v57, %v1468_v9  ;;  %v1853_v56 = vstv %s5271_s10  ;;  %v6510_v37 = vstv %s5204_s7  ;;  %v5328_v32 = vsel %vm155_vm1, %v5151_v44, %v1071_v5  ;;  %vm6567_vm1 = vmmov %vm6566_vm0  ;;  %s5628_s10 = sld [smem:[#allocation6 + $0x69]] }
 0x3a6   :  { %v5288_v29 = vld.sshfl [vmem:[#allocation1] sm:$0xff pattern:$0x73625140]  ;;  %v5290_v7 = vld.sshfl [vmem:[#allocation1 + $0x8] sm:$0xff pattern:$0x73625140]  ;;  %v1612_v13 = vadd.f32 %v4741_v30, %v1606_v41  ;;  %v1619_v50 = vadd.f32 %v4845_v0, %v1613_v19  ;;  %v1469_v41 = vadd.f32 %v5055_v15, %v1463_v58  ;;  %v5331_v35 = vmul.f32 %v1662_v24, %v5269_v3 }
 0x3a7   :  { %1762 = vst [vmem:[#allocation1] ss:$4 sm:$0xff] %v6508_v51  ;;  %v5309_v51 = vmul.f32 %v6509_v18, %v5280_v48  ;;  %v5324_v18 = vmul.f32 %v6510_v37, %v5280_v48  ;;  %v5336_v9 = vmul.f32 %v1662_v24, %v5285_v10  ;;  %v1283_v15 = vadd.f32 %v1281_v28, %v1277_v2 }
 0x3a8   :  { %v1618_v30 = vadd.f32 %v4842_v23, %v1612_v13  ;;  %6511 = vst [vmem:[#allocation97_spill] sm:$0xff] %v5328_v32  ;;  %v6512_v23 = vld [vmem:[#allocation120_spill] sm:$0xff]  ;;  %v1625_v0 = vadd.f32 %v4944_v21, %v1619_v50  ;;  %v1475_v33 = vadd.f32 %v1473_v59, %v1469_v41  ;;  %v1284_v57 = vadd.f32 %v1282_v26, %v1278_v14  ;;  %v1080_v50 = vpop.permute.xlu1 %1079  ;;  %v5351_v2 = vpop.permute.xlu2 %1120  ;;  %v6513_v59 = vld [vmem:[#allocation17_spill] sm:$0xff] }
 0x3a9   :  { %v5343_v44 = vmul.f32 %v1853_v56, %v5269_v3  ;;  %v5346_v58 = vmul.f32 %v1853_v56, %v5285_v10  ;;  %v1480_v28 = vadd.f32 %v1478_v25, %v1474_v20  ;;  %v6514_v26 = vld [vmem:[#allocation49_spill] sm:$0xff]  ;;  %v1083_v56 = vsel %vm167_vm2, %v1080_v50, %v5231_v54 }
 0x3aa   :  { %v1624_v13 = vadd.f32 %v6512_v23, %v1618_v30  ;;  %v1636_v24 = vadd.f32 %v5222_v60, %v1625_v0  ;;  %v1479_v30 = vmul.f32 %v1477_v40, %v5328_v32  ;;  %v1086_v41 = vsel %vm167_vm2, 0.0, %v1080_v50  ;;  %v6515_v40 = vld [vmem:[#allocation138_spill] sm:$0xff]  ;;  %v6516_v23 = vld [vmem:[#allocation56_spill] sm:$0xff] }
 0x3ab   :  { %v1288_v25 = vmul.f32 %v1286_v61, %v5328_v32  ;;  %v5363_v20 = vadd.f32 %v1287_v62, %v1283_v15  ;;  %v5372_v0 = vmul.f32 %v1083_v56, %v3299_v8  ;;  %v1674_v15 = vstv %s5311_s5  ;;  %s5632_s5 = sld [smem:[#allocation6 + $0x7e]] }
 0x3ac   :  { %v1635_v21 = vadd.f32 %v5220_v22, %v1624_v13  ;;  %v1125_v22 = vsel %vm214_vm5, %v5351_v2, 0.0  ;;  %v1642_v37 = vadd.f32 %v6515_v40, %v1636_v24  ;;  %v5369_v13 = vmul.f32 %v1086_v41, %v3281_v52  ;;  %v6523_v41 = vld [vmem:[#allocation23_spill] sm:$0xff] }
 0x3ad   :  { %6518 = vst [vmem:[#allocation114_spill] sm:$0xff] %v5372_v0  ;;  %v6521_v50 = vstv %s5191_s0  ;;  %v1481_v56 = vadd.f32 %v1479_v30, %v1475_v33  ;;  %s5563_s0 = sld [smem:[#allocation6 + $0x1a]]  ;;  %vm2686_vm2 = vcmask 74752  }
 0x3ae   :  { %v1763_v19 = vld.sshfl [vmem:[#allocation1] sm:$0xff pattern:$0x73625140]  ;;  %v1764_v5 = vld.sshfl [vmem:[#allocation1 + $0x8] sm:$0xff pattern:$0x73625140]  ;;  %v1641_v60 = vadd.f32 %v5000_v34, %v1635_v21  ;;  %v5375_v34 = vmul.f32 %v1125_v22, %v3297_v6  ;;  %v1648_v61 = vadd.f32 %v5126_v12, %v1642_v37  ;;  %v1675_v40 = vmul.f32 %v1674_v15, %v5369_v13 }
 0x3af   :  { %v1768_v14 = vadd.f32 %v1764_v5, %v6513_v59  ;;  %1821 = vst [vmem:[#allocation1] ss:$4 sm:$0xff] %v6514_v26  ;;  %v6185_v5 = vstv %s5317_s25  ;;  %v6520_v21 = vld [vmem:[#allocation57_spill] sm:$0xff]  ;;  %v1670_v59 = vmul.f32 %v6521_v50, %v5328_v32  ;;  %v1767_v22 = vadd.f32 %v1763_v19, %v6523_v41 }
 0x3b0   :  { %6517 = vst [vmem:[#allocation108_spill] sm:$0xff] %v5369_v13  ;;  %v1647_v62 = vadd.f32 %v5120_v16, %v1641_v60  ;;  %v1654_v12 = vadd.f32 %v5207_v39, %v1648_v61  ;;  %v1483_v60 = vstv %s5338_s19  ;;  %v1676_v37 = vmul.f32 %v1674_v15, %v5372_v0  ;;  %v1093_v61 = vpop.permute.xlu0 %1092  ;;  %v6525_v50 = vld [vmem:[#allocation85_spill] sm:$0xff]  ;;  %s5643_s19 = sld [smem:[#allocation6 + $0x80]] }
 0x3b1   :  { %v1774_v54 = vadd.f32 %v6516_v23, %v1768_v14  ;;  %6519 = vst [vmem:[#allocation44_spill] sm:$0xff] %v5375_v34  ;;  %v6522_v14 = vstv %s5204_s7  ;;  %v5403_v23 = vmul.f32 %v6185_v5, %v5375_v34  ;;  %v1485_v41 = vmul.f32 %v1483_v60, %v5372_v0  ;;  %s5603_s7 = sld [smem:[#allocation6 + $0x9a]] }
 0x3b2   :  { %v5392_v26 = vmul.f32 %v6522_v14, %v5328_v32  ;;  %v1653_v16 = vadd.f32 %v5202_v43, %v1647_v62  ;;  %v6524_v43 = vld [vmem:[#allocation74_spill] sm:$0xff]  ;;  %v1660_v39 = vadd.f32 %v5060_v38, %v1654_v12  ;;  %v1095_v62 = vpop.permute.xlu1 %1094  ;;  %v1484_v14 = vmul.f32 %v1483_v60, %v5369_v13  ;;  %v6526_v38 = vld [vmem:[#allocation69_spill] sm:$0xff]  ;;  %v6527_v12 = vld [vmem:[#allocation75_spill] sm:$0xff] }
 0x3b3   :  { %v1780_v24 = vadd.f32 %v6520_v21, %v1774_v54  ;;  %v5405_v54 = vadd.f32 %v1288_v25, %v1284_v57  ;;  %v1773_v30 = vadd.f32 %v6524_v43, %v1767_v22  ;;  %v1096_v57 = vsel %vm186_vm3, %v1093_v61, %v1095_v62  ;;  %v6530_v21 = vld [vmem:[#allocation91_spill] sm:$0xff] }
 0x3b4   :  { %v1659_v15 = vadd.f32 %v5252_v42, %v1653_v16  ;;  %v1099_v25 = vsel %vm186_vm3, 0.0, %v1093_v61  ;;  %v5425_v5 = vmul.f32 %v1096_v57, %v3297_v6  ;;  %v1666_v62 = vadd.f32 %v5336_v9, %v1660_v39  ;;  %v6532_v9 = vld [vmem:[#allocation98_spill] sm:$0xff] }
 0x3b5   :  { %v1786_v22 = vadd.f32 %v6526_v38, %v1780_v24  ;;  %v1779_v43 = vadd.f32 %v6527_v12, %v1773_v30  ;;  %v5429_v16 = vmul.f32 %v1099_v25, %v3274_v47  ;;  %v1489_v61 = vstv %s5377_s16  ;;  %v6533_v12 = vld [vmem:[#allocation99_spill] sm:$0xff]  ;;  %s5761_s16 = sld [smem:[#allocation6 + $0x9f]] }
 0x3b6   :  { %v5409_v33 = vld.sshfl [vmem:[#allocation1] sm:$0xff pattern:$0x73625140]  ;;  %v5411_v19 = vld.sshfl [vmem:[#allocation1 + $0x8] sm:$0xff pattern:$0x73625140]  ;;  %v1665_v42 = vadd.f32 %v5331_v35, %v1659_v15  ;;  %v1680_v38 = vstv %s5382_s30  ;;  %v6531_v30 = vstv %s5340_s20  ;;  %v1672_v57 = vadd.f32 %v1670_v59, %v1666_v62 }
 0x3b7   :  { %1880 = vst [vmem:[#allocation1] ss:$4 sm:$0xff] %v6525_v50  ;;  %v1292_v50 = vstv %s5365_s22  ;;  %v1785_v60 = vadd.f32 %v6530_v21, %v1779_v43  ;;  %v5442_v6 = vmul.f32 %v6531_v30, %v5375_v34  ;;  %v1486_v35 = vadd.f32 %v1484_v14, %v1480_v28  ;;  %v6535_v14 = vld [vmem:[#allocation109_spill] sm:$0xff]  ;;  %s5687_s22 = sld [smem:[#allocation6 + $0x83]] }
 0x3b8   :  { %6528 = vst [vmem:[#allocation120_spill] sm:$0xff] %v5425_v5  ;;  %v1671_v24 = vadd.f32 %v5309_v51, %v1665_v42  ;;  %v1487_v15 = vadd.f32 %v1485_v41, %v1481_v56  ;;  %v1491_v25 = vmul.f32 %v1489_v61, %v5425_v5  ;;  %v1792_v10 = vadd.f32 %v6533_v12, %v1786_v22  ;;  %v6536_v22 = vld [vmem:[#allocation115_spill] sm:$0xff]  ;;  %v1108_v62 = vpop.permute.xlu0 %1107  ;;  %v6538_v12 = vld [vmem:[#allocation126_spill] sm:$0xff]  ;;  %s5769_s30 = sld [smem:[#allocation6 + $0x9c]] }
 0x3b9   :  { %6529 = vst [vmem:[#allocation17_spill] sm:$0xff] %v5429_v16  ;;  %v1791_v39 = vadd.f32 %v6532_v9, %v1785_v60  ;;  %v1293_v51 = vmul.f32 %v1292_v50, %v5369_v13  ;;  %v1678_v43 = vadd.f32 %v1676_v37, %v1672_v57  ;;  %v1681_v42 = vmul.f32 %v1680_v38, %v5429_v16 }
 0x3ba   :  { %v1677_v21 = vadd.f32 %v1675_v40, %v1671_v24  ;;  %v1682_v30 = vmul.f32 %v1680_v38, %v5425_v5  ;;  %v1294_v28 = vmul.f32 %v1292_v50, %v5372_v0  ;;  %v1798_v40 = vadd.f32 %v6536_v22, %v1792_v10  ;;  %v6537_v24 = vld [vmem:[#allocation45_spill] sm:$0xff] }
 0x3bb   :  { %v1797_v41 = vadd.f32 %v6535_v14, %v1791_v39  ;;  %v1490_v37 = vmul.f32 %v1489_v61, %v5429_v16  ;;  %v1298_v60 = vstv %s5407_s15  ;;  %v1109_v50 = vsel %vm200_vm4, %v5295_v63, %v1108_v62  ;;  %s5773_s15 = sld [smem:[#allocation6 + $0x9e]] }
 0x3bc   :  { %v1112_v38 = vsel %vm200_vm4, %v1108_v62, 0.0  ;;  %v1683_v57 = vadd.f32 %v1681_v42, %v1677_v21  ;;  %v1493_v9 = vadd.f32 %v1491_v25, %v1487_v15  ;;  %v1684_v14 = vadd.f32 %v1682_v30, %v1678_v43  ;;  %v6542_v62 = vld [vmem:[#allocation139_spill] sm:$0xff]  ;;  %v6543_v42 = vld [vmem:[#allocation140_spill] sm:$0xff] }
 0x3bd   :  { %v1803_v3 = vadd.f32 %v6538_v12, %v1797_v41  ;;  %v5470_v10 = vmul.f32 %v1112_v38, %v3299_v8  ;;  %v5473_v61 = vmul.f32 %v1109_v50, %v3281_v52  ;;  %v1697_v22 = vstv %s5432_s6  ;;  %v1119_v12 = vpop.permute.xlu1 %1118  ;;  %s5785_s6 = sld [smem:[#allocation6 + $0xb6]] }
 0x3be   :  { %v5455_v59 = vld.sshfl [vmem:[#allocation1] sm:$0xff pattern:$0x73625140]  ;;  %v5457_v56 = vld.sshfl [vmem:[#allocation1 + $0x8] sm:$0xff pattern:$0x73625140]  ;;  %v1299_v63 = vmul.f32 %v1298_v60, %v5429_v16  ;;  %v1694_v41 = vadd.f32 %v5288_v29, %v1683_v57  ;;  %v1492_v43 = vadd.f32 %v1490_v37, %v1486_v35  ;;  %v1506_v30 = vstv %s5445_s3 }
 0x3bf   :  { %6534 = vst [vmem:[#allocation49_spill] sm:$0xff] %v5457_v56  ;;  %v6539_v56 = vld [vmem:[#allocation127_spill] sm:$0xff]  ;;  %v1809_v21 = vadd.f32 %v6542_v62, %v1803_v3  ;;  %v1699_v25 = vmul.f32 %v1697_v22, %v5470_v10  ;;  %v1695_v3 = vadd.f32 %v5290_v7, %v1684_v14  ;;  %v1504_v38 = vadd.f32 %v5090_v11, %v1493_v9  ;;  %v6545_v9 = vld [vmem:[#allocation18_spill] sm:$0xff]  ;;  %v6547_v62 = vld [vmem:[#allocation141_spill] sm:$0xff]  ;;  %s5798_s3 = sld [smem:[#allocation6 + $0x85]] }
 0x3c0   :  { %1953 = vst [vmem:[#allocation1] ss:$4 sm:$0xff] %v6537_v24  ;;  %v1804_v39 = vadd.f32 %v6539_v56, %v1798_v40  ;;  %v1295_v24 = vadd.f32 %v1293_v51, %v5363_v20  ;;  %v1296_v56 = vadd.f32 %v1294_v28, %v5405_v54  ;;  %v1300_v40 = vmul.f32 %v1298_v60, %v5425_v5  ;;  %v6544_v20 = vld [vmem:[#allocation121_spill] sm:$0xff]  ;;  %v6546_v14 = vld [vmem:[#allocation50_spill] sm:$0xff] }
 0x3c1   :  { %6540 = vst [vmem:[#allocation138_spill] sm:$0xff] %v5470_v10  ;;  %v1815_v51 = vadd.f32 %v6544_v20, %v1809_v21  ;;  %v1698_v54 = vmul.f32 %v1697_v22, %v5473_v61  ;;  %v1508_v29 = vmul.f32 %v1506_v30, %v5470_v10  ;;  %v1315_v28 = vstv %s5453_s17  ;;  %s5802_s17 = sld [smem:[#allocation6 + $0xa0]] }
 0x3c2   :  { %6541 = vst [vmem:[#allocation56_spill] sm:$0xff] %v5473_v61  ;;  %v1810_v15 = vadd.f32 %v6543_v42, %v1804_v39  ;;  %v1301_v35 = vadd.f32 %v1299_v63, %v1295_v24  ;;  %v1701_v7 = vadd.f32 %v1699_v25, %v1695_v3  ;;  %v1507_v11 = vmul.f32 %v1506_v30, %v5473_v61 }
 0x3c3   :  { %v1826_v57 = vadd.f32 %v5409_v33, %v1815_v51  ;;  %v1122_v22 = vsel %vm214_vm5, %v1119_v12, %v5351_v2  ;;  %v1510_v24 = vadd.f32 %v1508_v29, %v1504_v38  ;;  %v1302_v63 = vadd.f32 %v1300_v40, %v1296_v56  ;;  %v6550_v51 = vld [vmem:[#allocation136_spill] sm:$0xff] }
 0x3c4   :  { %v1816_v50 = vadd.f32 %v4950_v1, %v1810_v15  ;;  %v5510_v21 = vmul.f32 %v1122_v22, %v3274_v47  ;;  %v1316_v42 = vmul.f32 %v1315_v28, %v5473_v61  ;;  %v6548_v15 = vld [vmem:[#allocation58_spill] sm:$0xff]  ;;  %v1700_v30 = vadd.f32 %v1698_v54, %v1694_v41  ;;  %v6552_v54 = vld [vmem:[#allocation59_spill] sm:$0xff] }
 0x3c5   :  { %v1832_v33 = vadd.f32 %v5008_v17, %v1826_v57  ;;  %v1503_v20 = vadd.f32 %v5088_v27, %v1492_v43  ;;  %v1317_v2 = vmul.f32 %v1315_v28, %v5470_v10  ;;  %v6549_v47 = vstv %s5317_s25  ;;  %v6551_v43 = vld [vmem:[#allocation137_spill] sm:$0xff]  ;;  %v6553_v28 = vld [vmem:[#allocation26_spill] sm:$0xff]  ;;  %s5638_s25 = sld [smem:[#allocation6 + $0x6a]] }
 0x3c6   :  { %v1827_v1 = vadd.f32 %v5411_v19, %v1816_v50  ;;  %v1704_v40 = vmul.f32 %v6549_v47, %v5510_v21  ;;  %v1312_v50 = vadd.f32 %v6550_v51, %v1301_v35  ;;  %v1707_v41 = vadd.f32 %v5403_v23, %v1701_v7 }
 0x3c7   :  { %v1954_v37 = vld.sshfl [vmem:[#allocation1] sm:$0xff pattern:$0x73625140]  ;;  %v1955_v60 = vld.sshfl [vmem:[#allocation1 + $0x8] sm:$0xff pattern:$0x73625140]  ;;  %v1838_v17 = vadd.f32 %v5129_v31, %v1832_v33  ;;  %v1509_v3 = vadd.f32 %v1507_v11, %v1503_v20  ;;  %v1516_v27 = vadd.f32 %v5442_v6, %v1510_v24  ;;  %v1313_v38 = vadd.f32 %v6551_v43, %v1302_v63 }
 0x3c8   :  { %v1959_v39 = vadd.f32 %v1955_v60, %v6545_v9  ;;  %2012 = vst [vmem:[#allocation1] ss:$4 sm:$0xff] %v6546_v14  ;;  %v1833_v19 = vadd.f32 %v6547_v62, %v1827_v1  ;;  %v1958_v60 = vadd.f32 %v1954_v37, %v6553_v28  ;;  %v1318_v57 = vadd.f32 %v1316_v42, %v1312_v50  ;;  %v6555_v11 = vld [vmem:[#allocation76_spill] sm:$0xff]  ;;  %v1134_v37 = vpop.permute.xlu1 %1133  ;;  %v1132_v14 = vpop.permute.xlu0 %1131  ;;  %v6556_v24 = vld [vmem:[#allocation86_spill] sm:$0xff] }
 0x3c9   :  { %v1844_v31 = vadd.f32 %v5210_v36, %v1838_v17  ;;  %v1319_v12 = vadd.f32 %v1317_v2, %v1313_v38  ;;  %v1321_v35 = vstv %s5485_s8  ;;  %v1865_v23 = vstv %s5491_s13  ;;  %v6558_v42 = vld [vmem:[#allocation70_spill] sm:$0xff]  ;;  %s5810_s8 = sld [smem:[#allocation6 + $0xb7]] }
 0x3ca   :  { %v1965_v25 = vadd.f32 %v6548_v15, %v1959_v39  ;;  %v1839_v56 = vadd.f32 %v5134_v49, %v1833_v19  ;;  %v6554_v49 = vstv %s5340_s20  ;;  %v1964_v9 = vadd.f32 %v6555_v11, %v1958_v60  ;;  %v6559_v15 = vld [vmem:[#allocation77_spill] sm:$0xff]  ;;  %v6561_v60 = vld [vmem:[#allocation100_spill] sm:$0xff]  ;;  %s5672_s20 = sld [smem:[#allocation6 + $0x81]] }
 0x3cb   :  { %v1513_v1 = vmul.f32 %v6554_v49, %v5510_v21  ;;  %v1706_v36 = vadd.f32 %v1704_v40, %v1700_v30  ;;  %v1322_v22 = vmul.f32 %v1321_v35, %v5510_v21  ;;  %v5544_v63 = vsel %vm228_vm6, %v1134_v37, 0.0  ;;  %v6560_v40 = vld [vmem:[#allocation92_spill] sm:$0xff]  ;;  %v6562_v49 = vld [vmem:[#allocation101_spill] sm:$0xff]  ;;  %s5819_s13 = sld [smem:[#allocation6 + $0xba]] }
 0x3cc   :  { %v1971_v29 = vadd.f32 %v6552_v54, %v1965_v25  ;;  %v1845_v39 = vadd.f32 %v5213_v53, %v1839_v56  ;;  %6557 = vst [vmem:[#allocation57_spill] sm:$0xff] %v5544_v63  ;;  %v5547_v33 = vsel %vm228_vm6, %v1132_v14, %v1134_v37  ;;  %v1709_v62 = vstv %s5494_s14  ;;  %s5829_s14 = sld [smem:[#allocation6 + $0xb9]] }
 0x3cd   :  { %v1518_v19 = vstv %s5505_s26  ;;  %v1970_v25 = vadd.f32 %v6559_v15, %v1964_v9  ;;  %v1710_v30 = vmul.f32 %v1709_v62, %v5547_v33  ;;  %v1850_v20 = vadd.f32 %v5263_v4, %v1844_v31  ;;  %s5833_s26 = sld [smem:[#allocation6 + $0x86]] }
 0x3ce   :  { %v1977_v53 = vadd.f32 %v6558_v42, %v1971_v29  ;;  %v1711_v2 = vmul.f32 %v1709_v62, %v5544_v63  ;;  %v1519_v17 = vmul.f32 %v1518_v19, %v5547_v33  ;;  %v1520_v56 = vmul.f32 %v1518_v19, %v5544_v63 }
 0x3cf   :  { %v5535_v7 = vld.sshfl [vmem:[#allocation1] sm:$0xff pattern:$0x73625140]  ;;  %v5537_v6 = vld.sshfl [vmem:[#allocation1 + $0x8] sm:$0xff pattern:$0x73625140]  ;;  %v1327_v47 = vstv %s5516_s27  ;;  %v1976_v51 = vadd.f32 %v6560_v40, %v1970_v25  ;;  %v1851_v50 = vadd.f32 %v5076_v55, %v1845_v39  ;;  %v1515_v43 = vadd.f32 %v1513_v1, %v1509_v3 }
 0x3d0   :  { %2071 = vst [vmem:[#allocation1] ss:$4 sm:$0xff] %v6556_v24  ;;  %v1323_v38 = vmul.f32 %v1321_v35, %v5375_v34  ;;  %v1324_v54 = vadd.f32 %v1322_v22, %v1318_v57  ;;  %v1328_v29 = vmul.f32 %v1327_v47, %v5547_v33  ;;  %v1329_v4 = vmul.f32 %v1327_v47, %v5544_v63  ;;  %v6563_v1 = vld [vmem:[#allocation110_spill] sm:$0xff]  ;;  %v6564_v39 = vld [vmem:[#allocation116_spill] sm:$0xff]  ;;  %s5856_s27 = sld [smem:[#allocation6 + $0xa1]] }
 0x3d1   :  { %v1866_v28 = vmul.f32 %v1865_v23, %v5369_v13  ;;  %v1982_v31 = vadd.f32 %v6561_v60, %v1976_v51  ;;  %v1983_v11 = vadd.f32 %v6562_v49, %v1977_v53  ;;  %v1712_v9 = vadd.f32 %v1710_v30, %v1706_v36  ;;  %v1143_v36 = vpop.permute.xlu2 %1142  ;;  %v6568_v25 = vld [vmem:[#allocation128_spill] sm:$0xff]  ;;  %v6570_v51 = vld [vmem:[#allocation142_spill] sm:$0xff] }
 0x3d2   :  { %v1325_v37 = vadd.f32 %v1323_v38, %v1319_v12  ;;  %v1713_v14 = vadd.f32 %v1711_v2, %v1707_v41  ;;  %v1521_v24 = vadd.f32 %v1519_v17, %v1515_v43  ;;  %v1522_v62 = vadd.f32 %v1520_v56, %v1516_v27  ;;  %v1145_v12 = vpop.permute.xlu0 %1144  ;;  %v6571_v43 = vld [vmem:[#allocation144_spill] sm:$0xff] }
 0x3d3   :  { %v1856_v55 = vadd.f32 %v5343_v44, %v1850_v20  ;;  %v1988_v35 = vadd.f32 %v6563_v1, %v1982_v31  ;;  %v1989_v22 = vadd.f32 %v6564_v39, %v1983_v11  ;;  %v1857_v41 = vadd.f32 %v5346_v58, %v1851_v50  ;;  %v6565_v44 = vld [vmem:[#allocation46_spill] sm:$0xff]  ;;  %v6569_v20 = vld [vmem:[#allocation129_spill] sm:$0xff] }
 0x3d4   :  { %v1867_v27 = vmul.f32 %v1865_v23, %v5372_v0  ;;  %v1146_v19 = vsel %vm6566_vm0, %v1143_v36, %v1145_v12  ;;  %v1149_v42 = vsel %vm6567_vm1, %v1145_v12, 0.0  ;;  %v1330_v53 = vadd.f32 %v1328_v29, %v1324_v54 }
 0x3d5   :  { %v1331_v15 = vadd.f32 %v1329_v4, %v1325_v37  ;;  %v1994_v30 = vadd.f32 %v6568_v25, %v1988_v35  ;;  %v1995_v2 = vadd.f32 %v6569_v20, %v1989_v22  ;;  %v5590_v17 = vmul.f32 %v1146_v19, %v3281_v52  ;;  %v6573_v25 = vld [vmem:[#allocation19_spill] sm:$0xff] }
 0x3d6   :  { %v5593_v56 = vmul.f32 %v1149_v42, %v3299_v8  ;;  %v1715_v58 = vstv %s5550_s1  ;;  %v1524_v23 = vstv %s5556_s24  ;;  %v1333_v47 = vstv %s5563_s0  ;;  %v6574_v20 = vld [vmem:[#allocation51_spill] sm:$0xff]  ;;  %s5880_s1 = sld [smem:[#allocation6 + $0xbb]] }
 0x3d7   :  { %v5576_v3 = vld.sshfl [vmem:[#allocation1] sm:$0xff pattern:$0x73625140]  ;;  %v5578_v57 = vld.sshfl [vmem:[#allocation1 + $0x8] sm:$0xff pattern:$0x73625140]  ;;  %v1862_v40 = vadd.f32 %v5324_v18, %v1856_v55  ;;  %v2000_v50 = vadd.f32 %v6570_v51, %v1994_v30  ;;  %v2001_v38 = vadd.f32 %v6571_v43, %v1995_v2  ;;  %v1716_v54 = vmul.f32 %v1715_v58, %v5590_v17 }
 0x3d8   :  { %2144 = vst [vmem:[#allocation1] ss:$4 sm:$0xff] %v6565_v44  ;;  %v1717_v29 = vmul.f32 %v1715_v58, %v5593_v56  ;;  %v1525_v52 = vmul.f32 %v1524_v23, %v5590_v17  ;;  %v1526_v8 = vmul.f32 %v1524_v23, %v5593_v56  ;;  %v1334_v4 = vmul.f32 %v1333_v47, %v5590_v17  ;;  %v6572_v18 = vld [vmem:[#allocation122_spill] sm:$0xff]  ;;  %v6577_v51 = vld [vmem:[#allocation61_spill] sm:$0xff]  ;;  %s5903_s24 = sld [smem:[#allocation6 + $0xbc]] }
 0x3d9   :  { %v1335_v60 = vmul.f32 %v1333_v47, %v5593_v56  ;;  %v2006_v31 = vadd.f32 %v6572_v18, %v2000_v50  ;;  %v2007_v49 = vadd.f32 %v4954_v46, %v2001_v38  ;;  %v1718_v11 = vadd.f32 %v1716_v54, %v1712_v9  ;;  %v6579_v18 = vld [vmem:[#allocation167_spill] sm:$0xff]  ;;  %s6019_s0 = sld [smem:[#allocation6 + $0xce]] }
 0x3da   :  { %v1719_v37 = vadd.f32 %v1717_v29, %v1713_v14  ;;  %v1527_v55 = vadd.f32 %v1525_v52, %v1521_v24  ;;  %v1528_v1 = vadd.f32 %v1526_v8, %v1522_v62  ;;  %v1336_v35 = vadd.f32 %v1334_v4, %v1330_v53  ;;  %v6575_v24 = vld [vmem:[#allocation143_spill] sm:$0xff]  ;;  %v6578_v29 = vld [vmem:[#allocation27_spill] sm:$0xff] }
 0x3db   :  { %v1871_v39 = vstv %s5574_s18  ;;  %v2018_v12 = vadd.f32 %v5537_v6, %v2007_v49  ;;  %v1337_v44 = vadd.f32 %v1335_v60, %v1331_v15  ;;  %v1863_v19 = vadd.f32 %v5392_v26, %v1857_v41  ;;  %v6576_v6 = vld [vmem:[#allocation60_spill] sm:$0xff]  ;;  %s6034_s18 = sld [smem:[#allocation6 + $0xcf]] }
 0x3dc   :  { %v1868_v42 = vadd.f32 %v1866_v28, %v1862_v40  ;;  %v1720_v46 = vmax.f32 %v1718_v11, 0.0  ;;  %v1721_v2 = vmax.f32 %v1719_v37, 0.0  ;;  %v1529_v9 = vmax.f32 %v1527_v55, 0.0 }
 0x3dd   :  { %v2017_v14 = vadd.f32 %v5535_v7, %v2006_v31  ;;  %v2024_v62 = vadd.f32 %v6575_v24, %v2018_v12  ;;  %v1530_v53 = vmax.f32 %v1528_v1, 0.0  ;;  %v1338_v58 = vmax.f32 %v1336_v35, 0.0  ;;  %v6580_v1 = vld [vmem:[#allocation78_spill] sm:$0xff]  ;;  %v6589_v24 = vld [vmem:[#allocation79_spill] sm:$0xff] }
 0x3de   :  { %v1722_v26 = vsel %vm667_vm7, %v1720_v46, 0.0  ;;  %v1723_v28 = vsel %vm667_vm7, %v1721_v2, 0.0  ;;  %v1531_v41 = vsel %vm667_vm7, %v1529_v9, 0.0  ;;  %v1869_v7 = vadd.f32 %v1867_v27, %v1863_v19  ;;  %v6584_v19 = vld [vmem:[#allocation170_spill] sm:$0xff]  ;;  %v6588_v9 = vld [vmem:[#allocation71_spill] sm:$0xff] }
 0x3df   :  { %v2145_v22 = vld.sshfl [vmem:[#allocation1] sm:$0xff pattern:$0x73625140]  ;;  %v2146_v36 = vld.sshfl [vmem:[#allocation1 + $0x8] sm:$0xff pattern:$0x73625140]  ;;  %v1724_v23 = vadd.f32 %v1723_v28, %v1722_v26  ;;  %v1872_v40 = vmul.f32 %v1871_v39, %v5429_v16  ;;  %v2241_v8 = vstv %s5603_s7  ;;  %v2432_v4 = vstv %s5611_s29 }
 0x3e0   :  { %v2150_v30 = vadd.f32 %v2146_v36, %v6573_v25  ;;  %2203 = vst [vmem:[#allocation1] ss:$4 sm:$0xff] %v6574_v20  ;;  %v1532_v47 = vsel %vm667_vm7, %v1530_v53, 0.0  ;;  %v1339_v38 = vmax.f32 %v1337_v44, 0.0  ;;  %v1340_v54 = vsel %vm667_vm7, %v1338_v58, 0.0  ;;  %v6583_v44 = vld [vmem:[#allocation87_spill] sm:$0xff] }
 0x3e1   :  { %v1533_v43 = vadd.f32 %v1532_v47, %v1531_v41  ;;  %v2149_v52 = vadd.f32 %v2145_v22, %v6578_v29  ;;  %1725 = vadd.xlane.f32.xlu0 %v1724_v23  ;;  %v1873_v27 = vmul.f32 %v1871_v39, %v5425_v5  ;;  %v2023_v60 = vadd.f32 %v5012_v45, %v2017_v14  ;;  %v6581_v39 = vld [vmem:[#allocation171_spill] sm:$0xff]  ;;  %v6592_v26 = vld [vmem:[#allocation166_spill] sm:$0xff]  ;;  %v6597_v29 = vld [vmem:[#allocation49_spill] sm:$0xff]  ;;  %s6042_s7 = sld [smem:[#allocation6 + $0xd0]] }
 0x3e2   :  { %v2156_v15 = vadd.f32 %v6576_v6, %v2150_v30  ;;  %v2030_v31 = vadd.f32 %v6579_v18, %v2024_v62  ;;  %v1341_v49 = vsel %vm667_vm7, %v1339_v38, 0.0  ;;  %v1874_v11 = vadd.f32 %v1872_v40, %v1868_v42  ;;  %v6590_v58 = vld [vmem:[#allocation55_spill] sm:$0xff]  ;;  %v6593_v41 = vld [vmem:[#allocation66_spill] sm:$0xff]  ;;  %s6060_s29 = sld [smem:[#allocation6 + $0xd1]] }
 0x3e3   :  { %1534 = vadd.xlane.f32.xlu2 %v1533_v43  ;;  %v2155_v35 = vadd.f32 %v6580_v1, %v2149_v52  ;;  %v6582_v22 = vstv %s5111_s11  ;;  %v1342_v45 = vadd.f32 %v1341_v49, %v1340_v54  ;;  %v1875_v12 = vadd.f32 %v1873_v27, %v1869_v7  ;;  %s5677_s11 = sld [smem:[#allocation6 + $0x6b]]  ;;  %v6600_v49 = vld [vmem:[#allocation102_spill] sm:$0xff] }
 0x3e4   :  { %v2162_v50 = vadd.f32 %v6577_v51, %v2156_v15  ;;  %v5653_v36 = vmul.f32 %v6582_v22, %v6581_v39  ;;  %v6585_v42 = vmov %v6582_v22  ;;  %v6586_v30 = vstv %s5236_s4  ;;  %v6595_v51 = vld [vmem:[#allocation93_spill] sm:$0xff]  ;;  %s5757_s4 = sld [smem:[#allocation6 + $0x9b]] }
 0x3e5   :  { %v5659_v25 = vmul.f32 %v6585_v42, %v6584_v19  ;;  %v5664_v20 = vmul.f32 %v6586_v30, %v5280_v48  ;;  %v5667_v46 = vmul.f32 %v2241_v8, %v5280_v48  ;;  %v5670_v2 = vmul.f32 %v2432_v4, %v5280_v48  ;;  %1343 = vadd.xlane.f32.xlu1 %v1342_v45  ;;  %v6602_v45 = vld [vmem:[#allocation22_spill] sm:$0xff]  ;;  %v6628_v19 = vld [vmem:[#allocation68_spill] sm:$0xff] }
 0x3e6   :  { %v2168_v14 = vadd.f32 %v6588_v9, %v2162_v50  ;;  %v2161_v62 = vadd.f32 %v6589_v24, %v2155_v35  ;;  %v1888_v53 = vstv %s5620_s2  ;;  %v6591_v6 = vstv %s4873_s21  ;;  %s5709_s21 = sld [smem:[#allocation6 + $0x84]] }
 0x3e7   :  { %v5645_v37 = vld.sshfl [vmem:[#allocation1] sm:$0xff pattern:$0x73625140]  ;;  %v5647_v55 = vld.sshfl [vmem:[#allocation1 + $0x8] sm:$0xff pattern:$0x73625140]  ;;  %v5682_v15 = vmul.f32 %v6591_v6, %v6590_v58  ;;  %v2029_v28 = vadd.f32 %v6592_v26, %v2023_v60  ;;  %v2036_v23 = vadd.f32 %v6593_v41, %v2030_v31  ;;  %v1885_v47 = vadd.f32 %v5455_v59, %v1874_v11 }
 0x3e8   :  { %2262 = vst [vmem:[#allocation1] ss:$4 sm:$0xff] %v6583_v44  ;;  %v6594_v7 = vstv %s4885_s23  ;;  %v2167_v50 = vadd.f32 %v6595_v51, %v2161_v62  ;;  %v6596_v43 = vmov %v6586_v30  ;;  %v5701_v54 = vmul.f32 %v2241_v8, %v5328_v32  ;;  %v6601_v8 = vld [vmem:[#allocation103_spill] sm:$0xff]  ;;  %s5727_s23 = sld [smem:[#allocation6 + $0x99]] }
 0x3e9   :  { %6587 = vst [vmem:[#allocation23_spill] sm:$0xff] %v5670_v2  ;;  %v5692_v40 = vmul.f32 %v6594_v7, %v6590_v58  ;;  %v5698_v38 = vmul.f32 %v6596_v43, %v5328_v32  ;;  %v1886_v52 = vadd.f32 %v6597_v29, %v1875_v12  ;;  %v5705_v59 = vmul.f32 %v2432_v4, %v5328_v32  ;;  %v6603_v12 = vld [vmem:[#allocation163_spill] sm:$0xff]  ;;  %v6640_v2 = vld [vmem:[#allocation118_spill] sm:$0xff]  ;;  %s6073_s2 = sld [smem:[#allocation6 + $0xd2]] }
 0x3ea   :  { %v1889_v27 = vmul.f32 %v1888_v53, %v5473_v61  ;;  %v1890_v60 = vmul.f32 %v1888_v53, %v5470_v10  ;;  %v6599_v18 = vstv %s4939_s9  ;;  %v2173_v11 = vadd.f32 %v6600_v49, %v2167_v50  ;;  %v6605_v62 = vld [vmem:[#allocation111_spill] sm:$0xff]  ;;  %v6608_v50 = vld [vmem:[#allocation130_spill] sm:$0xff]  ;;  %s5747_s9 = sld [smem:[#allocation6 + $0xb4]] }
 0x3eb   :  { %6598 = vst [vmem:[#allocation74_spill] sm:$0xff] %v5705_v59  ;;  %v5714_v31 = vmul.f32 %v6599_v18, %v6590_v58  ;;  %v2174_v1 = vadd.f32 %v6601_v8, %v2168_v14  ;;  %v1894_v35 = vstv %s5628_s10  ;;  %v1900_v22 = vstv %s5638_s25  ;;  %v6606_v14 = vld [vmem:[#allocation117_spill] sm:$0xff]  ;;  %v6607_v41 = vld [vmem:[#allocation47_spill] sm:$0xff]  ;;  %v6639_v59 = vld [vmem:[#allocation112_spill] sm:$0xff]  ;;  %s2967_s10 = sld [smem:[#allocation6 + $0xd6]] }
 0x3ec   :  { %v5721_v4 = vadd.f32 %v6602_v45, %v2029_v28  ;;  %v5724_v44 = vadd.f32 %v6603_v12, %v2036_v23  ;;  %v1891_v42 = vadd.f32 %v1889_v27, %v1885_v47  ;;  %v2044_v30 = vstv %s5632_s5  ;;  %v6609_v29 = vld [vmem:[#allocation131_spill] sm:$0xff]  ;;  %v6613_v12 = vld [vmem:[#allocation146_spill] sm:$0xff]  ;;  %s2968_s5 = sld [smem:[#allocation6 + $0xd7]] }
 0x3ed   :  { %v2179_v53 = vadd.f32 %v6605_v62, %v2173_v11  ;;  %v2180_v6 = vadd.f32 %v6606_v14, %v2174_v1  ;;  %v1892_v26 = vadd.f32 %v1890_v60, %v1886_v52  ;;  %v2056_v28 = vstv %s5643_s19  ;;  %v6610_v49 = vld [vmem:[#allocation67_spill] sm:$0xff]  ;;  %v6611_v52 = vld [vmem:[#allocation96_spill] sm:$0xff] }
 0x3ee   :  { %v1895_v23 = vmul.f32 %v1894_v35, %v5510_v21  ;;  %v1896_v47 = vmul.f32 %v1894_v35, %v5375_v34  ;;  %v1901_v7 = vmul.f32 %v1900_v22, %v5547_v33  ;;  %v1902_v51 = vmul.f32 %v1900_v22, %v5544_v63  ;;  %v6612_v22 = vld [vmem:[#allocation145_spill] sm:$0xff] }
 0x3ef   :  { %v5729_v9 = vld.sshfl [vmem:[#allocation1] sm:$0xff pattern:$0x73625140]  ;;  %v5731_v24 = vld.sshfl [vmem:[#allocation1 + $0x8] sm:$0xff pattern:$0x73625140]  ;;  %v2185_v43 = vadd.f32 %v6608_v50, %v2179_v53  ;;  %v2186_v27 = vadd.f32 %v6609_v29, %v2180_v6  ;;  %v1906_v18 = vstv %s5677_s11  ;;  %v5745_v11 = vmul.f32 %v2044_v30, %v6610_v49 }
 0x3f0   :  { %6604 = vst [vmem:[#allocation85_spill] sm:$0xff] %v5729_v9  ;;  %v5750_v60 = vmul.f32 %v2044_v30, %v6611_v52  ;;  %v5753_v8 = vmul.f32 %v2056_v28, %v5369_v13  ;;  %v2062_v1 = vstv %s5672_s20  ;;  %v2079_v35 = vstv %s5687_s22  ;;  %v6614_v29 = vld [vmem:[#allocation123_spill] sm:$0xff]  ;;  %s6716_s20 = sld [smem:[#allocation173_spill]] }
 0x3f1   :  { %2335 = vst [vmem:[#allocation1] ss:$4 sm:$0xff] %v6607_v41  ;;  %v2191_v45 = vadd.f32 %v6612_v22, %v2185_v43  ;;  %v2192_v62 = vadd.f32 %v6613_v12, %v2186_v27  ;;  %v1897_v53 = vadd.f32 %v1895_v23, %v1891_v42  ;;  %v1898_v14 = vadd.f32 %v1896_v47, %v1892_v26  ;;  %v6615_v43 = vld [vmem:[#allocation154_spill] sm:$0xff] }
 0x3f2   :  { %v1907_v6 = vmul.f32 %v1906_v18, %v5590_v17  ;;  %v1908_v30 = vmul.f32 %v1906_v18, %v5593_v56  ;;  %v5766_v41 = vmul.f32 %v2056_v28, %v5372_v0  ;;  %v2085_v50 = vstv %s5709_s21  ;;  %s6717_s21 = sld [smem:[#allocation174_spill]] }
 0x3f3   :  { %v2197_v32 = vadd.f32 %v6614_v29, %v2191_v45  ;;  %v2198_v22 = vadd.f32 %v6615_v43, %v2192_v62  ;;  %v1903_v27 = vadd.f32 %v1901_v7, %v1897_v53  ;;  %v1904_v42 = vadd.f32 %v1902_v51, %v1898_v14  ;;  %v6616_v53 = vld [vmem:[#allocation20_spill] sm:$0xff] }
 0x3f4   :  { %v5776_v26 = vmul.f32 %v2062_v1, %v5429_v16  ;;  %v5779_v23 = vmul.f32 %v2062_v1, %v5425_v5  ;;  %v5782_v28 = vmul.f32 %v2079_v35, %v5473_v61  ;;  %v2235_v47 = vstv %s5727_s23  ;;  %v6617_v29 = vld [vmem:[#allocation52_spill] sm:$0xff]  ;;  %v6618_v1 = vld [vmem:[#allocation29_spill] sm:$0xff]  ;;  %s3106_s23 = smov [#allocation12]  }
 0x3f5   :  { %v2208_v12 = vadd.f32 %v5645_v37, %v2197_v32  ;;  %v2209_v7 = vadd.f32 %v5647_v55, %v2198_v22  ;;  %v1909_v51 = vadd.f32 %v1907_v6, %v1903_v27  ;;  %v1910_v62 = vadd.f32 %v1908_v30, %v1904_v42  ;;  %v6620_v32 = vld [vmem:[#allocation158_spill] sm:$0xff]  ;;  %v6621_v55 = vld [vmem:[#allocation147_spill] sm:$0xff] }
 0x3f6   :  { %v5793_v48 = vmul.f32 %v2079_v35, %v5470_v10  ;;  %v5796_v58 = vmul.f32 %v2085_v50, %v5375_v34  ;;  %v6622_v27 = vld [vmem:[#allocation62_spill] sm:$0xff]  ;;  %v5807_v35 = vmul.f32 %v2235_v47, %v6610_v49 }
 0x3f7   :  { %v2214_v37 = vadd.f32 %v6620_v32, %v2208_v12  ;;  %v2215_v6 = vadd.f32 %v6621_v55, %v2209_v7  ;;  %v1911_v30 = vmax.f32 %v1909_v51, 0.0  ;;  %v1912_v22 = vmax.f32 %v1910_v62, 0.0  ;;  %v6626_v32 = vld [vmem:[#allocation63_spill] sm:$0xff]  ;;  %v6627_v55 = vld [vmem:[#allocation81_spill] sm:$0xff] }
 0x3f8   :  { %v2336_v18 = vld.sshfl [vmem:[#allocation1] sm:$0xff pattern:$0x73625140]  ;;  %v2337_v45 = vld.sshfl [vmem:[#allocation1 + $0x8] sm:$0xff pattern:$0x73625140] }
 0x3f9   :  { %v2341_v14 = vadd.f32 %v2337_v45, %v6616_v53  ;;  %2394 = vst [vmem:[#allocation1] ss:$4 sm:$0xff] %v6617_v29  ;;  %v2340_v43 = vadd.f32 %v2336_v18, %v6618_v1  ;;  %v6623_v18 = vld [vmem:[#allocation80_spill] sm:$0xff]  ;;  %v2247_v53 = vstv %s5757_s4  ;;  %v6625_v1 = vld [vmem:[#allocation169_spill] sm:$0xff]  ;;  %v1913_v51 = vsel %vm667_vm7, %v1911_v30, 0.0 }
 0x3fa   :  { %6619 = vst [vmem:[#allocation69_spill] sm:$0xff] %v5796_v58  ;;  %v6624_v29 = vld [vmem:[#allocation168_spill] sm:$0xff]  ;;  %v2221_v7 = vadd.f32 %v6625_v1, %v2215_v6  ;;  %v1914_v62 = vsel %vm667_vm7, %v1912_v22, 0.0  ;;  %v5823_v58 = vmul.f32 %v2235_v47, %v6611_v52  ;;  %v2270_v6 = vstv %s5773_s15 }
 0x3fb   :  { %v2347_v42 = vadd.f32 %v6622_v27, %v2341_v14  ;;  %v2346_v45 = vadd.f32 %v6623_v18, %v2340_v43  ;;  %v2220_v12 = vadd.f32 %v6624_v29, %v2214_v37  ;;  %v1915_v27 = vadd.f32 %v1914_v62, %v1913_v51  ;;  %v6629_v30 = vld [vmem:[#allocation72_spill] sm:$0xff] }
 0x3fc   :  { %v2253_v18 = vstv %s5769_s30  ;;  %v2227_v39 = vadd.f32 %v6628_v19, %v2221_v7  ;;  %v5826_v37 = vmul.f32 %v2247_v53, %v5369_v13  ;;  %v5836_v29 = vmul.f32 %v2247_v53, %v5372_v0  ;;  %v6631_v7 = vld [vmem:[#allocation164_spill] sm:$0xff]  ;;  %s6718_s30 = sld [smem:[#allocation175_spill]] }
 0x3fd   :  { %v2353_v14 = vadd.f32 %v6626_v32, %v2347_v42  ;;  %v2352_v43 = vadd.f32 %v6627_v55, %v2346_v45  ;;  %v6630_v42 = vld [vmem:[#allocation94_spill] sm:$0xff]  ;;  %1916 = vadd.xlane.f32.xlu2 %v1915_v27  ;;  %v2276_v19 = vstv %s5761_s16  ;;  %v5841_v62 = vmul.f32 %v2085_v50, %v5510_v21  ;;  %v6633_v53 = vld [vmem:[#allocation88_spill] sm:$0xff]  ;;  %v6635_v27 = vld [vmem:[#allocation105_spill] sm:$0xff] }
 0x3fe   :  { %v2233_v51 = vadd.f32 %v6631_v7, %v2227_v39  ;;  %v5844_v32 = vmul.f32 %v2253_v18, %v5429_v16  ;;  %v6634_v55 = vld [vmem:[#allocation104_spill] sm:$0xff]  ;;  %v5854_v39 = vmul.f32 %v2270_v6, %v5473_v61  ;;  %v5859_v50 = vmul.f32 %v2270_v6, %v5470_v10 }
 0x3ff   :  { %v2359_v22 = vadd.f32 %v6629_v30, %v2353_v14  ;;  %v2358_v45 = vadd.f32 %v6630_v42, %v2352_v43  ;;  %6632 = vst [vmem:[#allocation75_spill] sm:$0xff] %v5841_v62  ;;  %v5847_v14 = vmul.f32 %v2253_v18, %v5425_v5  ;;  %v2091_v42 = vstv %s5798_s3 }
 0x400   :  { %v2395_v47 = vld.sshfl [vmem:[#allocation1] sm:$0xff pattern:$0x73625140]  ;;  %v2396_v1 = vld.sshfl [vmem:[#allocation1 + $0x8] sm:$0xff pattern:$0x73625140]  ;;  %v5862_v7 = vmul.f32 %v2276_v19, %v5375_v34  ;;  %v2282_v18 = vstv %s5802_s17  ;;  %v2426_v62 = vstv %s5747_s9  ;;  %v5872_v9 = vmul.f32 %v2091_v42, %v5547_v33 }
 0x401   :  { %2453 = vst [vmem:[#allocation1] ss:$4 sm:$0xff] %v6633_v53  ;;  %v2364_v43 = vadd.f32 %v6634_v55, %v2358_v45  ;;  %v2365_v30 = vadd.f32 %v6635_v27, %v2359_v22  ;;  %v2438_v22 = vstv %s5785_s6  ;;  %v2444_v55 = vstv %s5810_s8  ;;  %v6641_v27 = vld [vmem:[#allocation84_spill] sm:$0xff]  ;;  %s2693_s9 = sshll.u32 %s3106_s23, 4  ;;  %s2694_s9 = int_to_ptr.vmem [resolvable:$true] %s2693_s9 }
 0x402   :  { %6636 = vst [vmem:[#allocation91_spill] sm:$0xff] %v5854_v39  ;;  %v2226_v39 = vadd.f32 %v6641_v27, %v2220_v12  ;;  %v5875_v6 = vmul.f32 %v2091_v42, %v5544_v63  ;;  %v5887_v12 = vmul.f32 %v2282_v18, %v5547_v33  ;;  %v5890_v27 = vmul.f32 %v2282_v18, %v5544_v63  ;;  %v6652_v63 = vld [vmem:[#allocation155_spill] sm:$0xff]  ;;  %s2695_s15 = sshll.u32 %s6718_s30, 4  ;;  %s2696_s15 = int_to_ptr.hbm [resolvable:$true] %s2695_s15 }
 0x403   :  { %6637 = vst [vmem:[#allocation98_spill] sm:$0xff] %v5859_v50  ;;  %v2370_v53 = vadd.f32 %v6639_v59, %v2364_v43  ;;  %v2371_v45 = vadd.f32 %v6640_v2, %v2365_v30  ;;  %v6644_v59 = vld [vmem:[#allocation132_spill] sm:$0xff]  ;;  %v6645_v2 = vld [vmem:[#allocation133_spill] sm:$0xff]  ;;  %v2041_v50 = vadd.f32 %v5682_v15, %v5721_v4  ;;  %v5893_v42 = vmul.f32 %v2426_v62, %v6610_v49 }
 0x404   :  { %6638 = vst [vmem:[#allocation99_spill] sm:$0xff] %v5862_v7  ;;  %v5878_v7 = vmul.f32 %v2276_v19, %v5510_v21  ;;  %v5896_v19 = vmul.f32 %v2426_v62, %v6611_v52  ;;  %v2467_v15 = vstv %s5819_s13  ;;  %v5910_v49 = vmul.f32 %v2438_v22, %v5369_v13 }
 0x405   :  { %6642 = vst [vmem:[#allocation109_spill] sm:$0xff] %v5875_v6  ;;  %v2376_v43 = vadd.f32 %v6644_v59, %v2370_v53  ;;  %v2377_v30 = vadd.f32 %v6645_v2, %v2371_v45  ;;  %v6646_v53 = vld [vmem:[#allocation149_spill] sm:$0xff]  ;;  %v6647_v45 = vld [vmem:[#allocation150_spill] sm:$0xff]  ;;  %v2097_v6 = vstv %s5833_s26  ;;  %v5913_v62 = vmul.f32 %v2438_v22, %v5372_v0 }
 0x406   :  { %6643 = vst [vmem:[#allocation115_spill] sm:$0xff] %v5878_v7  ;;  %v2461_v7 = vstv %s5829_s14  ;;  %v5916_v52 = vmul.f32 %v2444_v55, %v5429_v16  ;;  %v5929_v22 = vmul.f32 %v2097_v6, %v5590_v17  ;;  %v5932_v16 = vmul.f32 %v2097_v6, %v5593_v56 }
 0x407   :  { %v2382_v59 = vadd.f32 %v6646_v53, %v2376_v43  ;;  %v2383_v2 = vadd.f32 %v6647_v45, %v2377_v30  ;;  %v5919_v43 = vmul.f32 %v2444_v55, %v5425_v5  ;;  %v6650_v30 = vld [vmem:[#allocation48_spill] sm:$0xff]  ;;  %v5926_v13 = vmul.f32 %v2461_v7, %v5473_v61 }
 0x408   :  { %v5905_v4 = vld.sshfl [vmem:[#allocation1] sm:$0xff pattern:$0x73625140]  ;;  %v5907_v18 = vld.sshfl [vmem:[#allocation1 + $0x8] sm:$0xff pattern:$0x73625140]  ;;  %v5935_v55 = vmul.f32 %v2461_v7, %v5470_v10  ;;  %v2239_v61 = vadd.f32 %v5823_v58, %v2233_v51  ;;  %v2473_v0 = vstv %s5880_s1 }
 0x409   :  { %6648 = vst [vmem:[#allocation45_spill] sm:$0xff] %v5905_v4  ;;  %v6651_v53 = vld [vmem:[#allocation124_spill] sm:$0xff]  ;;  %v2389_v4 = vadd.f32 %v6652_v63, %v2383_v2  ;;  %v2047_v63 = vadd.f32 %v5745_v11, %v2041_v50  ;;  %v2048_v2 = vadd.f32 %v5750_v60, %v5724_v44  ;;  %v6654_v7 = vld [vmem:[#allocation159_spill] sm:$0xff]  ;;  %v5959_v60 = vmul.f32 %v2467_v15, %v5510_v21  ;;  %v6657_v51 = vld [vmem:[#allocation54_spill] sm:$0xff] }
 0x40a   :  { %6649 = vst [vmem:[#allocation126_spill] sm:$0xff] %v5907_v18  ;;  %v2388_v45 = vadd.f32 %v6651_v53, %v2382_v59  ;;  %v2288_v18 = vstv %s5856_s27  ;;  %v2232_v53 = vadd.f32 %v5692_v40, %v2226_v39  ;;  %v2245_v40 = vadd.f32 %v5701_v54, %v2239_v61 }
 0x40b   :  { %2526 = vst [vmem:[#allocation1] ss:$4 sm:$0xff] %v6650_v30  ;;  %v5938_v30 = vmul.f32 %v2467_v15, %v5375_v34  ;;  %v2400_v59 = vadd.f32 %v2396_v1, %v2389_v4  ;;  %v5946_v6 = vmul.f32 %v2288_v18, %v5590_v17  ;;  %v2054_v11 = vadd.f32 %v5698_v38, %v2048_v2  ;;  %v6656_v1 = vld [vmem:[#allocation172_spill] sm:$0xff] }
 0x40c   :  { %6653 = vst [vmem:[#allocation127_spill] sm:$0xff] %v5935_v55  ;;  %v2399_v5 = vadd.f32 %v2395_v47, %v2388_v45  ;;  %v6655_v55 = vld [vmem:[#allocation148_spill] sm:$0xff]  ;;  %v2053_v47 = vadd.f32 %v5664_v20, %v2047_v63  ;;  %v2238_v44 = vadd.f32 %v5807_v35, %v2232_v53  ;;  %v5956_v58 = vmul.f32 %v2288_v18, %v5593_v56  ;;  %v6658_v18 = vld [vmem:[#allocation21_spill] sm:$0xff] }
 0x40d   :  { %v2406_v34 = vadd.f32 %v6655_v55, %v2400_v59  ;;  %v2060_v20 = vadd.f32 %v5766_v41, %v2054_v11  ;;  %v2251_v61 = vadd.f32 %v5836_v29, %v2245_v40  ;;  %v5970_v54 = vmul.f32 %v2473_v0, %v5547_v33  ;;  %v6661_v2 = vld [vmem:[#allocation64_spill] sm:$0xff]  ;;  %v6663_v11 = vld [vmem:[#allocation165_spill] sm:$0xff] }
 0x40e   :  { %v2405_v10 = vadd.f32 %v6654_v7, %v2399_v5  ;;  %v2059_v50 = vadd.f32 %v5753_v8, %v2053_v47  ;;  %v2244_v35 = vadd.f32 %v5667_v46, %v2238_v44  ;;  %v2479_v15 = vstv %s5903_s24  ;;  %v6662_v7 = vld [vmem:[#allocation82_spill] sm:$0xff] }
 0x40f   :  { %v2412_v39 = vadd.f32 %v6657_v51, %v2406_v34  ;;  %v6660_v34 = vld [vmem:[#allocation53_spill] sm:$0xff]  ;;  %v2066_v46 = vadd.f32 %v5779_v23, %v2060_v20  ;;  %v2257_v63 = vadd.f32 %v5847_v14, %v2251_v61  ;;  %v6670_v61 = vld [vmem:[#allocation23_spill] sm:$0xff] }
 0x410   :  { %v2411_v5 = vadd.f32 %v6656_v1, %v2405_v10  ;;  %v6659_v10 = vld [vmem:[#allocation30_spill] sm:$0xff]  ;;  %v2065_v59 = vadd.f32 %v5776_v26, %v2059_v50  ;;  %v2250_v29 = vadd.f32 %v5826_v37, %v2244_v35  ;;  %v6664_v1 = vld [vmem:[#allocation65_spill] sm:$0xff] }
 0x411   :  { %v2418_v41 = vadd.f32 %v5659_v25, %v2412_v39  ;;  %v2077_v25 = vadd.f32 %v5578_v57, %v2066_v46  ;;  %v2268_v23 = vadd.f32 %v5731_v24, %v2257_v63  ;;  %v6666_v20 = vld [vmem:[#allocation85_spill] sm:$0xff]  ;;  %v6669_v35 = vld [vmem:[#allocation95_spill] sm:$0xff] }
 0x412   :  { %v2528_v4 = vld.sshfl [vmem:[#allocation1 + $0x8] sm:$0xff pattern:$0x73625140]  ;;  %v2527_v38 = vld.sshfl [vmem:[#allocation1] sm:$0xff pattern:$0x73625140]  ;;  %v2417_v8 = vadd.f32 %v5653_v36, %v2411_v5  ;;  %v2076_v36 = vadd.f32 %v5576_v3, %v2065_v59  ;;  %v2256_v26 = vadd.f32 %v5844_v32, %v2250_v29 }
 0x413   :  { %v2532_v45 = vadd.f32 %v2528_v4, %v6658_v18  ;;  %v2531_v55 = vadd.f32 %v2527_v38, %v6659_v10  ;;  %2585 = vst [vmem:[#allocation1] ss:$4 sm:$0xff] %v6660_v34  ;;  %v2424_v44 = vadd.f32 %v6663_v11, %v2418_v41  ;;  %v6665_v5 = vld [vmem:[#allocation83_spill] sm:$0xff]  ;;  %v6667_v4 = vld [vmem:[#allocation98_spill] sm:$0xff]  ;;  %v6668_v38 = vld [vmem:[#allocation73_spill] sm:$0xff] }
 0x414   :  { %v2423_v40 = vadd.f32 %v5714_v31, %v2417_v8  ;;  %v2082_v50 = vadd.f32 %v5782_v28, %v2076_v36  ;;  %v2083_v31 = vadd.f32 %v5793_v48, %v2077_v25  ;;  %v2267_v3 = vadd.f32 %v6666_v20, %v2256_v26  ;;  %v6672_v34 = vld [vmem:[#allocation75_spill] sm:$0xff]  ;;  %v6673_v8 = vld [vmem:[#allocation69_spill] sm:$0xff]  ;;  %v6676_v29 = vld [vmem:[#allocation106_spill] sm:$0xff] }
 0x415   :  { %v2538_v53 = vadd.f32 %v6661_v2, %v2532_v45  ;;  %v2537_v47 = vadd.f32 %v6662_v7, %v2531_v55  ;;  %v2430_v39 = vadd.f32 %v5896_v19, %v2424_v44  ;;  %v2274_v57 = vadd.f32 %v6667_v4, %v2268_v23  ;;  %v6671_v45 = vld [vmem:[#allocation74_spill] sm:$0xff]  ;;  %v6674_v41 = vld [vmem:[#allocation91_spill] sm:$0xff]  ;;  %v6678_v7 = vld [vmem:[#allocation89_spill] sm:$0xff] }
 0x416   :  { %v2429_v51 = vadd.f32 %v5893_v42, %v2423_v40  ;;  %v2088_v19 = vadd.f32 %v6672_v34, %v2082_v50  ;;  %v2089_v28 = vadd.f32 %v6673_v8, %v2083_v31  ;;  %v2273_v48 = vadd.f32 %v6674_v41, %v2267_v3  ;;  %v6675_v59 = vld [vmem:[#allocation99_spill] sm:$0xff]  ;;  %v6679_v40 = vld [vmem:[#allocation109_spill] sm:$0xff]  ;;  %v6683_v31 = vld [vmem:[#allocation134_spill] sm:$0xff] }
 0x417   :  { %v2544_v37 = vadd.f32 %v6664_v1, %v2538_v53  ;;  %v2543_v14 = vadd.f32 %v6665_v5, %v2537_v47  ;;  %v2436_v10 = vadd.f32 %v6671_v45, %v2430_v39  ;;  %v2280_v46 = vadd.f32 %v6675_v59, %v2274_v57  ;;  %v6677_v2 = vld [vmem:[#allocation107_spill] sm:$0xff]  ;;  %v6681_v1 = vld [vmem:[#allocation113_spill] sm:$0xff]  ;;  %v6691_v41 = vld [vmem:[#allocation156_spill] sm:$0xff] }
 0x418   :  { %v2435_v18 = vadd.f32 %v6670_v61, %v2429_v51  ;;  %v2094_v44 = vadd.f32 %v5872_v9, %v2088_v19  ;;  %v2095_v36 = vadd.f32 %v6679_v40, %v2089_v28  ;;  %v6680_v25 = vld [vmem:[#allocation115_spill] sm:$0xff]  ;;  %v6685_v4 = vld [vmem:[#allocation45_spill] sm:$0xff]  ;;  %v6694_v40 = vstv %s5071_s28  ;;  %s6082_s28 = sld [smem:[#allocation6 + $0xd4]] }
 0x419   :  { %v2550_v32 = vadd.f32 %v6668_v38, %v2544_v37  ;;  %v2549_v24 = vadd.f32 %v6669_v35, %v2543_v14  ;;  %v2442_v11 = vadd.f32 %v5913_v62, %v2436_v10  ;;  %v2279_v26 = vadd.f32 %v6680_v25, %v2273_v48  ;;  %v6682_v5 = vld [vmem:[#allocation119_spill] sm:$0xff]  ;;  %v6686_v38 = vld [vmem:[#allocation126_spill] sm:$0xff]  ;;  %v6690_v8 = vld [vmem:[#allocation125_spill] sm:$0xff] }
 0x41a   :  { %v2586_v55 = vld.sshfl [vmem:[#allocation1] sm:$0xff pattern:$0x73625140]  ;;  %v2587_v42 = vld.sshfl [vmem:[#allocation1 + $0x8] sm:$0xff pattern:$0x73625140]  ;;  %v2441_v47 = vadd.f32 %v5910_v49, %v2435_v18  ;;  %v2286_v23 = vadd.f32 %v5890_v27, %v2280_v46  ;;  %v2100_v49 = vadd.f32 %v5929_v22, %v2094_v44  ;;  %v2101_v9 = vadd.f32 %v5932_v16, %v2095_v36 }
 0x41b   :  { %v2555_v63 = vadd.f32 %v6676_v29, %v2549_v24  ;;  %v2556_v53 = vadd.f32 %v6677_v2, %v2550_v32  ;;  %2644 = vst [vmem:[#allocation1] ss:$4 sm:$0xff] %v6678_v7  ;;  %v2448_v39 = vadd.f32 %v5919_v43, %v2442_v11  ;;  %v2285_v62 = vadd.f32 %v5887_v12, %v2279_v26  ;;  %v6684_v20 = vld [vmem:[#allocation135_spill] sm:$0xff]  ;;  %v6688_v16 = vld [vmem:[#allocation152_spill] sm:$0xff]  ;;  %v6693_v44 = vld [vmem:[#allocation161_spill] sm:$0xff] }
 0x41c   :  { %v2447_v51 = vadd.f32 %v5916_v52, %v2441_v47  ;;  %v2292_v50 = vadd.f32 %v5956_v58, %v2286_v23  ;;  %v2102_v32 = vmax.f32 %v2100_v49, 0.0  ;;  %v2103_v43 = vmax.f32 %v2101_v9, 0.0  ;;  %v6687_v22 = vld [vmem:[#allocation151_spill] sm:$0xff]  ;;  %v6695_v26 = vld [vmem:[#allocation162_spill] sm:$0xff] }
 0x41d   :  { %v2561_v37 = vadd.f32 %v6681_v1, %v2555_v63  ;;  %v2562_v14 = vadd.f32 %v6682_v5, %v2556_v53  ;;  %v2459_v52 = vadd.f32 %v6686_v38, %v2448_v39  ;;  %v2291_v35 = vadd.f32 %v5946_v6, %v2285_v62  ;;  %v6689_v18 = vld [vmem:[#allocation127_spill] sm:$0xff]  ;;  %v6692_v63 = vld [vmem:[#allocation57_spill] sm:$0xff]  ;;  %v6697_v1 = vld [vmem:[#allocation160_spill] sm:$0xff] }
 0x41e   :  { %v2458_v57 = vadd.f32 %v6685_v4, %v2447_v51  ;;  %v2294_v24 = vmax.f32 %v2292_v50, 0.0  ;;  %v2104_v10 = vsel %vm667_vm7, %v2102_v32, 0.0  ;;  %v2105_v34 = vsel %vm667_vm7, %v2103_v43, 0.0  ;;  %v6701_v49 = vld [vmem:[#allocation170_spill] sm:$0xff]  ;;  %v6704_v43 = vld [vmem:[#allocation55_spill] sm:$0xff] }
 0x41f   :  { %v2567_v27 = vadd.f32 %v6683_v31, %v2561_v37  ;;  %v2568_v3 = vadd.f32 %v6684_v20, %v2562_v14  ;;  %v2465_v45 = vadd.f32 %v6689_v18, %v2459_v52  ;;  %v2293_v19 = vmax.f32 %v2291_v35, 0.0  ;;  %v6698_v37 = vld [vmem:[#allocation153_spill] sm:$0xff]  ;;  %v6699_v14 = vld [vmem:[#allocation171_spill] sm:$0xff] }
 0x420   :  { %v2464_v58 = vadd.f32 %v5926_v13, %v2458_v57  ;;  %v2296_v6 = vsel %vm667_vm7, %v2294_v24, 0.0  ;;  %v2106_v59 = vadd.f32 %v2105_v34, %v2104_v10  ;;  %v2475_v2 = vmul.f32 %v2473_v0, %v6692_v63 }
 0x421   :  { %v2573_v61 = vadd.f32 %v6687_v22, %v2567_v27  ;;  %v2574_v12 = vadd.f32 %v6688_v16, %v2568_v3  ;;  %v2295_v46 = vsel %vm667_vm7, %v2293_v19, 0.0  ;;  %v2471_v29 = vadd.f32 %v5938_v30, %v2465_v45  ;;  %v6703_v3 = vld [vmem:[#allocation157_spill] sm:$0xff]  ;;  %v6706_v45 = vld [vmem:[#allocation96_spill] sm:$0xff]  ;;  %v6707_v19 = vld [vmem:[#allocation90_spill] sm:$0xff] }
 0x422   :  { %v2470_v13 = vadd.f32 %v5959_v60, %v2464_v58  ;;  %v2480_v53 = vmul.f32 %v2479_v15, %v5590_v17  ;;  %2107 = vadd.xlane.f32.xlu1 %v2106_v59  ;;  %v2297_v11 = vadd.f32 %v2296_v6, %v2295_v46  ;;  %v2600_v36 = vmul.f32 %v6694_v40, %v6693_v44 }
 0x423   :  { %v2579_v28 = vadd.f32 %v6690_v8, %v2573_v61  ;;  %v2580_v48 = vadd.f32 %v6691_v41, %v2574_v12  ;;  %v2611_v25 = vstv %s6019_s0  ;;  %v2477_v30 = vadd.f32 %v2475_v2, %v2471_v29  ;;  %v6705_v61 = vld [vmem:[#allocation67_spill] sm:$0xff]  ;;  %v6708_v8 = vld [vmem:[#allocation97_spill] sm:$0xff]  ;;  %v6709_v29 = vld [vmem:[#allocation108_spill] sm:$0xff] }
 0x424   :  { %v2476_v60 = vadd.f32 %v5970_v54, %v2470_v13  ;;  %v2481_v0 = vmul.f32 %v2479_v15, %v5593_v56  ;;  %v6696_v23 = vmov %v6694_v40  ;;  %2298 = vadd.xlane.f32.xlu0 %v2297_v11  ;;  %v6700_v51 = vstv %s5123_s12  ;;  %s6086_s12 = sld [smem:[#allocation6 + $0xd5]]  ;;  %v6712_v40 = vld [vmem:[#allocation120_spill] sm:$0xff] }
 0x425   :  { %v2590_v7 = vadd.f32 %v2586_v55, %v2579_v28  ;;  %v2591_v47 = vadd.f32 %v2587_v42, %v2580_v48  ;;  %v2601_v55 = vmul.f32 %v6696_v23, %v6695_v26  ;;  %v2606_v39 = vmul.f32 %v6700_v51, %v6699_v14  ;;  %v2645_v26 = vld.sshfl [vmem:[#allocation1] sm:$0xff pattern:$0x73625140]  ;;  %v2646_v23 = vld.sshfl [vmem:[#allocation1 + $0x8] sm:$0xff pattern:$0x73625140] }
 0x426   :  { %v2482_v54 = vadd.f32 %v2480_v53, %v2476_v60  ;;  %v6702_v9 = vmov %v6700_v51  ;;  %v2483_v50 = vadd.f32 %v2481_v0, %v2477_v30  ;;  %v2617_v20 = vstv %s6034_s18  ;;  %v6710_v53 = vld [vmem:[#allocation114_spill] sm:$0xff]  ;;  %v6711_v60 = vld [vmem:[#allocation17_spill] sm:$0xff] }
 0x427   :  { %v2596_v42 = vadd.f32 %v6697_v1, %v2590_v7  ;;  %v2597_v5 = vadd.f32 %v6698_v37, %v2591_v47  ;;  %v2607_v62 = vmul.f32 %v6702_v9, %v6701_v49  ;;  %v2613_v4 = vmul.f32 %v2611_v25, %v6703_v3  ;;  %v6713_v37 = vld [vmem:[#allocation56_spill] sm:$0xff] }
 0x428   :  { %v2484_v27 = vmax.f32 %v2482_v54, 0.0  ;;  %v2485_v57 = vmax.f32 %v2483_v50, 0.0  ;;  %v2612_v35 = vmul.f32 %v2611_v25, %v6704_v43  ;;  %v2623_v24 = vstv %s6042_s7  ;;  %v6714_v54 = vld [vmem:[#allocation138_spill] sm:$0xff] }
 0x429   :  { %v2602_v15 = vadd.f32 %v2600_v36, %v2596_v42  ;;  %v2603_v31 = vadd.f32 %v2601_v55, %v2597_v5  ;;  %v2618_v16 = vmul.f32 %v2617_v20, %v6705_v61  ;;  %v2619_v10 = vmul.f32 %v2617_v20, %v6706_v45 }
 0x42a   :  { %v2486_v32 = vsel %vm667_vm7, %v2484_v27, 0.0  ;;  %v2487_v22 = vsel %vm667_vm7, %v2485_v57, 0.0  ;;  %v2629_v34 = vstv %s6060_s29  ;;  %v2624_v6 = vmul.f32 %v2623_v24, %v6707_v19 }
 0x42b   :  { %v2608_v38 = vadd.f32 %v2606_v39, %v2602_v15  ;;  %v2609_v52 = vadd.f32 %v2607_v62, %v2603_v31  ;;  %v2488_v58 = vadd.f32 %v2487_v22, %v2486_v32  ;;  %v2625_v28 = vmul.f32 %v2623_v24, %v6708_v8  ;;  %v6715_v62 = vld [vmem:[#allocation44_spill] sm:$0xff] }
 0x42c   :  { %v2635_v59 = vstv %s6073_s2  ;;  %v2630_v2 = vmul.f32 %v2629_v34, %v6709_v29  ;;  %v2631_v7 = vmul.f32 %v2629_v34, %v6710_v53  ;;  %v2652_v25 = vstv %s6082_s28 }
 0x42d   :  { %v2615_v12 = vadd.f32 %v2613_v4, %v2609_v52  ;;  %v2614_v18 = vadd.f32 %v2612_v35, %v2608_v38  ;;  %2489 = vadd.xlane.f32.xlu2 %v2488_v58  ;;  %v2636_v44 = vmul.f32 %v2635_v59, %v6711_v60  ;;  %v2637_v36 = vmul.f32 %v2635_v59, %v6712_v40 }
 0x42e   :  { %v2658_v55 = vstv %s6086_s12  ;;  %v2653_v5 = vmul.f32 %v2652_v25, %v6713_v37  ;;  %v2654_v14 = vmul.f32 %v2652_v25, %v6714_v54  ;;  %v2664_v51 = vstv %s2967_s10 }
 0x42f   :  { %v2620_v41 = vadd.f32 %v2618_v16, %v2614_v18  ;;  %v2621_v48 = vadd.f32 %v2619_v10, %v2615_v12  ;;  %v2659_v9 = vmul.f32 %v2658_v55, %v5510_v21  ;;  %v2660_v50 = vmul.f32 %v2658_v55, %v6715_v62 }
 0x430   :  { %v2670_v15 = vstv %s2968_s5  ;;  %v2665_v20 = vmul.f32 %v2664_v51, %v5547_v33  ;;  %v2666_v3 = vmul.f32 %v2664_v51, %v6692_v63  ;;  %v1152_v33 = vld [vmem:[%s6716_s20] sm:$0xff] }
 0x431   :  { %v2626_v13 = vadd.f32 %v2624_v6, %v2620_v41  ;;  %v2627_v46 = vadd.f32 %v2625_v28, %v2621_v48  ;;  %v2671_v38 = vmul.f32 %v2670_v15, %v5590_v17  ;;  %v2672_v52 = vmul.f32 %v2670_v15, %v5593_v56  ;;  %v2983_v56 = vld [vmem:[%s6717_s21] ss:$0 sm:$0xff] }
 0x432   :  { %v1346_v12 = vperm.slane %v1152_v33, 0  ;;  %v1537_v10 = vperm.slane %v1152_v33, 1  ;;  %v1728_v6 = vperm.slane %v1152_v33, 2  ;;  %v1919_v48 = vperm.slane %v1152_v33, 3 }
 0x433   :  { %v2632_v47 = vadd.f32 %v2630_v2, %v2626_v13  ;;  %v2633_v11 = vadd.f32 %v2631_v7, %v2627_v46  ;;  %v2110_v29 = vperm.slane %v1152_v33, 4  ;;  %v2683_v55 = vperm.slane %v1152_v33, 7 }
 0x435   :  { %v2638_v30 = vadd.f32 %v2636_v44, %v2632_v47  ;;  %v2639_v0 = vadd.f32 %v2637_v36, %v2633_v11  ;;  %v2301_v11 = vperm.slane %v1152_v33, 5  ;;  %v2492_v36 = vperm.slane %v1152_v33, 6 }
 0x437   :  { %v2649_v1 = vadd.f32 %v2645_v26, %v2638_v30  ;;  %v2650_v42 = vadd.f32 %v2646_v23, %v2639_v0 }
 0x439   :  { %v2655_v39 = vadd.f32 %v2653_v5, %v2649_v1  ;;  %v2656_v49 = vadd.f32 %v2654_v14, %v2650_v42 }
 0x43b   :  { %v2661_v31 = vadd.f32 %v2659_v9, %v2655_v39  ;;  %v2662_v27 = vadd.f32 %v2660_v50, %v2656_v49 }
 0x43d   :  { %v2667_v4 = vadd.f32 %v2665_v20, %v2661_v31  ;;  %v2668_v57 = vadd.f32 %v2666_v3, %v2662_v27 }
 0x43f   :  { %v2673_v32 = vadd.f32 %v2671_v38, %v2667_v4  ;;  %v2674_v43 = vadd.f32 %v2672_v52, %v2668_v57 }
 0x441   :  { %v2675_v35 = vmax.f32 %v2673_v32, 0.0  ;;  %v2676_v24 = vmax.f32 %v2674_v43, 0.0 }
 0x443   :  { %v2677_v21 = vsel %vm667_vm7, %v2675_v35, 0.0  ;;  %v2678_v22 = vsel %vm667_vm7, %v2676_v24, 0.0 }
 0x444   :  { %v2679_v61 = vadd.f32 %v2678_v22, %v2677_v21 }
 0x446   :  { %2680 = vadd.xlane.f32.xlu1 %v2679_v61 }
 0x454   :  { %v1726_v58 = vpop.xlane.xlu0 %1725 }
 0x455   :  { %v1727_v28 = vmul.f32 0.00390625, %v1726_v58 }
 0x456   :  { %v1535_v16 = vpop.xlane.xlu2 %1534 }
 0x457   :  { %v1536_v34 = vmul.f32 0.00390625, %v1535_v16  ;;  %v1729_v7 = vmul.f32 %v1728_v6, %v1727_v28 }
 0x458   :  { %v1344_v63 = vpop.xlane.xlu1 %1343 }
 0x459   :  { %v1345_v17 = vmul.f32 0.00390625, %v1344_v63  ;;  %v1538_v41 = vmul.f32 %v1537_v10, %v1536_v34 }
 0x45b   :  { %v1347_v18 = vmul.f32 %v1346_v12, %v1345_v17 }
 0x45d   :  { %v1348_v19 = vadd.f32 %v2983_v56, %v1347_v18 }
 0x45f   :  { %v1539_v46 = vadd.f32 %v1538_v41, %v1348_v19 }
 0x461   :  { %v1730_v44 = vadd.f32 %v1729_v7, %v1539_v46 }
 0x470   :  { %v1917_v45 = vpop.xlane.xlu2 %1916 }
 0x471   :  { %v1918_v59 = vmul.f32 0.00390625, %v1917_v45 }
 0x473   :  { %v1920_v47 = vmul.f32 %v1919_v48, %v1918_v59 }
 0x475   :  { %v1921_v30 = vadd.f32 %v1920_v47, %v1730_v44 }
 0x495   :  { %v2108_v8 = vpop.xlane.xlu1 %2107 }
 0x496   :  { %v2109_v2 = vmul.f32 0.00390625, %v2108_v8 }
 0x497   :  { %v2299_v13 = vpop.xlane.xlu0 %2298 }
 0x498   :  { %v2300_v60 = vmul.f32 0.00390625, %v2299_v13  ;;  %v2111_v40 = vmul.f32 %v2110_v29, %v2109_v2 }
 0x49a   :  { %v2302_v0 = vmul.f32 %v2301_v11, %v2300_v60  ;;  %v2112_v26 = vadd.f32 %v2111_v40, %v1921_v30 }
 0x49c   :  { %v2303_v42 = vadd.f32 %v2302_v0, %v2112_v26 }
 0x4a0   :  { %v2490_v53 = vpop.xlane.xlu2 %2489 }
 0x4a1   :  { %v2491_v25 = vmul.f32 0.00390625, %v2490_v53 }
 0x4a3   :  { %v2493_v23 = vmul.f32 %v2492_v36, %v2491_v25 }
 0x4a5   :  { %v2494_v5 = vadd.f32 %v2493_v23, %v2303_v42 }
 0x4b9   :  { %v2681_v1 = vpop.xlane.xlu1 %2680 }
 0x4ba   :  { %v2682_v37 = vmul.f32 0.00390625, %v2681_v1 }
 0x4bc   :  { %v2684_v54 = vmul.f32 %v2683_v55, %v2682_v37 }
 0x4be   :  { %v2685_v14 = vadd.f32 %v2684_v54, %v2494_v5 }
 0x4c0   :  { %2687 = vst.msk [vmem:[#allocation12] sm:$0x3] %vm2686_vm2, %v2685_v14 }
 0x4c1   :  { %2698 = dma.vmem_to_hbm [thread:$0]  %s2694_s9, 32, %s2696_s15, [#allocation4]  }
 0x4c2   :  { %3091 = dma.done.wait [#allocation4], 32  }
 0x4c3   :  { %3092 = vsyncadd [#allocation4], 4294967264 }
 0x4c4   :  { %2707 = vsyncpa [#allocation4], 1 }
 0x4c5   :  { %2708 = vsyncpa [#allocation5], 1 }
 0x4c6   :  { %2709 = vsyncpa [#allocation7], 1 }
 0x4c7   :  { %2710 = vsyncpa [#allocation10], 1 }

</bundles_post_ra>
